<compile_context>
chip_gen: v7x
topology: tpu7x:2x2x1
jax: 0.10.0
libtpu: 0.0.40
codegen_flags: <defaults>
</compile_context>

<pallas_src>
import jax
import jax.numpy as jnp
from jax.experimental import pallas as pl
from jax.experimental.pallas import tpu as pltpu

# ---------------- synthetic GlobalConfig / block hyper-parameters ----------------
N = 2              # batch size
M = 2              # gc.max_person
T = 8              # frames
V = 16             # gc.num_joints (power of two -> joint index = row & (V-1))
C_IN = 32          # in_feats
C_OUT = 32         # out_feats (== in_feats, stride == 1  ->  self.downt is None)
KERNEL = 9         # temporal kernel size
PAD = (KERNEL - 1) // 2

NM = N * M                     # independent person-sequences (conv batch) = 4
ROWS = NM * T * V              # total graph nodes = 512
TP = T + 2 * PAD               # padded temporal length = 16

# Performance knobs (see review):
MXU_DTYPE = jnp.float32        # set jnp.bfloat16 on v5e/v6e: halves matmul operand traffic,
                               # f32 accumulation + f32 epilogue (reference mirrors the cast)
GRID_SPLIT = 1                 # 1 = whole problem in a single grid step (v5e/v6e, default);
                               # 2 on v7x shards the fused kernel across both TensorCores
assert NM % GRID_SPLIT == 0 and V & (V - 1) == 0


# ================= fused GCN + temporal-conv + BN + relu + residual kernel =================
def gtcn_kernel(h_ref, norm_ref, wg_ref, bg_ref, wcat_ref, scale_ref, shift_ref,
                o_ref, ypad_ref, xpad_ref, wide_ref):
    # h_ref    : (bps, T*V, C_IN)        input tile (also reused as the identity residual)
    # norm_ref : (bps*T*V, 1)            per-node norm = deg^{-1/2} of the chain+self-loop graph
    # wg_ref   : (C_IN, C_OUT)           GCN weight
    # bg_ref   : (1, C_OUT)              GCN bias
    # wcat_ref : (C_OUT, KERNEL*C_OUT)   tap-concatenated conv weight: w_cat[:, k*C:(k+1)*C] = w_k
    # scale/shift : (1, C_OUT)           eval-mode BN folded with the conv bias
    # ypad_ref : VMEM (8 + bps*T*V + 8, C_OUT)   zero-padded pre-aggregation features (GCN shifts)
    # xpad_ref : VMEM (bps, TP*V, C_OUT)         time-zero-padded GCN output (conv input)
    # wide_ref : VMEM (bps, TP*V, KERNEL*C_OUT)  all 9 taps produced by one wide matmul
    bps = h_ref.shape[0]
    rows = bps * T * V

    # ---------------- GCN: h @ W, symmetric-normalized chain aggregation ----------------
    h2 = h_ref[...].reshape(rows, C_IN)
    xw = jnp.dot(h2.astype(MXU_DTYPE), wg_ref[...].astype(MXU_DTYPE),
                 preferred_element_type=jnp.float32)              # (rows, C_OUT)
    n = norm_ref[...]                                             # (rows, 1)
    y = xw * n                                                    # h*W*norm

    # A = I + chain  ->  agg[i] = y[i] + y[i-1]·[joint!=0] + y[i+1]·[joint!=V-1]
    ypad_ref[0:8, :] = jnp.zeros((8, C_OUT), jnp.float32)
    ypad_ref[8:8 + rows, :] = y
    ypad_ref[8 + rows:8 + rows + 8, :] = jnp.zeros((8, C_OUT), jnp.float32)
    frm_prev = ypad_ref[7:7 + rows, :]                            # row i  <-  y[i-1]
    frm_next = ypad_ref[9:9 + rows, :]                            # row i  <-  y[i+1]
    joint = jax.lax.broadcasted_iota(jnp.int32, (rows, C_OUT), 0) & (V - 1)
    agg = (y + jnp.where(joint != 0, frm_prev, 0.0)
             + jnp.where(joint != V - 1, frm_next, 0.0))
    g = jnp.maximum(agg * n + bg_ref[...], 0.0)                   # +bias, dropout=eval, relu

    # ------------- write GCN output into the time-zero-padded conv scratch -------------
    xpad_ref[:, :PAD * V, :] = jnp.zeros((bps, PAD * V, C_OUT), jnp.float32)
    xpad_ref[:, PAD * V:PAD * V + T * V, :] = g.reshape(bps, T * V, C_OUT)
    xpad_ref[:, PAD * V + T * V:, :] = jnp.zeros((bps, PAD * V, C_OUT), jnp.float32)

    # ------------- temporal conv: ONE tap-concatenated wide MXU matmul -------------
    xp2 = xpad_ref[...].reshape(bps * TP * V, C_OUT)
    wide = jnp.dot(xp2.astype(MXU_DTYPE), wcat_ref[...].astype(MXU_DTYPE),
                   preferred_element_type=jnp.float32)            # (bps*TP*V, KERNEL*C_OUT)
    wide_ref[...] = wide.reshape(bps, TP * V, KERNEL * C_OUT)

    # accumulate the 9 time-shifted tap slices (static unrolled, cheap VPU adds)
    acc = wide_ref[:, 0:T * V, 0:C_OUT]
    for k in range(1, KERNEL):
        acc = acc + wide_ref[:, k * V:k * V + T * V, k * C_OUT:(k + 1) * C_OUT]

    # ------------- BN (eval, folded with conv bias) + relu + identity residual -------------
    yout = jnp.maximum(acc * scale_ref[...] + shift_ref[...], 0.0)
    o_ref[...] = yout + h_ref[...]                                # v = tcn(gcn(h)) + h


# ================================== wrapper ==================================
def gtcn_block(h, params):
    """h: (N*M*T*V, C_IN) node features, node order (N, M, T, V) row-major."""
    bps = NM // GRID_SPLIT
    h3 = h.reshape(NM, T * V, C_IN)                               # contiguous, free reshape
    out = pl.pallas_call(
        gtcn_kernel,
        out_shape=jax.ShapeDtypeStruct((NM, T * V, C_OUT), jnp.float32),
        grid=(GRID_SPLIT,),
        in_specs=[
            pl.BlockSpec((bps, T * V, C_IN), lambda i: (i, 0, 0)),
            pl.BlockSpec((bps * T * V, 1), lambda i: (i, 0)),
            pl.BlockSpec((C_IN, C_OUT), lambda i: (0, 0)),
            pl.BlockSpec((1, C_OUT), lambda i: (0, 0)),
            pl.BlockSpec((C_OUT, KERNEL * C_OUT), lambda i: (0, 0)),
            pl.BlockSpec((1, C_OUT), lambda i: (0, 0)),
            pl.BlockSpec((1, C_OUT), lambda i: (0, 0)),
        ],
        out_specs=pl.BlockSpec((bps, T * V, C_OUT), lambda i: (i, 0, 0)),
        scratch_shapes=[
            pltpu.VMEM((8 + bps * T * V + 8, C_OUT), jnp.float32),        # ypad
            pltpu.VMEM((bps, TP * V, C_OUT), jnp.float32),                # xpad
            pltpu.VMEM((bps, TP * V, KERNEL * C_OUT), jnp.float32),       # wide taps
        ],
        compiler_params=pltpu.CompilerParams(dimension_semantics=("parallel",)),
    )(h3, params["norm_rows"], params["w_gcn"], params["b_gcn"],
      params["w_cat"], params["bn_scale"], params["bn_shift"])
    return out.reshape(N, M, T, V, C_OUT)


# ============================ deterministic parameters ============================
def init_params(key):
    ks = jax.random.split(key, 4)
    # GCNLayer weight/bias (torch leaves the nn.Parameter uninitialized -> synthetic normal)
    w_gcn = jax.random.normal(ks[0], (C_IN, C_OUT), jnp.float32) / jnp.sqrt(C_IN)
    b_gcn = 0.01 * jax.random.normal(ks[1], (1, C_OUT), jnp.float32)

    # skeleton graph: chain over V joints + self-loops (symmetric); norm = deg^{-1/2}
    adj = jnp.eye(V, dtype=jnp.float32)
    idx = jnp.arange(V - 1)
    adj = adj.at[idx, idx + 1].set(1.0).at[idx + 1, idx].set(1.0)
    norm_v = 1.0 / jnp.sqrt(adj.sum(axis=1))                      # graph.ndata['norm']
    a_norm = norm_v[:, None] * adj * norm_v[None, :]              # D^-1/2 A D^-1/2 (reference only)
    norm_rows = jnp.tile(norm_v, NM * T)[:, None]                 # (ROWS, 1) per-node norm

    # TemporalConvNetwork conv weight (k, cin, cout); conv_init -> N(0, sqrt(2/(C_OUT*KERNEL)))
    std = (2.0 / (C_OUT * KERNEL)) ** 0.5
    w_tcn = std * jax.random.normal(ks[2], (KERNEL, C_OUT, C_OUT), jnp.float32)
    w_cat = jnp.transpose(w_tcn, (1, 0, 2)).reshape(C_OUT, KERNEL * C_OUT)   # tap-concatenated
    fan_in = C_OUT * KERNEL
    conv_bias = jax.random.uniform(ks[3], (C_OUT,), jnp.float32, -1.0, 1.0) / jnp.sqrt(fan_in)

    # BatchNorm2d eval-mode with default stats, folded together with the conv bias
    gamma = jnp.ones((C_OUT,), jnp.float32)
    beta = jnp.zeros((C_OUT,), jnp.float32)
    r_mean = jnp.zeros((C_OUT,), jnp.float32)
    r_var = jnp.ones((C_OUT,), jnp.float32)
    eps = 1e-5
    scale = gamma / jnp.sqrt(r_var + eps)
    shift = beta + scale * (conv_bias - r_mean)

    return dict(w_gcn=w_gcn, b_gcn=b_gcn, norm_rows=norm_rows, a_norm=a_norm,
                w_tcn=w_tcn, w_cat=w_cat,
                bn_scale=scale[None, :], bn_shift=shift[None, :])


# ============================== pure-JAX reference ==============================
def gtcn_block_ref(h, params):
    # GCN: h @ W, symmetric-normalized aggregation over the V-joint graph (per (N, M, T) block)
    xw = jnp.dot(h.astype(MXU_DTYPE), params["w_gcn"].astype(MXU_DTYPE),
                 preferred_element_type=jnp.float32)
    agg = jnp.einsum("uv,bvc->buc", params["a_norm"], xw.reshape(NM * T, V, C_OUT))
    g = jax.nn.relu(agg.reshape(ROWS, C_OUT) + params["b_gcn"])
    # temporal conv (kernel (KERNEL,1), stride 1, pad (PAD,0)) + eval-mode BN + relu
    x = g.reshape(NM, T, V, C_OUT)
    xp = jnp.pad(x, ((0, 0), (PAD, PAD), (0, 0), (0, 0)))
    conv = jnp.zeros((NM, T, V, C_OUT), jnp.float32)
    for k in range(KERNEL):
        conv = conv + jnp.einsum("ntvc,cd->ntvd",
                                 xp[:, k:k + T].astype(MXU_DTYPE),
                                 params["w_tcn"][k].astype(MXU_DTYPE),
                                 preferred_element_type=jnp.float32)
    y = jax.nn.relu(conv * params["bn_scale"] + params["bn_shift"])
    out = y + h.reshape(NM, T, V, C_IN)                           # identity residual (downt None)
    return out.reshape(N, M, T, V, C_OUT)


if __name__ == "__main__":
    key = jax.random.PRNGKey(0)
    k_h, k_p = jax.random.split(key)
    params = init_params(k_p)
    h = jax.random.normal(k_h, (ROWS, C_IN), jnp.float32)         # (512, 32)

    out = jax.block_until_ready(gtcn_block(h, params))
    ref = jax.block_until_ready(gtcn_block_ref(h, params))

    assert out.shape == (N, M, T, V, C_OUT), out.shape
    tol = 1e-4 if MXU_DTYPE == jnp.float32 else 2e-2
    err = float(jnp.max(jnp.abs(out - ref)))
    assert jnp.allclose(out, ref, atol=tol, rtol=tol), err
    print("KERNEL_OK")
</pallas_src>

<mosaic_0001>
module attributes {stable_mosaic.version = 11 : i64} {
  func.func @gtcn_kernel(%arg0: i32, %arg1: memref<4x128x32xf32, #tpu.memory_space<vmem>>, %arg2: memref<512x1xf32, #tpu.memory_space<vmem>>, %arg3: memref<32x32xf32, #tpu.memory_space<vmem>>, %arg4: memref<1x32xf32, #tpu.memory_space<vmem>>, %arg5: memref<32x288xf32, #tpu.memory_space<vmem>>, %arg6: memref<1x32xf32, #tpu.memory_space<vmem>>, %arg7: memref<1x32xf32, #tpu.memory_space<vmem>>, %arg8: memref<4x128x32xf32, #tpu.memory_space<vmem>>, %arg9: memref<528x32xf32, #tpu.memory_space<vmem>>, %arg10: memref<4x256x32xf32, #tpu.memory_space<vmem>>, %arg11: memref<4x256x288xf32, #tpu.memory_space<vmem>>) attributes {dimension_semantics = [#tpu.dimension_semantics<parallel>], iteration_bounds = array<i64: 1>, scalar_prefetch = 0 : i64, scratch_operands = 3 : i64, tpu.core_type = #tpu.core_type<tc>, window_params = [{transform_indices = @transform_0, window_bounds = array<i64: 4, 128, 32>}, {transform_indices = @transform_1, window_bounds = array<i64: 512, 1>}, {pipeline_mode = #tpu.pipeline_mode<synchronous>, transform_indices = @transform_2, window_bounds = array<i64: 32, 32>}, {pipeline_mode = #tpu.pipeline_mode<synchronous>, transform_indices = @transform_3, window_bounds = array<i64: 1, 32>}, {pipeline_mode = #tpu.pipeline_mode<synchronous>, transform_indices = @transform_4, window_bounds = array<i64: 32, 288>}, {pipeline_mode = #tpu.pipeline_mode<synchronous>, transform_indices = @transform_5, window_bounds = array<i64: 1, 32>}, {pipeline_mode = #tpu.pipeline_mode<synchronous>, transform_indices = @transform_6, window_bounds = array<i64: 1, 32>}, {transform_indices = @transform_7, window_bounds = array<i64: 4, 128, 32>}]} {
    %c0 = arith.constant 0 : index
    %c0_0 = arith.constant 0 : index
    %c0_1 = arith.constant 0 : index
    %0 = vector.load %arg1[%c0, %c0_0, %c0_1] : memref<4x128x32xf32, #tpu.memory_space<vmem>>, vector<4x128x32xf32>
    %1 = vector.shape_cast %0 : vector<4x128x32xf32> to vector<512x32xf32>
    %c0_2 = arith.constant 0 : index
    %c0_3 = arith.constant 0 : index
    %2 = vector.load %arg3[%c0_2, %c0_3] : memref<32x32xf32, #tpu.memory_space<vmem>>, vector<32x32xf32>
    %cst = arith.constant dense<0.000000e+00> : vector<512x32xf32>
    %3 = tpu.matmul %1, %2, %cst {dimension_numbers = #tpu.dot_dimension_numbers<[1], [0], [0], [1], [0, 0, 1, 1], [], []>} : vector<512x32xf32>, vector<32x32xf32>, vector<512x32xf32> -> vector<512x32xf32>
    %c0_4 = arith.constant 0 : index
    %c0_5 = arith.constant 0 : index
    %4 = vector.load %arg2[%c0_4, %c0_5] : memref<512x1xf32, #tpu.memory_space<vmem>>, vector<512x1xf32>
    %5 = vector.broadcast %4 : vector<512x1xf32> to vector<512x32xf32>
    %6 = arith.mulf %3, %5 : vector<512x32xf32>
    %cst_6 = arith.constant 0.000000e+00 : f32
    %7 = vector.broadcast %cst_6 : f32 to vector<8x32xf32>
    %c0_7 = arith.constant 0 : index
    %c0_8 = arith.constant 0 : index
    %8 = vector.load %arg9[%c0_7, %c0_8] : memref<528x32xf32, #tpu.memory_space<vmem>>, vector<8x32xf32>
    tpu.vector_store %arg9[%c0_7, %c0_8], %7 {strides = array<i32>} : memref<528x32xf32, #tpu.memory_space<vmem>>, vector<8x32xf32>,
    %c8 = arith.constant 8 : index
    %c0_9 = arith.constant 0 : index
    %9 = vector.load %arg9[%c8, %c0_9] : memref<528x32xf32, #tpu.memory_space<vmem>>, vector<512x32xf32>
    tpu.vector_store %arg9[%c8, %c0_9], %6 {strides = array<i32>} : memref<528x32xf32, #tpu.memory_space<vmem>>, vector<512x32xf32>,
    %cst_10 = arith.constant 0.000000e+00 : f32
    %10 = vector.broadcast %cst_10 : f32 to vector<8x32xf32>
    %c520 = arith.constant 520 : index
    %c0_11 = arith.constant 0 : index
    %11 = vector.load %arg9[%c520, %c0_11] : memref<528x32xf32, #tpu.memory_space<vmem>>, vector<8x32xf32>
    tpu.vector_store %arg9[%c520, %c0_11], %10 {strides = array<i32>} : memref<528x32xf32, #tpu.memory_space<vmem>>, vector<8x32xf32>,
    %c7 = arith.constant 7 : index
    %c0_12 = arith.constant 0 : index
    %12 = vector.load %arg9[%c7, %c0_12] : memref<528x32xf32, #tpu.memory_space<vmem>>, vector<512x32xf32>
    %c9 = arith.constant 9 : index
    %c0_13 = arith.constant 0 : index
    %13 = vector.load %arg9[%c9, %c0_13] : memref<528x32xf32, #tpu.memory_space<vmem>>, vector<512x32xf32>
    %14 = tpu.iota {dimensions = array<i32: 0>} : vector<512x32xi32>
    %c15_i32 = arith.constant 15 : i32
    %15 = vector.broadcast %c15_i32 : i32 to vector<512x32xi32>
    %16 = arith.andi %14, %15 : vector<512x32xi32>
    %c0_i32 = arith.constant 0 : i32
    %17 = vector.broadcast %c0_i32 : i32 to vector<512x32xi32>
    %18 = arith.cmpi ne, %16, %17 : vector<512x32xi32>
    %cst_14 = arith.constant 0.000000e+00 : f32
    %19 = vector.broadcast %cst_14 : f32 to vector<512x32xf32>
    %20 = arith.select %18, %12, %19 : vector<512x32xi1>, vector<512x32xf32>
    %21 = arith.addf %6, %20 : vector<512x32xf32>
    %c15_i32_15 = arith.constant 15 : i32
    %22 = vector.broadcast %c15_i32_15 : i32 to vector<512x32xi32>
    %23 = arith.cmpi ne, %16, %22 : vector<512x32xi32>
    %cst_16 = arith.constant 0.000000e+00 : f32
    %24 = vector.broadcast %cst_16 : f32 to vector<512x32xf32>
    %25 = arith.select %23, %13, %24 : vector<512x32xi1>, vector<512x32xf32>
    %26 = arith.addf %21, %25 : vector<512x32xf32>
    %27 = vector.broadcast %4 : vector<512x1xf32> to vector<512x32xf32>
    %28 = arith.mulf %26, %27 : vector<512x32xf32>
    %c0_17 = arith.constant 0 : index
    %c0_18 = arith.constant 0 : index
    %29 = vector.load %arg4[%c0_17, %c0_18] : memref<1x32xf32, #tpu.memory_space<vmem>>, vector<1x32xf32>
    %30 = vector.broadcast %29 : vector<1x32xf32> to vector<512x32xf32>
    %31 = arith.addf %28, %30 : vector<512x32xf32>
    %cst_19 = arith.constant 0.000000e+00 : f32
    %32 = vector.broadcast %cst_19 : f32 to vector<512x32xf32>
    %33 = arith.maximumf %31, %32 : vector<512x32xf32>
    %cst_20 = arith.constant 0.000000e+00 : f32
    %34 = vector.broadcast %cst_20 : f32 to vector<4x64x32xf32>
    %c0_21 = arith.constant 0 : index
    %c0_22 = arith.constant 0 : index
    %c0_23 = arith.constant 0 : index
    %35 = vector.load %arg10[%c0_21, %c0_22, %c0_23] : memref<4x256x32xf32, #tpu.memory_space<vmem>>, vector<4x64x32xf32>
    tpu.vector_store %arg10[%c0_21, %c0_22, %c0_23], %34 {strides = array<i32>} : memref<4x256x32xf32, #tpu.memory_space<vmem>>, vector<4x64x32xf32>,
    %36 = vector.shape_cast %33 : vector<512x32xf32> to vector<4x128x32xf32>
    %c0_24 = arith.constant 0 : index
    %c64 = arith.constant 64 : index
    %c0_25 = arith.constant 0 : index
    %37 = vector.load %arg10[%c0_24, %c64, %c0_25] : memref<4x256x32xf32, #tpu.memory_space<vmem>>, vector<4x128x32xf32>
    tpu.vector_store %arg10[%c0_24, %c64, %c0_25], %36 {strides = array<i32>} : memref<4x256x32xf32, #tpu.memory_space<vmem>>, vector<4x128x32xf32>,
    %cst_26 = arith.constant 0.000000e+00 : f32
    %38 = vector.broadcast %cst_26 : f32 to vector<4x64x32xf32>
    %c0_27 = arith.constant 0 : index
    %c192 = arith.constant 192 : index
    %c0_28 = arith.constant 0 : index
    %39 = vector.load %arg10[%c0_27, %c192, %c0_28] : memref<4x256x32xf32, #tpu.memory_space<vmem>>, vector<4x64x32xf32>
    tpu.vector_store %arg10[%c0_27, %c192, %c0_28], %38 {strides = array<i32>} : memref<4x256x32xf32, #tpu.memory_space<vmem>>, vector<4x64x32xf32>,
    %c0_29 = arith.constant 0 : index
    %c0_30 = arith.constant 0 : index
    %c0_31 = arith.constant 0 : index
    %40 = vector.load %arg10[%c0_29, %c0_30, %c0_31] : memref<4x256x32xf32, #tpu.memory_space<vmem>>, vector<4x256x32xf32>
    %41 = vector.shape_cast %40 : vector<4x256x32xf32> to vector<1024x32xf32>
    %c0_32 = arith.constant 0 : index
    %c0_33 = arith.constant 0 : index
    %42 = vector.load %arg5[%c0_32, %c0_33] : memref<32x288xf32, #tpu.memory_space<vmem>>, vector<32x288xf32>
    %cst_34 = arith.constant dense<0.000000e+00> : vector<1024x288xf32>
    %43 = tpu.matmul %41, %42, %cst_34 {dimension_numbers = #tpu.dot_dimension_numbers<[1], [0], [0], [1], [0, 0, 1, 1], [], []>} : vector<1024x32xf32>, vector<32x288xf32>, vector<1024x288xf32> -> vector<1024x288xf32>
    %44 = vector.shape_cast %43 : vector<1024x288xf32> to vector<4x256x288xf32>
    %c0_35 = arith.constant 0 : index
    %c0_36 = arith.constant 0 : index
    %c0_37 = arith.constant 0 : index
    %45 = vector.load %arg11[%c0_35, %c0_36, %c0_37] : memref<4x256x288xf32, #tpu.memory_space<vmem>>, vector<4x256x288xf32>
    tpu.vector_store %arg11[%c0_35, %c0_36, %c0_37], %44 {strides = array<i32>} : memref<4x256x288xf32, #tpu.memory_space<vmem>>, vector<4x256x288xf32>,
    %c0_38 = arith.constant 0 : index
    %c0_39 = arith.constant 0 : index
    %c0_40 = arith.constant 0 : index
    %46 = vector.load %arg11[%c0_38, %c0_39, %c0_40] : memref<4x256x288xf32, #tpu.memory_space<vmem>>, vector<4x128x32xf32>
    %c0_41 = arith.constant 0 : index
    %c16 = arith.constant 16 : index
    %c32 = arith.constant 32 : index
    %47 = vector.load %arg11[%c0_41, %c16, %c32] : memref<4x256x288xf32, #tpu.memory_space<vmem>>, vector<4x128x32xf32>
    %48 = arith.addf %46, %47 : vector<4x128x32xf32>
    %c0_42 = arith.constant 0 : index
    %c32_43 = arith.constant 32 : index
    %c64_44 = arith.constant 64 : index
    %49 = vector.load %arg11[%c0_42, %c32_43, %c64_44] : memref<4x256x288xf32, #tpu.memory_space<vmem>>, vector<4x128x32xf32>
    %50 = arith.addf %48, %49 : vector<4x128x32xf32>
    %c0_45 = arith.constant 0 : index
    %c48 = arith.constant 48 : index
    %c96 = arith.constant 96 : index
    %51 = vector.load %arg11[%c0_45, %c48, %c96] : memref<4x256x288xf32, #tpu.memory_space<vmem>>, vector<4x128x32xf32>
    %52 = arith.addf %50, %51 : vector<4x128x32xf32>
    %c0_46 = arith.constant 0 : index
    %c64_47 = arith.constant 64 : index
    %c128 = arith.constant 128 : index
    %53 = vector.load %arg11[%c0_46, %c64_47, %c128] : memref<4x256x288xf32, #tpu.memory_space<vmem>>, vector<4x128x32xf32>
    %54 = arith.addf %52, %53 : vector<4x128x32xf32>
    %c0_48 = arith.constant 0 : index
    %c80 = arith.constant 80 : index
    %c160 = arith.constant 160 : index
    %55 = vector.load %arg11[%c0_48, %c80, %c160] : memref<4x256x288xf32, #tpu.memory_space<vmem>>, vector<4x128x32xf32>
    %56 = arith.addf %54, %55 : vector<4x128x32xf32>
    %c0_49 = arith.constant 0 : index
    %c96_50 = arith.constant 96 : index
    %c192_51 = arith.constant 192 : index
    %57 = vector.load %arg11[%c0_49, %c96_50, %c192_51] : memref<4x256x288xf32, #tpu.memory_space<vmem>>, vector<4x128x32xf32>
    %58 = arith.addf %56, %57 : vector<4x128x32xf32>
    %c0_52 = arith.constant 0 : index
    %c112 = arith.constant 112 : index
    %c224 = arith.constant 224 : index
    %59 = vector.load %arg11[%c0_52, %c112, %c224] : memref<4x256x288xf32, #tpu.memory_space<vmem>>, vector<4x128x32xf32>
    %60 = arith.addf %58, %59 : vector<4x128x32xf32>
    %c0_53 = arith.constant 0 : index
    %c128_54 = arith.constant 128 : index
    %c256 = arith.constant 256 : index
    %61 = vector.load %arg11[%c0_53, %c128_54, %c256] : memref<4x256x288xf32, #tpu.memory_space<vmem>>, vector<4x128x32xf32>
    %62 = arith.addf %60, %61 : vector<4x128x32xf32>
    %c0_55 = arith.constant 0 : index
    %c0_56 = arith.constant 0 : index
    %63 = vector.load %arg6[%c0_55, %c0_56] : memref<1x32xf32, #tpu.memory_space<vmem>>, vector<1x32xf32>
    %64 = vector.shape_cast %63 : vector<1x32xf32> to vector<1x1x32xf32>
    %65 = vector.broadcast %64 : vector<1x1x32xf32> to vector<4x128x32xf32>
    %66 = arith.mulf %62, %65 : vector<4x128x32xf32>
    %c0_57 = arith.constant 0 : index
    %c0_58 = arith.constant 0 : index
    %67 = vector.load %arg7[%c0_57, %c0_58] : memref<1x32xf32, #tpu.memory_space<vmem>>, vector<1x32xf32>
    %68 = vector.shape_cast %67 : vector<1x32xf32> to vector<1x1x32xf32>
    %69 = vector.broadcast %68 : vector<1x1x32xf32> to vector<4x128x32xf32>
    %70 = arith.addf %66, %69 : vector<4x128x32xf32>
    %cst_59 = arith.constant 0.000000e+00 : f32
    %71 = vector.broadcast %cst_59 : f32 to vector<4x128x32xf32>
    %72 = arith.maximumf %70, %71 : vector<4x128x32xf32>
    %c0_60 = arith.constant 0 : index
    %c0_61 = arith.constant 0 : index
    %c0_62 = arith.constant 0 : index
    %73 = vector.load %arg1[%c0_60, %c0_61, %c0_62] : memref<4x128x32xf32, #tpu.memory_space<vmem>>, vector<4x128x32xf32>
    %74 = arith.addf %72, %73 : vector<4x128x32xf32>
    %c0_63 = arith.constant 0 : index
    %c0_64 = arith.constant 0 : index
    %c0_65 = arith.constant 0 : index
    %75 = vector.load %arg8[%c0_63, %c0_64, %c0_65] : memref<4x128x32xf32, #tpu.memory_space<vmem>>, vector<4x128x32xf32>
    tpu.vector_store %arg8[%c0_63, %c0_64, %c0_65], %74 {strides = array<i32>} : memref<4x128x32xf32, #tpu.memory_space<vmem>>, vector<4x128x32xf32>,
    return
  }
  func.func @transform_0(%arg0: i32) -> (i32, i32, i32) {
    %c0_i32 = arith.constant 0 : i32
    %c0_i32_0 = arith.constant 0 : i32
    %c0_i32_1 = arith.constant 0 : i32
    return %arg0, %c0_i32, %c0_i32_0 : i32, i32, i32
  }
  func.func @transform_1(%arg0: i32) -> (i32, i32) {
    %c0_i32 = arith.constant 0 : i32
    %c0_i32_0 = arith.constant 0 : i32
    return %arg0, %c0_i32 : i32, i32
  }
  func.func @transform_2(%arg0: i32) -> (i32, i32) {
    %c0_i32 = arith.constant 0 : i32
    %c0_i32_0 = arith.constant 0 : i32
    %c0_i32_1 = arith.constant 0 : i32
    return %c0_i32, %c0_i32_0 : i32, i32
  }
  func.func @transform_3(%arg0: i32) -> (i32, i32) {
    %c0_i32 = arith.constant 0 : i32
    %c0_i32_0 = arith.constant 0 : i32
    %c0_i32_1 = arith.constant 0 : i32
    return %c0_i32, %c0_i32_0 : i32, i32
  }
  func.func @transform_4(%arg0: i32) -> (i32, i32) {
    %c0_i32 = arith.constant 0 : i32
    %c0_i32_0 = arith.constant 0 : i32
    %c0_i32_1 = arith.constant 0 : i32
    return %c0_i32, %c0_i32_0 : i32, i32
  }
  func.func @transform_5(%arg0: i32) -> (i32, i32) {
    %c0_i32 = arith.constant 0 : i32
    %c0_i32_0 = arith.constant 0 : i32
    %c0_i32_1 = arith.constant 0 : i32
    return %c0_i32, %c0_i32_0 : i32, i32
  }
  func.func @transform_6(%arg0: i32) -> (i32, i32) {
    %c0_i32 = arith.constant 0 : i32
    %c0_i32_0 = arith.constant 0 : i32
    %c0_i32_1 = arith.constant 0 : i32
    return %c0_i32, %c0_i32_0 : i32, i32
  }
  func.func @transform_7(%arg0: i32) -> (i32, i32, i32) {
    %c0_i32 = arith.constant 0 : i32
    %c0_i32_0 = arith.constant 0 : i32
    %c0_i32_1 = arith.constant 0 : i32
    return %arg0, %c0_i32, %c0_i32_0 : i32, i32, i32
  }
}

</mosaic_0001>

<bundles_post_ra>
// kernel: tpu_custom_call.1
= control target key start
LH: loop header
LB: loop body
LE: loop exit
PB: predicated region body
PF: predicated region fallthrough
CT: control target
= control target key end

     0   :  { %v8016_v0 = vmov 0   ;;  %vm94_vm0 = vcmask 261120   ;;  %v13162_v12 = vmov 0.0   ;;  %s8018_s26 = smov 96   ;;  %s8020_s29 = smov 32   ;;  %s13154_s1 = inlined_call_operand.vmem [shape: f32[512,1], index: 1, kind: input, shape index: {}]   ;;  %s13155_s2 = inlined_call_operand.vmem [shape: f32[32,32], index: 2, kind: input, shape index: {}]   ;;  %s13156_s0 = inlined_call_operand.vmem [shape: f32[4,128,32], index: 0, kind: input, shape index: {}]   ;;  %s13157_s4 = inlined_call_operand.vmem [shape: f32[32,288], index: 4, kind: input, shape index: {}]   ;;  %s13158_s3 = inlined_call_operand.vmem [shape: f32[1,32], index: 3, kind: input, shape index: {}]   ;;  %s13159_s5 = inlined_call_operand.vmem [shape: f32[1,32], index: 5, kind: input, shape index: {}]   ;;  %s13160_s6 = inlined_call_operand.vmem [shape: f32[1,32], index: 6, kind: input, shape index: {}]   ;;  %s13161_s7 = inlined_call_operand.vmem [shape: f32[4,128,32], index: 7, kind: output, shape index: {}]  }
   0x1   :  { %7927 = vset.pattern.permute.xlu1 %v8016_v0  ;;  %7926 = vset.pattern.permute.xlu0 %v8016_v0  ;;  %v674_v1 = vld [vmem:[%s13154_s1 + $0x10] sm:$0xff]  ;;  %v672_v2 = vld [vmem:[%s13154_s1] sm:$0xff]  ;;  %v91_v4 = vld [vmem:[%s13155_s2 + $0x8] sm:$0xff]  ;;  %1120 = vst.msk [vmem:[#allocation2] sm:$0xff] %vm94_vm0, %v13162_v12 }
   0x2   :  { %v90_v3 = vld [vmem:[%s13155_s2] sm:$0xff]  ;;  %748 = vperm.xlu1 %7927, %v674_v1   ;;  %738 = vperm.xlu0 %7926, %v672_v2   ;;  %v8078_v6 = vld [vmem:[%s13154_s1 + $0x18] sm:$0xff]  ;;  %v92_v7 = vld [vmem:[%s13155_s2 + $0x10] sm:$0xff]  ;;  %1185 = vst.msk [vmem:[#allocation2 + $0x208] sm:$0xff] %vm94_vm0, %v13162_v12 }
   0x3   :  { %v8073_v5 = vpack.c.bf16 %v91_v4, %v90_v3  ;;  %v93_v8 = vld [vmem:[%s13155_s2 + $0x18] sm:$0xff]  ;;  %v8089_v9 = vld [vmem:[%s13154_s1 + $0x8] sm:$0xff]  ;;  %v26_v11 = vld [vmem:[%s13156_s0] sm:$0xff]  ;;  %2026 = vst.msk [vmem:[#allocation3] sm:$0xff] %vm94_vm0, %v13162_v12  ;;  %2838 = vmatprep.mubr.f32.mxu1 %v13162_v12 }
   0x4   :  { %v8091_v10 = vpack.c.bf16 %v93_v8, %v92_v7  ;;  %7597 = vmatprep.mubr.msk.f32.mxu0 %vm94_vm0, %v26_v11  ;;  %2027 = vst.msk [vmem:[#allocation3 + $0x8] sm:$0xff] %vm94_vm0, %v13162_v12  ;;  %2028 = vst.msk [vmem:[#allocation3 + $0x10] sm:$0xff] %vm94_vm0, %v13162_v12  ;;  %v677_v13 = vld [vmem:[%s13154_s1 + $0x28] sm:$0xff]  ;;  %v676_v14 = vld [vmem:[%s13154_s1 + $0x20] sm:$0xff] }
   0x5   :  { %7894 = vmatprep.subr.bf16.mxu0 %v8073_v5  ;;  %2029 = vst.msk [vmem:[#allocation3 + $0x18] sm:$0xff] %vm94_vm0, %v13162_v12  ;;  %2030 = vst.msk [vmem:[#allocation3 + $0x20] sm:$0xff] %vm94_vm0, %v13162_v12  ;;  %v27_v15 = vld [vmem:[%s13156_s0 + $0x8] sm:$0xff]  ;;  %v679_v16 = vld [vmem:[%s13154_s1 + $0x38] sm:$0xff] }
   0x6   :  { %2031 = vst.msk [vmem:[#allocation3 + $0x28] sm:$0xff] %vm94_vm0, %v13162_v12  ;;  %2032 = vst.msk [vmem:[#allocation3 + $0x30] sm:$0xff] %vm94_vm0, %v13162_v12  ;;  %7896 = vmatpush3.bf16.msra.mxu0 %v8073_v5  ;;  %753 = vperm.xlu1 %7927, %v8078_v6   ;;  %v28_v17 = vld [vmem:[%s13156_s0 + $0x10] sm:$0xff]  ;;  %v29_v19 = vld [vmem:[%s13156_s0 + $0x18] sm:$0xff] }
   0x7   :  { %2033 = vst.msk [vmem:[#allocation3 + $0x38] sm:$0xff] %vm94_vm0, %v13162_v12  ;;  %2034 = vst.msk [vmem:[#allocation3 + $0x100] sm:$0xff] %vm94_vm0, %v13162_v12  ;;  %743 = vperm.xlu0 %7926, %v8089_v9   ;;  %7898 = vmatprep.subr.bf16.mxu0 %v8091_v10  ;;  %v678_v18 = vld [vmem:[%s13154_s1 + $0x30] sm:$0xff]  ;;  %v681_v20 = vld [vmem:[%s13154_s1 + $0x48] sm:$0xff] }
   0x8   :  { %2035 = vst.msk [vmem:[#allocation3 + $0x108] sm:$0xff] %vm94_vm0, %v13162_v12  ;;  %2036 = vst.msk [vmem:[#allocation3 + $0x110] sm:$0xff] %vm94_vm0, %v13162_v12  ;;  %v30_v21 = vld [vmem:[%s13156_s0 + $0x20] sm:$0xff]  ;;  %v31_v23 = vld [vmem:[%s13156_s0 + $0x28] sm:$0xff] }
   0x9   :  { %2037 = vst.msk [vmem:[#allocation3 + $0x118] sm:$0xff] %vm94_vm0, %v13162_v12  ;;  %2038 = vst.msk [vmem:[#allocation3 + $0x120] sm:$0xff] %vm94_vm0, %v13162_v12  ;;  %v680_v22 = vld [vmem:[%s13154_s1 + $0x40] sm:$0xff]  ;;  %v683_v24 = vld [vmem:[%s13154_s1 + $0x58] sm:$0xff] }
   0xa   :  { %2039 = vst.msk [vmem:[#allocation3 + $0x128] sm:$0xff] %vm94_vm0, %v13162_v12  ;;  %2040 = vst.msk [vmem:[#allocation3 + $0x130] sm:$0xff] %vm94_vm0, %v13162_v12  ;;  %7900 = vmatpush3.bf16.msra.mxu0 %v8091_v10  ;;  %763 = vperm.xlu1 %7927, %v677_v13   ;;  %v32_v25 = vld [vmem:[%s13156_s0 + $0x30] sm:$0xff]  ;;  %v33_v27 = vld [vmem:[%s13156_s0 + $0x38] sm:$0xff] }
   0xb   :  { %2041 = vst.msk [vmem:[#allocation3 + $0x138] sm:$0xff] %vm94_vm0, %v13162_v12  ;;  %2042 = vst.msk [vmem:[#allocation3 + $0x200] sm:$0xff] %vm94_vm0, %v13162_v12  ;;  %758 = vperm.xlu0 %7926, %v676_v14   ;;  %v682_v26 = vld [vmem:[%s13154_s1 + $0x50] sm:$0xff]  ;;  %v685_v28 = vld [vmem:[%s13154_s1 + $0x68] sm:$0xff] }
   0xc   :  { %2043 = vst.msk [vmem:[#allocation3 + $0x208] sm:$0xff] %vm94_vm0, %v13162_v12  ;;  %2044 = vst.msk [vmem:[#allocation3 + $0x210] sm:$0xff] %vm94_vm0, %v13162_v12  ;;  %v34_v29 = vld [vmem:[%s13156_s0 + $0x40] sm:$0xff]  ;;  %v35_v31 = vld [vmem:[%s13156_s0 + $0x48] sm:$0xff] }
   0xd   :  { %2045 = vst.msk [vmem:[#allocation3 + $0x218] sm:$0xff] %vm94_vm0, %v13162_v12  ;;  %2046 = vst.msk [vmem:[#allocation3 + $0x220] sm:$0xff] %vm94_vm0, %v13162_v12  ;;  %7598 = vmatmul.mubr.msk.f32.vlgmr.msra.gmra.mrb[0].mxu0 %vm94_vm0, %v27_v15  ;;  %v684_v30 = vld [vmem:[%s13154_s1 + $0x60] sm:$0xff]  ;;  %v687_v32 = vld [vmem:[%s13154_s1 + $0x78] sm:$0xff] }
   0xe   :  { %2047 = vst.msk [vmem:[#allocation3 + $0x228] sm:$0xff] %vm94_vm0, %v13162_v12  ;;  %2048 = vst.msk [vmem:[#allocation3 + $0x230] sm:$0xff] %vm94_vm0, %v13162_v12  ;;  %773 = vperm.xlu1 %7927, %v679_v16   ;;  %7600 = vmatprep.mubr.msk.f32.mxu0 %vm94_vm0, %v28_v17  ;;  %v36_v33 = vld [vmem:[%s13156_s0 + $0x50] sm:$0xff]  ;;  %v37_v35 = vld [vmem:[%s13156_s0 + $0x58] sm:$0xff] }
   0xf   :  { %2049 = vst.msk [vmem:[#allocation3 + $0x238] sm:$0xff] %vm94_vm0, %v13162_v12  ;;  %2050 = vst.msk [vmem:[#allocation3 + $0x300] sm:$0xff] %vm94_vm0, %v13162_v12  ;;  %768 = vperm.xlu0 %7926, %v678_v18   ;;  %v686_v34 = vld [vmem:[%s13154_s1 + $0x70] sm:$0xff]  ;;  %v2283_v36 = vld [vmem:[%s13157_s4 + $0x8] sm:$0xff] }
  0x10   :  { %2051 = vst.msk [vmem:[#allocation3 + $0x308] sm:$0xff] %vm94_vm0, %v13162_v12  ;;  %2052 = vst.msk [vmem:[#allocation3 + $0x310] sm:$0xff] %vm94_vm0, %v13162_v12  ;;  %v2286_v37 = vld [vmem:[%s13157_s4 + $0x20] sm:$0xff]  ;;  %v689_v38 = vld [vmem:[%s13154_s1 + $0x88] sm:$0xff] }
  0x11   :  { %2053 = vst.msk [vmem:[#allocation3 + $0x318] sm:$0xff] %vm94_vm0, %v13162_v12  ;;  %2054 = vst.msk [vmem:[#allocation3 + $0x320] sm:$0xff] %vm94_vm0, %v13162_v12  ;;  %7601 = vmatmul.mubr.msk.f32.gmra.mrb[2].mxu0 %vm94_vm0, %v29_v19  ;;  %v38_v39 = vld [vmem:[%s13156_s0 + $0x60] sm:$0xff]  ;;  %v7901_v40 = vpack.c.bf16 %v2286_v37, %v2283_v36  ;;  %v2285_v43 = vld [vmem:[%s13157_s4 + $0x18] sm:$0xff] }
  0x12   :  { %2055 = vst.msk [vmem:[#allocation3 + $0x328] sm:$0xff] %vm94_vm0, %v13162_v12  ;;  %2056 = vst.msk [vmem:[#allocation3 + $0x330] sm:$0xff] %vm94_vm0, %v13162_v12  ;;  %783 = vperm.xlu1 %7927, %v681_v20   ;;  %7603 = vmatprep.mubr.msk.f32.mxu0 %vm94_vm0, %v30_v21  ;;  %v2282_v41 = vld [vmem:[%s13157_s4] sm:$0xff]  ;;  %v39_v45 = vld [vmem:[%s13156_s0 + $0x68] sm:$0xff] }
  0x13   :  { %2057 = vst.msk [vmem:[#allocation3 + $0x338] sm:$0xff] %vm94_vm0, %v13162_v12  ;;  %2122 = vst.msk [vmem:[#allocation3 + $0xc0] sm:$0xff] %vm94_vm0, %v13162_v12  ;;  %778 = vperm.xlu0 %7926, %v680_v22   ;;  %v688_v42 = vld [vmem:[%s13154_s1 + $0x80] sm:$0xff]  ;;  %7902 = vmatprep.subr.bf16.mxu0 %v7901_v40  ;;  %v7903_v44 = vpack.c.bf16 %v2285_v43, %v2282_v41  ;;  %v691_v46 = vld [vmem:[%s13154_s1 + $0x98] sm:$0xff] }
  0x14   :  { %2123 = vst.msk [vmem:[#allocation3 + $0xc8] sm:$0xff] %vm94_vm0, %v13162_v12  ;;  %2124 = vst.msk [vmem:[#allocation3 + $0xd0] sm:$0xff] %vm94_vm0, %v13162_v12  ;;  %v40_v47 = vld [vmem:[%s13156_s0 + $0x70] sm:$0xff]  ;;  %7917 = vmatprep.subr.bf16.mxu1 %v7901_v40  ;;  %v41_v49 = vld [vmem:[%s13156_s0 + $0x78] sm:$0xff] }
  0x15   :  { %2125 = vst.msk [vmem:[#allocation3 + $0xd8] sm:$0xff] %vm94_vm0, %v13162_v12  ;;  %2126 = vst.msk [vmem:[#allocation3 + $0xe0] sm:$0xff] %vm94_vm0, %v13162_v12  ;;  %7604 = vmatmul.mubr.msk.f32.gmra.mrb[4].mxu0 %vm94_vm0, %v31_v23  ;;  %v690_v48 = vld [vmem:[%s13154_s1 + $0x90] sm:$0xff]  ;;  %7919 = vmatpush1.bf16.msra.mxu1 %v7903_v44  ;;  %v693_v50 = vld [vmem:[%s13154_s1 + $0xa8] sm:$0xff] }
  0x16   :  { %2127 = vst.msk [vmem:[#allocation3 + $0xe8] sm:$0xff] %vm94_vm0, %v13162_v12  ;;  %2128 = vst.msk [vmem:[#allocation3 + $0xf0] sm:$0xff] %vm94_vm0, %v13162_v12  ;;  %793 = vperm.xlu1 %7927, %v683_v24   ;;  %7606 = vmatprep.mubr.msk.f32.mxu0 %vm94_vm0, %v32_v25  ;;  %v42_v51 = vld [vmem:[%s13156_s0 + $0x80] sm:$0xff]  ;;  %v43_v53 = vld [vmem:[%s13156_s0 + $0x88] sm:$0xff] }
  0x17   :  { %2129 = vst.msk [vmem:[#allocation3 + $0xf8] sm:$0xff] %vm94_vm0, %v13162_v12  ;;  %2130 = vst.msk [vmem:[#allocation3 + $0x1c0] sm:$0xff] %vm94_vm0, %v13162_v12  ;;  %788 = vperm.xlu0 %7926, %v682_v26   ;;  %7904 = vmatpush1.bf16.msra.mxu0 %v7903_v44  ;;  %v692_v52 = vld [vmem:[%s13154_s1 + $0xa0] sm:$0xff]  ;;  %v695_v54 = vld [vmem:[%s13154_s1 + $0xb8] sm:$0xff] }
  0x18   :  { %2131 = vst.msk [vmem:[#allocation3 + $0x1c8] sm:$0xff] %vm94_vm0, %v13162_v12  ;;  %2132 = vst.msk [vmem:[#allocation3 + $0x1d0] sm:$0xff] %vm94_vm0, %v13162_v12  ;;  %v44_v55 = vld [vmem:[%s13156_s0 + $0x90] sm:$0xff]  ;;  %v45_v57 = vld [vmem:[%s13156_s0 + $0x98] sm:$0xff] }
  0x19   :  { %2133 = vst.msk [vmem:[#allocation3 + $0x1d8] sm:$0xff] %vm94_vm0, %v13162_v12  ;;  %2134 = vst.msk [vmem:[#allocation3 + $0x1e0] sm:$0xff] %vm94_vm0, %v13162_v12  ;;  %7607 = vmatmul.mubr.msk.f32.gmra.mrb[6].mxu0 %vm94_vm0, %v33_v27  ;;  %v694_v56 = vld [vmem:[%s13154_s1 + $0xb0] sm:$0xff]  ;;  %v697_v58 = vld [vmem:[%s13154_s1 + $0xc8] sm:$0xff] }
  0x1a   :  { %2135 = vst.msk [vmem:[#allocation3 + $0x1e8] sm:$0xff] %vm94_vm0, %v13162_v12  ;;  %2136 = vst.msk [vmem:[#allocation3 + $0x1f0] sm:$0xff] %vm94_vm0, %v13162_v12  ;;  %803 = vperm.xlu1 %7927, %v685_v28   ;;  %7609 = vmatprep.mubr.msk.f32.mxu0 %vm94_vm0, %v34_v29  ;;  %v2289_v59 = vld [vmem:[%s13157_s4 + $0x38] sm:$0xff]  ;;  %v2292_v60 = vld [vmem:[%s13157_s4 + $0x50] sm:$0xff] }
  0x1b   :  { %2137 = vst.msk [vmem:[#allocation3 + $0x1f8] sm:$0xff] %vm94_vm0, %v13162_v12  ;;  %2138 = vst.msk [vmem:[#allocation3 + $0x2c0] sm:$0xff] %vm94_vm0, %v13162_v12  ;;  %798 = vperm.xlu0 %7926, %v684_v30   ;;  %v46_v61 = vld [vmem:[%s13156_s0 + $0xa0] sm:$0xff]  ;;  %v7905_v62 = vpack.c.bf16 %v2292_v60, %v2289_v59  ;;  %v2288_v63 = vld [vmem:[%s13157_s4 + $0x30] sm:$0xff] }
  0x1c   :  { %2139 = vst.msk [vmem:[#allocation3 + $0x2c8] sm:$0xff] %vm94_vm0, %v13162_v12  ;;  %2140 = vst.msk [vmem:[#allocation3 + $0x2d0] sm:$0xff] %vm94_vm0, %v13162_v12  ;;  %v2291_v0 = vld [vmem:[%s13157_s4 + $0x48] sm:$0xff]  ;;  %v696_v1 = vld [vmem:[%s13154_s1 + $0xc0] sm:$0xff] }
  0x1d   :  { %2141 = vst.msk [vmem:[#allocation3 + $0x2d8] sm:$0xff] %vm94_vm0, %v13162_v12  ;;  %2142 = vst.msk [vmem:[#allocation3 + $0x2e0] sm:$0xff] %vm94_vm0, %v13162_v12  ;;  %7610 = vmatmul.mubr.msk.f32.gmra.mrb[8].mxu0 %vm94_vm0, %v35_v31  ;;  %v7907_v2 = vpack.c.bf16 %v2291_v0, %v2288_v63  ;;  %7906 = vmatprep.subr.bf16.mxu0 %v7905_v62  ;;  %v47_v3 = vld [vmem:[%s13156_s0 + $0xa8] sm:$0xff]  ;;  %v699_v4 = vld [vmem:[%s13154_s1 + $0xd8] sm:$0xff] }
  0x1e   :  { %2143 = vst.msk [vmem:[#allocation3 + $0x2e8] sm:$0xff] %vm94_vm0, %v13162_v12  ;;  %2144 = vst.msk [vmem:[#allocation3 + $0x2f0] sm:$0xff] %vm94_vm0, %v13162_v12  ;;  %813 = vperm.xlu1 %7927, %v687_v32   ;;  %7612 = vmatprep.mubr.msk.f32.mxu0 %vm94_vm0, %v36_v33  ;;  %v48_v5 = vld [vmem:[%s13156_s0 + $0xb0] sm:$0xff]  ;;  %v49_v7 = vld [vmem:[%s13156_s0 + $0xb8] sm:$0xff] }
  0x1f   :  { %2145 = vst.msk [vmem:[#allocation3 + $0x2f8] sm:$0xff] %vm94_vm0, %v13162_v12  ;;  %2146 = vst.msk [vmem:[#allocation3 + $0x3c0] sm:$0xff] %vm94_vm0, %v13162_v12  ;;  %808 = vperm.xlu0 %7926, %v686_v34   ;;  %7908 = vmatpush1.bf16.msra.mxu0 %v7907_v2  ;;  %v698_v6 = vld [vmem:[%s13154_s1 + $0xd0] sm:$0xff]  ;;  %v701_v8 = vld [vmem:[%s13154_s1 + $0xe8] sm:$0xff] }
  0x20   :  { %2147 = vst.msk [vmem:[#allocation3 + $0x3c8] sm:$0xff] %vm94_vm0, %v13162_v12  ;;  %2148 = vst.msk [vmem:[#allocation3 + $0x3d0] sm:$0xff] %vm94_vm0, %v13162_v12  ;;  %7918 = vmatprep.subr.bf16.mxu1 %v7905_v62  ;;  %v50_v9 = vld [vmem:[%s13156_s0 + $0xc0] sm:$0xff]  ;;  %v51_v11 = vld [vmem:[%s13156_s0 + $0xc8] sm:$0xff] }
  0x21   :  { %2149 = vst.msk [vmem:[#allocation3 + $0x3d8] sm:$0xff] %vm94_vm0, %v13162_v12  ;;  %2150 = vst.msk [vmem:[#allocation3 + $0x3e0] sm:$0xff] %vm94_vm0, %v13162_v12  ;;  %7613 = vmatmul.mubr.msk.f32.gmra.mrb[10].mxu0 %vm94_vm0, %v37_v35  ;;  %7920 = vmatpush1.bf16.msra.mxu1 %v7907_v2  ;;  %v700_v10 = vld [vmem:[%s13154_s1 + $0xe0] sm:$0xff]  ;;  %v703_v13 = vld [vmem:[%s13154_s1 + $0xf8] sm:$0xff] }
  0x22   :  { %2151 = vst.msk [vmem:[#allocation3 + $0x3e8] sm:$0xff] %vm94_vm0, %v13162_v12  ;;  %2152 = vst.msk [vmem:[#allocation3 + $0x3f0] sm:$0xff] %vm94_vm0, %v13162_v12  ;;  %823 = vperm.xlu1 %7927, %v689_v38   ;;  %7615 = vmatprep.mubr.msk.f32.mxu0 %vm94_vm0, %v38_v39  ;;  %v52_v14 = vld [vmem:[%s13156_s0 + $0xd0] sm:$0xff]  ;;  %v53_v16 = vld [vmem:[%s13156_s0 + $0xd8] sm:$0xff] }
  0x23   :  { %2153 = vst.msk [vmem:[#allocation3 + $0x3f8] sm:$0xff] %vm94_vm0, %v13162_v12  ;;  %818 = vperm.xlu0 %7926, %v688_v42   ;;  %v702_v15 = vld [vmem:[%s13154_s1 + $0xf0] sm:$0xff]  ;;  %v705_v17 = vld [vmem:[%s13154_s1 + $0x108] sm:$0xff]  ;;  %v54_v18 = vld [vmem:[%s13156_s0 + $0xe0] sm:$0xff] }
  0x24   :  { %v704_v19 = vld [vmem:[%s13154_s1 + $0x100] sm:$0xff]  ;;  %v55_v20 = vld [vmem:[%s13156_s0 + $0xe8] sm:$0xff]  ;;  %v707_v21 = vld [vmem:[%s13154_s1 + $0x118] sm:$0xff] }
  0x25   :  { %7616 = vmatmul.mubr.msk.f32.gmra.mrb[12].mxu0 %vm94_vm0, %v39_v45  ;;  %v56_v22 = vld [vmem:[%s13156_s0 + $0xf0] sm:$0xff]  ;;  %v57_v24 = vld [vmem:[%s13156_s0 + $0xf8] sm:$0xff]  ;;  %v709_v25 = vld [vmem:[%s13154_s1 + $0x128] sm:$0xff] }
  0x26   :  { %833 = vperm.xlu1 %7927, %v691_v46   ;;  %7618 = vmatprep.mubr.msk.f32.mxu0 %vm94_vm0, %v40_v47  ;;  %v706_v23 = vld [vmem:[%s13154_s1 + $0x110] sm:$0xff]  ;;  %v58_v26 = vld [vmem:[%s13156_s0 + $0x100] sm:$0xff]  ;;  %v59_v28 = vld [vmem:[%s13156_s0 + $0x108] sm:$0xff] }
  0x27   :  { %828 = vperm.xlu0 %7926, %v690_v48   ;;  %v708_v27 = vld [vmem:[%s13154_s1 + $0x120] sm:$0xff]  ;;  %v711_v29 = vld [vmem:[%s13154_s1 + $0x138] sm:$0xff]  ;;  %v60_v30 = vld [vmem:[%s13156_s0 + $0x110] sm:$0xff] }
  0x28   :  { %v710_v31 = vld [vmem:[%s13154_s1 + $0x130] sm:$0xff]  ;;  %v61_v32 = vld [vmem:[%s13156_s0 + $0x118] sm:$0xff]  ;;  %v713_v33 = vld [vmem:[%s13154_s1 + $0x148] sm:$0xff] }
  0x29   :  { %7619 = vmatmul.mubr.msk.f32.gmra.mrb[14].mxu0 %vm94_vm0, %v41_v49  ;;  %v62_v34 = vld [vmem:[%s13156_s0 + $0x120] sm:$0xff]  ;;  %v63_v36 = vld [vmem:[%s13156_s0 + $0x128] sm:$0xff]  ;;  %v715_v37 = vld [vmem:[%s13154_s1 + $0x158] sm:$0xff] }
  0x2a   :  { %843 = vperm.xlu1 %7927, %v693_v50   ;;  %7621 = vmatprep.mubr.msk.f32.mxu0 %vm94_vm0, %v42_v51  ;;  %v712_v35 = vld [vmem:[%s13154_s1 + $0x140] sm:$0xff]  ;;  %v64_v38 = vld [vmem:[%s13156_s0 + $0x130] sm:$0xff]  ;;  %v65_v40 = vld [vmem:[%s13156_s0 + $0x138] sm:$0xff] }
  0x2b   :  { %838 = vperm.xlu0 %7926, %v692_v52   ;;  %v714_v39 = vld [vmem:[%s13154_s1 + $0x150] sm:$0xff]  ;;  %v717_v41 = vld [vmem:[%s13154_s1 + $0x168] sm:$0xff]  ;;  %v66_v42 = vld [vmem:[%s13156_s0 + $0x140] sm:$0xff] }
  0x2c   :  { %v716_v43 = vld [vmem:[%s13154_s1 + $0x160] sm:$0xff]  ;;  %v67_v44 = vld [vmem:[%s13156_s0 + $0x148] sm:$0xff]  ;;  %v719_v45 = vld [vmem:[%s13154_s1 + $0x178] sm:$0xff] }
  0x2d   :  { %7622 = vmatmul.mubr.msk.f32.gmra.mrb[16].mxu0 %vm94_vm0, %v43_v53  ;;  %v68_v46 = vld [vmem:[%s13156_s0 + $0x150] sm:$0xff]  ;;  %v69_v48 = vld [vmem:[%s13156_s0 + $0x158] sm:$0xff]  ;;  %v721_v49 = vld [vmem:[%s13154_s1 + $0x188] sm:$0xff] }
  0x2e   :  { %853 = vperm.xlu1 %7927, %v695_v54   ;;  %7624 = vmatprep.mubr.msk.f32.mxu0 %vm94_vm0, %v44_v55  ;;  %v718_v47 = vld [vmem:[%s13154_s1 + $0x170] sm:$0xff]  ;;  %v70_v50 = vld [vmem:[%s13156_s0 + $0x160] sm:$0xff]  ;;  %v71_v52 = vld [vmem:[%s13156_s0 + $0x168] sm:$0xff] }
  0x2f   :  { %848 = vperm.xlu0 %7926, %v694_v56   ;;  %v720_v51 = vld [vmem:[%s13154_s1 + $0x180] sm:$0xff]  ;;  %v723_v53 = vld [vmem:[%s13154_s1 + $0x198] sm:$0xff]  ;;  %v72_v54 = vld [vmem:[%s13156_s0 + $0x170] sm:$0xff] }
  0x30   :  { %v722_v55 = vld [vmem:[%s13154_s1 + $0x190] sm:$0xff]  ;;  %v73_v56 = vld [vmem:[%s13156_s0 + $0x178] sm:$0xff]  ;;  %v724_v59 = vld [vmem:[%s13154_s1 + $0x1a0] sm:$0xff] }
  0x31   :  { %7625 = vmatmul.mubr.msk.f32.gmra.mrb[18].mxu0 %vm94_vm0, %v45_v57  ;;  %v725_v57 = vld [vmem:[%s13154_s1 + $0x1a8] sm:$0xff]  ;;  %v76_v62 = vld [vmem:[%s13156_s0 + $0x190] sm:$0xff]  ;;  %v77_v0 = vld [vmem:[%s13156_s0 + $0x198] sm:$0xff] }
  0x32   :  { %863 = vperm.xlu1 %7927, %v697_v58   ;;  %7627 = vmatprep.mubr.msk.f32.mxu0 %vm94_vm0, %v46_v61  ;;  %v74_v58 = vld [vmem:[%s13156_s0 + $0x180] sm:$0xff]  ;;  %v75_v60 = vld [vmem:[%s13156_s0 + $0x188] sm:$0xff]  ;;  %v727_v61 = vld [vmem:[%s13154_s1 + $0x1b8] sm:$0xff] }
  0x33   :  { %858 = vperm.xlu0 %7926, %v696_v1   ;;  %v726_v63 = vld [vmem:[%s13154_s1 + $0x1b0] sm:$0xff]  ;;  %v729_v1 = vld [vmem:[%s13154_s1 + $0x1c8] sm:$0xff]  ;;  %v78_v2 = vld [vmem:[%s13156_s0 + $0x1a0] sm:$0xff] }
  0x35   :  { %7628 = vmatmul.mubr.msk.f32.gmra.mrb[20].mxu0 %vm94_vm0, %v47_v3  ;;  %v728_v3 = vld [vmem:[%s13154_s1 + $0x1c0] sm:$0xff] }
  0x36   :  { %873 = vperm.xlu1 %7927, %v699_v4   ;;  %7630 = vmatprep.mubr.msk.f32.mxu0 %vm94_vm0, %v48_v5  ;;  %v79_v4 = vld [vmem:[%s13156_s0 + $0x1a8] sm:$0xff]  ;;  %v731_v5 = vld [vmem:[%s13154_s1 + $0x1d8] sm:$0xff] }
  0x37   :  { %868 = vperm.xlu0 %7926, %v698_v6   ;;  %v80_v6 = vld [vmem:[%s13156_s0 + $0x1b0] sm:$0xff] }
  0x39   :  { %7631 = vmatmul.mubr.msk.f32.gmra.mrb[22].mxu0 %vm94_vm0, %v49_v7  ;;  %v730_v7 = vld [vmem:[%s13154_s1 + $0x1d0] sm:$0xff] }
  0x3a   :  { %883 = vperm.xlu1 %7927, %v701_v8   ;;  %7633 = vmatprep.mubr.msk.f32.mxu0 %vm94_vm0, %v50_v9  ;;  %v81_v8 = vld [vmem:[%s13156_s0 + $0x1b8] sm:$0xff]  ;;  %v733_v9 = vld [vmem:[%s13154_s1 + $0x1e8] sm:$0xff] }
  0x3b   :  { %878 = vperm.xlu0 %7926, %v700_v10   ;;  %v82_v10 = vld [vmem:[%s13156_s0 + $0x1c0] sm:$0xff] }
  0x3d   :  { %7634 = vmatmul.mubr.msk.f32.gmra.mrb[24].mxu0 %vm94_vm0, %v51_v11  ;;  %v732_v11 = vld [vmem:[%s13154_s1 + $0x1e0] sm:$0xff] }
  0x3e   :  { %893 = vperm.xlu1 %7927, %v703_v13   ;;  %7636 = vmatprep.mubr.msk.f32.mxu0 %vm94_vm0, %v52_v14  ;;  %v83_v13 = vld [vmem:[%s13156_s0 + $0x1c8] sm:$0xff]  ;;  %v735_v14 = vld [vmem:[%s13154_s1 + $0x1f8] sm:$0xff] }
  0x3f   :  { %888 = vperm.xlu0 %7926, %v702_v15   ;;  %v84_v15 = vld [vmem:[%s13156_s0 + $0x1d0] sm:$0xff] }
  0x41   :  { %7637 = vmatmul.mubr.msk.f32.gmra.mrb[26].mxu0 %vm94_vm0, %v53_v16  ;;  %v734_v16 = vld [vmem:[%s13154_s1 + $0x1f0] sm:$0xff] }
  0x42   :  { %903 = vperm.xlu1 %7927, %v705_v17   ;;  %7639 = vmatprep.mubr.msk.f32.mxu0 %vm94_vm0, %v54_v18  ;;  %v85_v17 = vld [vmem:[%s13156_s0 + $0x1d8] sm:$0xff]  ;;  %v86_v18 = vld [vmem:[%s13156_s0 + $0x1e0] sm:$0xff] }
  0x43   :  { %898 = vperm.xlu0 %7926, %v704_v19   ;;  %v87_v19 = vld [vmem:[%s13156_s0 + $0x1e8] sm:$0xff] }
  0x45   :  { %7640 = vmatmul.mubr.msk.f32.gmra.mrb[28].mxu0 %vm94_vm0, %v55_v20  ;;  %v88_v20 = vld [vmem:[%s13156_s0 + $0x1f0] sm:$0xff] }
  0x46   :  { %913 = vperm.xlu1 %7927, %v707_v21   ;;  %7642 = vmatprep.mubr.msk.f32.mxu0 %vm94_vm0, %v56_v22  ;;  %v89_v21 = vld [vmem:[%s13156_s0 + $0x1f8] sm:$0xff]  ;;  %v2154_v22 = vld [vmem:[#allocation3] sm:$0xff] }
  0x47   :  { %908 = vperm.xlu0 %7926, %v706_v23   ;;  %v2155_v23 = vld [vmem:[#allocation3 + $0x8] sm:$0xff] }
  0x49   :  { %7643 = vmatmul.mubr.msk.f32.gmra.mrb[30].mxu0 %vm94_vm0, %v57_v24  ;;  %v2156_v24 = vld [vmem:[#allocation3 + $0x10] sm:$0xff] }
  0x4a   :  { %923 = vperm.xlu1 %7927, %v709_v25   ;;  %7645 = vmatprep.mubr.msk.f32.mxu0 %vm94_vm0, %v58_v26  ;;  %v2284_v25 = vld [vmem:[%s13157_s4 + $0x10] sm:$0xff]  ;;  %v2287_v26 = vld [vmem:[%s13157_s4 + $0x28] sm:$0xff] }
  0x4b   :  { %918 = vperm.xlu0 %7926, %v708_v27   ;;  %v2157_v27 = vld [vmem:[#allocation3 + $0x18] sm:$0xff] }
  0x4d   :  { %7646 = vmatmul.mubr.msk.f32.gmra.mrb[32].mxu0 %vm94_vm0, %v59_v28  ;;  %v7909_v28 = vpack.c.bf16 %v2287_v26, %v2284_v25 }
  0x4e   :  { %933 = vperm.xlu1 %7927, %v711_v29   ;;  %7648 = vmatprep.mubr.msk.f32.mxu0 %vm94_vm0, %v60_v30  ;;  %v2290_v29 = vld [vmem:[%s13157_s4 + $0x40] sm:$0xff]  ;;  %v2293_v30 = vld [vmem:[%s13157_s4 + $0x58] sm:$0xff] }
  0x4f   :  { %928 = vperm.xlu0 %7926, %v710_v31   ;;  %7910 = vmatprep.subr.bf16.mxu0 %v7909_v28  ;;  %v2158_v31 = vld [vmem:[#allocation3 + $0x20] sm:$0xff] }
  0x51   :  { %7649 = vmatmul.mubr.msk.f32.gmra.mrb[34].mxu0 %vm94_vm0, %v61_v32  ;;  %v7913_v32 = vpack.c.bf16 %v2293_v30, %v2290_v29 }
  0x52   :  { %943 = vperm.xlu1 %7927, %v713_v33   ;;  %7651 = vmatprep.mubr.msk.f32.mxu0 %vm94_vm0, %v62_v34  ;;  %v2159_v33 = vld [vmem:[#allocation3 + $0x28] sm:$0xff] }
  0x53   :  { %938 = vperm.xlu0 %7926, %v712_v35   ;;  %v2160_v35 = vld [vmem:[#allocation3 + $0x30] sm:$0xff] }
  0x55   :  { %7652 = vmatmul.mubr.msk.f32.gmra.mrb[36].mxu0 %vm94_vm0, %v63_v36 }
  0x56   :  { %953 = vperm.xlu1 %7927, %v715_v37   ;;  %7654 = vmatprep.mubr.msk.f32.mxu0 %vm94_vm0, %v64_v38  ;;  %v2161_v37 = vld [vmem:[#allocation3 + $0x38] sm:$0xff] }
  0x57   :  { %948 = vperm.xlu0 %7926, %v714_v39  }
  0x59   :  { %7655 = vmatmul.mubr.msk.f32.gmra.mrb[38].mxu0 %vm94_vm0, %v65_v40 }
  0x5a   :  { %963 = vperm.xlu1 %7927, %v717_v41   ;;  %7657 = vmatprep.mubr.msk.f32.mxu0 %vm94_vm0, %v66_v42 }
  0x5b   :  { %958 = vperm.xlu0 %7926, %v716_v43  }
  0x5d   :  { %7658 = vmatmul.mubr.msk.f32.gmra.mrb[40].mxu0 %vm94_vm0, %v67_v44 }
  0x5e   :  { %973 = vperm.xlu1 %7927, %v719_v45   ;;  %7660 = vmatprep.mubr.msk.f32.mxu0 %vm94_vm0, %v68_v46 }
  0x5f   :  { %968 = vperm.xlu0 %7926, %v718_v47  }
  0x61   :  { %7661 = vmatmul.mubr.msk.f32.gmra.mrb[42].mxu0 %vm94_vm0, %v69_v48 }
  0x62   :  { %983 = vperm.xlu1 %7927, %v721_v49   ;;  %7663 = vmatprep.mubr.msk.f32.mxu0 %vm94_vm0, %v70_v50 }
  0x63   :  { %978 = vperm.xlu0 %7926, %v720_v51  }
  0x65   :  { %7664 = vmatmul.mubr.msk.f32.gmra.mrb[44].mxu0 %vm94_vm0, %v71_v52 }
  0x66   :  { %993 = vperm.xlu1 %7927, %v723_v53   ;;  %7666 = vmatprep.mubr.msk.f32.mxu0 %vm94_vm0, %v72_v54  ;;  %v1314_v54 = vlaneseq }
  0x67   :  { %988 = vperm.xlu0 %7926, %v722_v55  }
  0x69   :  { %7667 = vmatmul.mubr.msk.f32.gmra.mrb[46].mxu0 %vm94_vm0, %v73_v56  ;;  %v8759_v56 = vshrl.u32 %v1314_v54, 7 }
  0x6a   :  { %1003 = vperm.xlu1 %7927, %v725_v57   ;;  %7669 = vmatprep.mubr.msk.f32.mxu0 %vm94_vm0, %v74_v58 }
  0x6b   :  { %998 = vperm.xlu0 %7926, %v724_v59   ;;  %v1316_v58 = vadd.s32 8, %v8759_v56  ;;  %v1317_v59 = vadd.s32 16, %v8759_v56  ;;  %v8889_v26 = vadd.s32 200, %v8759_v56 }
  0x6d   :  { %7670 = vmatmul.mubr.msk.f32.gmra.mrb[48].mxu0 %vm94_vm0, %v75_v60  ;;  %v8766_v60 = vadd.s32 24, %v8759_v56  ;;  %13238 = vst [vmem:[#allocation15_spill] sm:$0xff] %v8889_v26 }
  0x6e   :  { %1013 = vperm.xlu1 %7927, %v727_v61   ;;  %7672 = vmatprep.mubr.msk.f32.mxu0 %vm94_vm0, %v76_v62  ;;  %v8769_v61 = vadd.s32 32, %v8759_v56  ;;  %v1379_v62 = vand.u32 15, %v8759_v56 }
  0x6f   :  { %1008 = vperm.xlu0 %7926, %v726_v63   ;;  %v8773_v63 = vadd.s32 40, %v8759_v56 }
  0x70   :  { %vm8805_vm1 = vcmp.ne.s32.totalorder %v1379_v62, 0  ;;  %v8877_v62 = vadd.s32 176, %v8759_v56 }
  0x71   :  { %7673 = vmatmul.mubr.msk.f32.gmra.mrb[50].mxu0 %vm94_vm0, %v77_v0 }
  0x72   :  { %1023 = vperm.xlu1 %7927, %v729_v1   ;;  %7675 = vmatprep.mubr.msk.f32.mxu0 %vm94_vm0, %v78_v2  ;;  %v1380_v1 = vand.u32 15, %v1316_v58  ;;  %v8778_v2 = vadd.s32 48, %v8759_v56  ;;  %13236 = vst [vmem:[#allocation13_spill] sm:$0xff] %v8877_v62 }
  0x73   :  { %1018 = vperm.xlu0 %7926, %v728_v3   ;;  %v8781_v3 = vadd.s32 56, %v8759_v56 }
  0x74   :  { %vm8853_vm3 = vcmp.ne.s32.totalorder %v1380_v1, 15  ;;  %v8870_v1 = vadd.s32 168, %v8759_v56 }
  0x75   :  { %7676 = vmatmul.mubr.msk.f32.gmra.mrb[52].mxu0 %vm94_vm0, %v79_v4  ;;  %v13262_v26 = vand.u32 15, %v8781_v3 }
  0x76   :  { %1033 = vperm.xlu1 %7927, %v731_v5   ;;  %7678 = vmatprep.mubr.msk.f32.mxu0 %vm94_vm0, %v80_v6  ;;  %v1381_v5 = vand.u32 15, %v1317_v59  ;;  %v1382_v6 = vand.u32 15, %v8766_v60  ;;  %13235 = vst [vmem:[#allocation12_spill] sm:$0xff] %v8870_v1 }
  0x77   :  { %1028 = vperm.xlu0 %7926, %v730_v7   ;;  %v8787_v7 = vadd.s32 64, %v8759_v56  ;;  %vm9008_vm9 = vcmp.ne.s32.totalorder %v13262_v26, 15 }
  0x78   :  { %vm8849_vm2 = vcmp.ne.s32.totalorder %v1381_v5, 0  ;;  %v8867_v5 = vadd.s32 160, %v8759_v56  ;;  %vm8901_vm5 = vcmp.ne.s32.totalorder %v1382_v6, 15 }
  0x79   :  { %7679 = vmatmul.mubr.msk.f32.gmra.mrb[54].mxu0 %vm94_vm0, %v81_v8  ;;  %v8790_v8 = vadd.s32 72, %v8759_v56 }
  0x7a   :  { %1043 = vperm.xlu1 %7927, %v733_v9   ;;  %7681 = vmatprep.mubr.msk.f32.mxu0 %vm94_vm0, %v82_v10  ;;  %v1383_v10 = vand.u32 15, %v8769_v61  ;;  %13234 = vst [vmem:[#allocation11_spill] sm:$0xff] %v8867_v5  ;;  %v8892_v61 = vadd.s32 208, %v8759_v56 }
  0x7b   :  { %1038 = vperm.xlu0 %7926, %v732_v11   ;;  %v8794_v11 = vadd.s32 80, %v8759_v56 }
  0x7c   :  { %13239 = vst [vmem:[#allocation16_spill] sm:$0xff] %v8892_v61  ;;  %vm8897_vm4 = vcmp.ne.s32.totalorder %v1383_v10, 0  ;;  %v8932_v10 = vadd.s32 248, %v8759_v56 }
  0x7d   :  { %7682 = vmatmul.mubr.msk.f32.gmra.mrb[56].mxu0 %vm94_vm0, %v83_v13  ;;  %v8797_v13 = vadd.s32 88, %v8759_v56 }
  0x7e   :  { %1053 = vperm.xlu1 %7927, %v735_v14   ;;  %7684 = vmatprep.mubr.msk.f32.mxu0 %vm94_vm0, %v84_v15  ;;  %v8800_v14 = vadd.s32 96, %v8759_v56  ;;  %13250 = vst [vmem:[#allocation23_spill] sm:$0xff] %v8932_v10 }
  0x7f   :  { %1048 = vperm.xlu0 %7926, %v734_v16  }
  0x81   :  { %7685 = vmatmul.mubr.msk.f32.gmra.mrb[58].mxu0 %vm94_vm0, %v85_v17  ;;  %v8716_v34 = vpop.permute.xlu1 %748  ;;  %v8719_v36 = vpop.permute.xlu0 %738 }
  0x82   :  { %7687 = vmatprep.mubr.msk.f32.mxu0 %vm94_vm0, %v86_v18  ;;  %v8907_v18 = vadd.s32 216, %v8759_v56 }
  0x84   :  { %13244 = vst [vmem:[#allocation17_spill] sm:$0xff] %v8907_v18 }
  0x85   :  { %7688 = vmatmul.mubr.msk.f32.gmra.mrb[60].mxu0 %vm94_vm0, %v87_v19  ;;  %v8723_v38 = vpop.permute.xlu1 %753  ;;  %v8811_v19 = vadd.s32 104, %v8759_v56 }
  0x86   :  { %7690 = vmatprep.mubr.msk.f32.mxu0 %vm94_vm0, %v88_v20  ;;  %v8725_v39 = vpop.permute.xlu0 %743  ;;  %v8814_v20 = vadd.s32 112, %v8759_v56 }
  0x89   :  { %7691 = vmatmul.mubr.msk.f32.gmra.mrb[62].mxu0 %vm94_vm0, %v89_v21  ;;  %v8729_v40 = vpop.permute.xlu1 %763 }
  0x8a   :  { %2742 = vmatprep.mubr.f32.mxu0 %v13162_v12  ;;  %v8731_v41 = vpop.permute.xlu0 %758 }
  0x8d   :  { %7131 = vmatmul.mubr.msk.f32.vlgmr.msra.gmra.mrb[64].mxu0 %vm94_vm0, %v2154_v22  ;;  %v8733_v42 = vpop.permute.xlu1 %773  ;;  %v8910_v22 = vadd.s32 224, %v8759_v56 }
  0x8e   :  { %2748 = vmatprep.mubr.f32.mxu0 %v13162_v12  ;;  %7912 = vmatpush3.bf16.msra.mxu0 %v7909_v28  ;;  %v8735_v43 = vpop.permute.xlu0 %768  ;;  %v8832_v28 = vadd.s32 136, %v8759_v56 }
  0x8f   :  { %7914 = vmatprep.subr.bf16.mxu0 %v7913_v32  ;;  %13245 = vst [vmem:[#allocation18_spill] sm:$0xff] %v8910_v22 }
  0x91   :  { %7132 = vmatmul.mubr.msk.f32.gmra.mrb[66].mxu0 %vm94_vm0, %v2155_v23  ;;  %v8737_v44 = vpop.permute.xlu1 %783  ;;  %v13265_v23 = vand.u32 15, %v8794_v11 }
  0x92   :  { %2754 = vmatprep.mubr.f32.mxu0 %v13162_v12  ;;  %7916 = vmatpush3.bf16.msra.mxu0 %v7913_v32  ;;  %v8739_v45 = vpop.permute.xlu0 %778 }
  0x93   :  { %vm9037_vm10 = vcmp.ne.s32.totalorder %v13265_v23, 0 }
  0x95   :  { %7133 = vmatmul.mubr.msk.f32.gmra.mrb[68].mxu0 %vm94_vm0, %v2156_v24  ;;  %v8741_v46 = vpop.permute.xlu1 %793  ;;  %v8822_v24 = vadd.s32 120, %v8759_v56 }
  0x96   :  { %2760 = vmatprep.mubr.f32.mxu0 %v13162_v12  ;;  %v8743_v47 = vpop.permute.xlu0 %788 }
  0x99   :  { %7134 = vmatmul.mubr.msk.f32.gmra.mrb[70].mxu0 %vm94_vm0, %v2157_v27  ;;  %v8745_v48 = vpop.permute.xlu1 %803  ;;  %v8829_v27 = vadd.s32 128, %v8759_v56 }
  0x9a   :  { %2766 = vmatprep.mubr.f32.mxu0 %v13162_v12  ;;  %v8747_v49 = vpop.permute.xlu0 %798 }
  0x9d   :  { %7135 = vmatmul.mubr.msk.f32.gmra.mrb[72].mxu0 %vm94_vm0, %v2158_v31  ;;  %v8749_v50 = vpop.permute.xlu1 %813 }
  0x9e   :  { %2772 = vmatprep.mubr.f32.mxu0 %v13162_v12  ;;  %v8751_v51 = vpop.permute.xlu0 %808 }
  0xa1   :  { %7136 = vmatmul.mubr.msk.f32.gmra.mrb[74].mxu0 %vm94_vm0, %v2159_v33  ;;  %v8753_v52 = vpop.permute.xlu1 %823  ;;  %v8886_v33 = vadd.s32 192, %v8759_v56 }
  0xa2   :  { %2778 = vmatprep.mubr.f32.mxu0 %v13162_v12  ;;  %v8755_v53 = vpop.permute.xlu0 %818 }
  0xa5   :  { %7137 = vmatmul.mubr.msk.f32.gmra.mrb[76].mxu0 %vm94_vm0, %v2160_v35  ;;  %v8757_v55 = vpop.permute.xlu1 %833  ;;  %v8842_v35 = vadd.s32 144, %v8759_v56 }
  0xa6   :  { %2784 = vmatprep.mubr.f32.mxu0 %v13162_v12  ;;  %v8761_v57 = vpop.permute.xlu0 %828 }
  0xa7   :  { %13222 = vst [vmem:[#allocation5_spill] sm:$0xff] %v8761_v57  ;;  %v13251_v57 = vand.u32 15, %v8778_v2 }
  0xa9   :  { %7138 = vmatmul.mubr.msk.f32.gmra.mrb[78].mxu0 %vm94_vm0, %v2161_v37  ;;  %v8775_v0 = vpop.permute.xlu1 %843  ;;  %vm8947_vm6 = vcmp.ne.s32.totalorder %v13251_v57, 0  ;;  %v8964_v57 = vadd.s32 256, %v8759_v56 }
  0xaa   :  { %2790 = vmatprep.mubr.f32.mxu0 %v13162_v12  ;;  %13223 = vst [vmem:[#allocation6_spill] sm:$0xff] %v8775_v0  ;;  %v8783_v4 = vpop.permute.xlu0 %838  ;;  %v8973_v0 = vld [vmem:[%s13158_s3] ss:$0 sm:$0xff] }
  0xab   :  { %13224 = vst [vmem:[#allocation7_spill] sm:$0xff] %v8783_v4 }
  0xad   :  { %v8834_v29 = vpop.permute.xlu1 %853 }
  0xae   :  { %13227 = vst [vmem:[#allocation8_spill] sm:$0xff] %v8834_v29  ;;  %v8844_v37 = vpop.permute.xlu0 %848  ;;  %v8920_v29 = vadd.s32 232, %v8759_v56 }
  0xaf   :  { %13228 = vst [vmem:[#allocation9_spill] sm:$0xff] %v8844_v37 }
  0xb0   :  { %13247 = vst [vmem:[#allocation20_spill] sm:$0xff] %v8920_v29 }
  0xb1   :  { %v8912_v37 = vpop.permute.xlu1 %863 }
  0xb2   :  { %13246 = vst [vmem:[#allocation19_spill] sm:$0xff] %v8912_v37  ;;  %v8922_v4 = vpop.permute.xlu0 %858  ;;  %v8967_v37 = vadd.s32 264, %v8759_v56 }
  0xb3   :  { %13248 = vst [vmem:[#allocation21_spill] sm:$0xff] %v8922_v4 }
  0xb4   :  { %13257 = vst [vmem:[#allocation24_spill] sm:$0xff] %v8967_v37 }
  0xb5   :  { %v8979_v29 = vpop.permute.xlu1 %873 }
  0xb6   :  { %13258 = vst [vmem:[#allocation25_spill] sm:$0xff] %v8979_v29  ;;  %v8993_v2 = vpop.permute.xlu0 %868 }
  0xe0   :  { %v7599_v9 = vpop.f32.mrb[0].mxu0 }
  0xe1   :  { %v8803_v15 = vmul.f32 %v7599_v9, %v8725_v39  ;;  %v353_v16 = vpop.f32.mrb[1].mxu0  ;;  %v8860_v9 = vadd.s32 152, %v8759_v56 }
  0xe2   :  { %v8817_v21 = vmul.f32 %v8719_v36, %v353_v16 }
  0xe3   :  { %1122 = vst.msk [vmem:[#allocation2 + $0x10] sm:$0xff] %vm94_vm0, %v8803_v15  ;;  %13233 = vst [vmem:[#allocation10_spill] sm:$0xff] %v8860_v9  ;;  %v13271_v9 = vand.u32 15, %v8800_v14 }
  0xe4   :  { %1121 = vst.msk [vmem:[#allocation2 + $0x8] sm:$0xff] %vm94_vm0, %v8817_v21  ;;  %v7602_v30 = vpop.f32.mrb[2].mxu0 }
  0xe5   :  { %v8847_v54 = vmul.f32 %v7602_v30, %v8723_v38  ;;  %v363_v58 = vpop.f32.mrb[3].mxu0  ;;  %vm9078_vm12 = vcmp.ne.s32.totalorder %v13271_v9, 0 }
  0xe6   :  { %v8863_v16 = vmul.f32 %v8716_v34, %v363_v58  ;;  %v8880_v58 = vadd.s32 184, %v8759_v56 }
  0xe7   :  { %1124 = vst.msk [vmem:[#allocation2 + $0x20] sm:$0xff] %vm94_vm0, %v8847_v54 }
  0xe8   :  { %13237 = vst [vmem:[#allocation14_spill] sm:$0xff] %v8880_v58  ;;  %1123 = vst.msk [vmem:[#allocation2 + $0x18] sm:$0xff] %vm94_vm0, %v8863_v16  ;;  %v7605_v30 = vpop.f32.mrb[4].mxu0 }
  0xe9   :  { %v8895_v12 = vmul.f32 %v7605_v30, %v8729_v40  ;;  %v373_v31 = vpop.f32.mrb[5].mxu0 }
  0xea   :  { %v8915_v30 = vmul.f32 %v8731_v41, %v373_v31  ;;  %v8929_v31 = vadd.s32 240, %v8759_v56 }
  0xeb   :  { %v1186_v32 = vld [vmem:[#allocation2 + $0x7] sm:$0xff]  ;;  %1126 = vst.msk [vmem:[#allocation2 + $0x30] sm:$0xff] %vm94_vm0, %v8895_v12  ;;  %v1187_v6 = vld [vmem:[#allocation2 + $0xf] sm:$0xff] }
  0xec   :  { %13249 = vst [vmem:[#allocation22_spill] sm:$0xff] %v8929_v31  ;;  %v1507_v1 = vsel %vm8805_vm1, %v1186_v32, 0.0  ;;  %1125 = vst.msk [vmem:[#allocation2 + $0x28] sm:$0xff] %vm94_vm0, %v8915_v30  ;;  %v7608_v4 = vpop.f32.mrb[6].mxu0  ;;  %v13254_v32 = vand.u32 15, %v8773_v63  ;;  %v1572_v63 = vadd.f32 %v1187_v6, %v8803_v15  ;;  %v13259_v31 = vand.u32 15, %v8787_v7 }
  0xed   :  { %v1571_v58 = vadd.f32 %v1507_v1, %v8817_v21  ;;  %v8943_v62 = vmul.f32 %v7608_v4, %v8733_v42  ;;  %v383_v5 = vpop.f32.mrb[7].mxu0  ;;  %v1250_v1 = vld [vmem:[#allocation2 + $0x9] sm:$0xff]  ;;  %v9018_v7 = vadd.s32 288, %v8759_v56 }
  0xee   :  { %vm8953_vm7 = vcmp.ne.s32.totalorder %v13254_v32, 15  ;;  %v8960_v4 = vmul.f32 %v8735_v43, %v383_v5  ;;  %v8991_v5 = vadd.s32 280, %v8759_v56  ;;  %vm9002_vm8 = vcmp.ne.s32.totalorder %v13259_v31, 0 }
  0xef   :  { %v1763_v32 = vadd.f32 %v1571_v58, %v1250_v1  ;;  %v1188_v21 = vld [vmem:[#allocation2 + $0x17] sm:$0xff]  ;;  %1128 = vst.msk [vmem:[#allocation2 + $0x40] sm:$0xff] %vm94_vm0, %v8943_v62  ;;  %v1189_v22 = vld [vmem:[#allocation2 + $0x1f] sm:$0xff]  ;;  %v8988_v1 = vadd.s32 272, %v8759_v56 }
  0xf0   :  { %v1251_v18 = vld [vmem:[#allocation2 + $0x11] sm:$0xff]  ;;  %v1509_v15 = vsel %vm8849_vm2, %v1188_v21, 0.0  ;;  %1127 = vst.msk [vmem:[#allocation2 + $0x38] sm:$0xff] %vm94_vm0, %v8960_v4  ;;  %v7611_v6 = vpop.f32.mrb[8].mxu0 }
  0xf1   :  { %v1700_v58 = vsel %vm8853_vm3, %v1251_v18, 0.0  ;;  %v1827_v10 = vmul.f32 %v1763_v32, %v8719_v36  ;;  %v1573_v59 = vadd.f32 %v1509_v15, %v8863_v16  ;;  %v8998_v60 = vmul.f32 %v7611_v6, %v8737_v44  ;;  %v393_v18 = vpop.f32.mrb[9].mxu0  ;;  %v1252_v36 = vld [vmem:[#allocation2 + $0x19] sm:$0xff] }
  0xf2   :  { %v1764_v21 = vadd.f32 %v1700_v58, %v1572_v63  ;;  %v9013_v16 = vmul.f32 %v8739_v45, %v393_v18  ;;  %v1574_v15 = vadd.f32 %v1189_v22, %v8847_v54 }
  0xf3   :  { %v1898_v31 = vadd.f32 %v8973_v0, %v1827_v10  ;;  %v1765_v3 = vadd.f32 %v1573_v59, %v1252_v36  ;;  %v1190_v58 = vld [vmem:[#allocation2 + $0x27] sm:$0xff]  ;;  %1130 = vst.msk [vmem:[#allocation2 + $0x50] sm:$0xff] %vm94_vm0, %v8998_v60  ;;  %v1191_v18 = vld [vmem:[#allocation2 + $0x2f] sm:$0xff] }
  0xf4   :  { %v1828_v26 = vmul.f32 %v1764_v21, %v8725_v39  ;;  %v1253_v6 = vld [vmem:[#allocation2 + $0x21] sm:$0xff]  ;;  %v1511_v63 = vsel %vm8897_vm4, %v1190_v58, 0.0  ;;  %1129 = vst.msk [vmem:[#allocation2 + $0x48] sm:$0xff] %vm94_vm0, %v9013_v16  ;;  %v7614_v10 = vpop.f32.mrb[10].mxu0  ;;  %v13268_v58 = vand.u32 15, %v8790_v8  ;;  %v9047_v39 = vpop.permute.xlu1 %883 }
  0xf5   :  { %v1702_v32 = vsel %vm8901_vm5, %v1253_v6, 0.0  ;;  %v1962_v54 = vmax.f32 %v1898_v31, 0.0  ;;  %v1829_v59 = vmul.f32 %v1765_v3, %v8716_v34  ;;  %v1575_v21 = vadd.f32 %v1511_v63, %v8915_v30  ;;  %v403_v37 = vpop.f32.mrb[11].mxu0  ;;  %v1254_v31 = vld [vmem:[#allocation2 + $0x29] sm:$0xff] }
  0xf6   :  { %v1766_v36 = vadd.f32 %v1702_v32, %v1574_v15  ;;  %vm9043_vm11 = vcmp.ne.s32.totalorder %v13268_v58, 15  ;;  %v9050_v34 = vmul.f32 %v7614_v10, %v8741_v46  ;;  %v9053_v30 = vmul.f32 %v8743_v47, %v403_v37  ;;  %v9057_v32 = vpop.permute.xlu0 %878 }
  0xf7   :  { %v1899_v11 = vadd.f32 %v8973_v0, %v1828_v26  ;;  %2058 = vst.msk [vmem:[#allocation3 + $0x40] sm:$0xff] %vm94_vm0, %v1962_v54  ;;  %v1900_v8 = vadd.f32 %v8973_v0, %v1829_v59  ;;  %v1576_v15 = vadd.f32 %v1191_v18, %v8895_v12  ;;  %v1767_v3 = vadd.f32 %v1575_v21, %v1254_v31  ;;  %v1192_v10 = vld [vmem:[#allocation2 + $0x37] sm:$0xff]  ;;  %v1193_v22 = vld [vmem:[#allocation2 + $0x3f] sm:$0xff] }
  0xf8   :  { %v1830_v23 = vmul.f32 %v1766_v36, %v8723_v38  ;;  %v1255_v58 = vld [vmem:[#allocation2 + $0x31] sm:$0xff]  ;;  %v1513_v37 = vsel %vm8947_vm6, %v1192_v10, 0.0  ;;  %1132 = vst.msk [vmem:[#allocation2 + $0x60] sm:$0xff] %vm94_vm0, %v9050_v34  ;;  %1131 = vst.msk [vmem:[#allocation2 + $0x58] sm:$0xff] %vm94_vm0, %v9053_v30  ;;  %v7617_v54 = vpop.f32.mrb[12].mxu0  ;;  %v9072_v18 = vadd.s32 296, %v8759_v56 }
  0xf9   :  { %v1704_v26 = vsel %vm8953_vm7, %v1255_v58, 0.0  ;;  %v1963_v12 = vmax.f32 %v1899_v11, 0.0  ;;  %v1964_v38 = vmax.f32 %v1900_v8, 0.0  ;;  %v1831_v59 = vmul.f32 %v1767_v3, %v8731_v41  ;;  %v413_v36 = vpop.f32.mrb[13].mxu0  ;;  %v1256_v58 = vld [vmem:[#allocation2 + $0x39] sm:$0xff] }
  0xfa   :  { %v1577_v17 = vadd.f32 %v1513_v37, %v8960_v4  ;;  %v1768_v21 = vadd.f32 %v1704_v26, %v1576_v15  ;;  %v13274_v10 = vand.u32 15, %v8797_v13  ;;  %v9089_v8 = vmul.f32 %v7617_v54, %v8745_v48 }
  0xfb   :  { %v9092_v41 = vmul.f32 %v8747_v49, %v413_v36  ;;  %2059 = vst.msk [vmem:[#allocation3 + $0x48] sm:$0xff] %vm94_vm0, %v1963_v12  ;;  %v1901_v14 = vadd.f32 %v8973_v0, %v1830_v23  ;;  %v9097_v4 = vadd.s32 304, %v8759_v56  ;;  %2060 = vst.msk [vmem:[#allocation3 + $0x50] sm:$0xff] %vm94_vm0, %v1964_v38  ;;  %v1902_v13 = vadd.f32 %v8973_v0, %v1831_v59  ;;  %v1194_v26 = vld [vmem:[#allocation2 + $0x47] sm:$0xff]  ;;  %v9103_v36 = vpop.permute.xlu1 %893  ;;  %v1195_v9 = vld [vmem:[#allocation2 + $0x4f] sm:$0xff]  ;;  %v9114_v38 = vpop.permute.xlu0 %888 }
  0xfc   :  { %vm9084_vm13 = vcmp.ne.s32.totalorder %v13274_v10, 15  ;;  %v1578_v15 = vadd.f32 %v1193_v22, %v8943_v62  ;;  %v1769_v3 = vadd.f32 %v1577_v17, %v1256_v58  ;;  %v1832_v37 = vmul.f32 %v1768_v21, %v8729_v40  ;;  %v1257_v54 = vld [vmem:[#allocation2 + $0x41] sm:$0xff]  ;;  %1134 = vst.msk [vmem:[#allocation2 + $0x70] sm:$0xff] %vm94_vm0, %v9089_v8  ;;  %v7620_v62 = vpop.f32.mrb[14].mxu0 }
  0xfd   :  { %v1515_v23 = vsel %vm9002_vm8, %v1194_v26, 0.0  ;;  %v1706_v12 = vsel %vm9008_vm9, %v1257_v54, 0.0  ;;  %1133 = vst.msk [vmem:[#allocation2 + $0x68] sm:$0xff] %vm94_vm0, %v9092_v41  ;;  %v1965_v22 = vmax.f32 %v1901_v14, 0.0  ;;  %v1966_v59 = vmax.f32 %v1902_v13, 0.0  ;;  %v423_v61 = vpop.f32.mrb[15].mxu0 }
  0xfe   :  { %v1833_v17 = vmul.f32 %v1769_v3, %v8735_v43  ;;  %v1579_v29 = vadd.f32 %v1515_v23, %v9013_v16  ;;  %v1770_v21 = vadd.f32 %v1706_v12, %v1578_v15  ;;  %v13277_v10 = vand.u32 15, %v8814_v20  ;;  %v1258_v54 = vld [vmem:[#allocation2 + $0x49] sm:$0xff] }
  0xff   :  { %v13280_v26 = vand.u32 15, %v8811_v19  ;;  %v9131_v13 = vmul.f32 %v7620_v62, %v8749_v50  ;;  %v9134_v43 = vmul.f32 %v8751_v51, %v423_v61  ;;  %v9136_v16 = vld [vmem:[#allocation3 + $0x40] sm:$0xff]  ;;  %2061 = vst.msk [vmem:[#allocation3 + $0x58] sm:$0xff] %vm94_vm0, %v1965_v22  ;;  %v1903_v20 = vadd.f32 %v8973_v0, %v1832_v37  ;;  %2062 = vst.msk [vmem:[#allocation3 + $0x60] sm:$0xff] %vm94_vm0, %v1966_v59 }
 0x100   :  { %vm9120_vm14 = vcmp.ne.s32.totalorder %v13277_v10, 0  ;;  %v1904_v19 = vadd.f32 %v8973_v0, %v1833_v17  ;;  %v1580_v3 = vadd.f32 %v1195_v9, %v8998_v60  ;;  %v1771_v23 = vadd.f32 %v1579_v29, %v1258_v54  ;;  %v1196_v62 = vld [vmem:[#allocation2 + $0x57] sm:$0xff]  ;;  %7139 = vmatmul.mubr.msk.f32.gmra.mrb[80].mxu0 %vm94_vm0, %v9136_v16  ;;  %v1197_v10 = vld [vmem:[#allocation2 + $0x5f] sm:$0xff]  ;;  %v7623_v60 = vpop.f32.mrb[16].mxu0 }
 0x101   :  { %vm9126_vm15 = vcmp.ne.s32.totalorder %v13280_v26, 15  ;;  %v1834_v12 = vmul.f32 %v1770_v21, %v8733_v42  ;;  %v1259_v61 = vld [vmem:[#allocation2 + $0x51] sm:$0xff]  ;;  %v1517_v37 = vsel %vm9037_vm10, %v1196_v62, 0.0  ;;  %1136 = vst.msk [vmem:[#allocation2 + $0x80] sm:$0xff] %vm94_vm0, %v9131_v13  ;;  %1135 = vst.msk [vmem:[#allocation2 + $0x78] sm:$0xff] %vm94_vm0, %v9134_v43  ;;  %v13283_v42 = vmov 0.0  }
 0x102   :  { %v1708_v22 = vsel %vm9043_vm11, %v1259_v61, 0.0  ;;  %2796 = vmatprep.mubr.f32.mxu0 %v13283_v42  ;;  %v1967_v9 = vmax.f32 %v1903_v20, 0.0  ;;  %v9157_v59 = vadd.s32 312, %v8759_v56  ;;  %v1968_v17 = vmax.f32 %v1904_v19, 0.0  ;;  %v433_v21 = vpop.f32.mrb[17].mxu0  ;;  %v9173_v61 = vpop.permute.xlu1 %903  ;;  %v1260_v19 = vld [vmem:[#allocation2 + $0x59] sm:$0xff] }
 0x103   :  { %v1835_v25 = vmul.f32 %v1771_v23, %v8739_v45  ;;  %v1581_v29 = vadd.f32 %v1517_v37, %v9053_v30  ;;  %v1772_v6 = vadd.f32 %v1708_v22, %v1580_v3  ;;  %v13285_v26 = vand.u32 15, %v8829_v27  ;;  %v9181_v27 = vld [vmem:[#allocation3 + $0x48] sm:$0xff]  ;;  %v9188_v23 = vpop.permute.xlu0 %898 }
 0x104   :  { %13284 = vst [vmem:[#allocation26_spill] sm:$0xff] %v9157_v59  ;;  %v13288_v62 = vand.u32 15, %v8822_v24  ;;  %v9176_v45 = vmul.f32 %v7623_v60, %v8753_v52  ;;  %v9179_v30 = vmul.f32 %v8755_v53, %v433_v21  ;;  %13291 = vst [vmem:[#allocation27_spill] sm:$0xff] %v9181_v27  ;;  %v1905_v3 = vadd.f32 %v8973_v0, %v1834_v12  ;;  %v1199_v12 = vld [vmem:[#allocation2 + $0x6f] sm:$0xff] }
 0x105   :  { %vm9163_vm1 = vcmp.ne.s32.totalorder %v13285_v26, 0  ;;  %2063 = vst.msk [vmem:[#allocation3 + $0x68] sm:$0xff] %vm94_vm0, %v1967_v9  ;;  %v9186_v24 = vadd.s32 320, %v8759_v56  ;;  %2064 = vst.msk [vmem:[#allocation3 + $0x70] sm:$0xff] %vm94_vm0, %v1968_v17  ;;  %v1906_v37 = vadd.f32 %v8973_v0, %v1835_v25  ;;  %v1582_v22 = vadd.f32 %v1197_v10, %v9050_v34  ;;  %v1198_v26 = vld [vmem:[#allocation2 + $0x67] sm:$0xff]  ;;  %7140 = vmatmul.mubr.msk.f32.gmra.mrb[82].mxu0 %vm94_vm0, %v9181_v27  ;;  %v7626_v34 = vpop.f32.mrb[18].mxu0 }
 0x106   :  { %vm9169_vm2 = vcmp.ne.s32.totalorder %v13288_v62, 15  ;;  %v1773_v60 = vadd.f32 %v1581_v29, %v1260_v19  ;;  %v1836_v21 = vmul.f32 %v1772_v6, %v8737_v44  ;;  %v1261_v62 = vld [vmem:[#allocation2 + $0x61] sm:$0xff]  ;;  %v1519_v9 = vsel %vm9078_vm12, %v1198_v26, 0.0  ;;  %1138 = vst.msk [vmem:[#allocation2 + $0x90] sm:$0xff] %vm94_vm0, %v9176_v45  ;;  %1137 = vst.msk [vmem:[#allocation2 + $0x88] sm:$0xff] %vm94_vm0, %v9179_v30  ;;  %2802 = vmatprep.mubr.f32.mxu0 %v13283_v42  ;;  %v443_v11 = vpop.f32.mrb[19].mxu0 }
 0x107   :  { %13292 = vst [vmem:[#allocation28_spill] sm:$0xff] %v9186_v24  ;;  %v1710_v40 = vsel %vm9084_vm13, %v1261_v62, 0.0  ;;  %v1969_v44 = vmax.f32 %v1905_v3, 0.0  ;;  %v1970_v17 = vmax.f32 %v1906_v37, 0.0  ;;  %v1583_v31 = vadd.f32 %v1519_v9, %v9092_v41  ;;  %v1262_v3 = vld [vmem:[#allocation2 + $0x69] sm:$0xff] }
 0x108   :  { %v1837_v25 = vmul.f32 %v1773_v60, %v8743_v47  ;;  %v1774_v29 = vadd.f32 %v1710_v40, %v1582_v22  ;;  %v13293_v6 = vand.u32 15, %v8842_v35  ;;  %v13296_v26 = vand.u32 15, %v8832_v28  ;;  %v13299_v47 = vld [vmem:[#allocation5_spill] sm:$0xff]  ;;  %v9226_v40 = vld [vmem:[#allocation3 + $0x50] sm:$0xff]  ;;  %v13306_v22 = vld [vmem:[#allocation10_spill] sm:$0xff] }
 0x109   :  { %v9221_v37 = vmul.f32 %v7626_v34, %v8757_v55  ;;  %v9224_v41 = vmul.f32 %v13299_v47, %v443_v11  ;;  %13300 = vst [vmem:[#allocation5_spill] sm:$0xff] %v9226_v40  ;;  %v1907_v35 = vadd.f32 %v8973_v0, %v1836_v21  ;;  %2065 = vst.msk [vmem:[#allocation3 + $0x78] sm:$0xff] %vm94_vm0, %v1969_v44  ;;  %v1263_v11 = vld [vmem:[#allocation2 + $0x71] sm:$0xff]  ;;  %7141 = vmatmul.mubr.msk.f32.gmra.mrb[84].mxu0 %vm94_vm0, %v9226_v40  ;;  %v1201_v21 = vld [vmem:[#allocation2 + $0x7f] sm:$0xff] }
 0x10a   :  { %vm9210_vm3 = vcmp.ne.s32.totalorder %v13293_v6, 0  ;;  %vm9216_vm4 = vcmp.ne.s32.totalorder %v13296_v26, 15  ;;  %2066 = vst.msk [vmem:[#allocation3 + $0x80] sm:$0xff] %vm94_vm0, %v1970_v17  ;;  %v1908_v28 = vadd.f32 %v8973_v0, %v1837_v25  ;;  %v1584_v60 = vadd.f32 %v1199_v12, %v9089_v8  ;;  %v1200_v6 = vld [vmem:[#allocation2 + $0x77] sm:$0xff]  ;;  %v9237_v26 = vpop.permute.xlu1 %913  ;;  %2808 = vmatprep.mubr.f32.mxu0 %v13283_v42  ;;  %v9251_v25 = vpop.permute.xlu0 %908  ;;  %v13343_v40 = vld [vmem:[#allocation15_spill] sm:$0xff] }
 0x10b   :  { %v1775_v9 = vadd.f32 %v1583_v31, %v1262_v3  ;;  %v1838_v34 = vmul.f32 %v1774_v29, %v8741_v46  ;;  %v1521_v44 = vsel %vm9120_vm14, %v1200_v6, 0.0  ;;  %v1712_v17 = vsel %vm9126_vm15, %v1263_v11, 0.0  ;;  %1140 = vst.msk [vmem:[#allocation2 + $0xa0] sm:$0xff] %vm94_vm0, %v9221_v37  ;;  %1139 = vst.msk [vmem:[#allocation2 + $0x98] sm:$0xff] %vm94_vm0, %v9224_v41  ;;  %v7629_v46 = vpop.f32.mrb[20].mxu0  ;;  %v13302_v6 = vld [vmem:[#allocation11_spill] sm:$0xff] }
 0x10c   :  { %v1971_v8 = vmax.f32 %v1907_v35, 0.0  ;;  %v9249_v12 = vadd.s32 328, %v8759_v56  ;;  %v1972_v58 = vmax.f32 %v1908_v28, 0.0  ;;  %v1585_v14 = vadd.f32 %v1521_v44, %v9134_v43  ;;  %v453_v3 = vpop.f32.mrb[21].mxu0  ;;  %v1264_v63 = vld [vmem:[#allocation2 + $0x79] sm:$0xff] }
 0x10d   :  { %v1839_v31 = vmul.f32 %v1775_v9, %v8747_v49  ;;  %v1776_v29 = vadd.f32 %v1712_v17, %v1584_v60  ;;  %v13303_v11 = vand.u32 15, %v13302_v6  ;;  %v13307_v35 = vand.u32 15, %v13306_v22  ;;  %v13310_v28 = vld [vmem:[#allocation6_spill] sm:$0xff]  ;;  %v13311_v49 = vld [vmem:[#allocation7_spill] sm:$0xff]  ;;  %v9273_v60 = vld [vmem:[#allocation3 + $0x58] sm:$0xff] }
 0x10e   :  { %13301 = vst [vmem:[#allocation29_spill] sm:$0xff] %v9249_v12  ;;  %v9268_v59 = vmul.f32 %v7629_v46, %v13310_v28  ;;  %v9271_v43 = vmul.f32 %v13311_v49, %v453_v3  ;;  %13312 = vst [vmem:[#allocation11_spill] sm:$0xff] %v9273_v60  ;;  %v1909_v9 = vadd.f32 %v8973_v0, %v1838_v34  ;;  %v9278_v44 = vadd.s32 336, %v8759_v56  ;;  %v1202_v3 = vld [vmem:[#allocation2 + $0x87] sm:$0xff] }
 0x10f   :  { %vm9257_vm5 = vcmp.ne.s32.totalorder %v13303_v11, 0  ;;  %vm9263_vm6 = vcmp.ne.s32.totalorder %v13307_v35, 15  ;;  %2067 = vst.msk [vmem:[#allocation3 + $0x88] sm:$0xff] %vm94_vm0, %v1971_v8  ;;  %2068 = vst.msk [vmem:[#allocation3 + $0x90] sm:$0xff] %vm94_vm0, %v1972_v58  ;;  %v1910_v22 = vadd.f32 %v8973_v0, %v1839_v31  ;;  %v1586_v17 = vadd.f32 %v1201_v21, %v9131_v13  ;;  %v1203_v11 = vld [vmem:[#allocation2 + $0x8f] sm:$0xff]  ;;  %v1265_v35 = vld [vmem:[#allocation2 + $0x81] sm:$0xff]  ;;  %7142 = vmatmul.mubr.msk.f32.gmra.mrb[86].mxu0 %vm94_vm0, %v9273_v60 }
 0x110   :  { %13313 = vst [vmem:[#allocation10_spill] sm:$0xff] %v9278_v44  ;;  %v1777_v46 = vadd.f32 %v1585_v14, %v1264_v63  ;;  %v1840_v6 = vmul.f32 %v1776_v29, %v8745_v48  ;;  %v1523_v34 = vsel %vm9163_vm1, %v1202_v3, 0.0  ;;  %v1714_v8 = vsel %vm9169_vm2, %v1265_v35, 0.0  ;;  %1142 = vst.msk [vmem:[#allocation2 + $0xb0] sm:$0xff] %vm94_vm0, %v9268_v59  ;;  %v7632_v63 = vpop.f32.mrb[22].mxu0  ;;  %2814 = vmatprep.mubr.f32.mxu0 %v13283_v42  ;;  %v13314_v14 = vld [vmem:[#allocation13_spill] sm:$0xff] }
 0x111   :  { %1141 = vst.msk [vmem:[#allocation2 + $0xa8] sm:$0xff] %vm94_vm0, %v9271_v43  ;;  %v1973_v48 = vmax.f32 %v1909_v9, 0.0  ;;  %v1974_v21 = vmax.f32 %v1910_v22, 0.0  ;;  %v1587_v54 = vadd.f32 %v1523_v34, %v9179_v30  ;;  %v1778_v31 = vadd.f32 %v1714_v8, %v1586_v17  ;;  %v463_v20 = vpop.f32.mrb[23].mxu0  ;;  %v13318_v35 = vld [vmem:[#allocation12_spill] sm:$0xff]  ;;  %v9310_v9 = vpop.permute.xlu1 %923  ;;  %v9319_v8 = vld [vmem:[#allocation3 + $0x60] sm:$0xff] }
 0x112   :  { %v1841_v58 = vmul.f32 %v1777_v46, %v8751_v51  ;;  %v13315_v29 = vand.u32 15, %v13314_v14  ;;  %v13319_v60 = vand.u32 15, %v13318_v35  ;;  %v1266_v22 = vld [vmem:[#allocation2 + $0x89] sm:$0xff]  ;;  %v1588_v51 = vadd.f32 %v1203_v11, %v9176_v45  ;;  %13324 = vst [vmem:[#allocation6_spill] sm:$0xff] %v9319_v8  ;;  %v1204_v35 = vld [vmem:[#allocation2 + $0x97] sm:$0xff] }
 0x113   :  { %v13322_v30 = vld [vmem:[#allocation8_spill] sm:$0xff]  ;;  %v13323_v46 = vld [vmem:[#allocation9_spill] sm:$0xff]  ;;  %2069 = vst.msk [vmem:[#allocation3 + $0x98] sm:$0xff] %vm94_vm0, %v1973_v48  ;;  %2070 = vst.msk [vmem:[#allocation3 + $0xa0] sm:$0xff] %vm94_vm0, %v1974_v21  ;;  %v1779_v11 = vadd.f32 %v1587_v54, %v1266_v22  ;;  %7143 = vmatmul.mubr.msk.f32.gmra.mrb[88].mxu0 %vm94_vm0, %v9319_v8  ;;  %v1525_v48 = vsel %vm9210_vm3, %v1204_v35, 0.0  ;;  %v9346_v54 = vadd.s32 344, %v8759_v56 }
 0x114   :  { %vm9300_vm7 = vcmp.ne.s32.totalorder %v13315_v29, 0  ;;  %vm9306_vm8 = vcmp.ne.s32.totalorder %v13319_v60, 15  ;;  %v9314_v17 = vmul.f32 %v7632_v63, %v13322_v30  ;;  %v9317_v34 = vmul.f32 %v13323_v46, %v463_v20  ;;  %v9321_v14 = vld [vmem:[#allocation3 + $0x80] sm:$0xff]  ;;  %v9325_v29 = vpop.permute.xlu0 %918  ;;  %v1205_v20 = vld [vmem:[#allocation2 + $0x9f] sm:$0xff]  ;;  %2820 = vmatprep.mubr.f32.mxu0 %v13283_v42 }
 0x115   :  { %13325 = vst [vmem:[#allocation7_spill] sm:$0xff] %v9321_v14  ;;  %v1911_v60 = vadd.f32 %v8973_v0, %v1840_v6  ;;  %v1912_v45 = vadd.f32 %v8973_v0, %v1841_v58  ;;  %v1842_v63 = vmul.f32 %v1778_v31, %v8749_v50  ;;  %v1267_v13 = vld [vmem:[#allocation2 + $0x91] sm:$0xff]  ;;  %7147 = vmatmul.mubr.msk.f32.vlgmr.msra.gmra.mrb[0].mxu1 %vm94_vm0, %v9321_v14  ;;  %v7635_v50 = vpop.f32.mrb[24].mxu0  ;;  %13326 = vst [vmem:[#allocation13_spill] sm:$0xff] %v9346_v54  ;;  %v1268_v44 = vld [vmem:[#allocation2 + $0x99] sm:$0xff] }
 0x116   :  { %v1716_v21 = vsel %vm9216_vm4, %v1267_v13, 0.0  ;;  %1144 = vst.msk [vmem:[#allocation2 + $0xc0] sm:$0xff] %vm94_vm0, %v9314_v17  ;;  %1143 = vst.msk [vmem:[#allocation2 + $0xb8] sm:$0xff] %vm94_vm0, %v9317_v34  ;;  %2844 = vmatprep.mubr.f32.mxu1 %v13283_v42  ;;  %v1843_v31 = vmul.f32 %v1779_v11, %v8755_v53  ;;  %v1589_v62 = vadd.f32 %v1525_v48, %v9224_v41  ;;  %v473_v22 = vpop.f32.mrb[25].mxu0  ;;  %v13327_v35 = vand.u32 15, %v8886_v33  ;;  %v13330_v14 = vld [vmem:[#allocation14_spill] sm:$0xff] }
 0x117   :  { %v1975_v58 = vmax.f32 %v1911_v60, 0.0  ;;  %v1976_v19 = vmax.f32 %v1912_v45, 0.0  ;;  %v1780_v13 = vadd.f32 %v1716_v21, %v1588_v51  ;;  %v13331_v12 = vand.u32 15, %v13330_v14  ;;  %v13334_v53 = vld [vmem:[#allocation19_spill] sm:$0xff]  ;;  %v13335_v41 = vld [vmem:[#allocation21_spill] sm:$0xff]  ;;  %v9369_v33 = vld [vmem:[#allocation3 + $0x68] sm:$0xff] }
 0x118   :  { %vm9352_vm9 = vcmp.ne.s32.totalorder %v13327_v35, 0  ;;  %v1590_v45 = vadd.f32 %v1205_v20, %v9221_v37  ;;  %v9364_v11 = vmul.f32 %v7635_v50, %v13334_v53  ;;  %v9367_v51 = vmul.f32 %v13335_v41, %v473_v22  ;;  %13336 = vst [vmem:[#allocation12_spill] sm:$0xff] %v9369_v33  ;;  %v9371_v48 = vld [vmem:[#allocation3 + $0x88] sm:$0xff]  ;;  %v1206_v20 = vld [vmem:[#allocation2 + $0xa7] sm:$0xff]  ;;  %v1207_v50 = vld [vmem:[#allocation2 + $0xaf] sm:$0xff]  ;;  %7144 = vmatmul.mubr.msk.f32.gmra.mrb[90].mxu0 %vm94_vm0, %v9369_v33 }
 0x119   :  { %vm9358_vm10 = vcmp.ne.s32.totalorder %v13331_v12, 15  ;;  %13337 = vst [vmem:[#allocation8_spill] sm:$0xff] %v9371_v48  ;;  %2071 = vst.msk [vmem:[#allocation3 + $0xa8] sm:$0xff] %vm94_vm0, %v1975_v58  ;;  %v1913_v12 = vadd.f32 %v8973_v0, %v1842_v63  ;;  %v1914_v14 = vadd.f32 %v8973_v0, %v1843_v31  ;;  %v1781_v21 = vadd.f32 %v1589_v62, %v1268_v44  ;;  %v1269_v35 = vld [vmem:[#allocation2 + $0xa1] sm:$0xff]  ;;  %v9385_v63 = vpop.permute.xlu1 %933  ;;  %v7638_v44 = vpop.f32.mrb[26].mxu0  ;;  %v1270_v62 = vld [vmem:[#allocation2 + $0xa9] sm:$0xff] }
 0x11a   :  { %2072 = vst.msk [vmem:[#allocation3 + $0xb0] sm:$0xff] %vm94_vm0, %v1976_v19  ;;  %v1844_v37 = vmul.f32 %v1780_v13, %v8753_v52  ;;  %7148 = vmatmul.mubr.msk.f32.gmra.mrb[2].mxu1 %vm94_vm0, %v9371_v48  ;;  %v9383_v58 = vadd.s32 352, %v8759_v56  ;;  %v1527_v19 = vsel %vm9257_vm5, %v1206_v20, 0.0  ;;  %v1718_v52 = vsel %vm9263_vm6, %v1269_v35, 0.0  ;;  %1146 = vst.msk [vmem:[#allocation2 + $0xd0] sm:$0xff] %vm94_vm0, %v9364_v11  ;;  %2826 = vmatprep.mubr.f32.mxu0 %v13283_v42  ;;  %v9398_v13 = vpop.permute.xlu0 %928  ;;  %v483_v35 = vpop.f32.mrb[27].mxu0 }
 0x11b   :  { %1145 = vst.msk [vmem:[#allocation2 + $0xc8] sm:$0xff] %vm94_vm0, %v9367_v51  ;;  %2850 = vmatprep.mubr.f32.mxu1 %v13283_v42  ;;  %v1977_v31 = vmax.f32 %v1913_v12, 0.0  ;;  %v1978_v10 = vmax.f32 %v1914_v14, 0.0  ;;  %v1845_v15 = vmul.f32 %v1781_v21, %v13299_v47  ;;  %v1591_v22 = vadd.f32 %v1527_v19, %v9271_v43  ;;  %v13339_v48 = vld [vmem:[#allocation16_spill] sm:$0xff]  ;;  %v13347_v47 = vld [vmem:[#allocation25_spill] sm:$0xff] }
 0x11c   :  { %13338 = vst [vmem:[#allocation9_spill] sm:$0xff] %v9383_v58  ;;  %v1782_v20 = vadd.f32 %v1718_v52, %v1590_v45  ;;  %v13340_v33 = vand.u32 15, %v13339_v48  ;;  %v13344_v27 = vand.u32 15, %v13343_v40  ;;  %v1592_v14 = vadd.f32 %v1207_v50, %v9268_v59  ;;  %v9421_v45 = vld [vmem:[#allocation3 + $0x70] sm:$0xff]  ;;  %v13364_v58 = vld [vmem:[#allocation20_spill] sm:$0xff] }
 0x11d   :  { %v9416_v21 = vmul.f32 %v7638_v44, %v13347_v47  ;;  %v9419_v43 = vmul.f32 %v8993_v2, %v483_v35  ;;  %13348 = vst [vmem:[#allocation14_spill] sm:$0xff] %v9421_v45  ;;  %2073 = vst.msk [vmem:[#allocation3 + $0xb8] sm:$0xff] %vm94_vm0, %v1977_v31  ;;  %v1916_v40 = vadd.f32 %v8973_v0, %v1845_v15  ;;  %v1208_v50 = vld [vmem:[#allocation2 + $0xb7] sm:$0xff]  ;;  %v1209_v19 = vld [vmem:[#allocation2 + $0xbf] sm:$0xff]  ;;  %7145 = vmatmul.mubr.msk.f32.gmra.mrb[92].mxu0 %vm94_vm0, %v9421_v45 }
 0x11e   :  { %vm9404_vm11 = vcmp.ne.s32.totalorder %v13340_v33, 0  ;;  %vm9410_vm12 = vcmp.ne.s32.totalorder %v13344_v27, 15  ;;  %v9423_v33 = vld [vmem:[#allocation3 + $0x90] sm:$0xff]  ;;  %v1915_v27 = vadd.f32 %v8973_v0, %v1844_v37  ;;  %2074 = vst.msk [vmem:[#allocation3 + $0x140] sm:$0xff] %vm94_vm0, %v1978_v10  ;;  %v1783_v48 = vadd.f32 %v1591_v22, %v1270_v62  ;;  %v1271_v52 = vld [vmem:[#allocation2 + $0xb1] sm:$0xff]  ;;  %2832 = vmatprep.mubr.f32.mxu0 %v13283_v42 }
 0x11f   :  { %13349 = vst [vmem:[#allocation19_spill] sm:$0xff] %v9423_v33  ;;  %v1846_v59 = vmul.f32 %v1782_v20, %v8757_v55  ;;  %7149 = vmatmul.mubr.msk.f32.gmra.mrb[4].mxu1 %vm94_vm0, %v9423_v33  ;;  %v1529_v37 = vsel %vm9300_vm7, %v1208_v50, 0.0  ;;  %v1720_v31 = vsel %vm9306_vm8, %v1271_v52, 0.0  ;;  %1148 = vst.msk [vmem:[#allocation2 + $0xe0] sm:$0xff] %vm94_vm0, %v9416_v21  ;;  %v7641_v55 = vpop.f32.mrb[28].mxu0  ;;  %v9446_v62 = vadd.s32 360, %v8759_v56 }
 0x120   :  { %1147 = vst.msk [vmem:[#allocation2 + $0xd8] sm:$0xff] %vm94_vm0, %v9419_v43  ;;  %2856 = vmatprep.mubr.f32.mxu1 %v13283_v42  ;;  %v1979_v10 = vmax.f32 %v1915_v27, 0.0  ;;  %v1980_v3 = vmax.f32 %v1916_v40, 0.0  ;;  %v1847_v15 = vmul.f32 %v1783_v48, %v13311_v49  ;;  %v1593_v24 = vadd.f32 %v1529_v37, %v9317_v34  ;;  %v493_v20 = vpop.f32.mrb[29].mxu0  ;;  %v13350_v35 = vld [vmem:[#allocation18_spill] sm:$0xff]  ;;  %v13354_v44 = vld [vmem:[#allocation17_spill] sm:$0xff]  ;;  %v9462_v27 = vpop.permute.xlu1 %943 }
 0x121   :  { %v1784_v22 = vadd.f32 %v1720_v31, %v1592_v14  ;;  %v13351_v50 = vand.u32 15, %v13350_v35  ;;  %v13355_v33 = vand.u32 15, %v13354_v44  ;;  %v1272_v40 = vld [vmem:[#allocation2 + $0xb9] sm:$0xff]  ;;  %v1594_v49 = vadd.f32 %v1209_v19, %v9314_v17  ;;  %v9471_v48 = vld [vmem:[#allocation3 + $0x78] sm:$0xff]  ;;  %v9477_v44 = vpop.permute.xlu0 %938 }
 0x122   :  { %v9466_v34 = vmul.f32 %v7641_v55, %v9047_v39  ;;  %v9469_v14 = vmul.f32 %v9057_v32, %v493_v20  ;;  %13358 = vst [vmem:[#allocation21_spill] sm:$0xff] %v9471_v48  ;;  %v9473_v37 = vld [vmem:[#allocation3 + $0x98] sm:$0xff]  ;;  %2075 = vst.msk [vmem:[#allocation3 + $0x148] sm:$0xff] %vm94_vm0, %v1979_v10  ;;  %v1918_v17 = vadd.f32 %v8973_v0, %v1847_v15  ;;  %7146 = vmatmul.mubr.msk.f32.gmra.mrb[94].mxu0 %vm94_vm0, %v9471_v48  ;;  %v7928_v15 = vld [vmem:[#allocation3] sm:$0xff] }
 0x123   :  { %vm9452_vm13 = vcmp.ne.s32.totalorder %v13351_v50, 0  ;;  %vm9458_vm14 = vcmp.ne.s32.totalorder %v13355_v33, 15  ;;  %13359 = vst [vmem:[#allocation16_spill] sm:$0xff] %v9473_v37  ;;  %v1917_v33 = vadd.f32 %v8973_v0, %v1846_v59  ;;  %2076 = vst.msk [vmem:[#allocation3 + $0x150] sm:$0xff] %vm94_vm0, %v1980_v3  ;;  %v1785_v19 = vadd.f32 %v1593_v24, %v1272_v40  ;;  %v1210_v55 = vld [vmem:[#allocation2 + $0xc7] sm:$0xff]  ;;  %v1211_v20 = vld [vmem:[#allocation2 + $0xcf] sm:$0xff]  ;;  %7150 = vmatmul.mubr.msk.f32.gmra.mrb[6].mxu1 %vm94_vm0, %v9473_v37 }
 0x124   :  { %v1848_v31 = vmul.f32 %v1784_v22, %v13310_v28  ;;  %v1273_v35 = vld [vmem:[#allocation2 + $0xc1] sm:$0xff]  ;;  %v9487_v59 = vadd.s32 368, %v8759_v56  ;;  %v1531_v10 = vsel %vm9352_vm9, %v1210_v55, 0.0  ;;  %1150 = vst.msk [vmem:[#allocation2 + $0xf0] sm:$0xff] %vm94_vm0, %v9466_v34  ;;  %1149 = vst.msk [vmem:[#allocation2 + $0xe8] sm:$0xff] %vm94_vm0, %v9469_v14  ;;  %v7644_v28 = vpop.f32.mrb[30].mxu0  ;;  %2862 = vmatprep.mubr.f32.mxu1 %v13283_v42  ;;  %7701 = vmatprep.mubr.msk.f32.mxu0 %vm94_vm0, %v7928_v15 }
 0x125   :  { %v1722_v3 = vsel %vm9358_vm10, %v1273_v35, 0.0  ;;  %v1981_v22 = vmax.f32 %v1917_v33, 0.0  ;;  %v1982_v6 = vmax.f32 %v1918_v17, 0.0  ;;  %v1849_v50 = vmul.f32 %v1785_v19, %v13323_v46  ;;  %v503_v55 = vpop.f32.mrb[31].mxu0  ;;  %v13360_v35 = vld [vmem:[#allocation22_spill] sm:$0xff]  ;;  %v1274_v33 = vld [vmem:[#allocation2 + $0xc9] sm:$0xff] }
 0x126   :  { %v1595_v60 = vadd.f32 %v1531_v10, %v9367_v51  ;;  %v1786_v40 = vadd.f32 %v1722_v3, %v1594_v49  ;;  %v13361_v37 = vand.u32 15, %v13360_v35  ;;  %v13365_v45 = vand.u32 15, %v13364_v58  ;;  %v9521_v49 = vld [vmem:[#allocation3 + $0xa0] sm:$0xff]  ;;  %v7929_v3 = vld [vmem:[#allocation3 + $0x8] sm:$0xff] }
 0x127   :  { %v1596_v17 = vadd.f32 %v1211_v20, %v9364_v11  ;;  %v9516_v46 = vmul.f32 %v7644_v28, %v9103_v36  ;;  %v9519_v51 = vmul.f32 %v9114_v38, %v503_v55  ;;  %2077 = vst.msk [vmem:[#allocation3 + $0x158] sm:$0xff] %vm94_vm0, %v1981_v22  ;;  %2078 = vst.msk [vmem:[#allocation3 + $0x160] sm:$0xff] %vm94_vm0, %v1982_v6  ;;  %v1212_v11 = vld [vmem:[#allocation2 + $0xd7] sm:$0xff]  ;;  %v1213_v20 = vld [vmem:[#allocation2 + $0xdf] sm:$0xff]  ;;  %7151 = vmatmul.mubr.msk.f32.gmra.mrb[8].mxu1 %vm94_vm0, %v9521_v49  ;;  %v9532_v22 = vpop.permute.xlu1 %953 }
 0x128   :  { %vm9504_vm15 = vcmp.ne.s32.totalorder %v13361_v37, 0  ;;  %vm9510_vm1 = vcmp.ne.s32.totalorder %v13365_v45, 15  ;;  %v1919_v37 = vadd.f32 %v8973_v0, %v1848_v31  ;;  %v1920_v58 = vadd.f32 %v8973_v0, %v1849_v50  ;;  %v1275_v10 = vld [vmem:[#allocation2 + $0xd1] sm:$0xff]  ;;  %7702 = vmatmul.mubr.msk.f32.vlgmr.msra.gmra.mrb[96].mxu0 %vm94_vm0, %v7929_v3  ;;  %2868 = vmatprep.mubr.f32.mxu1 %v13283_v42  ;;  %v7930_v50 = vld [vmem:[#allocation3 + $0x10] sm:$0xff] }
 0x129   :  { %v1787_v45 = vadd.f32 %v1595_v60, %v1274_v33  ;;  %v1850_v19 = vmul.f32 %v1786_v40, %v13322_v30  ;;  %v1533_v31 = vsel %vm9404_vm11, %v1212_v11, 0.0  ;;  %v1724_v6 = vsel %vm9410_vm12, %v1275_v10, 0.0  ;;  %1152 = vst.msk [vmem:[#allocation2 + $0x100] sm:$0xff] %vm94_vm0, %v9516_v46  ;;  %1151 = vst.msk [vmem:[#allocation2 + $0xf8] sm:$0xff] %vm94_vm0, %v9519_v51  ;;  %v7647_v30 = vpop.f32.mrb[32].mxu0  ;;  %7704 = vmatprep.mubr.msk.f32.mxu0 %vm94_vm0, %v7930_v50  ;;  %v9547_v40 = vpop.permute.xlu0 %948  ;;  %v13371_v50 = vld [vmem:[#allocation23_spill] sm:$0xff] }
 0x12a   :  { %v9545_v60 = vadd.s32 376, %v8759_v56  ;;  %v1983_v8 = vmax.f32 %v1919_v37, 0.0  ;;  %v1984_v12 = vmax.f32 %v1920_v58, 0.0  ;;  %v1597_v35 = vadd.f32 %v1533_v31, %v9419_v43  ;;  %v513_v11 = vpop.f32.mrb[33].mxu0  ;;  %v1276_v37 = vld [vmem:[#allocation2 + $0xd9] sm:$0xff] }
 0x12b   :  { %v1851_v55 = vmul.f32 %v1787_v45, %v13335_v41  ;;  %v1788_v33 = vadd.f32 %v1724_v6, %v1596_v17  ;;  %v13368_v10 = vand.u32 15, %v8964_v57  ;;  %v13372_v24 = vand.u32 15, %v13371_v50  ;;  %v9570_v57 = vld [vmem:[#allocation3 + $0xa8] sm:$0xff]  ;;  %v1277_v6 = vld [vmem:[#allocation2 + $0xe1] sm:$0xff] }
 0x12c   :  { %v1598_v58 = vadd.f32 %v1213_v20, %v9416_v21  ;;  %v9565_v41 = vmul.f32 %v7647_v30, %v9173_v61  ;;  %v9568_v43 = vmul.f32 %v9188_v23, %v513_v11  ;;  %2079 = vst.msk [vmem:[#allocation3 + $0x168] sm:$0xff] %vm94_vm0, %v1983_v8  ;;  %v1921_v17 = vadd.f32 %v8973_v0, %v1850_v19  ;;  %v1214_v21 = vld [vmem:[#allocation2 + $0xe7] sm:$0xff]  ;;  %v1215_v20 = vld [vmem:[#allocation2 + $0xef] sm:$0xff] }
 0x12d   :  { %vm9553_vm2 = vcmp.ne.s32.totalorder %v13368_v10, 0  ;;  %vm9559_vm3 = vcmp.ne.s32.totalorder %v13372_v24, 15  ;;  %2080 = vst.msk [vmem:[#allocation3 + $0x170] sm:$0xff] %vm94_vm0, %v1984_v12  ;;  %v1922_v24 = vadd.f32 %v8973_v0, %v1851_v55  ;;  %v1789_v45 = vadd.f32 %v1597_v35, %v1276_v37  ;;  %7152 = vmatmul.mubr.msk.f32.gmra.mrb[10].mxu1 %vm94_vm0, %v9570_v57  ;;  %v7931_v30 = vld [vmem:[#allocation3 + $0x18] sm:$0xff]  ;;  %v7932_v55 = vld [vmem:[#allocation3 + $0x20] sm:$0xff] }
 0x12e   :  { %v1852_v31 = vmul.f32 %v1788_v33, %v13334_v53  ;;  %7705 = vmatmul.mubr.msk.f32.gmra.mrb[98].mxu0 %vm94_vm0, %v7931_v30  ;;  %v9581_v8 = vadd.s32 384, %v8759_v56  ;;  %v1535_v19 = vsel %vm9452_vm13, %v1214_v21, 0.0  ;;  %v1726_v12 = vsel %vm9458_vm14, %v1277_v6, 0.0  ;;  %1154 = vst.msk [vmem:[#allocation2 + $0x110] sm:$0xff] %vm94_vm0, %v9565_v41  ;;  %1153 = vst.msk [vmem:[#allocation2 + $0x108] sm:$0xff] %vm94_vm0, %v9568_v43  ;;  %v7650_v53 = vpop.f32.mrb[34].mxu0  ;;  %2874 = vmatprep.mubr.f32.mxu1 %v13283_v42 }
 0x12f   :  { %7707 = vmatprep.mubr.msk.f32.mxu0 %vm94_vm0, %v7932_v55  ;;  %v1985_v33 = vmax.f32 %v1921_v17, 0.0  ;;  %v1986_v52 = vmax.f32 %v1922_v24, 0.0  ;;  %v1853_v11 = vmul.f32 %v1789_v45, %v8993_v2  ;;  %v1599_v54 = vadd.f32 %v1535_v19, %v9469_v14  ;;  %v523_v50 = vpop.f32.mrb[35].mxu0  ;;  %v13378_v6 = vld [vmem:[#allocation24_spill] sm:$0xff]  ;;  %v9608_v17 = vpop.permute.xlu1 %963 }
 0x130   :  { %v1790_v10 = vadd.f32 %v1726_v12, %v1598_v58  ;;  %v13375_v37 = vand.u32 15, %v8988_v1  ;;  %v13379_v30 = vand.u32 15, %v13378_v6  ;;  %v1278_v24 = vld [vmem:[#allocation2 + $0xe9] sm:$0xff]  ;;  %v1600_v2 = vadd.f32 %v1215_v20, %v9466_v34  ;;  %v9617_v58 = vld [vmem:[#allocation3 + $0xb0] sm:$0xff]  ;;  %v9621_v19 = vpop.permute.xlu0 %958  ;;  %v1216_v20 = vld [vmem:[#allocation2 + $0xf7] sm:$0xff] }
 0x131   :  { %v9612_v14 = vmul.f32 %v7650_v53, %v9237_v26  ;;  %v9615_v1 = vmul.f32 %v9251_v25, %v523_v50  ;;  %2081 = vst.msk [vmem:[#allocation3 + $0x178] sm:$0xff] %vm94_vm0, %v1985_v33  ;;  %v1923_v45 = vadd.f32 %v8973_v0, %v1852_v31  ;;  %2082 = vst.msk [vmem:[#allocation3 + $0x180] sm:$0xff] %vm94_vm0, %v1986_v52  ;;  %v1217_v53 = vld [vmem:[#allocation2 + $0xff] sm:$0xff]  ;;  %v1279_v6 = vld [vmem:[#allocation2 + $0xf1] sm:$0xff]  ;;  %7153 = vmatmul.mubr.msk.f32.gmra.mrb[12].mxu1 %vm94_vm0, %v9617_v58 }
 0x132   :  { %vm9598_vm4 = vcmp.ne.s32.totalorder %v13375_v37, 0  ;;  %vm9604_vm5 = vcmp.ne.s32.totalorder %v13379_v30, 15  ;;  %v1924_v12 = vadd.f32 %v8973_v0, %v1853_v11  ;;  %v1791_v37 = vadd.f32 %v1599_v54, %v1278_v24  ;;  %v7933_v50 = vld [vmem:[#allocation3 + $0x28] sm:$0xff]  ;;  %2880 = vmatprep.mubr.f32.mxu1 %v13283_v42  ;;  %v7934_v11 = vld [vmem:[#allocation3 + $0x30] sm:$0xff] }
 0x133   :  { %v1854_v34 = vmul.f32 %v1790_v10, %v13347_v47  ;;  %7708 = vmatmul.mubr.msk.f32.gmra.mrb[100].mxu0 %vm94_vm0, %v7933_v50  ;;  %v1537_v33 = vsel %vm9504_vm15, %v1216_v20, 0.0  ;;  %v1728_v52 = vsel %vm9510_vm1, %v1279_v6, 0.0  ;;  %1156 = vst.msk [vmem:[#allocation2 + $0x120] sm:$0xff] %vm94_vm0, %v9612_v14  ;;  %1155 = vst.msk [vmem:[#allocation2 + $0x118] sm:$0xff] %vm94_vm0, %v9615_v1  ;;  %v7653_v47 = vpop.f32.mrb[36].mxu0  ;;  %v9641_v54 = vadd.s32 392, %v8759_v56 }
 0x134   :  { %7710 = vmatprep.mubr.msk.f32.mxu0 %vm94_vm0, %v7934_v11  ;;  %v1987_v48 = vmax.f32 %v1923_v45, 0.0  ;;  %v1988_v10 = vmax.f32 %v1924_v12, 0.0  ;;  %v1855_v15 = vmul.f32 %v1791_v37, %v9057_v32  ;;  %v1601_v30 = vadd.f32 %v1537_v33, %v9519_v51  ;;  %v533_v20 = vpop.f32.mrb[37].mxu0  ;;  %v1280_v45 = vld [vmem:[#allocation2 + $0xf9] sm:$0xff]  ;;  %v13423_v50 = vld [vmem:[#allocation13_spill] sm:$0xff] }
 0x135   :  { %v1792_v24 = vadd.f32 %v1728_v52, %v1600_v2  ;;  %v13382_v6 = vand.u32 15, %v9018_v7  ;;  %v13385_v35 = vand.u32 15, %v8991_v5  ;;  %v1602_v12 = vadd.f32 %v1217_v53, %v9516_v46  ;;  %v9664_v7 = vld [vmem:[#allocation3 + $0xb8] sm:$0xff] }
 0x136   :  { %v9659_v32 = vmul.f32 %v7653_v47, %v9310_v9  ;;  %v9662_v51 = vmul.f32 %v9325_v29, %v533_v20  ;;  %2083 = vst.msk [vmem:[#allocation3 + $0x188] sm:$0xff] %vm94_vm0, %v1987_v48  ;;  %v1925_v2 = vadd.f32 %v8973_v0, %v1854_v34  ;;  %2084 = vst.msk [vmem:[#allocation3 + $0x190] sm:$0xff] %vm94_vm0, %v1988_v10  ;;  %v1218_v46 = vld [vmem:[#allocation2 + $0x107] sm:$0xff]  ;;  %v1219_v53 = vld [vmem:[#allocation2 + $0x10f] sm:$0xff]  ;;  %7154 = vmatmul.mubr.msk.f32.gmra.mrb[14].mxu1 %vm94_vm0, %v9664_v7  ;;  %v9677_v34 = vpop.permute.xlu1 %973  ;;  %v7656_v48 = vpop.f32.mrb[38].mxu0 }
 0x137   :  { %vm9647_vm6 = vcmp.ne.s32.totalorder %v13382_v6, 0  ;;  %vm9653_vm7 = vcmp.ne.s32.totalorder %v13385_v35, 15  ;;  %v1926_v5 = vadd.f32 %v8973_v0, %v1855_v15  ;;  %v1793_v35 = vadd.f32 %v1601_v30, %v1280_v45  ;;  %v1281_v33 = vld [vmem:[#allocation2 + $0x101] sm:$0xff]  ;;  %2886 = vmatprep.mubr.f32.mxu1 %v13283_v42  ;;  %v9690_v10 = vld [vmem:[#allocation3 + $0xc0] sm:$0xff]  ;;  %v9693_v30 = vpop.permute.xlu0 %968  ;;  %v543_v45 = vpop.f32.mrb[39].mxu0 }
 0x138   :  { %v1856_v37 = vmul.f32 %v1792_v24, %v9047_v39  ;;  %v7935_v52 = vld [vmem:[#allocation3 + $0x38] sm:$0xff]  ;;  %v9675_v47 = vadd.s32 400, %v8759_v56  ;;  %v1539_v0 = vsel %vm9553_vm2, %v1218_v46, 0.0  ;;  %v1730_v39 = vsel %vm9559_vm3, %v1281_v33, 0.0  ;;  %1158 = vst.msk [vmem:[#allocation2 + $0x130] sm:$0xff] %vm94_vm0, %v9659_v32  ;;  %1157 = vst.msk [vmem:[#allocation2 + $0x128] sm:$0xff] %vm94_vm0, %v9662_v51 }
 0x139   :  { %7711 = vmatmul.mubr.msk.f32.gmra.mrb[102].mxu0 %vm94_vm0, %v7935_v52  ;;  %13388 = vst [vmem:[#allocation15_spill] sm:$0xff] %v9690_v10  ;;  %v1989_v15 = vmax.f32 %v1925_v2, 0.0  ;;  %v1990_v28 = vmax.f32 %v1926_v5, 0.0  ;;  %v1857_v24 = vmul.f32 %v1793_v35, %v9114_v38  ;;  %v1603_v20 = vadd.f32 %v1539_v0, %v9568_v43  ;;  %v1282_v2 = vld [vmem:[#allocation2 + $0x109] sm:$0xff] }
 0x13a   :  { %7713 = vmatprep.mubr.msk.f32.mxu0 %vm94_vm0, %v9136_v16  ;;  %v1794_v6 = vadd.f32 %v1730_v39, %v1602_v12  ;;  %v13389_v46 = vand.u32 15, %v9097_v4  ;;  %v13392_v33 = vand.u32 15, %v9072_v18  ;;  %v1604_v5 = vadd.f32 %v1219_v53, %v9565_v41  ;;  %v9720_v4 = vld [vmem:[%s13158_s3] ss:$0 sm:$0xff]  ;;  %v1220_v53 = vld [vmem:[#allocation2 + $0x117] sm:$0xff]  ;;  %7155 = vmatmul.mubr.msk.f32.gmra.mrb[16].mxu1 %vm94_vm0, %v9690_v10 }
 0x13b   :  { %v9711_v38 = vmul.f32 %v7656_v48, %v9385_v63  ;;  %v9714_v43 = vmul.f32 %v9398_v13, %v543_v45  ;;  %2085 = vst.msk [vmem:[#allocation3 + $0x198] sm:$0xff] %vm94_vm0, %v1989_v15  ;;  %v1927_v18 = vadd.f32 %v9720_v4, %v1856_v37  ;;  %2086 = vst.msk [vmem:[#allocation3 + $0x1a0] sm:$0xff] %vm94_vm0, %v1990_v28  ;;  %v1221_v0 = vld [vmem:[#allocation2 + $0x11f] sm:$0xff]  ;;  %v1283_v39 = vld [vmem:[#allocation2 + $0x111] sm:$0xff]  ;;  %v1541_v37 = vsel %vm9598_vm4, %v1220_v53, 0.0 }
 0x13c   :  { %vm9699_vm8 = vcmp.ne.s32.totalorder %v13389_v46, 0  ;;  %vm9705_vm9 = vcmp.ne.s32.totalorder %v13392_v33, 15  ;;  %v1928_v12 = vadd.f32 %v9720_v4, %v1857_v24  ;;  %v1795_v41 = vadd.f32 %v1603_v20, %v1282_v2  ;;  %v13395_v48 = vld [vmem:[#allocation27_spill] sm:$0xff]  ;;  %v13396_v24 = vld [vmem:[#allocation5_spill] sm:$0xff]  ;;  %2892 = vmatprep.mubr.f32.mxu1 %v13283_v42  ;;  %v9742_v20 = vld [vmem:[#allocation3 + $0xc8] sm:$0xff] }
 0x13d   :  { %v1858_v35 = vmul.f32 %v1794_v6, %v9103_v36  ;;  %7714 = vmatmul.mubr.msk.f32.gmra.mrb[104].mxu0 %vm94_vm0, %v13395_v48  ;;  %v1732_v28 = vsel %vm9604_vm5, %v1283_v39, 0.0  ;;  %1160 = vst.msk [vmem:[#allocation2 + $0x140] sm:$0xff] %vm94_vm0, %v9711_v38  ;;  %1159 = vst.msk [vmem:[#allocation2 + $0x138] sm:$0xff] %vm94_vm0, %v9714_v43  ;;  %v7659_v36 = vpop.f32.mrb[40].mxu0  ;;  %v9745_v21 = vadd.s32 408, %v8759_v56  ;;  %v1991_v6 = vmax.f32 %v1927_v18, 0.0  ;;  %v9761_v18 = vpop.permute.xlu1 %983 }
 0x13e   :  { %7716 = vmatprep.mubr.msk.f32.mxu0 %vm94_vm0, %v13396_v24  ;;  %13397 = vst [vmem:[#allocation25_spill] sm:$0xff] %v9742_v20  ;;  %v1992_v55 = vmax.f32 %v1928_v12, 0.0  ;;  %v1859_v45 = vmul.f32 %v1795_v41, %v9188_v23  ;;  %v1605_v46 = vadd.f32 %v1541_v37, %v9615_v1  ;;  %v1796_v33 = vadd.f32 %v1732_v28, %v1604_v5  ;;  %v553_v2 = vpop.f32.mrb[41].mxu0  ;;  %v13398_v53 = vld [vmem:[#allocation28_spill] sm:$0xff]  ;;  %v13402_v24 = vld [vmem:[#allocation26_spill] sm:$0xff]  ;;  %v9772_v37 = vpop.permute.xlu0 %978 }
 0x13f   :  { %v13399_v39 = vand.u32 15, %v13398_v53  ;;  %v13403_v3 = vand.u32 15, %v13402_v24  ;;  %v1284_v12 = vld [vmem:[#allocation2 + $0x119] sm:$0xff]  ;;  %v1606_v23 = vadd.f32 %v1221_v0, %v9612_v14  ;;  %v9765_v1 = vmul.f32 %v7659_v36, %v9462_v27  ;;  %2087 = vst.msk [vmem:[#allocation3 + $0x1a8] sm:$0xff] %vm94_vm0, %v1991_v6  ;;  %v1222_v14 = vld [vmem:[#allocation2 + $0x127] sm:$0xff]  ;;  %v1223_v0 = vld [vmem:[#allocation2 + $0x12f] sm:$0xff]  ;;  %7156 = vmatmul.mubr.msk.f32.gmra.mrb[18].mxu1 %vm94_vm0, %v9742_v20 }
 0x140   :  { %v9768_v5 = vmul.f32 %v9477_v44, %v553_v2  ;;  %v1929_v41 = vadd.f32 %v9720_v4, %v1858_v35  ;;  %2088 = vst.msk [vmem:[#allocation3 + $0x1b0] sm:$0xff] %vm94_vm0, %v1992_v55  ;;  %v1797_v28 = vadd.f32 %v1605_v46, %v1284_v12  ;;  %v1860_v53 = vmul.f32 %v1796_v33, %v9173_v61  ;;  %v1285_v36 = vld [vmem:[#allocation2 + $0x121] sm:$0xff]  ;;  %v7662_v61 = vpop.f32.mrb[42].mxu0 }
 0x141   :  { %vm9751_vm10 = vcmp.ne.s32.totalorder %v13399_v39, 0  ;;  %vm9757_vm11 = vcmp.ne.s32.totalorder %v13403_v3, 15  ;;  %v1930_v3 = vadd.f32 %v9720_v4, %v1859_v45  ;;  %v13406_v2 = vld [vmem:[#allocation11_spill] sm:$0xff]  ;;  %v9782_v35 = vadd.s32 416, %v8759_v56  ;;  %1162 = vst.msk [vmem:[#allocation2 + $0x150] sm:$0xff] %vm94_vm0, %v9765_v1  ;;  %v13407_v45 = vld [vmem:[#allocation6_spill] sm:$0xff]  ;;  %2898 = vmatprep.mubr.f32.mxu1 %v13283_v42 }
 0x142   :  { %7717 = vmatmul.mubr.msk.f32.gmra.mrb[106].mxu0 %vm94_vm0, %v13406_v2  ;;  %v1543_v6 = vsel %vm9647_vm6, %v1222_v14, 0.0  ;;  %v1734_v55 = vsel %vm9653_vm7, %v1285_v36, 0.0  ;;  %1161 = vst.msk [vmem:[#allocation2 + $0x148] sm:$0xff] %vm94_vm0, %v9768_v5  ;;  %v9795_v46 = vld [vmem:[#allocation3 + $0xd0] sm:$0xff]  ;;  %v1993_v33 = vmax.f32 %v1929_v41, 0.0  ;;  %v1861_v11 = vmul.f32 %v1797_v28, %v9251_v25  ;;  %v563_v14 = vpop.f32.mrb[43].mxu0  ;;  %v9847_v52 = vpop.permute.xlu0 %988 }
 0x143   :  { %7719 = vmatprep.mubr.msk.f32.mxu0 %vm94_vm0, %v13407_v45  ;;  %13408 = vst [vmem:[#allocation18_spill] sm:$0xff] %v9795_v46  ;;  %v1994_v39 = vmax.f32 %v1930_v3, 0.0  ;;  %v1607_v24 = vadd.f32 %v1543_v6, %v9662_v51  ;;  %v1798_v12 = vadd.f32 %v1734_v55, %v1606_v23  ;;  %v13409_v36 = vld [vmem:[#allocation10_spill] sm:$0xff]  ;;  %v13413_v45 = vld [vmem:[#allocation29_spill] sm:$0xff]  ;;  %v1608_v3 = vadd.f32 %v1223_v0, %v9659_v32  ;;  %v13417_v0 = vld [vmem:[#allocation12_spill] sm:$0xff] }
 0x144   :  { %v13410_v2 = vand.u32 15, %v13409_v36  ;;  %v13414_v20 = vand.u32 15, %v13413_v45  ;;  %v1286_v41 = vld [vmem:[#allocation2 + $0x129] sm:$0xff]  ;;  %v9814_v25 = vmul.f32 %v7662_v61, %v9532_v22  ;;  %v9817_v51 = vmul.f32 %v9547_v40, %v563_v14  ;;  %2089 = vst.msk [vmem:[#allocation3 + $0x1b8] sm:$0xff] %vm94_vm0, %v1993_v33  ;;  %v1224_v55 = vld [vmem:[#allocation2 + $0x137] sm:$0xff]  ;;  %v1225_v36 = vld [vmem:[#allocation2 + $0x13f] sm:$0xff]  ;;  %7157 = vmatmul.mubr.msk.f32.gmra.mrb[20].mxu1 %vm94_vm0, %v9795_v46  ;;  %v9829_v33 = vpop.permute.xlu1 %993 }
 0x145   :  { %v1931_v23 = vadd.f32 %v9720_v4, %v1860_v53  ;;  %2090 = vst.msk [vmem:[#allocation3 + $0x240] sm:$0xff] %vm94_vm0, %v1994_v39  ;;  %v1799_v28 = vadd.f32 %v1607_v24, %v1286_v41  ;;  %v1862_v6 = vmul.f32 %v1798_v12, %v9237_v26  ;;  %v1287_v32 = vld [vmem:[#allocation2 + $0x131] sm:$0xff]  ;;  %v1545_v53 = vsel %vm9699_vm8, %v1224_v55, 0.0  ;;  %v7665_v26 = vpop.f32.mrb[44].mxu0  ;;  %2904 = vmatprep.mubr.f32.mxu1 %v13283_v42  ;;  %v9842_v24 = vld [vmem:[#allocation3 + $0xd8] sm:$0xff] }
 0x146   :  { %vm9802_vm12 = vcmp.ne.s32.totalorder %v13410_v2, 0  ;;  %vm9808_vm13 = vcmp.ne.s32.totalorder %v13414_v20, 15  ;;  %v1932_v20 = vadd.f32 %v9720_v4, %v1861_v11  ;;  %7720 = vmatmul.mubr.msk.f32.gmra.mrb[108].mxu0 %vm94_vm0, %v13417_v0  ;;  %v1736_v39 = vsel %vm9705_vm9, %v1287_v32, 0.0  ;;  %1164 = vst.msk [vmem:[#allocation2 + $0x160] sm:$0xff] %vm94_vm0, %v9814_v25  ;;  %1163 = vst.msk [vmem:[#allocation2 + $0x158] sm:$0xff] %vm94_vm0, %v9817_v51  ;;  %v13418_v11 = vld [vmem:[#allocation14_spill] sm:$0xff] }
 0x147   :  { %7722 = vmatprep.mubr.msk.f32.mxu0 %vm94_vm0, %v13418_v11  ;;  %v9845_v16 = vadd.s32 424, %v8759_v56  ;;  %v1995_v12 = vmax.f32 %v1931_v23, 0.0  ;;  %v1863_v2 = vmul.f32 %v1799_v28, %v9325_v29  ;;  %v1609_v45 = vadd.f32 %v1545_v53, %v9714_v43  ;;  %v573_v55 = vpop.f32.mrb[45].mxu0  ;;  %v13419_v32 = vld [vmem:[#allocation9_spill] sm:$0xff]  ;;  %v1288_v23 = vld [vmem:[#allocation2 + $0x139] sm:$0xff] }
 0x148   :  { %v1996_v14 = vmax.f32 %v1932_v20, 0.0  ;;  %v1800_v41 = vadd.f32 %v1736_v39, %v1608_v3  ;;  %v13420_v0 = vand.u32 15, %v13419_v32  ;;  %v13424_v61 = vand.u32 15, %v13423_v50  ;;  %7158 = vmatmul.mubr.msk.f32.gmra.mrb[22].mxu1 %vm94_vm0, %v9842_v24 }
 0x149   :  { %v1610_v20 = vadd.f32 %v1225_v36, %v9711_v38  ;;  %v9865_v29 = vmul.f32 %v7665_v26, %v9608_v17  ;;  %v9868_v43 = vmul.f32 %v9621_v19, %v573_v55  ;;  %2091 = vst.msk [vmem:[#allocation3 + $0x248] sm:$0xff] %vm94_vm0, %v1995_v12  ;;  %v1933_v3 = vadd.f32 %v9720_v4, %v1862_v6  ;;  %v1226_v53 = vld [vmem:[#allocation2 + $0x147] sm:$0xff]  ;;  %v1227_v39 = vld [vmem:[#allocation2 + $0x14f] sm:$0xff] }
 0x14a   :  { %vm9853_vm14 = vcmp.ne.s32.totalorder %v13420_v0, 0  ;;  %vm9859_vm15 = vcmp.ne.s32.totalorder %v13424_v61, 15  ;;  %2092 = vst.msk [vmem:[#allocation3 + $0x250] sm:$0xff] %vm94_vm0, %v1996_v14  ;;  %v1934_v50 = vadd.f32 %v9720_v4, %v1863_v2  ;;  %v1801_v28 = vadd.f32 %v1609_v45, %v1288_v23  ;;  %v1289_v38 = vld [vmem:[#allocation2 + $0x141] sm:$0xff]  ;;  %v13427_v36 = vld [vmem:[#allocation21_spill] sm:$0xff]  ;;  %2910 = vmatprep.mubr.f32.mxu1 %v13283_v42 }
 0x14b   :  { %v1864_v61 = vmul.f32 %v1800_v41, %v9310_v9  ;;  %7723 = vmatmul.mubr.msk.f32.gmra.mrb[110].mxu0 %vm94_vm0, %v13427_v36  ;;  %v9880_v26 = vadd.s32 432, %v8759_v56  ;;  %v1547_v6 = vsel %vm9751_vm10, %v1226_v53, 0.0  ;;  %v1738_v12 = vsel %vm9757_vm11, %v1289_v38, 0.0  ;;  %1166 = vst.msk [vmem:[#allocation2 + $0x170] sm:$0xff] %vm94_vm0, %v9865_v29  ;;  %1165 = vst.msk [vmem:[#allocation2 + $0x168] sm:$0xff] %vm94_vm0, %v9868_v43  ;;  %v7668_v9 = vpop.f32.mrb[46].mxu0 }
 0x14c   :  { %v13428_v14 = vld [vmem:[#allocation7_spill] sm:$0xff]  ;;  %v9893_v2 = vld [vmem:[#allocation3 + $0xe0] sm:$0xff]  ;;  %v1432_v48 = vand.u32 15, %v9845_v16  ;;  %v1997_v45 = vmax.f32 %v1933_v3, 0.0  ;;  %v1998_v41 = vmax.f32 %v1934_v50, 0.0  ;;  %v1865_v15 = vmul.f32 %v1801_v28, %v9398_v13  ;;  %v583_v0 = vpop.f32.mrb[47].mxu0  ;;  %v9910_v3 = vpop.permute.xlu1 %1003 }
 0x14d   :  { %7725 = vmatprep.mubr.msk.f32.mxu0 %vm94_vm0, %v13428_v14  ;;  %v1611_v55 = vadd.f32 %v1547_v6, %v9768_v5  ;;  %v1802_v32 = vadd.f32 %v1738_v12, %v1610_v20  ;;  %v13429_v23 = vand.u32 15, %v9487_v59  ;;  %v13432_v38 = vand.u32 15, %v9446_v62  ;;  %v1290_v50 = vld [vmem:[#allocation2 + $0x149] sm:$0xff]  ;;  %v9921_v62 = vpop.permute.xlu0 %998  ;;  %7159 = vmatmul.mubr.msk.f32.gmra.mrb[24].mxu1 %vm94_vm0, %v9893_v2 }
 0x14e   :  { %v1612_v13 = vadd.f32 %v1227_v39, %v9765_v1  ;;  %v9914_v5 = vmul.f32 %v7668_v9, %v9677_v34  ;;  %v9917_v59 = vmul.f32 %v9693_v30, %v583_v0  ;;  %2093 = vst.msk [vmem:[#allocation3 + $0x258] sm:$0xff] %vm94_vm0, %v1997_v45  ;;  %v1935_v20 = vadd.f32 %v9720_v4, %v1864_v61  ;;  %v1228_v1 = vld [vmem:[#allocation2 + $0x157] sm:$0xff]  ;;  %v1229_v39 = vld [vmem:[#allocation2 + $0x15f] sm:$0xff]  ;;  %v13435_v14 = vld [vmem:[#allocation8_spill] sm:$0xff] }
 0x14f   :  { %vm9900_vm1 = vcmp.ne.s32.totalorder %v13429_v23, 0  ;;  %vm9906_vm2 = vcmp.ne.s32.totalorder %v13432_v38, 15  ;;  %2094 = vst.msk [vmem:[#allocation3 + $0x260] sm:$0xff] %vm94_vm0, %v1998_v41  ;;  %v1936_v28 = vadd.f32 %v9720_v4, %v1865_v15  ;;  %v1803_v6 = vadd.f32 %v1611_v55, %v1290_v50  ;;  %v1291_v9 = vld [vmem:[#allocation2 + $0x151] sm:$0xff]  ;;  %7726 = vmatmul.mubr.msk.f32.gmra.mrb[112].mxu0 %vm94_vm0, %v13435_v14  ;;  %v13436_v15 = vld [vmem:[#allocation19_spill] sm:$0xff]  ;;  %2916 = vmatprep.mubr.f32.mxu1 %v13283_v42 }
 0x150   :  { %v1866_v12 = vmul.f32 %v1802_v32, %v9385_v63  ;;  %v1433_v61 = vand.u32 15, %v9880_v26  ;;  %v1549_v45 = vsel %vm9802_vm12, %v1228_v1, 0.0  ;;  %v1740_v41 = vsel %vm9808_vm13, %v1291_v9, 0.0  ;;  %1168 = vst.msk [vmem:[#allocation2 + $0x180] sm:$0xff] %vm94_vm0, %v9914_v5  ;;  %1167 = vst.msk [vmem:[#allocation2 + $0x178] sm:$0xff] %vm94_vm0, %v9917_v59  ;;  %v7671_v63 = vpop.f32.mrb[48].mxu0  ;;  %7728 = vmatprep.mubr.msk.f32.mxu0 %vm94_vm0, %v13436_v15 }
 0x151   :  { %v9942_v55 = vld [vmem:[#allocation3 + $0xe8] sm:$0xff]  ;;  %v9945_v31 = vadd.s32 440, %v8759_v56  ;;  %v1999_v32 = vmax.f32 %v1935_v20, 0.0  ;;  %v2000_v10 = vmax.f32 %v1936_v28, 0.0  ;;  %v1867_v0 = vmul.f32 %v1803_v6, %v9477_v44  ;;  %v593_v50 = vpop.f32.mrb[49].mxu0 }
 0x152   :  { %v1613_v23 = vadd.f32 %v1549_v45, %v9817_v51  ;;  %v1804_v38 = vadd.f32 %v1740_v41, %v1612_v13  ;;  %v13437_v1 = vand.u32 15, %v9581_v8  ;;  %v13440_v14 = vand.u32 15, %v9545_v60  ;;  %v1292_v20 = vld [vmem:[#allocation2 + $0x159] sm:$0xff]  ;;  %v1230_v45 = vld [vmem:[#allocation2 + $0x167] sm:$0xff]  ;;  %v1231_v41 = vld [vmem:[#allocation2 + $0x16f] sm:$0xff]  ;;  %7160 = vmatmul.mubr.msk.f32.gmra.mrb[26].mxu1 %vm94_vm0, %v9942_v55 }
 0x153   :  { %v1614_v28 = vadd.f32 %v1229_v39, %v9814_v25  ;;  %v9963_v44 = vmul.f32 %v7671_v63, %v9761_v18  ;;  %v9966_v51 = vmul.f32 %v9772_v37, %v593_v50  ;;  %2095 = vst.msk [vmem:[#allocation3 + $0x268] sm:$0xff] %vm94_vm0, %v1999_v32  ;;  %v1937_v8 = vadd.f32 %v9720_v4, %v1866_v12  ;;  %v1293_v25 = vld [vmem:[#allocation2 + $0x161] sm:$0xff]  ;;  %v9980_v12 = vpop.permute.xlu1 %1013 }
 0x154   :  { %vm9951_vm3 = vcmp.ne.s32.totalorder %v13437_v1, 0  ;;  %vm9957_vm4 = vcmp.ne.s32.totalorder %v13440_v14, 15  ;;  %2096 = vst.msk [vmem:[#allocation3 + $0x270] sm:$0xff] %vm94_vm0, %v2000_v10  ;;  %v1938_v60 = vadd.f32 %v9720_v4, %v1867_v0  ;;  %v1805_v13 = vadd.f32 %v1613_v23, %v1292_v20  ;;  %v13443_v39 = vld [vmem:[#allocation16_spill] sm:$0xff]  ;;  %v7674_v10 = vpop.f32.mrb[50].mxu0  ;;  %2922 = vmatprep.mubr.f32.mxu1 %v13283_v42  ;;  %v9993_v0 = vld [vmem:[#allocation3 + $0xf0] sm:$0xff] }
 0x155   :  { %v1868_v6 = vmul.f32 %v1804_v38, %v9462_v27  ;;  %7729 = vmatmul.mubr.msk.f32.gmra.mrb[114].mxu0 %vm94_vm0, %v13443_v39  ;;  %v9978_v63 = vadd.s32 448, %v8759_v56  ;;  %v1551_v32 = vsel %vm9853_vm14, %v1230_v45, 0.0  ;;  %v1742_v27 = vsel %vm9859_vm15, %v1293_v25, 0.0  ;;  %1170 = vst.msk [vmem:[#allocation2 + $0x190] sm:$0xff] %vm94_vm0, %v9963_v44  ;;  %1169 = vst.msk [vmem:[#allocation2 + $0x188] sm:$0xff] %vm94_vm0, %v9966_v51  ;;  %v9996_v38 = vpop.permute.xlu0 %1008  ;;  %v603_v20 = vpop.f32.mrb[51].mxu0 }
 0x156   :  { %7731 = vmatprep.mubr.msk.f32.mxu0 %vm94_vm0, %v9521_v49  ;;  %v1434_v11 = vand.u32 15, %v9945_v31  ;;  %v2001_v23 = vmax.f32 %v1937_v8, 0.0  ;;  %v2002_v46 = vmax.f32 %v1938_v60, 0.0  ;;  %v1869_v50 = vmul.f32 %v1805_v13, %v9547_v40  ;;  %v1294_v8 = vld [vmem:[#allocation2 + $0x169] sm:$0xff]  ;;  %7161 = vmatmul.mubr.msk.f32.gmra.mrb[28].mxu1 %vm94_vm0, %v9993_v0 }
 0x157   :  { %v1615_v1 = vadd.f32 %v1551_v32, %v9868_v43  ;;  %v1806_v14 = vadd.f32 %v1742_v27, %v1614_v28  ;;  %v13444_v45 = vand.u32 15, %v9675_v47  ;;  %v13447_v25 = vand.u32 15, %v9641_v54  ;;  %v1232_v32 = vld [vmem:[#allocation2 + $0x177] sm:$0xff]  ;;  %v1233_v27 = vld [vmem:[#allocation2 + $0x17f] sm:$0xff]  ;;  %2928 = vmatprep.mubr.f32.mxu1 %v13283_v42 }
 0x158   :  { %v1616_v60 = vadd.f32 %v1231_v41, %v9865_v29  ;;  %v10014_v40 = vmul.f32 %v7674_v10, %v9829_v33  ;;  %v10017_v43 = vmul.f32 %v9847_v52, %v603_v20  ;;  %2097 = vst.msk [vmem:[#allocation3 + $0x278] sm:$0xff] %vm94_vm0, %v2001_v23  ;;  %v1939_v47 = vadd.f32 %v9720_v4, %v1868_v6  ;;  %v1295_v29 = vld [vmem:[#allocation2 + $0x171] sm:$0xff] }
 0x159   :  { %vm10002_vm5 = vcmp.ne.s32.totalorder %v13444_v45, 0  ;;  %vm10008_vm6 = vcmp.ne.s32.totalorder %v13447_v25, 15  ;;  %2098 = vst.msk [vmem:[#allocation3 + $0x280] sm:$0xff] %vm94_vm0, %v2002_v46  ;;  %v1940_v54 = vadd.f32 %v9720_v4, %v1869_v50  ;;  %v1807_v28 = vadd.f32 %v1615_v1, %v1294_v8  ;;  %7732 = vmatmul.mubr.msk.f32.gmra.mrb[116].mxu0 %vm94_vm0, %v9570_v57  ;;  %v10040_v57 = vld [vmem:[#allocation3 + $0xf8] sm:$0xff]  ;;  %v10059_v8 = vpop.permute.xlu1 %1023 }
 0x15a   :  { %v1870_v13 = vmul.f32 %v1806_v14, %v9532_v22  ;;  %v1435_v41 = vand.u32 15, %v9978_v63  ;;  %v1553_v6 = vsel %vm9900_vm1, %v1232_v32, 0.0  ;;  %v1744_v10 = vsel %vm9906_vm2, %v1295_v29, 0.0  ;;  %1172 = vst.msk [vmem:[#allocation2 + $0x1a0] sm:$0xff] %vm94_vm0, %v10014_v40  ;;  %1171 = vst.msk [vmem:[#allocation2 + $0x198] sm:$0xff] %vm94_vm0, %v10017_v43  ;;  %v7677_v22 = vpop.f32.mrb[52].mxu0  ;;  %7734 = vmatprep.mubr.msk.f32.mxu0 %vm94_vm0, %v9617_v58  ;;  %7162 = vmatmul.mubr.msk.f32.gmra.mrb[30].mxu1 %vm94_vm0, %v10040_v57 }
 0x15b   :  { %v10043_v53 = vadd.s32 456, %v8759_v56  ;;  %v2003_v23 = vmax.f32 %v1939_v47, 0.0  ;;  %v2004_v36 = vmax.f32 %v1940_v54, 0.0  ;;  %v1871_v46 = vmul.f32 %v1807_v28, %v9621_v19  ;;  %v613_v14 = vpop.f32.mrb[53].mxu0  ;;  %v1296_v47 = vld [vmem:[#allocation2 + $0x179] sm:$0xff]  ;;  %2934 = vmatprep.mubr.f32.mxu1 %v13283_v42 }
 0x15c   :  { %v1617_v50 = vadd.f32 %v1553_v6, %v9917_v59  ;;  %v1808_v1 = vadd.f32 %v1744_v10, %v1616_v60  ;;  %v13450_v20 = vand.u32 15, %v9782_v35  ;;  %v13453_v58 = vand.u32 15, %v9745_v21  ;;  %v10070_v21 = vpop.permute.xlu0 %1018  ;;  %v1297_v29 = vld [vmem:[#allocation2 + $0x181] sm:$0xff] }
 0x15d   :  { %v1618_v19 = vadd.f32 %v1233_v27, %v9914_v5  ;;  %v10063_v59 = vmul.f32 %v7677_v22, %v9910_v3  ;;  %v10066_v35 = vmul.f32 %v9921_v62, %v613_v14  ;;  %2099 = vst.msk [vmem:[#allocation3 + $0x288] sm:$0xff] %vm94_vm0, %v2003_v23  ;;  %v1941_v60 = vadd.f32 %v9720_v4, %v1870_v13  ;;  %v1234_v5 = vld [vmem:[#allocation2 + $0x187] sm:$0xff]  ;;  %v1235_v27 = vld [vmem:[#allocation2 + $0x18f] sm:$0xff] }
 0x15e   :  { %vm10049_vm7 = vcmp.ne.s32.totalorder %v13450_v20, 0  ;;  %vm10055_vm8 = vcmp.ne.s32.totalorder %v13453_v58, 15  ;;  %2100 = vst.msk [vmem:[#allocation3 + $0x290] sm:$0xff] %vm94_vm0, %v2004_v36  ;;  %v1942_v54 = vadd.f32 %v9720_v4, %v1871_v46  ;;  %v1809_v28 = vadd.f32 %v1617_v50, %v1296_v47  ;;  %7735 = vmatmul.mubr.msk.f32.gmra.mrb[118].mxu0 %vm94_vm0, %v9664_v7  ;;  %v13456_v22 = vld [vmem:[#allocation15_spill] sm:$0xff]  ;;  %v10093_v7 = vld [vmem:[#allocation3 + $0x100] sm:$0xff] }
 0x15f   :  { %v1872_v32 = vmul.f32 %v1808_v1, %v9608_v17  ;;  %v10080_v13 = vadd.s32 464, %v8759_v56  ;;  %v1555_v6 = vsel %vm9951_vm3, %v1234_v5, 0.0  ;;  %v1746_v10 = vsel %vm9957_vm4, %v1297_v29, 0.0  ;;  %1174 = vst.msk [vmem:[#allocation2 + $0x1b0] sm:$0xff] %vm94_vm0, %v10063_v59  ;;  %1173 = vst.msk [vmem:[#allocation2 + $0x1a8] sm:$0xff] %vm94_vm0, %v10066_v35  ;;  %v7680_v17 = vpop.f32.mrb[54].mxu0  ;;  %7737 = vmatprep.mubr.msk.f32.mxu0 %vm94_vm0, %v13456_v22  ;;  %7163 = vmatmul.mubr.msk.f32.gmra.mrb[32].mxu1 %vm94_vm0, %v10093_v7  ;;  %v10127_v5 = vpop.permute.xlu1 %1033 }
 0x160   :  { %v1436_v9 = vand.u32 15, %v10043_v53  ;;  %v2005_v23 = vmax.f32 %v1941_v60, 0.0  ;;  %v2006_v36 = vmax.f32 %v1942_v54, 0.0  ;;  %v1873_v15 = vmul.f32 %v1809_v28, %v9693_v30  ;;  %v623_v1 = vpop.f32.mrb[55].mxu0  ;;  %v1298_v58 = vld [vmem:[#allocation2 + $0x189] sm:$0xff]  ;;  %2940 = vmatprep.mubr.f32.mxu1 %v13283_v42  ;;  %v13462_v29 = vld [vmem:[#allocation18_spill] sm:$0xff]  ;;  %v10145_v39 = vpop.permute.xlu0 %1028 }
 0x161   :  { %v1619_v46 = vadd.f32 %v1555_v6, %v9966_v51  ;;  %v1810_v50 = vadd.f32 %v1746_v10, %v1618_v19  ;;  %vm10100_vm9 = vcmp.ne.s32.totalorder %v1433_v61, 0  ;;  %vm10106_vm10 = vcmp.ne.s32.totalorder %v1432_v48, 15  ;;  %v1236_v19 = vld [vmem:[#allocation2 + $0x197] sm:$0xff]  ;;  %v1237_v60 = vld [vmem:[#allocation2 + $0x19f] sm:$0xff] }
 0x162   :  { %v1620_v47 = vadd.f32 %v1235_v27, %v9963_v44  ;;  %v10112_v30 = vmul.f32 %v7680_v17, %v9980_v12  ;;  %v10115_v51 = vmul.f32 %v9996_v38, %v623_v1  ;;  %2101 = vst.msk [vmem:[#allocation3 + $0x298] sm:$0xff] %vm94_vm0, %v2005_v23  ;;  %v1943_v26 = vadd.f32 %v9720_v4, %v1872_v32  ;;  %v1299_v44 = vld [vmem:[#allocation2 + $0x191] sm:$0xff] }
 0x163   :  { %2102 = vst.msk [vmem:[#allocation3 + $0x2a0] sm:$0xff] %vm94_vm0, %v2006_v36  ;;  %v1944_v16 = vadd.f32 %v9720_v4, %v1873_v15  ;;  %v1811_v48 = vadd.f32 %v1619_v46, %v1298_v58  ;;  %v1874_v61 = vmul.f32 %v1810_v50, %v9677_v34  ;;  %v13461_v54 = vld [vmem:[#allocation25_spill] sm:$0xff]  ;;  %v1437_v28 = vand.u32 15, %v10080_v13  ;;  %v7683_v34 = vpop.f32.mrb[56].mxu0  ;;  %v10140_v13 = vld [vmem:[#allocation3 + $0x108] sm:$0xff] }
 0x164   :  { %7738 = vmatmul.mubr.msk.f32.gmra.mrb[120].mxu0 %vm94_vm0, %v13461_v54  ;;  %v1557_v32 = vsel %vm10002_vm5, %v1236_v19, 0.0  ;;  %v1748_v27 = vsel %vm10008_vm6, %v1299_v44, 0.0  ;;  %1176 = vst.msk [vmem:[#allocation2 + $0x1c0] sm:$0xff] %vm94_vm0, %v10112_v30  ;;  %1175 = vst.msk [vmem:[#allocation2 + $0x1b8] sm:$0xff] %vm94_vm0, %v10115_v51  ;;  %v10143_v49 = vadd.s32 480, %v8759_v56  ;;  %v2007_v6 = vmax.f32 %v1943_v26, 0.0  ;;  %7164 = vmatmul.mubr.msk.f32.gmra.mrb[34].mxu1 %vm94_vm0, %v10140_v13  ;;  %v10217_v53 = vpop.permute.xlu0 %1038 }
 0x165   :  { %7740 = vmatprep.mubr.msk.f32.mxu0 %vm94_vm0, %v13462_v29  ;;  %v2008_v10 = vmax.f32 %v1944_v16, 0.0  ;;  %v1875_v17 = vmul.f32 %v1811_v48, %v9772_v37  ;;  %v1621_v22 = vadd.f32 %v1557_v32, %v10017_v43  ;;  %v1812_v23 = vadd.f32 %v1748_v27, %v1620_v47  ;;  %v633_v36 = vpop.f32.mrb[57].mxu0  ;;  %v1300_v50 = vld [vmem:[#allocation2 + $0x199] sm:$0xff]  ;;  %2946 = vmatprep.mubr.f32.mxu1 %v13283_v42  ;;  %v10206_v27 = vpop.permute.xlu1 %1043 }
 0x166   :  { %vm10151_vm11 = vcmp.ne.s32.totalorder %v1435_v41, 0  ;;  %vm10157_vm12 = vcmp.ne.s32.totalorder %v1434_v11, 15  ;;  %v1622_v1 = vadd.f32 %v1237_v60, %v10014_v40  ;;  %v10163_v37 = vmul.f32 %v7683_v34, %v10059_v8  ;;  %2103 = vst.msk [vmem:[#allocation3 + $0x2a8] sm:$0xff] %vm94_vm0, %v2007_v6  ;;  %v1238_v58 = vld [vmem:[#allocation2 + $0x1a7] sm:$0xff]  ;;  %v1239_v47 = vld [vmem:[#allocation2 + $0x1af] sm:$0xff] }
 0x167   :  { %v10166_v43 = vmul.f32 %v10070_v21, %v633_v36  ;;  %v1945_v63 = vadd.f32 %v9720_v4, %v1874_v61  ;;  %2104 = vst.msk [vmem:[#allocation3 + $0x2b0] sm:$0xff] %vm94_vm0, %v2008_v10  ;;  %v1946_v31 = vadd.f32 %v9720_v4, %v1875_v17  ;;  %v1813_v11 = vadd.f32 %v1621_v22, %v1300_v50  ;;  %v1301_v40 = vld [vmem:[#allocation2 + $0x1a1] sm:$0xff]  ;;  %v1302_v34 = vld [vmem:[#allocation2 + $0x1a9] sm:$0xff] }
 0x168   :  { %v1876_v41 = vmul.f32 %v1812_v23, %v9761_v18  ;;  %7741 = vmatmul.mubr.msk.f32.gmra.mrb[122].mxu0 %vm94_vm0, %v9842_v24  ;;  %v10178_v26 = vadd.s32 472, %v8759_v56  ;;  %v1559_v16 = vsel %vm10049_vm7, %v1238_v58, 0.0  ;;  %v1750_v48 = vsel %vm10055_vm8, %v1301_v40, 0.0  ;;  %1178 = vst.msk [vmem:[#allocation2 + $0x1d0] sm:$0xff] %vm94_vm0, %v10163_v37  ;;  %v7686_v18 = vpop.f32.mrb[58].mxu0  ;;  %v10191_v24 = vld [vmem:[#allocation3 + $0x110] sm:$0xff] }
 0x169   :  { %1177 = vst.msk [vmem:[#allocation2 + $0x1c8] sm:$0xff] %vm94_vm0, %v10166_v43  ;;  %7743 = vmatprep.mubr.msk.f32.mxu0 %vm94_vm0, %v9893_v2  ;;  %v1439_v45 = vand.u32 15, %v10143_v49  ;;  %v2009_v61 = vmax.f32 %v1945_v63, 0.0  ;;  %v2010_v19 = vmax.f32 %v1946_v31, 0.0  ;;  %v1877_v25 = vmul.f32 %v1813_v11, %v9847_v52  ;;  %v643_v54 = vpop.f32.mrb[59].mxu0  ;;  %7165 = vmatmul.mubr.msk.f32.gmra.mrb[36].mxu1 %vm94_vm0, %v10191_v24 }
 0x16a   :  { %v1623_v60 = vadd.f32 %v1559_v16, %v10066_v35  ;;  %v1814_v44 = vadd.f32 %v1750_v48, %v1622_v1  ;;  %vm10196_vm13 = vcmp.ne.s32.totalorder %v1437_v28, 0  ;;  %vm10202_vm14 = vcmp.ne.s32.totalorder %v1436_v9, 15  ;;  %2952 = vmatprep.mubr.f32.mxu1 %v13283_v42 }
 0x16b   :  { %v1624_v29 = vadd.f32 %v1239_v47, %v10063_v59  ;;  %v10210_v52 = vmul.f32 %v7686_v18, %v10127_v5  ;;  %v10213_v35 = vmul.f32 %v10145_v39, %v643_v54  ;;  %2105 = vst.msk [vmem:[#allocation3 + $0x2b8] sm:$0xff] %vm94_vm0, %v2009_v61  ;;  %v1947_v28 = vadd.f32 %v9720_v4, %v1876_v41  ;;  %v1240_v59 = vld [vmem:[#allocation2 + $0x1b7] sm:$0xff]  ;;  %v1241_v10 = vld [vmem:[#allocation2 + $0x1bf] sm:$0xff]  ;;  %v10268_v61 = vpop.permute.xlu1 %1053 }
 0x16c   :  { %2106 = vst.msk [vmem:[#allocation3 + $0x340] sm:$0xff] %vm94_vm0, %v2010_v19  ;;  %v1948_v9 = vadd.f32 %v9720_v4, %v1877_v25  ;;  %v1815_v49 = vadd.f32 %v1623_v60, %v1302_v34  ;;  %v1878_v6 = vmul.f32 %v1814_v44, %v9829_v33  ;;  %v1303_v17 = vld [vmem:[#allocation2 + $0x1b1] sm:$0xff]  ;;  %7744 = vmatmul.mubr.msk.f32.gmra.mrb[124].mxu0 %vm94_vm0, %v9942_v55  ;;  %v1438_v22 = vand.u32 15, %v10178_v26  ;;  %v7689_v33 = vpop.f32.mrb[60].mxu0  ;;  %v10238_v55 = vld [vmem:[#allocation3 + $0x118] sm:$0xff]  ;;  %v1304_v58 = vld [vmem:[#allocation2 + $0x1b9] sm:$0xff]  ;;  %v10282_v44 = vpop.permute.xlu0 %1048 }
 0x16d   :  { %v1561_v23 = vsel %vm10100_vm9, %v1240_v59, 0.0  ;;  %v1752_v36 = vsel %vm10106_vm10, %v1303_v17, 0.0  ;;  %1180 = vst.msk [vmem:[#allocation2 + $0x1e0] sm:$0xff] %vm94_vm0, %v10210_v52  ;;  %1179 = vst.msk [vmem:[#allocation2 + $0x1d8] sm:$0xff] %vm94_vm0, %v10213_v35  ;;  %7746 = vmatprep.mubr.msk.f32.mxu0 %vm94_vm0, %v9993_v0  ;;  %v10241_v14 = vadd.s32 504, %v8759_v56  ;;  %v2011_v50 = vmax.f32 %v1947_v28, 0.0  ;;  %7166 = vmatmul.mubr.msk.f32.gmra.mrb[38].mxu1 %vm94_vm0, %v10238_v55 }
 0x16e   :  { %v2012_v20 = vmax.f32 %v1948_v9, 0.0  ;;  %v1879_v1 = vmul.f32 %v1815_v49, %v9921_v62  ;;  %v1625_v63 = vadd.f32 %v1561_v23, %v10115_v51  ;;  %v1816_v31 = vadd.f32 %v1752_v36, %v1624_v29  ;;  %v653_v11 = vpop.f32.mrb[61].mxu0  ;;  %2958 = vmatprep.mubr.f32.mxu1 %v13283_v42  ;;  %v2190_v60 = vld [vmem:[#allocation3 + $0x120] sm:$0xff] }
 0x16f   :  { %vm10245_vm15 = vcmp.ne.s32.totalorder %v1439_v45, 0  ;;  %v1626_v0 = vadd.f32 %v1241_v10, %v10112_v30  ;;  %v10251_v47 = vmul.f32 %v7689_v33, %v10206_v27  ;;  %v10254_v40 = vmul.f32 %v10217_v53, %v653_v11  ;;  %2107 = vst.msk [vmem:[#allocation3 + $0x348] sm:$0xff] %vm94_vm0, %v2011_v50  ;;  %v7692_v25 = vpop.f32.mrb[62].mxu0 }
 0x170   :  { %v1949_v62 = vadd.f32 %v9720_v4, %v1878_v6  ;;  %2108 = vst.msk [vmem:[#allocation3 + $0x350] sm:$0xff] %vm94_vm0, %v2012_v20  ;;  %v1950_v51 = vadd.f32 %v9720_v4, %v1879_v1  ;;  %v1817_v26 = vadd.f32 %v1625_v63, %v1304_v58  ;;  %v1880_v16 = vmul.f32 %v1816_v31, %v9910_v3  ;;  %v1242_v48 = vld [vmem:[#allocation2 + $0x1c7] sm:$0xff]  ;;  %v1243_v18 = vld [vmem:[#allocation2 + $0x1cf] sm:$0xff]  ;;  %v663_v28 = vpop.f32.mrb[63].mxu0 }
 0x171   :  { %v1305_v30 = vld [vmem:[#allocation2 + $0x1c1] sm:$0xff]  ;;  %7747 = vmatmul.mubr.msk.f32.gmra.mrb[126].mxu0 %vm94_vm0, %v10040_v57  ;;  %v10266_v45 = vadd.s32 488, %v8759_v56  ;;  %v1563_v19 = vsel %vm10151_vm11, %v1242_v48, 0.0  ;;  %1182 = vst.msk [vmem:[#allocation2 + $0x1f0] sm:$0xff] %vm94_vm0, %v10251_v47  ;;  %1181 = vst.msk [vmem:[#allocation2 + $0x1e8] sm:$0xff] %vm94_vm0, %v10254_v40  ;;  %v1377_v57 = vadd.s32 496, %v8759_v56  ;;  %v1628_v49 = vadd.f32 %v1243_v18, %v10163_v37  ;;  %7167 = vmatmul.mubr.msk.f32.gmra.mrb[40].mxu1 %vm94_vm0, %v2190_v60 }
 0x172   :  { %v1754_v3 = vsel %vm10157_vm12, %v1305_v30, 0.0  ;;  %7749 = vmatprep.mubr.msk.f32.mxu0 %vm94_vm0, %v10093_v7  ;;  %v2013_v15 = vmax.f32 %v1949_v62, 0.0  ;;  %v2014_v46 = vmax.f32 %v1950_v51, 0.0  ;;  %v1881_v54 = vmul.f32 %v1817_v26, %v9996_v38  ;;  %v1306_v9 = vld [vmem:[#allocation2 + $0x1c9] sm:$0xff]  ;;  %2964 = vmatprep.mubr.f32.mxu1 %v13283_v42  ;;  %v2744_v32 = vpop.f32.mrb[64].mxu0 }
 0x173   :  { %v1627_v34 = vadd.f32 %v1563_v19, %v10166_v43  ;;  %v1818_v29 = vadd.f32 %v1754_v3, %v1626_v0  ;;  %v10288_v56 = vmul.f32 %v7692_v25, %v10268_v61  ;;  %v10291_v6 = vmul.f32 %v10282_v44, %v663_v28  ;;  %4216 = vst [vmem:[#allocation4] sm:$0xff] %v2744_v32  ;;  %v2746_v63 = vpop.f32.mrb[65].mxu0 }
 0x174   :  { %2109 = vst.msk [vmem:[#allocation3 + $0x358] sm:$0xff] %vm94_vm0, %v2013_v15  ;;  %v1951_v7 = vadd.f32 %v9720_v4, %v1880_v16  ;;  %2110 = vst.msk [vmem:[#allocation3 + $0x360] sm:$0xff] %vm94_vm0, %v2014_v46  ;;  %v1952_v38 = vadd.f32 %v9720_v4, %v1881_v54  ;;  %v1244_v10 = vld [vmem:[#allocation2 + $0x1d7] sm:$0xff]  ;;  %v1245_v17 = vld [vmem:[#allocation2 + $0x1df] sm:$0xff]  ;;  %vm10298_vm1 = vcmp.ne.s32.totalorder %v1438_v22, 15  ;;  %v1441_v22 = vand.u32 15, %v1377_v57 }
 0x175   :  { %v1819_v43 = vadd.f32 %v1627_v34, %v1306_v9  ;;  %v1882_v59 = vmul.f32 %v1818_v29, %v9980_v12  ;;  %v1307_v37 = vld [vmem:[#allocation2 + $0x1d1] sm:$0xff]  ;;  %7750 = vmatmul.mubr.msk.f32.gmra.mrb[128].mxu0 %vm94_vm0, %v10140_v13  ;;  %v1565_v36 = vsel %vm10196_vm13, %v1244_v10, 0.0  ;;  %1184 = vst.msk [vmem:[#allocation2 + $0x200] sm:$0xff] %vm94_vm0, %v10288_v56  ;;  %v1442_v12 = vand.u32 15, %v10241_v14  ;;  %1183 = vst.msk [vmem:[#allocation2 + $0x1f8] sm:$0xff] %vm94_vm0, %v10291_v6  ;;  %v1308_v14 = vld [vmem:[#allocation2 + $0x1d9] sm:$0xff] }
 0x176   :  { %v1756_v33 = vsel %vm10202_vm14, %v1307_v37, 0.0  ;;  %7752 = vmatprep.mubr.msk.f32.mxu0 %vm94_vm0, %v10191_v24  ;;  %v2191_v13 = vld [vmem:[#allocation3 + $0x128] sm:$0xff]  ;;  %v2016_v50 = vmax.f32 %v1952_v38, 0.0  ;;  %v1629_v20 = vadd.f32 %v1565_v36, %v10213_v35  ;;  %v1630_v31 = vadd.f32 %v1245_v17, %v10210_v52  ;;  %v2200_v16 = vld [vmem:[#allocation3 + $0x170] sm:$0xff] }
 0x177   :  { %v1883_v2 = vmul.f32 %v1819_v43, %v10070_v21  ;;  %v1820_v1 = vadd.f32 %v1756_v33, %v1628_v49  ;;  %v1440_v11 = vand.u32 15, %v10266_v45  ;;  %v2015_v58 = vmax.f32 %v1951_v7, 0.0  ;;  %7168 = vmatmul.mubr.msk.f32.gmra.mrb[42].mxu1 %vm94_vm0, %v2191_v13  ;;  %v2195_v63 = vld [vmem:[#allocation3 + $0x148] sm:$0xff] }
 0x178   :  { %v1953_v0 = vadd.f32 %v9720_v4, %v1882_v59  ;;  %2112 = vst.msk [vmem:[#allocation3 + $0x370] sm:$0xff] %vm94_vm0, %v2016_v50  ;;  %v1821_v62 = vadd.f32 %v1629_v20, %v1308_v14  ;;  %v1246_v51 = vld [vmem:[#allocation2 + $0x1e7] sm:$0xff]  ;;  %vm10332_vm2 = vcmp.ne.s32.totalorder %v1442_v12, 15  ;;  %vm10336_vm3 = vcmp.ne.s32.totalorder %v1441_v22, 0  ;;  %2970 = vmatprep.mubr.f32.mxu1 %v13283_v42  ;;  %v1247_v30 = vld [vmem:[#allocation2 + $0x1ef] sm:$0xff]  ;;  %v2207_v57 = vld [vmem:[#allocation3 + $0x1a8] sm:$0xff] }
 0x179   :  { %v1954_v24 = vadd.f32 %v9720_v4, %v1883_v2  ;;  %v1884_v21 = vmul.f32 %v1820_v1, %v10059_v8  ;;  %v1309_v35 = vld [vmem:[#allocation2 + $0x1e1] sm:$0xff]  ;;  %7753 = vmatmul.mubr.msk.f32.gmra.mrb[130].mxu0 %vm94_vm0, %v10238_v55  ;;  %v1567_v52 = vsel %vm10245_vm15, %v1246_v51, 0.0  ;;  %v2750_v8 = vpop.f32.mrb[66].mxu0  ;;  %2111 = vst.msk [vmem:[#allocation3 + $0x368] sm:$0xff] %vm94_vm0, %v2015_v58  ;;  %v1310_v25 = vld [vmem:[#allocation2 + $0x1e9] sm:$0xff]  ;;  %vm10345_vm4 = vcmp.ne.s32.totalorder %v1440_v11, 15 }
 0x17a   :  { %v1758_v26 = vsel %vm10298_vm1, %v1309_v35, 0.0  ;;  %7755 = vmatprep.mubr.msk.f32.mxu0 %vm94_vm0, %v2190_v60  ;;  %v2192_v55 = vld [vmem:[#allocation3 + $0x130] sm:$0xff]  ;;  %v1885_v18 = vmul.f32 %v1821_v62, %v10145_v39  ;;  %v1631_v45 = vadd.f32 %v1567_v52, %v10254_v40  ;;  %4219 = vst [vmem:[#allocation4 + $0x18] sm:$0xff] %v2750_v8  ;;  %v2752_v3 = vpop.f32.mrb[67].mxu0  ;;  %v2017_v15 = vmax.f32 %v1953_v0, 0.0  ;;  %v2198_v51 = vld [vmem:[#allocation3 + $0x160] sm:$0xff] }
 0x17b   :  { %v2018_v41 = vmax.f32 %v1954_v24, 0.0  ;;  %v1822_v19 = vadd.f32 %v1758_v26, %v1630_v31  ;;  %v1955_v60 = vadd.f32 %v9720_v4, %v1884_v21  ;;  %7169 = vmatmul.mubr.msk.f32.gmra.mrb[44].mxu1 %vm94_vm0, %v2192_v55  ;;  %v1632_v28 = vadd.f32 %v1247_v30, %v10251_v47  ;;  %v2756_v43 = vpop.f32.mrb[68].mxu0  ;;  %v2197_v21 = vld [vmem:[#allocation3 + $0x158] sm:$0xff]  ;;  %v2199_v26 = vld [vmem:[#allocation3 + $0x168] sm:$0xff] }
 0x17c   :  { %v1956_v46 = vadd.f32 %v9720_v4, %v1885_v18  ;;  %v1823_v54 = vadd.f32 %v1631_v45, %v1310_v25  ;;  %v1313_v34 = vld [vmem:[#allocation2 + $0x201] sm:$0xff]  ;;  %v1248_v40 = vld [vmem:[#allocation2 + $0x1f7] sm:$0xff]  ;;  %2976 = vmatprep.mubr.f32.mxu1 %v13283_v42  ;;  %2113 = vst.msk [vmem:[#allocation3 + $0x378] sm:$0xff] %vm94_vm0, %v2017_v15  ;;  %4222 = vst [vmem:[#allocation4 + $0x30] sm:$0xff] %v2756_v43  ;;  %v2758_v37 = vpop.f32.mrb[69].mxu0  ;;  %4736 = vrot.lane.b32.xlu0 %v2756_v43, %s8018_s26 }
 0x17d   :  { %2114 = vst.msk [vmem:[#allocation3 + $0x380] sm:$0xff] %vm94_vm0, %v2018_v41  ;;  %v1886_v39 = vmul.f32 %v1822_v19, %v10127_v5  ;;  %v1249_v29 = vld [vmem:[#allocation2 + $0x1ff] sm:$0xff]  ;;  %7756 = vmatmul.mubr.msk.f32.gmra.mrb[132].mxu0 %vm94_vm0, %v2191_v13  ;;  %v1762_v9 = vsel %vm10332_vm2, %v1313_v34, 0.0  ;;  %v1311_v49 = vld [vmem:[#allocation2 + $0x1f1] sm:$0xff]  ;;  %v1569_v7 = vsel %vm10336_vm3, %v1248_v40, 0.0  ;;  %v2193_v5 = vld [vmem:[#allocation3 + $0x138] sm:$0xff] }
 0x17e   :  { %v1634_v38 = vadd.f32 %v1249_v29, %v10288_v56  ;;  %7758 = vmatprep.mubr.msk.f32.mxu0 %vm94_vm0, %v2192_v55  ;;  %v2020_v59 = vmax.f32 %v1956_v46, 0.0  ;;  %v1887_v47 = vmul.f32 %v1823_v54, %v10217_v53  ;;  %v1633_v10 = vadd.f32 %v1569_v7, %v10291_v6  ;;  %v1312_v56 = vld [vmem:[#allocation2 + $0x1f9] sm:$0xff]  ;;  %v2194_v6 = vld [vmem:[#allocation3 + $0x140] sm:$0xff]  ;;  %v2762_v50 = vpop.f32.mrb[70].mxu0  ;;  %v2201_v55 = vld [vmem:[#allocation3 + $0x178] sm:$0xff] }
 0x17f   :  { %v1760_v17 = vsel %vm10345_vm4, %v1311_v49, 0.0  ;;  %v2019_v33 = vmax.f32 %v1955_v60, 0.0  ;;  %v1957_v12 = vadd.f32 %v9720_v4, %v1886_v39  ;;  %7170 = vmatmul.mubr.msk.f32.gmra.mrb[46].mxu1 %vm94_vm0, %v2193_v5  ;;  %4225 = vst [vmem:[#allocation4 + $0x48] sm:$0xff] %v2762_v50  ;;  %v2764_v1 = vpop.f32.mrb[71].mxu0  ;;  %4738 = vrot.lane.b32.xlu1 %v2762_v50, %s8018_s26  ;;  %v2202_v41 = vld [vmem:[#allocation3 + $0x180] sm:$0xff]  ;;  %v2203_v45 = vld [vmem:[#allocation3 + $0x188] sm:$0xff] }
 0x180   :  { %v1824_v23 = vadd.f32 %v1760_v17, %v1632_v28  ;;  %v1826_v36 = vadd.f32 %v1762_v9, %v1634_v38  ;;  %2116 = vst.msk [vmem:[#allocation3 + $0x390] sm:$0xff] %vm94_vm0, %v2020_v59  ;;  %v1958_v53 = vadd.f32 %v9720_v4, %v1887_v47  ;;  %v1825_v22 = vadd.f32 %v1633_v10, %v1312_v56  ;;  %v2768_v11 = vpop.f32.mrb[72].mxu0  ;;  %v2204_v19 = vld [vmem:[#allocation3 + $0x190] sm:$0xff]  ;;  %v2205_v3 = vld [vmem:[#allocation3 + $0x198] sm:$0xff]  ;;  %v2206_v25 = vld [vmem:[#allocation3 + $0x1a0] sm:$0xff] }
 0x181   :  { %7759 = vmatmul.mubr.msk.f32.gmra.mrb[134].mxu0 %vm94_vm0, %v2193_v5  ;;  %2982 = vmatprep.mubr.f32.mxu1 %v13283_v42  ;;  %2115 = vst.msk [vmem:[#allocation3 + $0x388] sm:$0xff] %vm94_vm0, %v2019_v33  ;;  %v2021_v2 = vmax.f32 %v1957_v12, 0.0  ;;  %4228 = vst [vmem:[#allocation4 + $0x60] sm:$0xff] %v2768_v11  ;;  %v2770_v62 = vpop.f32.mrb[73].mxu0  ;;  %v2208_v15 = vld [vmem:[#allocation3 + $0x1b0] sm:$0xff]  ;;  %v2210_v60 = vld [vmem:[#allocation3 + $0x1c0] sm:$0xff] }
 0x182   :  { %v1888_v13 = vmul.f32 %v1824_v23, %v10206_v27  ;;  %v1890_v32 = vmul.f32 %v1826_v36, %v10268_v61  ;;  %7761 = vmatprep.mubr.msk.f32.mxu0 %vm94_vm0, %v2194_v6  ;;  %v2022_v20 = vmax.f32 %v1958_v53, 0.0  ;;  %v1889_v4 = vmul.f32 %v1825_v22, %v10282_v44  ;;  %v7937_v27 = vld [vmem:[%s13158_s3] ss:$0 sm:$0xff]  ;;  %4740 = vrot.lane.b32.xlu0 %v2768_v11, %s8018_s26  ;;  %v2774_v35 = vpop.f32.mrb[74].mxu0  ;;  %s8019_s3 = smov 64   ;;  %v2209_v46 = vld [vmem:[#allocation3 + $0x1b8] sm:$0xff] }
 0x183   :  { %2117 = vst.msk [vmem:[#allocation3 + $0x398] sm:$0xff] %vm94_vm0, %v2021_v2  ;;  %7171 = vmatmul.mubr.msk.f32.gmra.mrb[48].mxu1 %vm94_vm0, %v2194_v6  ;;  %v2196_v44 = vld [vmem:[#allocation3 + $0x150] sm:$0xff]  ;;  %4231 = vst [vmem:[#allocation4 + $0x78] sm:$0xff] %v2774_v35  ;;  %v2776_v52 = vpop.f32.mrb[75].mxu0  ;;  %4742 = vrot.lane.b32.xlu1 %v2774_v35, %s8018_s26  ;;  %v2211_v54 = vld [vmem:[#allocation3 + $0x1c8] sm:$0xff] }
 0x184   :  { %v1959_v61 = vadd.f32 %v7937_v27, %v1888_v13  ;;  %v1961_v14 = vadd.f32 %v7937_v27, %v1890_v32  ;;  %2118 = vst.msk [vmem:[#allocation3 + $0x3a0] sm:$0xff] %vm94_vm0, %v2022_v20  ;;  %v1960_v31 = vadd.f32 %v7937_v27, %v1889_v4  ;;  %2988 = vmatprep.mubr.f32.mxu1 %v13283_v42  ;;  %v2780_v48 = vpop.f32.mrb[76].mxu0  ;;  %v2212_v39 = vld [vmem:[#allocation3 + $0x1d0] sm:$0xff]  ;;  %v2213_v34 = vld [vmem:[#allocation3 + $0x1d8] sm:$0xff]  ;;  %v10435_v40 = vld [vmem:[#allocation3 + $0x1e0] sm:$0xff] }
 0x185   :  { %7762 = vmatmul.mubr.msk.f32.gmra.mrb[136].mxu0 %vm94_vm0, %v2195_v63  ;;  %4234 = vst [vmem:[#allocation4 + $0x90] sm:$0xff] %v2780_v48  ;;  %v2782_v8 = vpop.f32.mrb[77].mxu0  ;;  %v10442_v29 = vld [vmem:[#allocation3 + $0x1e8] sm:$0xff]  ;;  %v10444_v28 = vld [vmem:[#allocation3 + $0x1f0] sm:$0xff]  ;;  %v10452_v9 = vld [vmem:[#allocation3 + $0x1f8] sm:$0xff] }
 0x186   :  { %7764 = vmatprep.mubr.msk.f32.mxu0 %vm94_vm0, %v2196_v44  ;;  %v2023_v58 = vmax.f32 %v1959_v61, 0.0  ;;  %v2025_v0 = vmax.f32 %v1961_v14, 0.0  ;;  %v2024_v24 = vmax.f32 %v1960_v31, 0.0  ;;  %5008 = vrot.lane.b32.xlu0 %v2768_v11, %s8019_s3  ;;  %v2786_v18 = vpop.f32.mrb[78].mxu0  ;;  %v10454_v49 = vld [vmem:[#allocation3 + $0x200] sm:$0xff]  ;;  %v10462_v7 = vld [vmem:[#allocation3 + $0x208] sm:$0xff] }
 0x187   :  { %7172 = vmatmul.mubr.msk.f32.gmra.mrb[50].mxu1 %vm94_vm0, %v2195_v63  ;;  %5010 = vrot.lane.b32.xlu1 %v2774_v35, %s8019_s3  ;;  %4237 = vst [vmem:[#allocation4 + $0xa8] sm:$0xff] %v2786_v18  ;;  %v2788_v30 = vpop.f32.mrb[79].mxu0  ;;  %v10464_v38 = vld [vmem:[#allocation3 + $0x210] sm:$0xff]  ;;  %v10472_v43 = vld [vmem:[#allocation3 + $0x218] sm:$0xff]  ;;  %v10474_v5 = vld [vmem:[#allocation3 + $0x220] sm:$0xff] }
 0x188   :  { %2119 = vst.msk [vmem:[#allocation3 + $0x3a8] sm:$0xff] %vm94_vm0, %v2023_v58  ;;  %2121 = vst.msk [vmem:[#allocation3 + $0x3b8] sm:$0xff] %vm94_vm0, %v2025_v0  ;;  %2994 = vmatprep.mubr.f32.mxu1 %v13283_v42  ;;  %v10482_v59 = vld [vmem:[#allocation3 + $0x228] sm:$0xff]  ;;  %v10484_v47 = vld [vmem:[#allocation3 + $0x230] sm:$0xff] }
 0x189   :  { %2120 = vst.msk [vmem:[#allocation3 + $0x3b0] sm:$0xff] %vm94_vm0, %v2024_v24  ;;  %7765 = vmatmul.mubr.msk.f32.gmra.mrb[138].mxu0 %vm94_vm0, %v2197_v21  ;;  %v10492_v10 = vld [vmem:[#allocation3 + $0x238] sm:$0xff]  ;;  %v10497_v17 = vld [vmem:[#allocation3 + $0x240] sm:$0xff]  ;;  %v10502_v37 = vld [vmem:[#allocation3 + $0x248] sm:$0xff] }
 0x18a   :  { %7767 = vmatprep.mubr.msk.f32.mxu0 %vm94_vm0, %v2198_v51  ;;  %4744 = vrot.lane.b32.xlu0 %v2780_v48, %s8018_s26  ;;  %v10507_v56 = vld [vmem:[#allocation3 + $0x250] sm:$0xff]  ;;  %v10512_v23 = vld [vmem:[#allocation3 + $0x258] sm:$0xff]  ;;  %v10517_v36 = vld [vmem:[#allocation3 + $0x260] sm:$0xff] }
 0x18b   :  { %7173 = vmatmul.mubr.msk.f32.gmra.mrb[52].mxu1 %vm94_vm0, %v2196_v44  ;;  %4746 = vrot.lane.b32.xlu1 %v2786_v18, %s8018_s26  ;;  %v10522_v33 = vld [vmem:[#allocation3 + $0x268] sm:$0xff]  ;;  %v10527_v12 = vld [vmem:[#allocation3 + $0x270] sm:$0xff]  ;;  %v10532_v53 = vld [vmem:[#allocation3 + $0x278] sm:$0xff] }
 0x18c   :  { %3000 = vmatprep.mubr.f32.mxu1 %v13283_v42  ;;  %v10537_v22 = vld [vmem:[#allocation3 + $0x280] sm:$0xff]  ;;  %v10542_v6 = vld [vmem:[#allocation3 + $0x288] sm:$0xff]  ;;  %v10548_v13 = vld [vmem:[#allocation3 + $0x290] sm:$0xff] }
 0x18d   :  { %7768 = vmatmul.mubr.msk.f32.gmra.mrb[140].mxu0 %vm94_vm0, %v2199_v26  ;;  %v10553_v32 = vld [vmem:[#allocation3 + $0x298] sm:$0xff]  ;;  %v10559_v50 = vld [vmem:[#allocation3 + $0x2a0] sm:$0xff]  ;;  %v10564_v2 = vld [vmem:[#allocation3 + $0x2a8] sm:$0xff] }
 0x18e   :  { %7770 = vmatprep.mubr.msk.f32.mxu0 %vm94_vm0, %v2200_v16  ;;  %5012 = vrot.lane.b32.xlu0 %v2780_v48, %s8019_s3  ;;  %v10570_v20 = vld [vmem:[#allocation3 + $0x2b0] sm:$0xff]  ;;  %v10575_v4 = vld [vmem:[#allocation3 + $0x2c0] sm:$0xff]  ;;  %v10577_v1 = vld [vmem:[#allocation3 + $0x2b8] sm:$0xff] }
 0x18f   :  { %7174 = vmatmul.mubr.msk.f32.gmra.mrb[54].mxu1 %vm94_vm0, %v2197_v21  ;;  %5014 = vrot.lane.b32.xlu1 %v2786_v18, %s8019_s3  ;;  %v10586_v63 = vld [vmem:[#allocation3 + $0x2c8] sm:$0xff]  ;;  %v10588_v27 = vld [vmem:[#allocation3 + $0x2d0] sm:$0xff]  ;;  %v10597_v61 = vld [vmem:[#allocation3 + $0x2d8] sm:$0xff] }
 0x190   :  { %3006 = vmatprep.mubr.f32.mxu1 %v13283_v42  ;;  %v10599_v14 = vld [vmem:[#allocation3 + $0x2e0] sm:$0xff]  ;;  %v10608_v11 = vld [vmem:[#allocation3 + $0x2e8] sm:$0xff]  ;;  %v10610_v58 = vld [vmem:[#allocation3 + $0x2f0] sm:$0xff] }
 0x191   :  { %7771 = vmatmul.mubr.msk.f32.gmra.mrb[142].mxu0 %vm94_vm0, %v2201_v55  ;;  %v10620_v62 = vld [vmem:[#allocation3 + $0x2f8] sm:$0xff]  ;;  %v10622_v21 = vld [vmem:[#allocation3 + $0x300] sm:$0xff]  ;;  %v10635_v52 = vld [vmem:[#allocation3 + $0x308] sm:$0xff] }
 0x192   :  { %7773 = vmatprep.mubr.msk.f32.mxu0 %vm94_vm0, %v2202_v41  ;;  %5280 = vrot.lane.b32.xlu0 %v2780_v48, %s8020_s29  ;;  %v10650_v8 = vld [vmem:[#allocation3 + $0x318] sm:$0xff] }
 0x193   :  { %7175 = vmatmul.mubr.msk.f32.gmra.mrb[56].mxu1 %vm94_vm0, %v2198_v51  ;;  %5282 = vrot.lane.b32.xlu1 %v2786_v18, %s8020_s29 }
 0x194   :  { %3012 = vmatprep.mubr.f32.mxu1 %v13283_v42 }
 0x195   :  { %7774 = vmatmul.mubr.msk.f32.gmra.mrb[144].mxu0 %vm94_vm0, %v2203_v45 }
 0x196   :  { %7776 = vmatprep.mubr.msk.f32.mxu0 %vm94_vm0, %v2204_v19 }
 0x197   :  { %7176 = vmatmul.mubr.msk.f32.gmra.mrb[58].mxu1 %vm94_vm0, %v2199_v26  ;;  %v10637_v26 = vld [vmem:[#allocation3 + $0x310] sm:$0xff] }
 0x198   :  { %3018 = vmatprep.mubr.f32.mxu1 %v13283_v42 }
 0x199   :  { %7777 = vmatmul.mubr.msk.f32.gmra.mrb[146].mxu0 %vm94_vm0, %v2205_v3 }
 0x19a   :  { %7779 = vmatprep.mubr.msk.f32.mxu0 %vm94_vm0, %v2206_v25 }
 0x19b   :  { %7177 = vmatmul.mubr.msk.f32.gmra.mrb[60].mxu1 %vm94_vm0, %v2200_v16 }
 0x19c   :  { %3024 = vmatprep.mubr.f32.mxu1 %v13283_v42 }
 0x19d   :  { %7780 = vmatmul.mubr.msk.f32.gmra.mrb[148].mxu0 %vm94_vm0, %v2207_v57 }
 0x19e   :  { %7782 = vmatprep.mubr.msk.f32.mxu0 %vm94_vm0, %v2208_v15 }
 0x19f   :  { %7178 = vmatmul.mubr.msk.f32.gmra.mrb[62].mxu1 %vm94_vm0, %v2201_v55  ;;  %v10652_v55 = vld [vmem:[#allocation3 + $0x320] sm:$0xff] }
 0x1a0   :  { %3030 = vmatprep.mubr.f32.mxu1 %v13283_v42 }
 0x1a1   :  { %7783 = vmatmul.mubr.msk.f32.gmra.mrb[150].mxu0 %vm94_vm0, %v2209_v46 }
 0x1a2   :  { %7785 = vmatprep.mubr.msk.f32.mxu0 %vm94_vm0, %v2210_v60 }
 0x1a3   :  { %7179 = vmatmul.mubr.msk.f32.gmra.mrb[64].mxu1 %vm94_vm0, %v2202_v41 }
 0x1a4   :  { %3036 = vmatprep.mubr.f32.mxu1 %v13283_v42 }
 0x1a5   :  { %7786 = vmatmul.mubr.msk.f32.gmra.mrb[152].mxu0 %vm94_vm0, %v2211_v54 }
 0x1a6   :  { %7788 = vmatprep.mubr.msk.f32.mxu0 %vm94_vm0, %v2212_v39 }
 0x1a7   :  { %7180 = vmatmul.mubr.msk.f32.gmra.mrb[66].mxu1 %vm94_vm0, %v2203_v45 }
 0x1a8   :  { %3042 = vmatprep.mubr.f32.mxu1 %v13283_v42 }
 0x1a9   :  { %7789 = vmatmul.mubr.msk.f32.gmra.mrb[154].mxu0 %vm94_vm0, %v2213_v34 }
 0x1aa   :  { %7791 = vmatprep.mubr.msk.f32.mxu0 %vm94_vm0, %v10435_v40 }
 0x1ab   :  { %7181 = vmatmul.mubr.msk.f32.gmra.mrb[68].mxu1 %vm94_vm0, %v2204_v19  ;;  %v10673_v19 = vld [vmem:[#allocation3 + $0x328] sm:$0xff] }
 0x1ac   :  { %3048 = vmatprep.mubr.f32.mxu1 %v13283_v42 }
 0x1ad   :  { %7792 = vmatmul.mubr.msk.f32.gmra.mrb[156].mxu0 %vm94_vm0, %v10442_v29 }
 0x1ae   :  { %7794 = vmatprep.mubr.msk.f32.mxu0 %vm94_vm0, %v10444_v28 }
 0x1af   :  { %7182 = vmatmul.mubr.msk.f32.gmra.mrb[70].mxu1 %vm94_vm0, %v2205_v3  ;;  %v10675_v3 = vld [vmem:[#allocation3 + $0x330] sm:$0xff] }
 0x1b0   :  { %3054 = vmatprep.mubr.f32.mxu1 %v13283_v42 }
 0x1b1   :  { %7795 = vmatmul.mubr.msk.f32.gmra.mrb[158].mxu0 %vm94_vm0, %v10452_v9 }
 0x1b2   :  { %7797 = vmatprep.mubr.msk.f32.mxu0 %vm94_vm0, %v10454_v49 }
 0x1b3   :  { %7183 = vmatmul.mubr.msk.f32.gmra.mrb[72].mxu1 %vm94_vm0, %v2206_v25 }
 0x1b4   :  { %3060 = vmatprep.mubr.f32.mxu1 %v13283_v42 }
 0x1b5   :  { %7798 = vmatmul.mubr.msk.f32.gmra.mrb[160].mxu0 %vm94_vm0, %v10462_v7 }
 0x1b6   :  { %7800 = vmatprep.mubr.msk.f32.mxu0 %vm94_vm0, %v10464_v38 }
 0x1b7   :  { %7184 = vmatmul.mubr.msk.f32.gmra.mrb[74].mxu1 %vm94_vm0, %v2207_v57 }
 0x1b8   :  { %3066 = vmatprep.mubr.f32.mxu1 %v13283_v42 }
 0x1b9   :  { %7801 = vmatmul.mubr.msk.f32.gmra.mrb[162].mxu0 %vm94_vm0, %v10472_v43 }
 0x1ba   :  { %7803 = vmatprep.mubr.msk.f32.mxu0 %vm94_vm0, %v10474_v5 }
 0x1bb   :  { %7185 = vmatmul.mubr.msk.f32.gmra.mrb[76].mxu1 %vm94_vm0, %v2208_v15 }
 0x1bc   :  { %3072 = vmatprep.mubr.f32.mxu1 %v13283_v42 }
 0x1bd   :  { %7804 = vmatmul.mubr.msk.f32.gmra.mrb[164].mxu0 %vm94_vm0, %v10482_v59 }
 0x1be   :  { %7806 = vmatprep.mubr.msk.f32.mxu0 %vm94_vm0, %v10484_v47 }
 0x1bf   :  { %7186 = vmatmul.mubr.msk.f32.gmra.mrb[78].mxu1 %vm94_vm0, %v2209_v46  ;;  %v10696_v46 = vld [vmem:[#allocation3 + $0x338] sm:$0xff] }
 0x1c0   :  { %3078 = vmatprep.mubr.f32.mxu1 %v13283_v42 }
 0x1c1   :  { %7807 = vmatmul.mubr.msk.f32.gmra.mrb[166].mxu0 %vm94_vm0, %v10492_v10 }
 0x1c2   :  { %7809 = vmatprep.mubr.msk.f32.mxu0 %vm94_vm0, %v10497_v17 }
 0x1c3   :  { %7187 = vmatmul.mubr.msk.f32.gmra.mrb[80].mxu1 %vm94_vm0, %v2210_v60 }
 0x1c4   :  { %3084 = vmatprep.mubr.f32.mxu1 %v13283_v42 }
 0x1c5   :  { %7810 = vmatmul.mubr.msk.f32.gmra.mrb[168].mxu0 %vm94_vm0, %v10502_v37 }
 0x1c6   :  { %7812 = vmatprep.mubr.msk.f32.mxu0 %vm94_vm0, %v10507_v56 }
 0x1c7   :  { %7188 = vmatmul.mubr.msk.f32.gmra.mrb[82].mxu1 %vm94_vm0, %v2211_v54 }
 0x1c8   :  { %3090 = vmatprep.mubr.f32.mxu1 %v13283_v42 }
 0x1c9   :  { %7813 = vmatmul.mubr.msk.f32.gmra.mrb[170].mxu0 %vm94_vm0, %v10512_v23 }
 0x1ca   :  { %7815 = vmatprep.mubr.msk.f32.mxu0 %vm94_vm0, %v10517_v36 }
 0x1cb   :  { %7189 = vmatmul.mubr.msk.f32.gmra.mrb[84].mxu1 %vm94_vm0, %v2212_v39 }
 0x1cc   :  { %3096 = vmatprep.mubr.f32.mxu1 %v13283_v42 }
 0x1cd   :  { %7816 = vmatmul.mubr.msk.f32.gmra.mrb[172].mxu0 %vm94_vm0, %v10522_v33 }
 0x1ce   :  { %7818 = vmatprep.mubr.msk.f32.mxu0 %vm94_vm0, %v10527_v12 }
 0x1cf   :  { %7190 = vmatmul.mubr.msk.f32.gmra.mrb[86].mxu1 %vm94_vm0, %v2213_v34 }
 0x1d0   :  { %3102 = vmatprep.mubr.f32.mxu1 %v13283_v42 }
 0x1d1   :  { %7819 = vmatmul.mubr.msk.f32.gmra.mrb[174].mxu0 %vm94_vm0, %v10532_v53 }
 0x1d2   :  { %7821 = vmatprep.mubr.msk.f32.mxu0 %vm94_vm0, %v10537_v22 }
 0x1d3   :  { %7191 = vmatmul.mubr.msk.f32.gmra.mrb[88].mxu1 %vm94_vm0, %v10435_v40  ;;  %v2792_v31 = vpop.f32.mrb[80].mxu0 }
 0x1d4   :  { %3108 = vmatprep.mubr.f32.mxu1 %v13283_v42  ;;  %4240 = vst [vmem:[#allocation4 + $0xc0] sm:$0xff] %v2792_v31  ;;  %v2794_v44 = vpop.f32.mrb[81].mxu0  ;;  %4748 = vrot.lane.b32.xlu0 %v2792_v31, %s8018_s26 }
 0x1d5   :  { %7822 = vmatmul.mubr.msk.f32.gmra.mrb[176].mxu0 %vm94_vm0, %v10542_v6  ;;  %4241 = vst [vmem:[#allocation4 + $0xc8] sm:$0xff] %v2794_v44  ;;  %v10769_v44 = vld [vmem:[#allocation3 + $0x368] sm:$0xff] }
 0x1d6   :  { %7824 = vmatprep.mubr.msk.f32.mxu0 %vm94_vm0, %v10548_v13  ;;  %13481 = vst [vmem:[#allocation17_spill] sm:$0xff] %v10769_v44 }
 0x1d7   :  { %7192 = vmatmul.mubr.msk.f32.gmra.mrb[90].mxu1 %vm94_vm0, %v10442_v29  ;;  %v10713_v29 = vld [vmem:[#allocation3 + $0x340] sm:$0xff] }
 0x1d8   :  { %3114 = vmatprep.mubr.f32.mxu1 %v13283_v42  ;;  %v2798_v0 = vpop.f32.mrb[82].mxu0  ;;  %5016 = vrot.lane.b32.xlu0 %v2792_v31, %s8019_s3 }
 0x1d9   :  { %7825 = vmatmul.mubr.msk.f32.gmra.mrb[178].mxu0 %vm94_vm0, %v10553_v32  ;;  %4243 = vst [vmem:[#allocation4 + $0xd8] sm:$0xff] %v2798_v0  ;;  %v2800_v24 = vpop.f32.mrb[83].mxu0  ;;  %4750 = vrot.lane.b32.xlu1 %v2798_v0, %s8018_s26 }
 0x1da   :  { %7827 = vmatprep.mubr.msk.f32.mxu0 %vm94_vm0, %v10559_v50  ;;  %4244 = vst [vmem:[#allocation4 + $0xe0] sm:$0xff] %v2800_v24 }
 0x1db   :  { %7193 = vmatmul.mubr.msk.f32.gmra.mrb[92].mxu1 %vm94_vm0, %v10444_v28 }
 0x1dc   :  { %3120 = vmatprep.mubr.f32.mxu1 %v13283_v42  ;;  %v2804_v51 = vpop.f32.mrb[84].mxu0  ;;  %5284 = vrot.lane.b32.xlu0 %v2792_v31, %s8020_s29 }
 0x1dd   :  { %7828 = vmatmul.mubr.msk.f32.gmra.mrb[180].mxu0 %vm94_vm0, %v10564_v2  ;;  %4246 = vst [vmem:[#allocation4 + $0xf0] sm:$0xff] %v2804_v51  ;;  %v10630_v35 = vpop.f32.mrb[85].mxu0  ;;  %5018 = vrot.lane.b32.xlu1 %v2798_v0, %s8019_s3 }
 0x1de   :  { %7830 = vmatprep.mubr.msk.f32.mxu0 %vm94_vm0, %v10570_v20 }
 0x1df   :  { %7194 = vmatmul.mubr.msk.f32.gmra.mrb[94].mxu1 %vm94_vm0, %v10452_v9 }
 0x1e0   :  { %3126 = vmatprep.mubr.f32.mxu1 %v13283_v42  ;;  %4752 = vrot.lane.b32.xlu0 %v2804_v51, %s8018_s26 }
 0x1e1   :  { %7831 = vmatmul.mubr.msk.f32.gmra.mrb[182].mxu0 %vm94_vm0, %v10577_v1  ;;  %5286 = vrot.lane.b32.xlu1 %v2798_v0, %s8020_s29 }
 0x1e2   :  { %7833 = vmatprep.mubr.msk.f32.mxu0 %vm94_vm0, %v10575_v4  ;;  %v2810_v16 = vpop.f32.mrb[86].mxu0 }
 0x1e3   :  { %7195 = vmatmul.mubr.msk.f32.gmra.mrb[96].mxu1 %vm94_vm0, %v10454_v49  ;;  %4249 = vst [vmem:[#allocation4 + $0x108] sm:$0xff] %v2810_v16  ;;  %v10645_v48 = vpop.f32.mrb[87].mxu0  ;;  %v10726_v49 = vld [vmem:[#allocation3 + $0x348] sm:$0xff] }
 0x1e4   :  { %3132 = vmatprep.mubr.f32.mxu1 %v13283_v42  ;;  %5020 = vrot.lane.b32.xlu0 %v2804_v51, %s8019_s3 }
 0x1e5   :  { %7834 = vmatmul.mubr.msk.f32.gmra.mrb[184].mxu0 %vm94_vm0, %v10586_v63  ;;  %4754 = vrot.lane.b32.xlu1 %v2810_v16, %s8018_s26 }
 0x1e6   :  { %7836 = vmatprep.mubr.msk.f32.mxu0 %vm94_vm0, %v10588_v27  ;;  %v10656_v41 = vpop.f32.mrb[88].mxu0 }
 0x1e7   :  { %7196 = vmatmul.mubr.msk.f32.gmra.mrb[98].mxu1 %vm94_vm0, %v10462_v7  ;;  %4252 = vst [vmem:[#allocation4 + $0x120] sm:$0xff] %v10656_v41  ;;  %v10667_v45 = vpop.f32.mrb[89].mxu0 }
 0x1e8   :  { %3138 = vmatprep.mubr.f32.mxu1 %v13283_v42  ;;  %v10658_v18 = vpop.f32.mrb[0].mxu1  ;;  %5288 = vrot.lane.b32.xlu0 %v2804_v51, %s8020_s29  ;;  %v2264_v51 = vld [vmem:[#allocation3 + $0x370] sm:$0xff] }
 0x1e9   :  { %7837 = vmatmul.mubr.msk.f32.gmra.mrb[186].mxu0 %vm94_vm0, %v10597_v61  ;;  %v10661_v30 = vpop.f32.mrb[1].mxu1  ;;  %5022 = vrot.lane.b32.xlu1 %v2810_v16, %s8019_s3 }
 0x1ea   :  { %7839 = vmatprep.mubr.msk.f32.mxu0 %vm94_vm0, %v10599_v14  ;;  %4265 = vst [vmem:[#allocation4 + $0x188] sm:$0xff] %v10661_v30 }
 0x1eb   :  { %7197 = vmatmul.mubr.msk.f32.gmra.mrb[100].mxu1 %vm94_vm0, %v10464_v38  ;;  %v10679_v25 = vpop.f32.mrb[90].mxu0 }
 0x1ec   :  { %3144 = vmatprep.mubr.f32.mxu1 %v13283_v42  ;;  %4255 = vst [vmem:[#allocation4 + $0x138] sm:$0xff] %v10679_v25  ;;  %v10690_v60 = vpop.f32.mrb[91].mxu0  ;;  %5736 = vrot.lane.b32.xlu0 %v10630_v35, %s8018_s26 }
 0x1ed   :  { %7840 = vmatmul.mubr.msk.f32.gmra.mrb[188].mxu0 %vm94_vm0, %v10608_v11  ;;  %v10681_v57 = vpop.f32.mrb[2].mxu1  ;;  %5290 = vrot.lane.b32.xlu1 %v2810_v16, %s8020_s29 }
 0x1ee   :  { %7842 = vmatprep.mubr.msk.f32.mxu0 %vm94_vm0, %v10610_v58  ;;  %v10684_v15 = vpop.f32.mrb[3].mxu1 }
 0x1ef   :  { %7198 = vmatmul.mubr.msk.f32.gmra.mrb[102].mxu1 %vm94_vm0, %v10472_v43  ;;  %4268 = vst [vmem:[#allocation4 + $0x1a0] sm:$0xff] %v10684_v15  ;;  %v10737_v43 = vld [vmem:[#allocation3 + $0x350] sm:$0xff] }
 0x1f0   :  { %3150 = vmatprep.mubr.f32.mxu1 %v13283_v42  ;;  %v10700_v54 = vpop.f32.mrb[92].mxu0  ;;  %4756 = vrot.lane.b32.xlu0 %v10656_v41, %s8018_s26 }
 0x1f1   :  { %7843 = vmatmul.mubr.msk.f32.gmra.mrb[190].mxu0 %vm94_vm0, %v10620_v62  ;;  %4258 = vst [vmem:[#allocation4 + $0x150] sm:$0xff] %v10700_v54  ;;  %v10711_v40 = vpop.f32.mrb[93].mxu0  ;;  %5738 = vrot.lane.b32.xlu1 %v10645_v48, %s8018_s26 }
 0x1f2   :  { %7845 = vmatprep.mubr.msk.f32.mxu0 %vm94_vm0, %v10622_v21  ;;  %v10702_v39 = vpop.f32.mrb[4].mxu1 }
 0x1f3   :  { %7199 = vmatmul.mubr.msk.f32.gmra.mrb[104].mxu1 %vm94_vm0, %v10474_v5  ;;  %v10705_v34 = vpop.f32.mrb[5].mxu1 }
 0x1f4   :  { %3156 = vmatprep.mubr.f32.mxu1 %v13283_v42  ;;  %4271 = vst [vmem:[#allocation4 + $0x1b8] sm:$0xff] %v10705_v34  ;;  %4764 = vrot.lane.b32.xlu0 %v10658_v18, %s8018_s26 }
 0x1f5   :  { %7846 = vmatmul.mubr.msk.f32.gmra.mrb[192].mxu0 %vm94_vm0, %v10635_v52  ;;  %v10722_v28 = vpop.f32.mrb[94].mxu0  ;;  %4758 = vrot.lane.b32.xlu1 %v10679_v25, %s8018_s26 }
 0x1f6   :  { %7848 = vmatprep.mubr.msk.f32.mxu0 %vm94_vm0, %v10637_v26  ;;  %v10724_v9 = vpop.f32.mrb[6].mxu1  ;;  %4261 = vst [vmem:[#allocation4 + $0x168] sm:$0xff] %v10722_v28  ;;  %v10735_v38 = vpop.f32.mrb[95].mxu0 }
 0x1f7   :  { %7200 = vmatmul.mubr.msk.f32.gmra.mrb[106].mxu1 %vm94_vm0, %v10482_v59  ;;  %v10729_v7 = vpop.f32.mrb[7].mxu1  ;;  %v10749_v59 = vld [vmem:[#allocation3 + $0x358] sm:$0xff] }
 0x1f8   :  { %3162 = vmatprep.mubr.f32.mxu1 %v13283_v42  ;;  %4274 = vst [vmem:[#allocation4 + $0x1d0] sm:$0xff] %v10729_v7  ;;  %5024 = vrot.lane.b32.xlu0 %v10656_v41, %s8019_s3 }
 0x1f9   :  { %7849 = vmatmul.mubr.msk.f32.gmra.mrb[194].mxu0 %vm94_vm0, %v10650_v8  ;;  %4766 = vrot.lane.b32.xlu1 %v10681_v57, %s8018_s26 }
 0x1fa   :  { %7851 = vmatprep.mubr.msk.f32.mxu0 %vm94_vm0, %v10652_v55  ;;  %v10747_v5 = vpop.f32.mrb[8].mxu1 }
 0x1fb   :  { %7201 = vmatmul.mubr.msk.f32.gmra.mrb[108].mxu1 %vm94_vm0, %v10484_v47  ;;  %v7703_v47 = vpop.f32.mrb[96].mxu0 }
 0x1fc   :  { %3168 = vmatprep.mubr.f32.mxu1 %v13283_v42  ;;  %v3577_v31 = vpop.f32.mrb[97].mxu0  ;;  %5032 = vrot.lane.b32.xlu0 %v10658_v18, %s8019_s3 }
 0x1fd   :  { %7852 = vmatmul.mubr.msk.f32.gmra.mrb[196].mxu0 %vm94_vm0, %v10673_v19  ;;  %v2265_v31 = vld [vmem:[#allocation3 + $0x378] sm:$0xff]  ;;  %5026 = vrot.lane.b32.xlu1 %v10679_v25, %s8019_s3 }
 0x1fe   :  { %7854 = vmatprep.mubr.msk.f32.mxu0 %vm94_vm0, %v10675_v3 }
 0x1ff   :  { %7202 = vmatmul.mubr.msk.f32.gmra.mrb[110].mxu1 %vm94_vm0, %v10492_v10  ;;  %v10751_v10 = vpop.f32.mrb[9].mxu1 }
 0x200   :  { %3174 = vmatprep.mubr.f32.mxu1 %v13283_v42  ;;  %4277 = vst [vmem:[#allocation4 + $0x1e8] sm:$0xff] %v10751_v10  ;;  %5292 = vrot.lane.b32.xlu0 %v10656_v41, %s8020_s29 }
 0x201   :  { %7855 = vmatmul.mubr.msk.f32.gmra.mrb[198].mxu0 %vm94_vm0, %v10696_v46  ;;  %v7706_v0 = vpop.f32.mrb[98].mxu0  ;;  %5034 = vrot.lane.b32.xlu1 %v10681_v57, %s8019_s3 }
 0x202   :  { %7857 = vmatprep.mubr.msk.f32.mxu0 %vm94_vm0, %v10713_v29  ;;  %v3587_v16 = vpop.f32.mrb[99].mxu0 }
 0x203   :  { %7203 = vmatmul.mubr.msk.f32.gmra.mrb[112].mxu1 %vm94_vm0, %v10497_v17  ;;  %v10757_v17 = vld [vmem:[#allocation3 + $0x360] sm:$0xff] }
 0x204   :  { %3180 = vmatprep.mubr.f32.mxu1 %v13283_v42  ;;  %v2266_v16 = vld [vmem:[#allocation3 + $0x380] sm:$0xff]  ;;  %5300 = vrot.lane.b32.xlu0 %v10658_v18, %s8020_s29 }
 0x205   :  { %7858 = vmatmul.mubr.msk.f32.gmra.mrb[200].mxu0 %vm94_vm0, %v10726_v49  ;;  %5294 = vrot.lane.b32.xlu1 %v10679_v25, %s8020_s29  ;;  %v2273_v25 = vld [vmem:[#allocation3 + $0x3b8] sm:$0xff] }
 0x206   :  { %7860 = vmatprep.mubr.msk.f32.mxu0 %vm94_vm0, %v10737_v43 }
 0x207   :  { %7204 = vmatmul.mubr.msk.f32.gmra.mrb[114].mxu1 %vm94_vm0, %v10502_v37  ;;  %v10767_v37 = vpop.f32.mrb[10].mxu1 }
 0x208   :  { %3186 = vmatprep.mubr.f32.mxu1 %v13283_v42  ;;  %v10771_v24 = vpop.f32.mrb[11].mxu1  ;;  %5740 = vrot.lane.b32.xlu0 %v10667_v45, %s8018_s26 }
 0x209   :  { %7861 = vmatmul.mubr.msk.f32.gmra.mrb[202].mxu0 %vm94_vm0, %v10749_v59  ;;  %4280 = vst [vmem:[#allocation4 + $0x200] sm:$0xff] %v10771_v24  ;;  %v2876_v47 = vpop.f32.mrb[12].mxu1  ;;  %5302 = vrot.lane.b32.xlu1 %v10681_v57, %s8020_s29 }
 0x20a   :  { %7863 = vmatprep.mubr.msk.f32.mxu0 %vm94_vm0, %v10757_v17  ;;  %v10784_v0 = vpop.f32.mrb[13].mxu1 }
 0x20b   :  { %7205 = vmatmul.mubr.msk.f32.gmra.mrb[116].mxu1 %vm94_vm0, %v10507_v56  ;;  %v7709_v56 = vpop.f32.mrb[100].mxu0  ;;  %4283 = vst [vmem:[#allocation4 + $0x218] sm:$0xff] %v10784_v0  ;;  %v2882_v47 = vpop.f32.mrb[14].mxu1 }
 0x20c   :  { %3192 = vmatprep.mubr.f32.mxu1 %v13283_v42  ;;  %v2267_v56 = vld [vmem:[#allocation3 + $0x388] sm:$0xff]  ;;  %5748 = vrot.lane.b32.xlu0 %v10661_v30, %s8018_s26 }
 0x20d   :  { %7864 = vmatmul.mubr.msk.f32.gmra.mrb[204].mxu0 %vm94_vm0, %v10769_v44  ;;  %5742 = vrot.lane.b32.xlu1 %v10690_v60, %s8018_s26 }
 0x20e   :  { %7866 = vmatprep.mubr.msk.f32.mxu0 %vm94_vm0, %v2264_v51  ;;  %v3597_v51 = vpop.f32.mrb[101].mxu0 }
 0x20f   :  { %7206 = vmatmul.mubr.msk.f32.gmra.mrb[118].mxu1 %vm94_vm0, %v10512_v23  ;;  %v7712_v44 = vpop.f32.mrb[102].mxu0  ;;  %v10796_v23 = vpop.f32.mrb[15].mxu1  ;;  %v2269_v51 = vld [vmem:[#allocation3 + $0x398] sm:$0xff] }
 0x210   :  { %3198 = vmatprep.mubr.f32.mxu1 %v13283_v42  ;;  %4286 = vst [vmem:[#allocation4 + $0x230] sm:$0xff] %v10796_v23  ;;  %v2888_v47 = vpop.f32.mrb[16].mxu1  ;;  %6008 = vrot.lane.b32.xlu0 %v10667_v45, %s8019_s3 }
 0x211   :  { %7867 = vmatmul.mubr.msk.f32.gmra.mrb[206].mxu0 %vm94_vm0, %v2265_v31  ;;  %v2268_v31 = vld [vmem:[#allocation3 + $0x390] sm:$0xff]  ;;  %5750 = vrot.lane.b32.xlu1 %v10684_v15, %s8018_s26 }
 0x212   :  { %7869 = vmatprep.mubr.msk.f32.mxu0 %vm94_vm0, %v2266_v16  ;;  %v3607_v16 = vpop.f32.mrb[103].mxu0 }
 0x213   :  { %7207 = vmatmul.mubr.msk.f32.gmra.mrb[120].mxu1 %vm94_vm0, %v10517_v36  ;;  %v7715_v44 = vpop.f32.mrb[104].mxu0  ;;  %v10811_v16 = vpop.f32.mrb[17].mxu1 }
 0x214   :  { %3204 = vmatprep.mubr.f32.mxu1 %v13283_v42  ;;  %v3617_v36 = vpop.f32.mrb[105].mxu0  ;;  %v2894_v44 = vpop.f32.mrb[18].mxu1  ;;  %6016 = vrot.lane.b32.xlu0 %v10661_v30, %s8019_s3 }
 0x215   :  { %7870 = vmatmul.mubr.msk.f32.gmra.mrb[208].mxu0 %vm94_vm0, %v2267_v56  ;;  %v2270_v56 = vld [vmem:[#allocation3 + $0x3a0] sm:$0xff]  ;;  %v7718_v41 = vpop.f32.mrb[106].mxu0  ;;  %v10822_v47 = vpop.f32.mrb[19].mxu1  ;;  %6010 = vrot.lane.b32.xlu1 %v10690_v60, %s8019_s3 }
 0x216   :  { %7872 = vmatprep.mubr.msk.f32.mxu0 %vm94_vm0, %v2268_v31  ;;  %v2271_v31 = vld [vmem:[#allocation3 + $0x3a8] sm:$0xff] }
 0x217   :  { %7208 = vmatmul.mubr.msk.f32.gmra.mrb[122].mxu1 %vm94_vm0, %v10522_v33  ;;  %v3627_v33 = vpop.f32.mrb[107].mxu0  ;;  %v2900_v36 = vpop.f32.mrb[20].mxu1 }
 0x218   :  { %3210 = vmatprep.mubr.f32.mxu1 %v13283_v42  ;;  %6284 = vrot.lane.b32.xlu0 %v10661_v30, %s8020_s29 }
 0x219   :  { %7873 = vmatmul.mubr.msk.f32.gmra.mrb[210].mxu0 %vm94_vm0, %v2269_v51  ;;  %v2272_v51 = vld [vmem:[#allocation3 + $0x3b0] sm:$0xff]  ;;  %v7721_v18 = vpop.f32.mrb[108].mxu0  ;;  %6018 = vrot.lane.b32.xlu1 %v10684_v15, %s8019_s3 }
 0x21a   :  { %7875 = vmatprep.mubr.msk.f32.mxu0 %vm94_vm0, %v2270_v56  ;;  %v10833_v56 = vpop.f32.mrb[21].mxu1 }
 0x21b   :  { %7209 = vmatmul.mubr.msk.f32.gmra.mrb[124].mxu1 %vm94_vm0, %v10527_v12  ;;  %v3637_v12 = vpop.f32.mrb[109].mxu0  ;;  %v2906_v41 = vpop.f32.mrb[22].mxu1 }
 0x21c   :  { %3216 = vmatprep.mubr.f32.mxu1 %v13283_v42  ;;  %4760 = vrot.lane.b32.xlu0 %v10700_v54, %s8018_s26 }
 0x21d   :  { %7876 = vmatmul.mubr.msk.f32.gmra.mrb[212].mxu0 %vm94_vm0, %v2271_v31  ;;  %6286 = vrot.lane.b32.xlu1 %v10684_v15, %s8020_s29 }
 0x21e   :  { %7878 = vmatprep.mubr.msk.f32.mxu0 %vm94_vm0, %v2272_v51  ;;  %v7724_v57 = vpop.f32.mrb[110].mxu0 }
 0x21f   :  { %7210 = vmatmul.mubr.msk.f32.gmra.mrb[126].mxu1 %vm94_vm0, %v10532_v53  ;;  %v3647_v31 = vpop.f32.mrb[111].mxu0  ;;  %v10842_v53 = vpop.f32.mrb[23].mxu1 }
 0x220   :  { %3222 = vmatprep.mubr.f32.mxu1 %v13283_v42  ;;  %v2912_v33 = vpop.f32.mrb[24].mxu1  ;;  %5028 = vrot.lane.b32.xlu0 %v10700_v54, %s8019_s3 }
 0x221   :  { %7879 = vmatmul.mubr.msk.f32.gmra.mrb[214].mxu0 %vm94_vm0, %v2273_v25  ;;  %v10885_v33 = vpop.permute.xlu0 %4736  ;;  %4762 = vrot.lane.b32.xlu1 %v10722_v28, %s8018_s26 }
 0x222   :  { %v7727_v44 = vpop.f32.mrb[112].mxu0 }
 0x223   :  { %7211 = vmatmul.mubr.msk.f32.gmra.mrb[128].mxu1 %vm94_vm0, %v10537_v22  ;;  %4269 = vst.msk [vmem:[#allocation4 + $0x1a8] sm:$0xff] %vm94_vm0, %v7727_v44  ;;  %v3657_v51 = vpop.f32.mrb[113].mxu0  ;;  %v10852_v22 = vpop.f32.mrb[25].mxu1 }
 0x224   :  { %3228 = vmatprep.mubr.f32.mxu1 %v13283_v42  ;;  %4266 = vst.msk [vmem:[#allocation4 + $0x190] sm:$0xff] %vm94_vm0, %v3657_v51  ;;  %5036 = vrot.lane.b32.xlu0 %v10702_v39, %s8019_s3 }
 0x225   :  { %v2918_v25 = vpop.f32.mrb[26].mxu1  ;;  %5030 = vrot.lane.b32.xlu1 %v10722_v28, %s8019_s3 }
 0x226   :  { %v10863_v36 = vpop.f32.mrb[27].mxu1  ;;  %v10896_v25 = vpop.permute.xlu1 %4738 }
 0x227   :  { %7212 = vmatmul.mubr.msk.f32.gmra.mrb[130].mxu1 %vm94_vm0, %v10542_v6 }
 0x228   :  { %3234 = vmatprep.mubr.f32.mxu1 %v13283_v42  ;;  %v7730_v18 = vpop.f32.mrb[114].mxu0  ;;  %5296 = vrot.lane.b32.xlu0 %v10700_v54, %s8020_s29 }
 0x229   :  { %4275 = vst.msk [vmem:[#allocation4 + $0x1d8] sm:$0xff] %vm94_vm0, %v7730_v18  ;;  %v3667_v6 = vpop.f32.mrb[115].mxu0  ;;  %v2924_v57 = vpop.f32.mrb[28].mxu1  ;;  %5038 = vrot.lane.b32.xlu1 %v10724_v9, %s8019_s3 }
 0x22a   :  { %4272 = vst.msk [vmem:[#allocation4 + $0x1c0] sm:$0xff] %vm94_vm0, %v3667_v6  ;;  %v2926_v41 = vpop.f32.mrb[29].mxu1  ;;  %v10898_v6 = vpop.permute.xlu0 %4740 }
 0x22b   :  { %7213 = vmatmul.mubr.msk.f32.gmra.mrb[132].mxu1 %vm94_vm0, %v10548_v13  ;;  %v10909_v41 = vpop.permute.xlu1 %4742 }
 0x22c   :  { %3240 = vmatprep.mubr.f32.mxu1 %v13283_v42  ;;  %v7733_v12 = vpop.f32.mrb[116].mxu0  ;;  %5304 = vrot.lane.b32.xlu0 %v10702_v39, %s8020_s29 }
 0x22d   :  { %4281 = vst.msk [vmem:[#allocation4 + $0x208] sm:$0xff] %vm94_vm0, %v7733_v12  ;;  %v3677_v13 = vpop.f32.mrb[117].mxu0  ;;  %v2930_v31 = vpop.f32.mrb[30].mxu1  ;;  %5298 = vrot.lane.b32.xlu1 %v10722_v28, %s8020_s29 }
 0x22e   :  { %4278 = vst.msk [vmem:[#allocation4 + $0x1f0] sm:$0xff] %vm94_vm0, %v3677_v13  ;;  %v2932_v44 = vpop.f32.mrb[31].mxu1  ;;  %v10923_v54 = vpop.permute.xlu0 %5008 }
 0x22f   :  { %7214 = vmatmul.mubr.msk.f32.gmra.mrb[134].mxu1 %vm94_vm0, %v10553_v32  ;;  %v10937_v39 = vpop.permute.xlu1 %5010 }
 0x230   :  { %3246 = vmatprep.mubr.f32.mxu1 %v13283_v42  ;;  %5744 = vrot.lane.b32.xlu0 %v10711_v40, %s8018_s26 }
 0x231   :  { %v7736_v30 = vpop.f32.mrb[118].mxu0  ;;  %5306 = vrot.lane.b32.xlu1 %v10724_v9, %s8020_s29 }
 0x232   :  { %4287 = vst.msk [vmem:[#allocation4 + $0x238] sm:$0xff] %vm94_vm0, %v7736_v30  ;;  %v3687_v32 = vpop.f32.mrb[119].mxu0  ;;  %v2936_v15 = vpop.f32.mrb[32].mxu1 }
 0x233   :  { %7215 = vmatmul.mubr.msk.f32.gmra.mrb[136].mxu1 %vm94_vm0, %v10559_v50  ;;  %4284 = vst.msk [vmem:[#allocation4 + $0x220] sm:$0xff] %vm94_vm0, %v3687_v32  ;;  %4312 = vst [vmem:[#allocation4 + $0x300] sm:$0xff] %v2936_v15  ;;  %v2938_v50 = vpop.f32.mrb[33].mxu1 }
 0x234   :  { %3252 = vmatprep.mubr.f32.mxu1 %v13283_v42  ;;  %5752 = vrot.lane.b32.xlu0 %v10705_v34, %s8018_s26 }
 0x235   :  { %5746 = vrot.lane.b32.xlu1 %v10735_v38, %s8018_s26 }
 0x237   :  { %v7739_v51 = vpop.f32.mrb[120].mxu0  ;;  %7216 = vmatmul.mubr.msk.f32.gmra.mrb[138].mxu1 %vm94_vm0, %v10564_v2  ;;  %v2942_v2 = vpop.f32.mrb[34].mxu1 }
 0x238   :  { %4293 = vst.msk [vmem:[#allocation4 + $0x268] sm:$0xff] %vm94_vm0, %v7739_v51  ;;  %v3697_v18 = vpop.f32.mrb[121].mxu0  ;;  %3258 = vmatprep.mubr.f32.mxu1 %v13283_v42  ;;  %4315 = vst [vmem:[#allocation4 + $0x318] sm:$0xff] %v2942_v2  ;;  %v2944_v57 = vpop.f32.mrb[35].mxu1  ;;  %6012 = vrot.lane.b32.xlu0 %v10711_v40, %s8019_s3 }
 0x239   :  { %4290 = vst.msk [vmem:[#allocation4 + $0x250] sm:$0xff] %vm94_vm0, %v3697_v18  ;;  %v10949_v2 = vpop.permute.xlu0 %4744  ;;  %5754 = vrot.lane.b32.xlu1 %v10729_v7, %s8018_s26 }
 0x23b   :  { %v7742_v12 = vpop.f32.mrb[122].mxu0  ;;  %7217 = vmatmul.mubr.msk.f32.gmra.mrb[140].mxu1 %vm94_vm0, %v10570_v20 }
 0x23c   :  { %4299 = vst.msk [vmem:[#allocation4 + $0x298] sm:$0xff] %vm94_vm0, %v7742_v12  ;;  %v3707_v13 = vpop.f32.mrb[123].mxu0  ;;  %3264 = vmatprep.mubr.f32.mxu1 %v13283_v42  ;;  %v10915_v30 = vpop.f32.mrb[36].mxu1  ;;  %6020 = vrot.lane.b32.xlu0 %v10705_v34, %s8019_s3 }
 0x23d   :  { %4296 = vst.msk [vmem:[#allocation4 + $0x280] sm:$0xff] %vm94_vm0, %v3707_v13  ;;  %4318 = vst [vmem:[#allocation4 + $0x330] sm:$0xff] %v10915_v30  ;;  %v2950_v31 = vpop.f32.mrb[37].mxu1  ;;  %v10961_v13 = vpop.permute.xlu1 %4746  ;;  %6014 = vrot.lane.b32.xlu1 %v10735_v38, %s8019_s3 }
 0x23f   :  { %v7745_v20 = vpop.f32.mrb[124].mxu0  ;;  %7218 = vmatmul.mubr.msk.f32.gmra.mrb[142].mxu1 %vm94_vm0, %v10577_v1 }
 0x240   :  { %4305 = vst.msk [vmem:[#allocation4 + $0x2c8] sm:$0xff] %vm94_vm0, %v7745_v20  ;;  %v3717_v32 = vpop.f32.mrb[125].mxu0  ;;  %3270 = vmatprep.mubr.f32.mxu1 %v13283_v42  ;;  %v10929_v44 = vpop.f32.mrb[38].mxu1  ;;  %6280 = vrot.lane.b32.xlu0 %v10711_v40, %s8020_s29 }
 0x241   :  { %4302 = vst.msk [vmem:[#allocation4 + $0x2b0] sm:$0xff] %vm94_vm0, %v3717_v32  ;;  %4321 = vst [vmem:[#allocation4 + $0x348] sm:$0xff] %v10929_v44  ;;  %v2956_v15 = vpop.f32.mrb[39].mxu1  ;;  %6022 = vrot.lane.b32.xlu1 %v10729_v7, %s8019_s3 }
 0x243   :  { %7219 = vmatmul.mubr.msk.f32.gmra.mrb[144].mxu1 %vm94_vm0, %v10575_v4 }
 0x244   :  { %v7748_v1 = vpop.f32.mrb[126].mxu0  ;;  %3276 = vmatprep.mubr.f32.mxu1 %v13283_v42  ;;  %v10943_v28 = vpop.f32.mrb[40].mxu1  ;;  %6288 = vrot.lane.b32.xlu0 %v10705_v34, %s8020_s29 }
 0x245   :  { %4311 = vst.msk [vmem:[#allocation4 + $0x2f8] sm:$0xff] %vm94_vm0, %v7748_v1  ;;  %v3727_v51 = vpop.f32.mrb[127].mxu0  ;;  %4324 = vst [vmem:[#allocation4 + $0x360] sm:$0xff] %v10943_v28  ;;  %v2962_v50 = vpop.f32.mrb[41].mxu1  ;;  %6282 = vrot.lane.b32.xlu1 %v10735_v38, %s8020_s29 }
 0x246   :  { %4308 = vst.msk [vmem:[#allocation4 + $0x2e0] sm:$0xff] %vm94_vm0, %v3727_v51  ;;  %v5013_v1 = vpop.permute.xlu0 %5012  ;;  %v5015_v50 = vpop.permute.xlu1 %5014 }
 0x247   :  { %7220 = vmatmul.mubr.msk.f32.gmra.mrb[146].mxu1 %vm94_vm0, %v10586_v63 }
 0x248   :  { %v7751_v4 = vpop.f32.mrb[128].mxu0  ;;  %3282 = vmatprep.mubr.f32.mxu1 %v13283_v42  ;;  %5308 = vrot.lane.b32.xlu0 %v10747_v5, %s8020_s29 }
 0x249   :  { %v3737_v18 = vpop.f32.mrb[129].mxu0  ;;  %6290 = vrot.lane.b32.xlu1 %v10729_v7, %s8020_s29 }
 0x24a   :  { %v10955_v9 = vpop.f32.mrb[42].mxu1 }
 0x24b   :  { %7221 = vmatmul.mubr.msk.f32.gmra.mrb[148].mxu1 %vm94_vm0, %v10588_v27  ;;  %4327 = vst [vmem:[#allocation4 + $0x378] sm:$0xff] %v10955_v9  ;;  %v2968_v63 = vpop.f32.mrb[43].mxu1 }
 0x24c   :  { %v7754_v12 = vpop.f32.mrb[130].mxu0  ;;  %3288 = vmatprep.mubr.f32.mxu1 %v13283_v42  ;;  %5756 = vrot.lane.b32.xlu0 %v10751_v10, %s8018_s26 }
 0x24d   :  { %v3747_v57 = vpop.f32.mrb[131].mxu0  ;;  %5310 = vrot.lane.b32.xlu1 %v10767_v37, %s8020_s29 }
 0x24e   :  { %v10967_v20 = vpop.f32.mrb[44].mxu1  ;;  %v10992_v57 = vpop.permute.xlu0 %5280 }
 0x24f   :  { %7222 = vmatmul.mubr.msk.f32.gmra.mrb[150].mxu1 %vm94_vm0, %v10597_v61  ;;  %4330 = vst [vmem:[#allocation4 + $0x390] sm:$0xff] %v10967_v20  ;;  %v2974_v27 = vpop.f32.mrb[45].mxu1 }
 0x250   :  { %v7757_v31 = vpop.f32.mrb[132].mxu0  ;;  %3294 = vmatprep.mubr.f32.mxu1 %v13283_v42  ;;  %6024 = vrot.lane.b32.xlu0 %v10751_v10, %s8019_s3 }
 0x251   :  { %v3757_v32 = vpop.f32.mrb[133].mxu0  ;;  %5758 = vrot.lane.b32.xlu1 %v10771_v24, %s8018_s26 }
 0x252   :  { %v10977_v15 = vpop.f32.mrb[46].mxu1 }
 0x253   :  { %7223 = vmatmul.mubr.msk.f32.gmra.mrb[152].mxu1 %vm94_vm0, %v10599_v14  ;;  %4333 = vst [vmem:[#allocation4 + $0x3a8] sm:$0xff] %v10977_v15  ;;  %v2980_v61 = vpop.f32.mrb[47].mxu1 }
 0x254   :  { %v7760_v51 = vpop.f32.mrb[134].mxu0  ;;  %3300 = vmatprep.mubr.f32.mxu1 %v13283_v42  ;;  %v11007_v61 = vpop.permute.xlu0 %4748  ;;  %6292 = vrot.lane.b32.xlu0 %v10751_v10, %s8020_s29 }
 0x255   :  { %v3767_v4 = vpop.f32.mrb[135].mxu0  ;;  %v11004_v51 = vpop.permute.xlu1 %5282  ;;  %6026 = vrot.lane.b32.xlu1 %v10771_v24, %s8019_s3 }
 0x256   :  { %v10987_v18 = vpop.f32.mrb[48].mxu1  ;;  %13482 = vst [vmem:[#allocation22_spill] sm:$0xff] %v11004_v51 }
 0x257   :  { %4336 = vst [vmem:[#allocation4 + $0x3c0] sm:$0xff] %v10987_v18  ;;  %v2986_v63 = vpop.f32.mrb[49].mxu1  ;;  %7224 = vmatmul.mubr.msk.f32.gmra.mrb[154].mxu1 %vm94_vm0, %v10608_v11 }
 0x258   :  { %v7763_v12 = vpop.f32.mrb[136].mxu0  ;;  %4337 = vst [vmem:[#allocation4 + $0x3c8] sm:$0xff] %v2986_v63  ;;  %3306 = vmatprep.mubr.f32.mxu1 %v13283_v42  ;;  %v5017_v63 = vpop.permute.xlu0 %5016  ;;  %5760 = vrot.lane.b32.xlu0 %v10784_v0, %s8018_s26 }
 0x259   :  { %v3777_v14 = vpop.f32.mrb[137].mxu0  ;;  %v11022_v5 = vpop.permute.xlu1 %4750  ;;  %6294 = vrot.lane.b32.xlu1 %v10771_v24, %s8020_s29  ;;  %v7941_v24 = vld [vmem:[#allocation4 + $0x78] sm:$0xff] }
 0x25a   :  { %v10999_v31 = vpop.f32.mrb[50].mxu1  ;;  %v7938_v14 = vld [vmem:[#allocation4 + $0x30] sm:$0xff] }
 0x25b   :  { %4339 = vst [vmem:[#allocation4 + $0x3d8] sm:$0xff] %v10999_v31  ;;  %v2992_v32 = vpop.f32.mrb[51].mxu1  ;;  %7225 = vmatmul.mubr.msk.f32.gmra.mrb[156].mxu1 %vm94_vm0, %v10610_v58  ;;  %v4930_v7 = vadd.f32 %v7938_v14, %v10898_v6  ;;  %v7939_v14 = vld [vmem:[#allocation4 + $0x48] sm:$0xff] }
 0x25c   :  { %v7766_v27 = vpop.f32.mrb[138].mxu0  ;;  %4340 = vst [vmem:[#allocation4 + $0x3e0] sm:$0xff] %v2992_v32  ;;  %3312 = vmatprep.mubr.f32.mxu1 %v13283_v42  ;;  %v5285_v6 = vpop.permute.xlu0 %5284  ;;  %v4931_v37 = vadd.f32 %v7939_v14, %v10909_v41  ;;  %6028 = vrot.lane.b32.xlu0 %v10784_v0, %s8019_s3 }
 0x25d   :  { %v3787_v11 = vpop.f32.mrb[139].mxu0  ;;  %v5202_v32 = vadd.f32 %v5013_v1, %v4930_v7  ;;  %5762 = vrot.lane.b32.xlu1 %v10796_v23, %s8018_s26 }
 0x25e   :  { %v11013_v34 = vpop.f32.mrb[52].mxu1  ;;  %v5203_v7 = vadd.f32 %v5015_v50, %v4931_v37 }
 0x25f   :  { %4342 = vst [vmem:[#allocation4 + $0x3f0] sm:$0xff] %v11013_v34  ;;  %v11016_v58 = vpop.f32.mrb[53].mxu1  ;;  %7226 = vmatmul.mubr.msk.f32.gmra.mrb[158].mxu1 %vm94_vm0, %v10620_v62  ;;  %v5474_v51 = vadd.f32 %v5285_v6, %v5202_v32 }
 0x260   :  { %v7769_v4 = vpop.f32.mrb[140].mxu0  ;;  %4343 = vst [vmem:[#allocation4 + $0x3f8] sm:$0xff] %v11016_v58  ;;  %3318 = vmatprep.mubr.f32.mxu1 %v13283_v42  ;;  %v11054_v6 = vpop.permute.xlu0 %4752  ;;  %6296 = vrot.lane.b32.xlu0 %v10784_v0, %s8020_s29 }
 0x261   :  { %v3797_v12 = vpop.f32.mrb[141].mxu0  ;;  %v11050_v32 = vadd.f32 %v5474_v51, %v10630_v35  ;;  %6030 = vrot.lane.b32.xlu1 %v10796_v23, %s8019_s3 }
 0x262   :  { %v11029_v27 = vpop.f32.mrb[54].mxu1  ;;  %v5019_v12 = vpop.permute.xlu1 %5018 }
 0x263   :  { %4345 = vst [vmem:[#allocation4 + $0x408] sm:$0xff] %v11029_v27  ;;  %v11032_v11 = vpop.f32.mrb[55].mxu1  ;;  %7227 = vmatmul.mubr.msk.f32.gmra.mrb[160].mxu1 %vm94_vm0, %v10622_v21 }
 0x264   :  { %v7772_v62 = vpop.f32.mrb[142].mxu0  ;;  %4346 = vst [vmem:[#allocation4 + $0x410] sm:$0xff] %v11032_v11  ;;  %3324 = vmatprep.mubr.f32.mxu1 %v13283_v42  ;;  %v11071_v10 = vpop.permute.xlu0 %5020  ;;  %5764 = vrot.lane.b32.xlu0 %v10811_v16, %s8018_s26 }
 0x265   :  { %v3807_v4 = vpop.f32.mrb[143].mxu0  ;;  %6298 = vrot.lane.b32.xlu1 %v10796_v23, %s8020_s29 }
 0x266   :  { %v11043_v1 = vpop.f32.mrb[56].mxu1  ;;  %v5287_v4 = vpop.permute.xlu1 %5286 }
 0x267   :  { %4348 = vst [vmem:[#allocation4 + $0x420] sm:$0xff] %v11043_v1  ;;  %v3010_v62 = vpop.f32.mrb[57].mxu1  ;;  %7228 = vmatmul.mubr.msk.f32.gmra.mrb[162].mxu1 %vm94_vm0, %v10635_v52  ;;  %v5475_v50 = vadd.f32 %v5287_v4, %v5203_v7  ;;  %v7940_v7 = vld [vmem:[#allocation4 + $0x60] sm:$0xff] }
 0x268   :  { %v7775_v21 = vpop.f32.mrb[144].mxu0  ;;  %4349 = vst [vmem:[#allocation4 + $0x428] sm:$0xff] %v3010_v62  ;;  %3330 = vmatprep.mubr.f32.mxu1 %v13283_v42  ;;  %v4932_v62 = vadd.f32 %v7940_v7, %v10949_v2  ;;  %v5289_v2 = vpop.permute.xlu0 %5288  ;;  %6032 = vrot.lane.b32.xlu0 %v10811_v16, %s8019_s3 }
 0x269   :  { %4365 = vst.msk [vmem:[#allocation4 + $0x4a8] sm:$0xff] %vm94_vm0, %v7775_v21  ;;  %v3817_v41 = vpop.f32.mrb[145].mxu0  ;;  %v11067_v37 = vadd.f32 %v5475_v50, %v10645_v48  ;;  %5766 = vrot.lane.b32.xlu1 %v10822_v47, %s8018_s26 }
 0x26a   :  { %4362 = vst.msk [vmem:[#allocation4 + $0x490] sm:$0xff] %vm94_vm0, %v3817_v41  ;;  %v11060_v52 = vpop.f32.mrb[58].mxu1  ;;  %v11073_v21 = vpop.permute.xlu1 %4754  ;;  %v5204_v41 = vadd.f32 %v5017_v63, %v4932_v62 }
 0x26b   :  { %4351 = vst [vmem:[#allocation4 + $0x438] sm:$0xff] %v11060_v52  ;;  %v3016_v35 = vpop.f32.mrb[59].mxu1  ;;  %7229 = vmatmul.mubr.msk.f32.gmra.mrb[164].mxu1 %vm94_vm0, %v10637_v26 }
 0x26c   :  { %v7778_v14 = vpop.f32.mrb[146].mxu0  ;;  %4352 = vst [vmem:[#allocation4 + $0x440] sm:$0xff] %v3016_v35  ;;  %3336 = vmatprep.mubr.f32.mxu1 %v13283_v42  ;;  %v4933_v35 = vadd.f32 %v7941_v24, %v10961_v13  ;;  %v5476_v63 = vadd.f32 %v5289_v2, %v5204_v41  ;;  %6300 = vrot.lane.b32.xlu0 %v10811_v16, %s8020_s29  ;;  %v7942_v16 = vld [vmem:[#allocation4 + $0x90] sm:$0xff] }
 0x26d   :  { %4371 = vst.msk [vmem:[#allocation4 + $0x4d8] sm:$0xff] %vm94_vm0, %v7778_v14  ;;  %v3827_v51 = vpop.f32.mrb[147].mxu0  ;;  %6034 = vrot.lane.b32.xlu1 %v10822_v47, %s8019_s3 }
 0x26e   :  { %4368 = vst.msk [vmem:[#allocation4 + $0x4c0] sm:$0xff] %vm94_vm0, %v3827_v51  ;;  %v3020_v26 = vpop.f32.mrb[60].mxu1  ;;  %v11085_v14 = vpop.permute.xlu1 %5022  ;;  %v5205_v7 = vadd.f32 %v5019_v12, %v4933_v35  ;;  %v11096_v13 = vadd.f32 %v5476_v63, %v10667_v45 }
 0x26f   :  { %4354 = vst [vmem:[#allocation4 + $0x450] sm:$0xff] %v3020_v26  ;;  %v3022_v4 = vpop.f32.mrb[61].mxu1  ;;  %7230 = vmatmul.mubr.msk.f32.gmra.mrb[166].mxu1 %vm94_vm0, %v10650_v8 }
 0x270   :  { %v7781_v48 = vpop.f32.mrb[148].mxu0  ;;  %4355 = vst [vmem:[#allocation4 + $0x458] sm:$0xff] %v3022_v4  ;;  %3342 = vmatprep.mubr.f32.mxu1 %v13283_v42  ;;  %6036 = vrot.lane.b32.xlu0 %v10833_v56, %s8019_s3 }
 0x271   :  { %4377 = vst.msk [vmem:[#allocation4 + $0x508] sm:$0xff] %vm94_vm0, %v7781_v48  ;;  %v3837_v50 = vpop.f32.mrb[149].mxu0  ;;  %v11100_v48 = vpop.permute.xlu0 %5736  ;;  %6302 = vrot.lane.b32.xlu1 %v10822_v47, %s8020_s29 }
 0x272   :  { %4374 = vst.msk [vmem:[#allocation4 + $0x4f0] sm:$0xff] %vm94_vm0, %v3837_v50  ;;  %v3026_v8 = vpop.f32.mrb[62].mxu1  ;;  %v5291_v41 = vpop.permute.xlu1 %5290 }
 0x273   :  { %4357 = vst [vmem:[#allocation4 + $0x468] sm:$0xff] %v3026_v8  ;;  %v3028_v62 = vpop.f32.mrb[63].mxu1  ;;  %7231 = vmatmul.mubr.msk.f32.gmra.mrb[168].mxu1 %vm94_vm0, %v10652_v55  ;;  %v5477_v12 = vadd.f32 %v5291_v41, %v5205_v7 }
 0x274   :  { %v7784_v51 = vpop.f32.mrb[150].mxu0  ;;  %4358 = vst [vmem:[#allocation4 + $0x470] sm:$0xff] %v3028_v62  ;;  %3348 = vmatprep.mubr.f32.mxu1 %v13283_v42  ;;  %6304 = vrot.lane.b32.xlu0 %v10833_v56, %s8020_s29 }
 0x275   :  { %4383 = vst.msk [vmem:[#allocation4 + $0x538] sm:$0xff] %vm94_vm0, %v7784_v51  ;;  %v3847_v26 = vpop.f32.mrb[151].mxu0  ;;  %v11110_v2 = vadd.f32 %v5477_v12, %v10690_v60  ;;  %v11115_v24 = vpop.permute.xlu0 %4756  ;;  %6038 = vrot.lane.b32.xlu1 %v10842_v53, %s8019_s3 }
 0x276   :  { %4380 = vst.msk [vmem:[#allocation4 + $0x520] sm:$0xff] %vm94_vm0, %v3847_v26  ;;  %v3032_v55 = vpop.f32.mrb[64].mxu1  ;;  %v11113_v0 = vpop.permute.xlu1 %5738 }
 0x277   :  { %4360 = vst [vmem:[#allocation4 + $0x480] sm:$0xff] %v3032_v55  ;;  %v3034_v45 = vpop.f32.mrb[65].mxu1  ;;  %7232 = vmatmul.mubr.msk.f32.gmra.mrb[170].mxu1 %vm94_vm0, %v10673_v19 }
 0x278   :  { %v7787_v4 = vpop.f32.mrb[152].mxu0  ;;  %4361 = vst [vmem:[#allocation4 + $0x488] sm:$0xff] %v3034_v45  ;;  %3354 = vmatprep.mubr.f32.mxu1 %v13283_v42  ;;  %6308 = vrot.lane.b32.xlu0 %v10852_v22, %s8020_s29 }
 0x279   :  { %4389 = vst.msk [vmem:[#allocation4 + $0x568] sm:$0xff] %vm94_vm0, %v7787_v4  ;;  %v3857_v50 = vpop.f32.mrb[153].mxu0  ;;  %v11126_v8 = vpop.permute.xlu0 %4764  ;;  %6306 = vrot.lane.b32.xlu1 %v10842_v53, %s8020_s29 }
 0x27a   :  { %4386 = vst.msk [vmem:[#allocation4 + $0x550] sm:$0xff] %vm94_vm0, %v3857_v50  ;;  %v3038_v19 = vpop.f32.mrb[66].mxu1  ;;  %v11128_v51 = vpop.permute.xlu1 %4758 }
 0x27b   :  { %4363 = vst [vmem:[#allocation4 + $0x498] sm:$0xff] %v3038_v19  ;;  %v3040_v60 = vpop.f32.mrb[67].mxu1  ;;  %7233 = vmatmul.mubr.msk.f32.gmra.mrb[172].mxu1 %vm94_vm0, %v10675_v3  ;;  %v4934_v19 = vadd.f32 %v7942_v16, %v11007_v61 }
 0x27c   :  { %v7790_v35 = vpop.f32.mrb[154].mxu0  ;;  %4364 = vst [vmem:[#allocation4 + $0x4a0] sm:$0xff] %v3040_v60  ;;  %3360 = vmatprep.mubr.f32.mxu1 %v13283_v42  ;;  %4768 = vrot.lane.b32.xlu0 %v10915_v30, %s8018_s26 }
 0x27d   :  { %4395 = vst.msk [vmem:[#allocation4 + $0x598] sm:$0xff] %vm94_vm0, %v7790_v35  ;;  %v3867_v63 = vpop.f32.mrb[155].mxu0  ;;  %v11139_v26 = vpop.permute.xlu0 %5024  ;;  %v5206_v60 = vadd.f32 %v11071_v10, %v4934_v19  ;;  %6310 = vrot.lane.b32.xlu1 %v10863_v36, %s8020_s29 }
 0x27e   :  { %4392 = vst.msk [vmem:[#allocation4 + $0x580] sm:$0xff] %vm94_vm0, %v3867_v63  ;;  %v3044_v23 = vpop.f32.mrb[68].mxu1  ;;  %v11141_v41 = vpop.permute.xlu1 %4766 }
 0x27f   :  { %4366 = vst [vmem:[#allocation4 + $0x4b0] sm:$0xff] %v3044_v23  ;;  %v3046_v7 = vpop.f32.mrb[69].mxu1  ;;  %7234 = vmatmul.mubr.msk.f32.gmra.mrb[174].mxu1 %vm94_vm0, %v10696_v46 }
 0x280   :  { %v7793_v3 = vpop.f32.mrb[156].mxu0  ;;  %4367 = vst [vmem:[#allocation4 + $0x4b8] sm:$0xff] %v3046_v7  ;;  %3366 = vmatprep.mubr.f32.mxu1 %v13283_v42  ;;  %v7943_v7 = vld [vmem:[#allocation4 + $0xa8] sm:$0xff]  ;;  %4772 = vrot.lane.b32.xlu0 %v10943_v28, %s8018_s26 }
 0x281   :  { %4401 = vst.msk [vmem:[#allocation4 + $0x5c8] sm:$0xff] %vm94_vm0, %v7793_v3  ;;  %v3877_v62 = vpop.f32.mrb[157].mxu0  ;;  %v11152_v45 = vpop.permute.xlu0 %5032  ;;  %4770 = vrot.lane.b32.xlu1 %v10929_v44, %s8018_s26 }
 0x282   :  { %4398 = vst.msk [vmem:[#allocation4 + $0x5b0] sm:$0xff] %vm94_vm0, %v3877_v62  ;;  %v3050_v12 = vpop.f32.mrb[70].mxu1  ;;  %v11154_v50 = vpop.permute.xlu1 %5026  ;;  %v4935_v62 = vadd.f32 %v7943_v7, %v11022_v5 }
 0x283   :  { %4369 = vst [vmem:[#allocation4 + $0x4c8] sm:$0xff] %v3050_v12  ;;  %v3052_v55 = vpop.f32.mrb[71].mxu1  ;;  %7235 = vmatmul.mubr.msk.f32.gmra.mrb[176].mxu1 %vm94_vm0, %v10713_v29 }
 0x284   :  { %v7796_v46 = vpop.f32.mrb[158].mxu0  ;;  %4370 = vst [vmem:[#allocation4 + $0x4d0] sm:$0xff] %v3052_v55  ;;  %3372 = vmatprep.mubr.f32.mxu1 %v13283_v42  ;;  %5040 = vrot.lane.b32.xlu0 %v10943_v28, %s8019_s3 }
 0x285   :  { %4407 = vst.msk [vmem:[#allocation4 + $0x5f8] sm:$0xff] %vm94_vm0, %v7796_v46  ;;  %v3887_v4 = vpop.f32.mrb[159].mxu0  ;;  %v5293_v61 = vpop.permute.xlu0 %5292  ;;  %4774 = vrot.lane.b32.xlu1 %v10955_v9, %s8018_s26 }
 0x286   :  { %4404 = vst.msk [vmem:[#allocation4 + $0x5e0] sm:$0xff] %vm94_vm0, %v3887_v4  ;;  %v3056_v29 = vpop.f32.mrb[72].mxu1  ;;  %v11166_v3 = vpop.permute.xlu1 %5034  ;;  %v5478_v47 = vadd.f32 %v5293_v61, %v5206_v60  ;;  %v13483_v61 = vld [vmem:[#allocation17_spill] sm:$0xff] }
 0x287   :  { %4372 = vst [vmem:[#allocation4 + $0x4e0] sm:$0xff] %v3056_v29  ;;  %v3058_v63 = vpop.f32.mrb[73].mxu1  ;;  %7236 = vmatmul.mubr.msk.f32.gmra.mrb[178].mxu1 %vm94_vm0, %v10726_v49  ;;  %v5207_v49 = vadd.f32 %v11085_v14, %v4935_v62 }
 0x288   :  { %v7799_v35 = vpop.f32.mrb[160].mxu0  ;;  %4373 = vst [vmem:[#allocation4 + $0x4e8] sm:$0xff] %v3058_v63  ;;  %3378 = vmatprep.mubr.f32.mxu1 %v13283_v42  ;;  %v11177_v4 = vadd.f32 %v5478_v47, %v10711_v40  ;;  %4776 = vrot.lane.b32.xlu0 %v10967_v20, %s8018_s26 }
 0x289   :  { %v3897_v23 = vpop.f32.mrb[161].mxu0  ;;  %v11180_v56 = vpop.permute.xlu0 %5300  ;;  %5042 = vrot.lane.b32.xlu1 %v10955_v9, %s8019_s3 }
 0x28a   :  { %v3062_v10 = vpop.f32.mrb[74].mxu1  ;;  %v5295_v5 = vpop.permute.xlu1 %5294 }
 0x28b   :  { %4375 = vst [vmem:[#allocation4 + $0x4f8] sm:$0xff] %v3062_v10  ;;  %v3064_v46 = vpop.f32.mrb[75].mxu1  ;;  %7237 = vmatmul.mubr.msk.f32.gmra.mrb[180].mxu1 %vm94_vm0, %v10737_v43  ;;  %v5479_v16 = vadd.f32 %v5295_v5, %v5207_v49 }
 0x28c   :  { %v7802_v12 = vpop.f32.mrb[162].mxu0  ;;  %4376 = vst [vmem:[#allocation4 + $0x500] sm:$0xff] %v3064_v46  ;;  %3384 = vmatprep.mubr.f32.mxu1 %v13283_v42  ;;  %5044 = vrot.lane.b32.xlu0 %v10967_v20, %s8019_s3 }
 0x28d   :  { %v3907_v55 = vpop.f32.mrb[163].mxu0  ;;  %v11189_v29 = vadd.f32 %v5479_v16, %v10735_v38  ;;  %v11192_v35 = vpop.permute.xlu0 %5740  ;;  %v7944_v12 = vld [vmem:[#allocation3 + $0x370] sm:$0xff]  ;;  %4778 = vrot.lane.b32.xlu1 %v10977_v15, %s8018_s26 }
 0x28e   :  { %v3068_v14 = vpop.f32.mrb[76].mxu1  ;;  %v11194_v60 = vpop.permute.xlu1 %5302 }
 0x28f   :  { %v3070_v43 = vpop.f32.mrb[77].mxu1  ;;  %7238 = vmatmul.mubr.msk.f32.gmra.mrb[182].mxu1 %vm94_vm0, %v10749_v59  ;;  %v7945_v14 = vld [vmem:[#allocation3 + $0x378] sm:$0xff] }
 0x290   :  { %v7805_v19 = vpop.f32.mrb[164].mxu0  ;;  %4379 = vst [vmem:[#allocation4 + $0x518] sm:$0xff] %v3070_v43  ;;  %3390 = vmatprep.mubr.f32.mxu1 %v13283_v42  ;;  %5312 = vrot.lane.b32.xlu0 %v10967_v20, %s8020_s29 }
 0x291   :  { %v3917_v40 = vpop.f32.mrb[165].mxu0  ;;  %v11203_v63 = vpop.permute.xlu0 %5748  ;;  %5046 = vrot.lane.b32.xlu1 %v10977_v15, %s8019_s3 }
 0x292   :  { %v3074_v53 = vpop.f32.mrb[78].mxu1  ;;  %v11205_v23 = vpop.permute.xlu1 %5742 }
 0x293   :  { %v3076_v59 = vpop.f32.mrb[79].mxu1  ;;  %7239 = vmatmul.mubr.msk.f32.gmra.mrb[184].mxu1 %vm94_vm0, %v10757_v17 }
 0x294   :  { %v7808_v22 = vpop.f32.mrb[166].mxu0  ;;  %4382 = vst [vmem:[#allocation4 + $0x530] sm:$0xff] %v3076_v59  ;;  %3396 = vmatprep.mubr.f32.mxu1 %v13283_v42  ;;  %v7946_v59 = vld [vmem:[#allocation3 + $0x380] sm:$0xff]  ;;  %4780 = vrot.lane.b32.xlu0 %v10987_v18, %s8018_s26 }
 0x295   :  { %v3927_v38 = vpop.f32.mrb[167].mxu0  ;;  %v11214_v62 = vpop.permute.xlu0 %6008  ;;  %5314 = vrot.lane.b32.xlu1 %v10977_v15, %s8020_s29 }
 0x296   :  { %v3080_v30 = vpop.f32.mrb[80].mxu1  ;;  %v11216_v47 = vpop.permute.xlu1 %5750 }
 0x297   :  { %7240 = vmatmul.mubr.msk.f32.gmra.mrb[186].mxu1 %vm94_vm0, %v13483_v61  ;;  %v3082_v7 = vpop.f32.mrb[81].mxu1 }
 0x298   :  { %v7811_v36 = vpop.f32.mrb[168].mxu0  ;;  %3402 = vmatprep.mubr.f32.mxu1 %v13283_v42  ;;  %4385 = vst [vmem:[#allocation4 + $0x548] sm:$0xff] %v3082_v7  ;;  %5048 = vrot.lane.b32.xlu0 %v10987_v18, %s8019_s3 }
 0x299   :  { %v3937_v17 = vpop.f32.mrb[169].mxu0  ;;  %v11224_v55 = vpop.permute.xlu0 %6016  ;;  %4782 = vrot.lane.b32.xlu1 %v10999_v31, %s8018_s26 }
 0x29a   :  { %v3086_v10 = vpop.f32.mrb[82].mxu1  ;;  %v11226_v5 = vpop.permute.xlu1 %6010 }
 0x29b   :  { %7241 = vmatmul.mubr.msk.f32.gmra.mrb[188].mxu1 %vm94_vm0, %v7944_v12  ;;  %v3088_v46 = vpop.f32.mrb[83].mxu1  ;;  %v7948_v12 = vld [vmem:[#allocation3 + $0x388] sm:$0xff] }
 0x29c   :  { %v7814_v44 = vpop.f32.mrb[170].mxu0  ;;  %3408 = vmatprep.mubr.f32.mxu1 %v13283_v42  ;;  %4388 = vst [vmem:[#allocation4 + $0x560] sm:$0xff] %v3088_v46  ;;  %5316 = vrot.lane.b32.xlu0 %v10987_v18, %s8020_s29 }
 0x29d   :  { %v3947_v49 = vpop.f32.mrb[171].mxu0  ;;  %v11234_v40 = vpop.permute.xlu0 %6284  ;;  %v7947_v44 = vld [vmem:[#allocation4 + $0xf0] sm:$0xff]  ;;  %5050 = vrot.lane.b32.xlu1 %v10999_v31, %s8019_s3 }
 0x29e   :  { %v3092_v16 = vpop.f32.mrb[84].mxu1  ;;  %v11236_v53 = vpop.permute.xlu1 %6018  ;;  %v4938_v10 = vadd.f32 %v7947_v44, %v11115_v24 }
 0x29f   :  { %7242 = vmatmul.mubr.msk.f32.gmra.mrb[190].mxu1 %vm94_vm0, %v7945_v14  ;;  %v3094_v43 = vpop.f32.mrb[85].mxu1 }
 0x2a0   :  { %v7817_v28 = vpop.f32.mrb[172].mxu0  ;;  %3414 = vmatprep.mubr.f32.mxu1 %v13283_v42  ;;  %4391 = vst [vmem:[#allocation4 + $0x578] sm:$0xff] %v3094_v43  ;;  %4784 = vrot.lane.b32.xlu0 %v11013_v34, %s8018_s26 }
 0x2a1   :  { %v3957_v19 = vpop.f32.mrb[173].mxu0  ;;  %v4761_v61 = vpop.permute.xlu0 %4760  ;;  %5318 = vrot.lane.b32.xlu1 %v10999_v31, %s8020_s29 }
 0x2a2   :  { %v3098_v22 = vpop.f32.mrb[86].mxu1  ;;  %v11244_v30 = vpop.permute.xlu1 %6286  ;;  %v7949_v19 = vld [vmem:[#allocation4 + $0x108] sm:$0xff] }
 0x2a3   :  { %7243 = vmatmul.mubr.msk.f32.gmra.mrb[192].mxu1 %vm94_vm0, %v7946_v59  ;;  %v3100_v36 = vpop.f32.mrb[87].mxu1  ;;  %v4939_v43 = vadd.f32 %v7949_v19, %v11128_v51 }
 0x2a4   :  { %v7820_v9 = vpop.f32.mrb[174].mxu0  ;;  %3420 = vmatprep.mubr.f32.mxu1 %v13283_v42  ;;  %4394 = vst [vmem:[#allocation4 + $0x590] sm:$0xff] %v3100_v36  ;;  %5052 = vrot.lane.b32.xlu0 %v11013_v34, %s8019_s3 }
 0x2a5   :  { %v3967_v38 = vpop.f32.mrb[175].mxu0  ;;  %v5029_v20 = vpop.permute.xlu0 %5028  ;;  %v7950_v9 = vld [vmem:[#allocation3 + $0x390] sm:$0xff]  ;;  %4786 = vrot.lane.b32.xlu1 %v11029_v27, %s8018_s26 }
 0x2a6   :  { %v3104_v7 = vpop.f32.mrb[88].mxu1  ;;  %v4763_v28 = vpop.permute.xlu1 %4762  ;;  %v5210_v16 = vadd.f32 %v5029_v20, %v4938_v10 }
 0x2a7   :  { %7244 = vmatmul.mubr.msk.f32.gmra.mrb[194].mxu1 %vm94_vm0, %v7948_v12  ;;  %v3106_v46 = vpop.f32.mrb[89].mxu1 }
 0x2a8   :  { %v7823_v17 = vpop.f32.mrb[176].mxu0  ;;  %3426 = vmatprep.mubr.f32.mxu1 %v13283_v42  ;;  %4397 = vst [vmem:[#allocation4 + $0x5a8] sm:$0xff] %v3106_v46  ;;  %v5482_v59 = vadd.f32 %v11180_v56, %v5210_v16  ;;  %v7952_v56 = vld [vmem:[#allocation4 + $0x1b8] sm:$0xff]  ;;  %v7953_v46 = vld [vmem:[#allocation4 + $0x120] sm:$0xff]  ;;  %5320 = vrot.lane.b32.xlu0 %v11013_v34, %s8020_s29 }
 0x2a9   :  { %4461 = vst.msk [vmem:[#allocation4 + $0x7a8] sm:$0xff] %vm94_vm0, %v7823_v17  ;;  %v3977_v49 = vpop.f32.mrb[177].mxu0  ;;  %v11265_v36 = vpop.permute.xlu0 %5036  ;;  %v7951_v17 = vld [vmem:[#allocation4 + $0xc0] sm:$0xff]  ;;  %v4940_v20 = vadd.f32 %v7953_v46, %v4761_v61  ;;  %v7954_v16 = vld [vmem:[#allocation3 + $0x398] sm:$0xff]  ;;  %5054 = vrot.lane.b32.xlu1 %v11029_v27, %s8019_s3 }
 0x2aa   :  { %4458 = vst.msk [vmem:[#allocation4 + $0x790] sm:$0xff] %vm94_vm0, %v3977_v49  ;;  %v3110_v14 = vpop.f32.mrb[90].mxu1  ;;  %v5031_v15 = vpop.permute.xlu1 %5030  ;;  %v4936_v51 = vadd.f32 %v7951_v17, %v11054_v6  ;;  %v11272_v44 = vadd.f32 %v7952_v56, %v5482_v59  ;;  %v7957_v17 = vld [vmem:[#allocation4 + $0x138] sm:$0xff]  ;;  %v7959_v56 = vld [vmem:[#allocation4 + $0x188] sm:$0xff] }
 0x2ab   :  { %7245 = vmatmul.mubr.msk.f32.gmra.mrb[196].mxu1 %vm94_vm0, %v7950_v9  ;;  %v3112_v38 = vpop.f32.mrb[91].mxu1  ;;  %v5211_v7 = vadd.f32 %v5031_v15, %v4939_v43  ;;  %v7955_v9 = vld [vmem:[#allocation4 + $0xd8] sm:$0xff]  ;;  %v5212_v18 = vadd.f32 %v11152_v45, %v4940_v20  ;;  %v7960_v20 = vld [vmem:[#allocation3 + $0x3a8] sm:$0xff] }
 0x2ac   :  { %v7826_v24 = vpop.f32.mrb[178].mxu0  ;;  %3432 = vmatprep.mubr.f32.mxu1 %v13283_v42  ;;  %4400 = vst [vmem:[#allocation4 + $0x5c0] sm:$0xff] %v3112_v38  ;;  %v5208_v49 = vadd.f32 %v11139_v26, %v4936_v51  ;;  %v4937_v26 = vadd.f32 %v7955_v9, %v11073_v21  ;;  %v4941_v51 = vadd.f32 %v7957_v17, %v4763_v28 }
 0x2ad   :  { %4467 = vst.msk [vmem:[#allocation4 + $0x7d8] sm:$0xff] %vm94_vm0, %v7826_v24  ;;  %v3987_v22 = vpop.f32.mrb[179].mxu0  ;;  %v5483_v24 = vadd.f32 %v11194_v60, %v5211_v7  ;;  %v5297_v19 = vpop.permute.xlu0 %5296  ;;  %v7958_v7 = vld [vmem:[#allocation3 + $0x3a0] sm:$0xff]  ;;  %5768 = vrot.lane.b32.xlu0 %v11016_v58, %s8018_s26  ;;  %5322 = vrot.lane.b32.xlu1 %v11029_v27, %s8020_s29  ;;  %v13484_v58 = vld [vmem:[#allocation22_spill] sm:$0xff] }
 0x2ae   :  { %4464 = vst.msk [vmem:[#allocation4 + $0x7c0] sm:$0xff] %vm94_vm0, %v3987_v22  ;;  %v3116_v12 = vpop.f32.mrb[92].mxu1  ;;  %v11280_v43 = vpop.permute.xlu1 %5038  ;;  %v5480_v61 = vadd.f32 %v5297_v19, %v5208_v49  ;;  %v7956_v22 = vld [vmem:[#allocation4 + $0x1d0] sm:$0xff]  ;;  %v5209_v15 = vadd.f32 %v11154_v50, %v4937_v26  ;;  %v7962_v26 = vld [vmem:[#allocation4 + $0x1e8] sm:$0xff]  ;;  %v6538_v27 = vld [vmem:[#allocation4 + $0x1c0] sm:$0xff] }
 0x2af   :  { %7246 = vmatmul.mubr.msk.f32.gmra.mrb[198].mxu1 %vm94_vm0, %v7954_v16  ;;  %v3118_v14 = vpop.f32.mrb[93].mxu1  ;;  %v11287_v60 = vadd.f32 %v7956_v22, %v5483_v24  ;;  %v7961_v24 = vld [vmem:[#allocation4 + $0x1a0] sm:$0xff] }
 0x2b0   :  { %v7829_v10 = vpop.f32.mrb[180].mxu0  ;;  %3438 = vmatprep.mubr.f32.mxu1 %v13283_v42 }
 0x2b1   :  { %4473 = vst.msk [vmem:[#allocation4 + $0x808] sm:$0xff] %vm94_vm0, %v7829_v10  ;;  %v3997_v6 = vpop.f32.mrb[181].mxu0  ;;  %v11293_v10 = vadd.f32 %v7959_v56, %v5480_v61  ;;  %v5305_v49 = vpop.permute.xlu0 %5304  ;;  %4788 = vrot.lane.b32.xlu0 %v11043_v1, %s8018_s26  ;;  %5770 = vrot.lane.b32.xlu1 %v11032_v11, %s8018_s26 }
 0x2b2   :  { %4470 = vst.msk [vmem:[#allocation4 + $0x7f0] sm:$0xff] %vm94_vm0, %v3997_v6  ;;  %v3122_v38 = vpop.f32.mrb[94].mxu1  ;;  %v5299_v50 = vpop.permute.xlu1 %5298  ;;  %v5484_v46 = vadd.f32 %v5305_v49, %v5212_v18  ;;  %v5213_v6 = vadd.f32 %v11166_v3, %v4941_v51  ;;  %v7964_v51 = vld [vmem:[#allocation3 + $0x3b0] sm:$0xff]  ;;  %v7965_v18 = vld [vmem:[#allocation4 + $0x200] sm:$0xff] }
 0x2b3   :  { %7247 = vmatmul.mubr.msk.f32.gmra.mrb[200].mxu1 %vm94_vm0, %v7958_v7  ;;  %v3124_v12 = vpop.f32.mrb[95].mxu1  ;;  %v5481_v28 = vadd.f32 %v5299_v50, %v5209_v15  ;;  %v7963_v15 = vld [vmem:[#allocation4] sm:$0xff] }
 0x2b4   :  { %v7832_v59 = vpop.f32.mrb[182].mxu0  ;;  %3444 = vmatprep.mubr.f32.mxu1 %v13283_v42  ;;  %v11306_v61 = vadd.f32 %v7962_v26, %v5484_v46  ;;  %v4928_v17 = vadd.f32 %v7963_v15, %v10885_v33 }
 0x2b5   :  { %4479 = vst.msk [vmem:[#allocation4 + $0x838] sm:$0xff] %vm94_vm0, %v7832_v59  ;;  %v4007_v21 = vpop.f32.mrb[183].mxu0  ;;  %v11303_v14 = vadd.f32 %v7961_v24, %v5481_v28  ;;  %v11309_v31 = vpop.permute.xlu0 %5744  ;;  %5056 = vrot.lane.b32.xlu0 %v11043_v1, %s8019_s3  ;;  %4790 = vrot.lane.b32.xlu1 %v11060_v52, %s8018_s26 }
 0x2b6   :  { %4476 = vst.msk [vmem:[#allocation4 + $0x820] sm:$0xff] %vm94_vm0, %v4007_v21  ;;  %v3128_v16 = vpop.f32.mrb[96].mxu1  ;;  %v5307_v22 = vpop.permute.xlu1 %5306  ;;  %v5200_v33 = vadd.f32 %v10923_v54, %v4928_v17 }
 0x2b7   :  { %7248 = vmatmul.mubr.msk.f32.gmra.mrb[202].mxu1 %vm94_vm0, %v7960_v20  ;;  %4408 = vst [vmem:[#allocation4 + $0x600] sm:$0xff] %v3128_v16  ;;  %v3130_v19 = vpop.f32.mrb[97].mxu1  ;;  %v5485_v59 = vadd.f32 %v5307_v22, %v5213_v6  ;;  %v5930_v16 = vadd.f32 %v11192_v35, %v11050_v32  ;;  %v7967_v6 = vld [vmem:[#allocation4 + $0x18] sm:$0xff]  ;;  %v5536_v35 = vld [vmem:[#allocation4 + $0xc8] sm:$0xff]  ;;  %v5931_v22 = vadd.f32 %v11205_v23, %v11067_v37 }
 0x2b8   :  { %v7835_v45 = vpop.f32.mrb[184].mxu0  ;;  %3450 = vmatprep.mubr.f32.mxu1 %v13283_v42  ;;  %v5472_v28 = vadd.f32 %v10992_v57, %v5200_v33  ;;  %v4929_v34 = vadd.f32 %v7967_v6, %v10896_v25  ;;  %v5537_v33 = vld [vmem:[#allocation4 + $0xe0] sm:$0xff] }
 0x2b9   :  { %4485 = vst.msk [vmem:[#allocation4 + $0x868] sm:$0xff] %vm94_vm0, %v7835_v45  ;;  %v4017_v9 = vpop.f32.mrb[185].mxu0  ;;  %v11319_v56 = vadd.f32 %v7965_v18, %v5485_v59  ;;  %v11322_v12 = vpop.permute.xlu0 %5752  ;;  %v7966_v45 = vld [vmem:[#allocation3 + $0x3b8] sm:$0xff]  ;;  %5324 = vrot.lane.b32.xlu0 %v11043_v1, %s8020_s29  ;;  %5058 = vrot.lane.b32.xlu1 %v11060_v52, %s8019_s3 }
 0x2ba   :  { %4482 = vst.msk [vmem:[#allocation4 + $0x850] sm:$0xff] %vm94_vm0, %v4017_v9  ;;  %v3134_v3 = vpop.f32.mrb[98].mxu1  ;;  %v11324_v49 = vpop.permute.xlu1 %5746  ;;  %v5201_v32 = vadd.f32 %v10937_v39, %v4929_v34  ;;  %v5600_v25 = vadd.f32 %v5536_v35, %v5472_v28  ;;  %v11355_v39 = vld [vmem:[%s13159_s5] ss:$0 sm:$0xff] }
 0x2bb   :  { %7249 = vmatmul.mubr.msk.f32.gmra.mrb[204].mxu1 %vm94_vm0, %v7964_v51  ;;  %4411 = vst [vmem:[#allocation4 + $0x618] sm:$0xff] %v3134_v3  ;;  %v3136_v7 = vpop.f32.mrb[99].mxu1 }
 0x2bc   :  { %v7838_v38 = vpop.f32.mrb[186].mxu0  ;;  %3456 = vmatprep.mubr.f32.mxu1 %v13283_v42  ;;  %v5473_v15 = vadd.f32 %v13484_v58, %v5201_v32  ;;  %v5928_v37 = vadd.f32 %v11100_v48, %v5600_v25  ;;  %v11368_v7 = vld [vmem:[%s13160_s6] ss:$0 sm:$0xff]  ;;  %v5932_v48 = vadd.f32 %v11309_v31, %v11096_v13  ;;  %v5933_v58 = vadd.f32 %v11324_v49, %v11110_v2 }
 0x2bd   :  { %4491 = vst.msk [vmem:[#allocation4 + $0x898] sm:$0xff] %vm94_vm0, %v7838_v38  ;;  %v4027_v21 = vpop.f32.mrb[187].mxu0  ;;  %v6013_v24 = vpop.permute.xlu0 %6012  ;;  %5326 = vrot.lane.b32.xlu1 %v11060_v52, %s8020_s29  ;;  %v6874_v52 = vld [vmem:[%s13156_s0 + $0x20] sm:$0xff] }
 0x2be   :  { %4488 = vst.msk [vmem:[#allocation4 + $0x880] sm:$0xff] %vm94_vm0, %v4027_v21  ;;  %v3140_v50 = vpop.f32.mrb[100].mxu1  ;;  %v11338_v19 = vpop.permute.xlu1 %5754  ;;  %v6202_v57 = vadd.f32 %v6013_v24, %v5930_v16 }
 0x2bf   :  { %7250 = vmatmul.mubr.msk.f32.gmra.mrb[206].mxu1 %vm94_vm0, %v7966_v45  ;;  %4414 = vst [vmem:[#allocation4 + $0x630] sm:$0xff] %v3140_v50  ;;  %v3142_v54 = vpop.f32.mrb[101].mxu1  ;;  %v6200_v50 = vadd.f32 %v11214_v62, %v5928_v37  ;;  %v5601_v45 = vadd.f32 %v5537_v33, %v5473_v15  ;;  %v6872_v62 = vld [vmem:[%s13156_s0 + $0x10] sm:$0xff] }
 0x2c0   :  { %v7841_v46 = vpop.f32.mrb[188].mxu0  ;;  %3462 = vmatprep.mubr.f32.mxu1 %v13283_v42  ;;  %v6474_v59 = vadd.f32 %v11234_v40, %v6202_v57  ;;  %v6539_v54 = vld [vmem:[#allocation4 + $0x1d8] sm:$0xff] }
 0x2c1   :  { %4497 = vst.msk [vmem:[#allocation4 + $0x8c8] sm:$0xff] %vm94_vm0, %v7841_v46  ;;  %v4037_v20 = vpop.f32.mrb[189].mxu0  ;;  %v11357_v17 = vpop.permute.xlu0 %6020  ;;  %v5929_v13 = vadd.f32 %v11113_v0, %v5601_v45  ;;  %v7968_v0 = vld [vmem:[#allocation4 + $0x150] sm:$0xff] }
 0x2c2   :  { %4494 = vst.msk [vmem:[#allocation4 + $0x8b0] sm:$0xff] %vm94_vm0, %v4037_v20  ;;  %v3146_v9 = vpop.f32.mrb[102].mxu1  ;;  %v6015_v51 = vpop.permute.xlu1 %6014  ;;  %v6602_v23 = vadd.f32 %v6538_v27, %v6474_v59 }
 0x2c3   :  { %4417 = vst [vmem:[#allocation4 + $0x648] sm:$0xff] %v3146_v9  ;;  %v3148_v3 = vpop.f32.mrb[103].mxu1  ;;  %v6203_v40 = vadd.f32 %v6015_v51, %v5931_v22  ;;  %v6204_v22 = vadd.f32 %v11224_v55, %v5932_v48  ;;  %v6540_v55 = vld [vmem:[#allocation4 + $0x1f0] sm:$0xff] }
 0x2c4   :  { %v7844_v26 = vpop.f32.mrb[190].mxu0  ;;  %v6673_v46 = vmul.f32 %v11355_v39, %v6602_v23  ;;  %v4942_v3 = vadd.f32 %v7968_v0, %v11126_v8  ;;  %v6873_v8 = vld [vmem:[%s13156_s0 + $0x18] sm:$0xff] }
 0x2c5   :  { %4503 = vst.msk [vmem:[#allocation4 + $0x8f8] sm:$0xff] %vm94_vm0, %v7844_v26  ;;  %v4047_v38 = vpop.f32.mrb[191].mxu0  ;;  %v6475_v28 = vadd.f32 %v11244_v30, %v6203_v40  ;;  %v6281_v20 = vpop.permute.xlu0 %6280  ;;  %v6536_v30 = vld [vmem:[#allocation4 + $0x190] sm:$0xff] }
 0x2c6   :  { %4500 = vst.msk [vmem:[#allocation4 + $0x8e0] sm:$0xff] %vm94_vm0, %v4047_v38  ;;  %v3152_v21 = vpop.f32.mrb[104].mxu1  ;;  %v11375_v6 = vpop.permute.xlu1 %6022  ;;  %v6744_v34 = vadd.f32 %v11368_v7, %v6673_v46  ;;  %v6472_v57 = vadd.f32 %v6281_v20, %v6200_v50  ;;  %v6201_v38 = vadd.f32 %v11226_v5, %v5929_v13  ;;  %v5214_v2 = vadd.f32 %v11265_v36, %v4942_v3  ;;  %v6537_v50 = vld [vmem:[#allocation4 + $0x1a8] sm:$0xff]  ;;  %v6870_v36 = vld [vmem:[%s13156_s0] sm:$0xff] }
 0x2c7   :  { %4420 = vst [vmem:[#allocation4 + $0x660] sm:$0xff] %v3152_v21  ;;  %v3154_v16 = vpop.f32.mrb[105].mxu1  ;;  %v6603_v24 = vadd.f32 %v6539_v54, %v6475_v28  ;;  %v7969_v28 = vld [vmem:[#allocation4 + $0x168] sm:$0xff]  ;;  %v6205_v54 = vadd.f32 %v11236_v53, %v5933_v58 }
 0x2c8   :  { %v7847_v18 = vpop.f32.mrb[192].mxu0  ;;  %v6808_v35 = vmax.f32 %v6744_v34, 0.0  ;;  %v6600_v26 = vadd.f32 %v6536_v30, %v6472_v57  ;;  %v4943_v16 = vadd.f32 %v7969_v28, %v11141_v41  ;;  %v5556_v34 = vld [vmem:[#allocation4 + $0x428] sm:$0xff]  ;;  %v5934_v28 = vadd.f32 %v11203_v63, %v11177_v4 }
 0x2c9   :  { %v4057_v11 = vpop.f32.mrb[193].mxu0  ;;  %v6674_v9 = vmul.f32 %v11355_v39, %v6603_v24  ;;  %v6289_v15 = vpop.permute.xlu0 %6288  ;;  %5772 = vrot.lane.b32.xlu0 %v5556_v34, %s8018_s26 }
 0x2ca   :  { %v3158_v31 = vpop.f32.mrb[106].mxu1  ;;  %v6283_v27 = vpop.permute.xlu1 %6282  ;;  %v6936_v51 = vadd.f32 %v6872_v62, %v6808_v35  ;;  %v6671_v23 = vmul.f32 %v11355_v39, %v6600_v26  ;;  %v6476_v40 = vadd.f32 %v6289_v15, %v6204_v22  ;;  %v5215_v35 = vadd.f32 %v11280_v43, %v4943_v16  ;;  %v6875_v16 = vld [vmem:[%s13156_s0 + $0x28] sm:$0xff] }
 0x2cb   :  { %4423 = vst [vmem:[#allocation4 + $0x678] sm:$0xff] %v3158_v31  ;;  %v3160_v25 = vpop.f32.mrb[107].mxu1  ;;  %v6745_v37 = vadd.f32 %v11368_v7, %v6674_v9  ;;  %v6473_v5 = vadd.f32 %v6283_v27, %v6201_v38  ;;  %v6871_v27 = vld [vmem:[%s13156_s0 + $0x8] sm:$0xff]  ;;  %v6206_v4 = vadd.f32 %v11357_v17, %v5934_v28 }
 0x2cc   :  { %v7850_v32 = vpop.f32.mrb[194].mxu0  ;;  %7000 = vst.msk [vmem:[%s13161_s7 + $0x10] sm:$0xff] %vm94_vm0, %v6936_v51  ;;  %v6742_v1 = vadd.f32 %v11368_v7, %v6671_v23  ;;  %v6604_v33 = vadd.f32 %v6540_v55, %v6476_v40  ;;  %v6541_v25 = vld [vmem:[#allocation4 + $0x208] sm:$0xff] }
 0x2cd   :  { %v4067_v59 = vpop.f32.mrb[195].mxu0  ;;  %v6809_v49 = vmax.f32 %v6745_v37, 0.0  ;;  %v6601_v11 = vadd.f32 %v6537_v50, %v6473_v5  ;;  %v5309_v45 = vpop.permute.xlu0 %5308  ;;  %6040 = vrot.lane.b32.xlu0 %v5556_v34, %s8019_s3  ;;  %v5557_v37 = vld [vmem:[#allocation4 + $0x440] sm:$0xff] }
 0x2ce   :  { %v3164_v21 = vpop.f32.mrb[108].mxu1  ;;  %v6291_v20 = vpop.permute.xlu1 %6290  ;;  %v6806_v57 = vmax.f32 %v6742_v1, 0.0  ;;  %v6675_v13 = vmul.f32 %v11355_v39, %v6604_v33  ;;  %v5486_v62 = vadd.f32 %v5309_v45, %v5214_v2  ;;  %v7970_v59 = vld [vmem:[#allocation4 + $0x218] sm:$0xff]  ;;  %5774 = vrot.lane.b32.xlu1 %v5557_v37, %s8018_s26  ;;  %v7971_v2 = vld [vmem:[#allocation4 + $0x230] sm:$0xff] }
 0x2cf   :  { %4426 = vst [vmem:[#allocation4 + $0x690] sm:$0xff] %v3164_v21  ;;  %v3166_v48 = vpop.f32.mrb[109].mxu1  ;;  %v6937_v24 = vadd.f32 %v6873_v8, %v6809_v49  ;;  %v6672_v30 = vmul.f32 %v11355_v39, %v6601_v11  ;;  %v6477_v32 = vadd.f32 %v6291_v20, %v6205_v54 }
 0x2d0   :  { %v7853_v18 = vpop.f32.mrb[196].mxu0  ;;  %v6934_v53 = vadd.f32 %v6870_v36, %v6806_v57  ;;  %v6746_v9 = vadd.f32 %v11368_v7, %v6675_v13  ;;  %v11423_v0 = vadd.f32 %v7970_v59, %v5486_v62  ;;  %v5935_v57 = vadd.f32 %v11216_v47, %v11189_v29  ;;  %v4631_v62 = vld [vmem:[#allocation4 + $0x468] sm:$0xff]  ;;  %v6543_v59 = vld [vmem:[#allocation4 + $0x238] sm:$0xff] }
 0x2d1   :  { %v4077_v46 = vpop.f32.mrb[197].mxu0  ;;  %7001 = vst.msk [vmem:[%s13161_s7 + $0x18] sm:$0xff] %vm94_vm0, %v6937_v24  ;;  %v6743_v43 = vadd.f32 %v11368_v7, %v6672_v30  ;;  %v6605_v3 = vadd.f32 %v6541_v25, %v6477_v32  ;;  %v11429_v38 = vpop.permute.xlu0 %5756 }
 0x2d2   :  { %v3170_v41 = vpop.f32.mrb[110].mxu1  ;;  %v5311_v58 = vpop.permute.xlu1 %5310  ;;  %6998 = vst.msk [vmem:[%s13161_s7] sm:$0xff] %vm94_vm0, %v6934_v53  ;;  %v6810_v15 = vmax.f32 %v6746_v9, 0.0  ;;  %v4630_v46 = vld [vmem:[#allocation4 + $0x450] sm:$0xff]  ;;  %6042 = vrot.lane.b32.xlu1 %v5557_v37, %s8019_s3  ;;  %v5936_v37 = vadd.f32 %v11322_v12, %v11293_v10  ;;  %v6877_v10 = vld [vmem:[%s13156_s0 + $0x38] sm:$0xff] }
 0x2d3   :  { %4429 = vst [vmem:[#allocation4 + $0x6a8] sm:$0xff] %v3170_v41  ;;  %v3172_v26 = vpop.f32.mrb[111].mxu1  ;;  %v5487_v51 = vadd.f32 %v5311_v58, %v5215_v35  ;;  %v6807_v23 = vmax.f32 %v6743_v43, 0.0  ;;  %v6676_v40 = vmul.f32 %v11355_v39, %v6605_v3  ;;  %4792 = vrot.lane.b32.xlu0 %v4630_v46, %s8018_s26  ;;  %v6542_v41 = vld [vmem:[#allocation4 + $0x220] sm:$0xff] }
 0x2d4   :  { %v7856_v31 = vpop.f32.mrb[198].mxu0  ;;  %v6938_v5 = vadd.f32 %v6874_v52, %v6810_v15  ;;  %v6876_v58 = vld [vmem:[%s13156_s0 + $0x30] sm:$0xff] }
 0x2d5   :  { %v4087_v22 = vpop.f32.mrb[199].mxu0  ;;  %v11441_v49 = vadd.f32 %v7971_v2, %v5487_v51  ;;  %v6935_v1 = vadd.f32 %v6871_v27, %v6807_v23  ;;  %v6747_v33 = vadd.f32 %v11368_v7, %v6676_v40  ;;  %v6025_v50 = vpop.permute.xlu0 %6024  ;;  %v6207_v31 = vadd.f32 %v11375_v6, %v5935_v57  ;;  %v5558_v51 = vld [vmem:[#allocation4 + $0x458] sm:$0xff]  ;;  %v6545_v57 = vld [vmem:[#allocation4 + $0x268] sm:$0xff] }
 0x2d6   :  { %v3176_v8 = vpop.f32.mrb[112].mxu1  ;;  %v11444_v48 = vpop.permute.xlu1 %5758  ;;  %7002 = vst.msk [vmem:[%s13161_s7 + $0x20] sm:$0xff] %vm94_vm0, %v6938_v5  ;;  %4794 = vrot.lane.b32.xlu1 %v4631_v62, %s8018_s26  ;;  %v6208_v5 = vadd.f32 %v6025_v50, %v5936_v37  ;;  %v5937_v50 = vadd.f32 %v11338_v19, %v11303_v14  ;;  %v6546_v37 = vld [vmem:[#allocation4 + $0x280] sm:$0xff] }
 0x2d7   :  { %4432 = vst [vmem:[#allocation4 + $0x6c0] sm:$0xff] %v3176_v8  ;;  %v3178_v21 = vpop.f32.mrb[113].mxu1  ;;  %6999 = vst.msk [vmem:[%s13161_s7 + $0x8] sm:$0xff] %vm94_vm0, %v6935_v1  ;;  %v6811_v36 = vmax.f32 %v6747_v33, 0.0  ;;  %5060 = vrot.lane.b32.xlu0 %v4630_v46, %s8019_s3  ;;  %v6544_v33 = vld [vmem:[#allocation4 + $0x250] sm:$0xff] }
 0x2d8   :  { %v7859_v55 = vpop.f32.mrb[200].mxu0  ;;  %4433 = vst [vmem:[#allocation4 + $0x6c8] sm:$0xff] %v3178_v21 }
 0x2d9   :  { %v4097_v18 = vpop.f32.mrb[201].mxu0  ;;  %v6939_v20 = vadd.f32 %v6875_v16, %v6811_v36  ;;  %v6293_v34 = vpop.permute.xlu0 %6292  ;;  %v5559_v36 = vld [vmem:[#allocation4 + $0x470] sm:$0xff] }
 0x2da   :  { %v3182_v11 = vpop.f32.mrb[114].mxu1  ;;  %v11462_v24 = vpop.permute.xlu1 %6026  ;;  %v6478_v13 = vadd.f32 %v6293_v34, %v6206_v4  ;;  %5062 = vrot.lane.b32.xlu1 %v4631_v62, %s8019_s3 }
 0x2db   :  { %4435 = vst [vmem:[#allocation4 + $0x6d8] sm:$0xff] %v3182_v11  ;;  %v3184_v63 = vpop.f32.mrb[115].mxu1  ;;  %7003 = vst.msk [vmem:[%s13161_s7 + $0x28] sm:$0xff] %vm94_vm0, %v6939_v20  ;;  %5328 = vrot.lane.b32.xlu0 %v4630_v46, %s8020_s29  ;;  %v6209_v4 = vadd.f32 %v11462_v24, %v5937_v50 }
 0x2dc   :  { %v7862_v45 = vpop.f32.mrb[202].mxu0  ;;  %4436 = vst [vmem:[#allocation4 + $0x6e0] sm:$0xff] %v3184_v63  ;;  %v6606_v29 = vadd.f32 %v6542_v41, %v6478_v13 }
 0x2dd   :  { %v4107_v54 = vpop.f32.mrb[203].mxu0  ;;  %v11473_v47 = vpop.permute.xlu0 %5760 }
 0x2de   :  { %v3188_v17 = vpop.f32.mrb[116].mxu1  ;;  %v6295_v53 = vpop.permute.xlu1 %6294  ;;  %v6677_v9 = vmul.f32 %v11355_v39, %v6606_v29  ;;  %5330 = vrot.lane.b32.xlu1 %v4631_v62, %s8020_s29 }
 0x2df   :  { %4438 = vst [vmem:[#allocation4 + $0x6f0] sm:$0xff] %v3188_v17  ;;  %v3190_v32 = vpop.f32.mrb[117].mxu1  ;;  %v6479_v26 = vadd.f32 %v6295_v53, %v6207_v31  ;;  %5776 = vrot.lane.b32.xlu0 %v5558_v51, %s8018_s26 }
 0x2e0   :  { %v7865_v30 = vpop.f32.mrb[204].mxu0  ;;  %4439 = vst [vmem:[#allocation4 + $0x6f8] sm:$0xff] %v3190_v32  ;;  %v6748_v6 = vadd.f32 %v11368_v7, %v6677_v9  ;;  %v4666_v9 = vld [vmem:[#allocation4 + $0x480] sm:$0xff] }
 0x2e1   :  { %v4117_v35 = vpop.f32.mrb[205].mxu0  ;;  %v6607_v3 = vadd.f32 %v6543_v59, %v6479_v26  ;;  %v11482_v15 = vpop.permute.xlu0 %6028  ;;  %v5938_v26 = vadd.f32 %v11429_v38, %v11272_v44  ;;  %v6879_v44 = vld [vmem:[%s13156_s0 + $0x48] sm:$0xff] }
 0x2e2   :  { %v3194_v25 = vpop.f32.mrb[118].mxu1  ;;  %v11484_v27 = vpop.permute.xlu1 %5762  ;;  %v6812_v23 = vmax.f32 %v6748_v6, 0.0  ;;  %5778 = vrot.lane.b32.xlu1 %v5559_v36, %s8018_s26  ;;  %v6878_v35 = vld [vmem:[%s13156_s0 + $0x40] sm:$0xff] }
 0x2e3   :  { %4441 = vst [vmem:[#allocation4 + $0x708] sm:$0xff] %v3194_v25  ;;  %v3196_v52 = vpop.f32.mrb[119].mxu1  ;;  %v6678_v40 = vmul.f32 %v11355_v39, %v6607_v3  ;;  %6044 = vrot.lane.b32.xlu0 %v5558_v51, %s8019_s3 }
 0x2e4   :  { %v7868_v22 = vpop.f32.mrb[206].mxu0  ;;  %4442 = vst [vmem:[#allocation4 + $0x710] sm:$0xff] %v3196_v52  ;;  %v6940_v21 = vadd.f32 %v6876_v58, %v6812_v23  ;;  %v6210_v52 = vadd.f32 %v11482_v15, %v5938_v26  ;;  %v5939_v15 = vadd.f32 %v11444_v48, %v11287_v60 }
 0x2e5   :  { %v4127_v43 = vpop.f32.mrb[207].mxu0  ;;  %v6749_v18 = vadd.f32 %v11368_v7, %v6678_v40  ;;  %v6297_v12 = vpop.permute.xlu0 %6296 }
 0x2e6   :  { %v3200_v8 = vpop.f32.mrb[120].mxu1  ;;  %v11497_v46 = vpop.permute.xlu1 %6030  ;;  %7004 = vst.msk [vmem:[%s13161_s7 + $0x30] sm:$0xff] %vm94_vm0, %v6940_v21  ;;  %v6480_v16 = vadd.f32 %v6297_v12, %v6208_v5  ;;  %6046 = vrot.lane.b32.xlu1 %v5559_v36, %s8019_s3  ;;  %v5940_v12 = vadd.f32 %v11473_v47, %v11306_v61  ;;  %v5941_v61 = vadd.f32 %v11484_v27, %v11319_v56  ;;  %v6880_v47 = vld [vmem:[%s13156_s0 + $0x50] sm:$0xff] }
 0x2e7   :  { %4444 = vst [vmem:[#allocation4 + $0x720] sm:$0xff] %v3200_v8  ;;  %v3202_v2 = vpop.f32.mrb[121].mxu1  ;;  %v6813_v28 = vmax.f32 %v6749_v18, 0.0  ;;  %6312 = vrot.lane.b32.xlu0 %v5558_v51, %s8020_s29  ;;  %v6211_v21 = vadd.f32 %v11497_v46, %v5939_v15  ;;  %v6551_v15 = vld [vmem:[#allocation4 + $0x2f8] sm:$0xff] }
 0x2e8   :  { %v7871_v55 = vpop.f32.mrb[208].mxu0  ;;  %4445 = vst [vmem:[#allocation4 + $0x728] sm:$0xff] %v3202_v2  ;;  %v6608_v54 = vadd.f32 %v6544_v33, %v6480_v16 }
 0x2e9   :  { %4557 = vst.msk [vmem:[#allocation4 + $0xaa8] sm:$0xff] %vm94_vm0, %v7871_v55  ;;  %v4137_v1 = vpop.f32.mrb[209].mxu0  ;;  %v6941_v63 = vadd.f32 %v6877_v10, %v6813_v28  ;;  %v11510_v20 = vpop.permute.xlu0 %5764  ;;  %v4667_v55 = vld [vmem:[#allocation4 + $0x498] sm:$0xff] }
 0x2ea   :  { %4554 = vst.msk [vmem:[#allocation4 + $0xa90] sm:$0xff] %vm94_vm0, %v4137_v1  ;;  %v3206_v11 = vpop.f32.mrb[122].mxu1  ;;  %v6299_v34 = vpop.permute.xlu1 %6298  ;;  %v6679_v24 = vmul.f32 %v11355_v39, %v6608_v54  ;;  %6314 = vrot.lane.b32.xlu1 %v5559_v36, %s8020_s29  ;;  %v6547_v10 = vld [vmem:[#allocation4 + $0x298] sm:$0xff] }
 0x2eb   :  { %4447 = vst [vmem:[#allocation4 + $0x738] sm:$0xff] %v3206_v11  ;;  %v3208_v14 = vpop.f32.mrb[123].mxu1  ;;  %7005 = vst.msk [vmem:[%s13161_s7 + $0x38] sm:$0xff] %vm94_vm0, %v6941_v63  ;;  %v6481_v13 = vadd.f32 %v6299_v34, %v6209_v4  ;;  %4796 = vrot.lane.b32.xlu0 %v4666_v9, %s8018_s26  ;;  %v6548_v4 = vld [vmem:[#allocation4 + $0x2b0] sm:$0xff] }
 0x2ec   :  { %v7874_v45 = vpop.f32.mrb[210].mxu0  ;;  %4448 = vst [vmem:[#allocation4 + $0x740] sm:$0xff] %v3208_v14  ;;  %v6750_v30 = vadd.f32 %v11368_v7, %v6679_v24  ;;  %v5560_v14 = vld [vmem:[#allocation4 + $0x488] sm:$0xff] }
 0x2ed   :  { %4563 = vst.msk [vmem:[#allocation4 + $0xad8] sm:$0xff] %vm94_vm0, %v7874_v45  ;;  %v4147_v19 = vpop.f32.mrb[211].mxu0  ;;  %v6609_v32 = vadd.f32 %v6545_v57, %v6481_v13  ;;  %v6033_v29 = vpop.permute.xlu0 %6032 }
 0x2ee   :  { %4560 = vst.msk [vmem:[#allocation4 + $0xac0] sm:$0xff] %vm94_vm0, %v4147_v19  ;;  %v3212_v62 = vpop.f32.mrb[124].mxu1  ;;  %v11525_v53 = vpop.permute.xlu1 %5766  ;;  %v6814_v25 = vmax.f32 %v6750_v30, 0.0  ;;  %4798 = vrot.lane.b32.xlu1 %v4667_v55, %s8018_s26  ;;  %v6212_v28 = vadd.f32 %v6033_v29, %v5940_v12  ;;  %v5942_v19 = vadd.f32 %v11510_v20, %v11423_v0  ;;  %v6881_v0 = vld [vmem:[%s13156_s0 + $0x58] sm:$0xff]  ;;  %v4994_v12 = vld [vmem:[#allocation4 + $0x4b0] sm:$0xff] }
 0x2ef   :  { %4450 = vst [vmem:[#allocation4 + $0x750] sm:$0xff] %v3212_v62  ;;  %v3214_v41 = vpop.f32.mrb[125].mxu1  ;;  %v6680_v22 = vmul.f32 %v11355_v39, %v6609_v32  ;;  %5064 = vrot.lane.b32.xlu0 %v4666_v9, %s8019_s3  ;;  %v6549_v32 = vld [vmem:[#allocation4 + $0x2c8] sm:$0xff] }
 0x2f0   :  { %v7877_v17 = vpop.f32.mrb[212].mxu0  ;;  %4451 = vst [vmem:[#allocation4 + $0x758] sm:$0xff] %v3214_v41  ;;  %v6942_v43 = vadd.f32 %v6878_v35, %v6814_v25  ;;  %v6550_v41 = vld [vmem:[#allocation4 + $0x2e0] sm:$0xff] }
 0x2f1   :  { %4569 = vst.msk [vmem:[#allocation4 + $0xb08] sm:$0xff] %vm94_vm0, %v7877_v17  ;;  %v4157_v31 = vpop.f32.mrb[213].mxu0  ;;  %v6751_v3 = vadd.f32 %v11368_v7, %v6680_v22  ;;  %v6301_v38 = vpop.permute.xlu0 %6300  ;;  %v5561_v25 = vld [vmem:[#allocation4 + $0x4a0] sm:$0xff]  ;;  %v5943_v22 = vadd.f32 %v11525_v53, %v11441_v49 }
 0x2f2   :  { %4566 = vst.msk [vmem:[#allocation4 + $0xaf0] sm:$0xff] %vm94_vm0, %v4157_v31  ;;  %v3218_v59 = vpop.f32.mrb[126].mxu1  ;;  %v6035_v23 = vpop.permute.xlu1 %6034  ;;  %7006 = vst.msk [vmem:[%s13161_s7 + $0x40] sm:$0xff] %vm94_vm0, %v6942_v43  ;;  %v6482_v8 = vadd.f32 %v6301_v38, %v6210_v52  ;;  %5066 = vrot.lane.b32.xlu1 %v4667_v55, %s8019_s3 }
 0x2f3   :  { %4453 = vst [vmem:[#allocation4 + $0x768] sm:$0xff] %v3218_v59  ;;  %v3220_v58 = vpop.f32.mrb[127].mxu1  ;;  %v6815_v40 = vmax.f32 %v6751_v3, 0.0  ;;  %5332 = vrot.lane.b32.xlu0 %v4666_v9, %s8020_s29  ;;  %v6213_v24 = vadd.f32 %v6035_v23, %v5941_v61 }
 0x2f4   :  { %v7880_v6 = vpop.f32.mrb[214].mxu0  ;;  %4454 = vst [vmem:[#allocation4 + $0x770] sm:$0xff] %v3220_v58  ;;  %v6610_v1 = vadd.f32 %v6546_v37, %v6482_v8 }
 0x2f5   :  { %4575 = vst.msk [vmem:[#allocation4 + $0xb38] sm:$0xff] %vm94_vm0, %v7880_v6  ;;  %v4167_v51 = vpop.f32.mrb[215].mxu0  ;;  %v6943_v18 = vadd.f32 %v6879_v44, %v6815_v40  ;;  %v6037_v60 = vpop.permute.xlu0 %6036 }
 0x2f6   :  { %4572 = vst.msk [vmem:[#allocation4 + $0xb20] sm:$0xff] %vm94_vm0, %v4167_v51  ;;  %v3224_v5 = vpop.f32.mrb[128].mxu1  ;;  %v6303_v48 = vpop.permute.xlu1 %6302  ;;  %v6681_v33 = vmul.f32 %v11355_v39, %v6610_v1  ;;  %5334 = vrot.lane.b32.xlu1 %v4667_v55, %s8020_s29  ;;  %v6214_v13 = vadd.f32 %v6037_v60, %v5942_v19  ;;  %v6882_v51 = vld [vmem:[%s13156_s0 + $0x60] sm:$0xff]  ;;  %v6883_v1 = vld [vmem:[%s13156_s0 + $0x68] sm:$0xff] }
 0x2f7   :  { %4456 = vst [vmem:[#allocation4 + $0x780] sm:$0xff] %v3224_v5  ;;  %v3226_v2 = vpop.f32.mrb[129].mxu1  ;;  %7007 = vst.msk [vmem:[%s13161_s7 + $0x48] sm:$0xff] %vm94_vm0, %v6943_v18  ;;  %v6483_v50 = vadd.f32 %v6303_v48, %v6211_v21  ;;  %5780 = vrot.lane.b32.xlu0 %v5560_v14, %s8018_s26 }
 0x2f8   :  { %4457 = vst [vmem:[#allocation4 + $0x788] sm:$0xff] %v3226_v2  ;;  %v6752_v16 = vadd.f32 %v11368_v7, %v6681_v33  ;;  %v6884_v2 = vld [vmem:[%s13156_s0 + $0x70] sm:$0xff] }
 0x2f9   :  { %v6611_v11 = vadd.f32 %v6547_v10, %v6483_v50  ;;  %v6305_v45 = vpop.permute.xlu0 %6304 }
 0x2fa   :  { %v3230_v46 = vpop.f32.mrb[130].mxu1  ;;  %v6039_v63 = vpop.permute.xlu1 %6038  ;;  %v6816_v54 = vmax.f32 %v6752_v16, 0.0  ;;  %v6484_v57 = vadd.f32 %v6305_v45, %v6212_v28  ;;  %5782 = vrot.lane.b32.xlu1 %v5561_v25, %s8018_s26 }
 0x2fb   :  { %4459 = vst [vmem:[#allocation4 + $0x798] sm:$0xff] %v3230_v46  ;;  %v3232_v36 = vpop.f32.mrb[131].mxu1  ;;  %v6682_v34 = vmul.f32 %v11355_v39, %v6611_v11  ;;  %6048 = vrot.lane.b32.xlu0 %v5560_v14, %s8019_s3  ;;  %v6215_v44 = vadd.f32 %v6039_v63, %v5943_v22 }
 0x2fc   :  { %4460 = vst [vmem:[#allocation4 + $0x7a0] sm:$0xff] %v3232_v36  ;;  %v6944_v27 = vadd.f32 %v6880_v47, %v6816_v54  ;;  %v6612_v30 = vadd.f32 %v6548_v4, %v6484_v57  ;;  %v11634_v57 = vld [vmem:[#allocation4 + $0x4b8] sm:$0xff] }
 0x2fd   :  { %v6753_v62 = vadd.f32 %v11368_v7, %v6682_v34  ;;  %v6309_v20 = vpop.permute.xlu0 %6308 }
 0x2fe   :  { %v3236_v56 = vpop.f32.mrb[132].mxu1  ;;  %v6307_v31 = vpop.permute.xlu1 %6306  ;;  %7008 = vst.msk [vmem:[%s13161_s7 + $0x50] sm:$0xff] %vm94_vm0, %v6944_v27  ;;  %v6683_v29 = vmul.f32 %v11355_v39, %v6612_v30  ;;  %v6486_v9 = vadd.f32 %v6309_v20, %v6214_v13  ;;  %6050 = vrot.lane.b32.xlu1 %v5561_v25, %s8019_s3 }
 0x2ff   :  { %4462 = vst [vmem:[#allocation4 + $0x7b0] sm:$0xff] %v3236_v56  ;;  %v3238_v17 = vpop.f32.mrb[133].mxu1  ;;  %v6817_v35 = vmax.f32 %v6753_v62, 0.0  ;;  %v6485_v26 = vadd.f32 %v6307_v31, %v6213_v24  ;;  %6316 = vrot.lane.b32.xlu0 %v5560_v14, %s8020_s29  ;;  %v11647_v62 = vld [vmem:[#allocation4 + $0x4d0] sm:$0xff] }
 0x300   :  { %4463 = vst [vmem:[#allocation4 + $0x7b8] sm:$0xff] %v3238_v17  ;;  %v6754_v52 = vadd.f32 %v11368_v7, %v6683_v29  ;;  %v6614_v3 = vadd.f32 %v6550_v41, %v6486_v9  ;;  %v5266_v29 = vld [vmem:[#allocation4 + $0x4e0] sm:$0xff] }
 0x301   :  { %v6945_v6 = vadd.f32 %v6881_v0, %v6817_v35  ;;  %v6613_v58 = vadd.f32 %v6549_v32, %v6485_v26  ;;  %v11585_v38 = vpop.permute.xlu0 %4768 }
 0x302   :  { %v3242_v59 = vpop.f32.mrb[134].mxu1  ;;  %v6311_v37 = vpop.permute.xlu1 %6310  ;;  %v6818_v49 = vmax.f32 %v6754_v52, 0.0  ;;  %v6685_v53 = vmul.f32 %v11355_v39, %v6614_v3  ;;  %6318 = vrot.lane.b32.xlu1 %v5561_v25, %s8020_s29 }
 0x303   :  { %4465 = vst [vmem:[#allocation4 + $0x7c8] sm:$0xff] %v3242_v59  ;;  %v3244_v43 = vpop.f32.mrb[135].mxu1  ;;  %7009 = vst.msk [vmem:[%s13161_s7 + $0x58] sm:$0xff] %vm94_vm0, %v6945_v6  ;;  %v6684_v23 = vmul.f32 %v11355_v39, %v6613_v58  ;;  %v6487_v8 = vadd.f32 %v6311_v37, %v6215_v44  ;;  %5068 = vrot.lane.b32.xlu0 %v4994_v12, %s8019_s3  ;;  %v11668_v59 = vld [vmem:[#allocation4 + $0x4e8] sm:$0xff]  ;;  %v7972_v6 = vld [vmem:[#allocation4 + $0x330] sm:$0xff] }
 0x304   :  { %4466 = vst [vmem:[#allocation4 + $0x7d0] sm:$0xff] %v3244_v43  ;;  %v6946_v55 = vadd.f32 %v6882_v51, %v6818_v49  ;;  %v6756_v5 = vadd.f32 %v11368_v7, %v6685_v53  ;;  %v5267_v43 = vld [vmem:[#allocation4 + $0x4f8] sm:$0xff]  ;;  %v7973_v49 = vld [vmem:[#allocation4 + $0x348] sm:$0xff] }
 0x305   :  { %v6755_v21 = vadd.f32 %v11368_v7, %v6684_v23  ;;  %v6615_v60 = vadd.f32 %v6551_v15, %v6487_v8  ;;  %v11603_v48 = vpop.permute.xlu0 %4772  ;;  %v11678_v15 = vld [vmem:[#allocation4 + $0x500] sm:$0xff] }
 0x306   :  { %v3248_v40 = vpop.f32.mrb[136].mxu1  ;;  %v11605_v10 = vpop.permute.xlu1 %4770  ;;  %7010 = vst.msk [vmem:[%s13161_s7 + $0x60] sm:$0xff] %vm94_vm0, %v6946_v55  ;;  %v6820_v33 = vmax.f32 %v6756_v5, 0.0  ;;  %v4946_v52 = vadd.f32 %v7972_v6, %v11603_v48  ;;  %v7974_v5 = vld [vmem:[#allocation4 + $0x3f8] sm:$0xff] }
 0x307   :  { %4468 = vst [vmem:[#allocation4 + $0x7e0] sm:$0xff] %v3248_v40  ;;  %v3250_v18 = vpop.f32.mrb[137].mxu1  ;;  %v6819_v50 = vmax.f32 %v6755_v21, 0.0  ;;  %v6686_v46 = vmul.f32 %v11355_v39, %v6615_v60  ;;  %v6885_v39 = vld [vmem:[%s13156_s0 + $0x78] sm:$0xff]  ;;  %5336 = vrot.lane.b32.xlu0 %v4994_v12, %s8020_s29  ;;  %v7975_v12 = vld [vmem:[#allocation4 + $0x410] sm:$0xff] }
 0x308   :  { %4469 = vst [vmem:[#allocation4 + $0x7e8] sm:$0xff] %v3250_v18  ;;  %v6948_v16 = vadd.f32 %v6884_v2, %v6820_v33 }
 0x309   :  { %v6947_v36 = vadd.f32 %v6883_v1, %v6819_v50  ;;  %v6757_v61 = vadd.f32 %v11368_v7, %v6686_v46  ;;  %v11615_v47 = vpop.permute.xlu0 %5040  ;;  %v4995_v7 = vld [vmem:[#allocation4 + $0x4c8] sm:$0xff] }
 0x30a   :  { %v3254_v28 = vpop.f32.mrb[138].mxu1  ;;  %v4775_v45 = vpop.permute.xlu1 %4774  ;;  %7012 = vst.msk [vmem:[%s13161_s7 + $0x70] sm:$0xff] %vm94_vm0, %v6948_v16  ;;  %5070 = vrot.lane.b32.xlu1 %v4995_v7, %s8019_s3 }
 0x30b   :  { %4471 = vst [vmem:[#allocation4 + $0x7f8] sm:$0xff] %v3254_v28  ;;  %v3256_v11 = vpop.f32.mrb[139].mxu1  ;;  %7011 = vst.msk [vmem:[%s13161_s7 + $0x68] sm:$0xff] %vm94_vm0, %v6947_v36  ;;  %v6821_v4 = vmax.f32 %v6757_v61, 0.0  ;;  %5784 = vrot.lane.b32.xlu0 %v11634_v57, %s8018_s26  ;;  %v4947_v53 = vadd.f32 %v7973_v49, %v4775_v45  ;;  %v11696_v28 = vld [vmem:[#allocation4 + $0x518] sm:$0xff]  ;;  %v11708_v45 = vld [vmem:[#allocation4 + $0x530] sm:$0xff] }
 0x30c   :  { %4472 = vst [vmem:[#allocation4 + $0x800] sm:$0xff] %v3256_v11 }
 0x30d   :  { %v6949_v19 = vadd.f32 %v6885_v39, %v6821_v4  ;;  %v11630_v54 = vpop.permute.xlu0 %4776 }
 0x30e   :  { %v3260_v63 = vpop.f32.mrb[140].mxu1  ;;  %v11632_v34 = vpop.permute.xlu1 %5042  ;;  %5338 = vrot.lane.b32.xlu1 %v4995_v7, %s8020_s29 }
 0x30f   :  { %v3262_v14 = vpop.f32.mrb[141].mxu1  ;;  %7013 = vst.msk [vmem:[%s13161_s7 + $0x78] sm:$0xff] %vm94_vm0, %v6949_v19  ;;  %6052 = vrot.lane.b32.xlu0 %v11634_v57, %s8019_s3 }
 0x310   :  { %4475 = vst [vmem:[#allocation4 + $0x818] sm:$0xff] %v3262_v14 }
 0x311   :  { %v5045_v27 = vpop.permute.xlu0 %5044 }
 0x312   :  { %v3266_v24 = vpop.f32.mrb[142].mxu1  ;;  %v11643_v13 = vpop.permute.xlu1 %4778  ;;  %5786 = vrot.lane.b32.xlu1 %v11647_v62, %s8018_s26  ;;  %v5218_v58 = vadd.f32 %v5045_v27, %v4946_v52  ;;  %v5666_v27 = vld [vmem:[#allocation4 + $0x548] sm:$0xff] }
 0x313   :  { %v3268_v56 = vpop.f32.mrb[143].mxu1  ;;  %6320 = vrot.lane.b32.xlu0 %v11634_v57, %s8020_s29 }
 0x314   :  { %4478 = vst [vmem:[#allocation4 + $0x830] sm:$0xff] %v3268_v56 }
 0x315   :  { %v11651_v0 = vpop.permute.xlu0 %5312 }
 0x316   :  { %v3272_v17 = vpop.f32.mrb[144].mxu1  ;;  %v5047_v20 = vpop.permute.xlu1 %5046  ;;  %6054 = vrot.lane.b32.xlu1 %v11647_v62, %s8019_s3 }
 0x317   :  { %v3274_v30 = vpop.f32.mrb[145].mxu1  ;;  %5340 = vrot.lane.b32.xlu0 %v5266_v29, %s8020_s29  ;;  %v5219_v8 = vadd.f32 %v5047_v20, %v4947_v53 }
 0x318   :  { %4481 = vst [vmem:[#allocation4 + $0x848] sm:$0xff] %v3274_v30 }
 0x319   :  { %v11657_v32 = vpop.permute.xlu0 %4780 }
 0x31a   :  { %v3278_v41 = vpop.f32.mrb[146].mxu1  ;;  %v11659_v35 = vpop.permute.xlu1 %5314  ;;  %6322 = vrot.lane.b32.xlu1 %v11647_v62, %s8020_s29 }
 0x31b   :  { %v3280_v31 = vpop.f32.mrb[147].mxu1  ;;  %5788 = vrot.lane.b32.xlu0 %v11668_v59, %s8018_s26 }
 0x31c   :  { %4484 = vst [vmem:[#allocation4 + $0x860] sm:$0xff] %v3280_v31  ;;  %v5667_v31 = vld [vmem:[#allocation4 + $0x560] sm:$0xff] }
 0x31d   :  { %v11664_v25 = vpop.permute.xlu0 %5048 }
 0x31e   :  { %v3284_v9 = vpop.f32.mrb[148].mxu1  ;;  %v11666_v22 = vpop.permute.xlu1 %4782  ;;  %5342 = vrot.lane.b32.xlu1 %v5267_v43, %s8020_s29 }
 0x31f   :  { %v3286_v26 = vpop.f32.mrb[149].mxu1  ;;  %6056 = vrot.lane.b32.xlu0 %v11668_v59, %s8019_s3 }
 0x320   :  { %4487 = vst [vmem:[#allocation4 + $0x878] sm:$0xff] %v3286_v26 }
 0x321   :  { %v5317_v44 = vpop.permute.xlu0 %5316 }
 0x322   :  { %v3290_v3 = vpop.f32.mrb[150].mxu1  ;;  %v11674_v37 = vpop.permute.xlu1 %5050  ;;  %v5490_v23 = vadd.f32 %v5317_v44, %v5218_v58  ;;  %5790 = vrot.lane.b32.xlu1 %v11678_v15, %s8018_s26 }
 0x323   :  { %v3292_v51 = vpop.f32.mrb[151].mxu1  ;;  %6324 = vrot.lane.b32.xlu0 %v11668_v59, %s8020_s29 }
 0x324   :  { %4490 = vst [vmem:[#allocation4 + $0x890] sm:$0xff] %v3292_v51  ;;  %v11682_v21 = vadd.f32 %v7974_v5, %v5490_v23  ;;  %v5994_v51 = vld [vmem:[#allocation4 + $0x578] sm:$0xff] }
 0x325   :  { %v11684_v18 = vpop.permute.xlu0 %4784 }
 0x326   :  { %v3296_v40 = vpop.f32.mrb[152].mxu1  ;;  %v5319_v2 = vpop.permute.xlu1 %5318  ;;  %6058 = vrot.lane.b32.xlu1 %v11678_v15, %s8019_s3 }
 0x327   :  { %v3298_v55 = vpop.f32.mrb[153].mxu1  ;;  %v5491_v1 = vadd.f32 %v5319_v2, %v5219_v8  ;;  %5792 = vrot.lane.b32.xlu0 %v11696_v28, %s8018_s26  ;;  %v5995_v40 = vld [vmem:[#allocation4 + $0x590] sm:$0xff] }
 0x328   :  { %4493 = vst [vmem:[#allocation4 + $0x8a8] sm:$0xff] %v3298_v55 }
 0x329   :  { %v11690_v33 = vadd.f32 %v7975_v12, %v5491_v1  ;;  %v11692_v50 = vpop.permute.xlu0 %5052  ;;  %v6266_v1 = vld [vmem:[#allocation4 + $0x5a8] sm:$0xff] }
 0x32a   :  { %v3302_v60 = vpop.f32.mrb[154].mxu1  ;;  %v11694_v46 = vpop.permute.xlu1 %4786  ;;  %6326 = vrot.lane.b32.xlu1 %v11678_v15, %s8020_s29 }
 0x32b   :  { %v3304_v48 = vpop.f32.mrb[155].mxu1  ;;  %6060 = vrot.lane.b32.xlu0 %v11696_v28, %s8019_s3 }
 0x32c   :  { %4496 = vst [vmem:[#allocation4 + $0x8c0] sm:$0xff] %v3304_v48 }
 0x32d   :  { %v11702_v11 = vpop.permute.xlu0 %5320 }
 0x32e   :  { %v3308_v16 = vpop.f32.mrb[156].mxu1  ;;  %v11704_v61 = vpop.permute.xlu1 %5054  ;;  %5794 = vrot.lane.b32.xlu1 %v11708_v45, %s8018_s26 }
 0x32f   :  { %v3310_v36 = vpop.f32.mrb[157].mxu1  ;;  %6328 = vrot.lane.b32.xlu0 %v11696_v28, %s8020_s29 }
 0x330   :  { %v4634_v36 = vld [vmem:[#allocation4 + $0x630] sm:$0xff] }
 0x331   :  { %v11712_v4 = vpop.permute.xlu0 %5768 }
 0x332   :  { %v3314_v39 = vpop.f32.mrb[158].mxu1  ;;  %v11714_v63 = vpop.permute.xlu1 %5322  ;;  %6062 = vrot.lane.b32.xlu1 %v11708_v45, %s8019_s3 }
 0x333   :  { %v3316_v7 = vpop.f32.mrb[159].mxu1  ;;  %5796 = vrot.lane.b32.xlu0 %v5666_v27, %s8018_s26  ;;  %v6267_v39 = vld [vmem:[#allocation4 + $0x5c0] sm:$0xff] }
 0x334   :  { %v4616_v7 = vld [vmem:[#allocation4 + $0x300] sm:$0xff] }
 0x335   :  { %v11720_v24 = vpop.permute.xlu0 %4788 }
 0x336   :  { %v3320_v14 = vpop.f32.mrb[160].mxu1  ;;  %v11722_v56 = vpop.permute.xlu1 %5770  ;;  %6330 = vrot.lane.b32.xlu1 %v11708_v45, %s8020_s29 }
 0x337   :  { %4504 = vst [vmem:[#allocation4 + $0x900] sm:$0xff] %v3320_v14  ;;  %v3322_v19 = vpop.f32.mrb[161].mxu1  ;;  %6064 = vrot.lane.b32.xlu0 %v5666_v27, %s8019_s3 }
 0x338   :  { %v4636_v19 = vld [vmem:[#allocation4 + $0x660] sm:$0xff] }
 0x339   :  { %v11727_v20 = vpop.permute.xlu0 %5056 }
 0x33a   :  { %v3326_v17 = vpop.f32.mrb[162].mxu1  ;;  %v11729_v41 = vpop.permute.xlu1 %4790  ;;  %5798 = vrot.lane.b32.xlu1 %v5667_v31, %s8018_s26 }
 0x33b   :  { %4507 = vst [vmem:[#allocation4 + $0x918] sm:$0xff] %v3326_v17  ;;  %v3328_v30 = vpop.f32.mrb[163].mxu1  ;;  %6332 = vrot.lane.b32.xlu0 %v5666_v27, %s8020_s29  ;;  %v4944_v27 = vadd.f32 %v11585_v38, %v4616_v7 }
 0x33d   :  { %v11733_v26 = vpop.permute.xlu0 %5324 }
 0x33e   :  { %v3332_v29 = vpop.f32.mrb[164].mxu1  ;;  %v11735_v6 = vpop.permute.xlu1 %5058  ;;  %6066 = vrot.lane.b32.xlu1 %v5667_v31, %s8019_s3 }
 0x33f   :  { %4510 = vst [vmem:[#allocation4 + $0x930] sm:$0xff] %v3332_v29  ;;  %v3334_v9 = vpop.f32.mrb[165].mxu1  ;;  %6068 = vrot.lane.b32.xlu0 %v5994_v51, %s8019_s3  ;;  %v5216_v29 = vadd.f32 %v11615_v47, %v4944_v27 }
 0x340   :  { %v4635_v9 = vld [vmem:[#allocation4 + $0x648] sm:$0xff] }
 0x341   :  { %v11739_v3 = vpop.permute.xlu0 %5772 }
 0x342   :  { %v3338_v52 = vpop.f32.mrb[166].mxu1  ;;  %v11741_v58 = vpop.permute.xlu1 %5326  ;;  %6334 = vrot.lane.b32.xlu1 %v5667_v31, %s8020_s29 }
 0x343   :  { %4513 = vst [vmem:[#allocation4 + $0x948] sm:$0xff] %v3338_v52  ;;  %v3340_v43 = vpop.f32.mrb[167].mxu1  ;;  %6336 = vrot.lane.b32.xlu0 %v5994_v51, %s8020_s29  ;;  %v4617_v52 = vld [vmem:[#allocation4 + $0x318] sm:$0xff] }
 0x344   :  { %v4945_v51 = vadd.f32 %v11605_v10, %v4617_v52 }
 0x345   :  { %v11745_v53 = vpop.permute.xlu0 %6040 }
 0x346   :  { %v3344_v44 = vpop.f32.mrb[168].mxu1  ;;  %v11747_v23 = vpop.permute.xlu1 %5774  ;;  %6070 = vrot.lane.b32.xlu1 %v5995_v40, %s8019_s3  ;;  %v5217_v47 = vadd.f32 %v11632_v34, %v4945_v51  ;;  %v2274_v34 = vld [vmem:[#allocation3 + $0x3c0] sm:$0xff]  ;;  %v2275_v51 = vld [vmem:[#allocation3 + $0x3c8] sm:$0xff] }
 0x347   :  { %4516 = vst [vmem:[#allocation4 + $0x960] sm:$0xff] %v3344_v44  ;;  %v3346_v49 = vpop.f32.mrb[169].mxu1  ;;  %6340 = vrot.lane.b32.xlu0 %v6266_v1, %s8020_s29  ;;  %v5488_v44 = vadd.f32 %v11651_v0, %v5216_v29  ;;  %7251 = vmatmul.mubr.msk.f32.gmra.mrb[208].mxu1 %vm94_vm0, %v2274_v34  ;;  %v4639_v29 = vld [vmem:[#allocation4 + $0x6a8] sm:$0xff] }
 0x348   :  { %v4637_v49 = vld [vmem:[#allocation4 + $0x678] sm:$0xff]  ;;  %v5489_v10 = vadd.f32 %v11659_v35, %v5217_v47  ;;  %3468 = vmatprep.mubr.f32.mxu1 %v13283_v42  ;;  %7881 = vmatprep.mubr.msk.f32.mxu0 %vm94_vm0, %v2274_v34 }
 0x349   :  { %v11751_v5 = vpop.permute.xlu0 %4792  ;;  %7882 = vmatmul.mubr.msk.f32.gmra.mrb[216].mxu0 %vm94_vm0, %v2275_v51 }
 0x34a   :  { %v3350_v8 = vpop.f32.mrb[170].mxu1  ;;  %v11753_v2 = vpop.permute.xlu1 %6042  ;;  %6338 = vrot.lane.b32.xlu1 %v5995_v40, %s8020_s29 }
 0x34b   :  { %4519 = vst [vmem:[#allocation4 + $0x978] sm:$0xff] %v3350_v8  ;;  %v3352_v55 = vpop.f32.mrb[171].mxu1  ;;  %4800 = vrot.lane.b32.xlu0 %v4634_v36, %s8018_s26  ;;  %7252 = vmatmul.mubr.msk.f32.gmra.mrb[210].mxu1 %vm94_vm0, %v2275_v51 }
 0x34c   :  { %v5552_v55 = vld [vmem:[#allocation4 + $0x3c8] sm:$0xff]  ;;  %3474 = vmatprep.mubr.f32.mxu1 %v13283_v42 }
 0x34d   :  { %v11757_v12 = vpop.permute.xlu0 %5060  ;;  %v5616_v0 = vadd.f32 %v5552_v55, %v5488_v44 }
 0x34e   :  { %v3356_v60 = vpop.f32.mrb[172].mxu1  ;;  %v11759_v16 = vpop.permute.xlu1 %4794  ;;  %6342 = vrot.lane.b32.xlu1 %v6267_v39, %s8020_s29 }
 0x34f   :  { %4522 = vst [vmem:[#allocation4 + $0x990] sm:$0xff] %v3356_v60  ;;  %v3358_v48 = vpop.f32.mrb[173].mxu1  ;;  %4804 = vrot.lane.b32.xlu0 %v4636_v19, %s8018_s26  ;;  %v4638_v60 = vld [vmem:[#allocation4 + $0x690] sm:$0xff]  ;;  %v5944_v7 = vadd.f32 %v11712_v4, %v5616_v0 }
 0x351   :  { %v11764_v30 = vpop.permute.xlu0 %5328  ;;  %v6216_v27 = vadd.f32 %v11745_v53, %v5944_v7  ;;  %v11814_v7 = vld [vmem:[%s13160_s6] ss:$0 sm:$0xff] }
 0x352   :  { %v3362_v14 = vpop.f32.mrb[174].mxu1  ;;  %v11766_v31 = vpop.permute.xlu1 %5062  ;;  %4802 = vrot.lane.b32.xlu1 %v4635_v9, %s8018_s26 }
 0x353   :  { %4525 = vst [vmem:[#allocation4 + $0x9a8] sm:$0xff] %v3362_v14  ;;  %v3364_v17 = vpop.f32.mrb[175].mxu1  ;;  %5072 = vrot.lane.b32.xlu0 %v4636_v19, %s8019_s3  ;;  %v5553_v14 = vld [vmem:[#allocation4 + $0x3e0] sm:$0xff] }
 0x354   :  { %v5617_v35 = vadd.f32 %v5553_v14, %v5489_v10 }
 0x355   :  { %v11773_v40 = vpop.permute.xlu0 %5776 }
 0x356   :  { %v3368_v43 = vpop.f32.mrb[176].mxu1  ;;  %v11775_v8 = vpop.permute.xlu1 %5330  ;;  %4806 = vrot.lane.b32.xlu1 %v4637_v49, %s8018_s26  ;;  %v5945_v52 = vadd.f32 %v11722_v56, %v5617_v35  ;;  %v6886_v35 = vld [vmem:[%s13156_s0 + $0x80] sm:$0xff] }
 0x357   :  { %4528 = vst [vmem:[#allocation4 + $0x9c0] sm:$0xff] %v3368_v43  ;;  %v3370_v38 = vpop.f32.mrb[177].mxu1  ;;  %4808 = vrot.lane.b32.xlu0 %v4638_v60, %s8018_s26 }
 0x358   :  { %4529 = vst [vmem:[#allocation4 + $0x9c8] sm:$0xff] %v3370_v38  ;;  %v6552_v38 = vld [vmem:[#allocation4 + $0x490] sm:$0xff]  ;;  %v6217_v53 = vadd.f32 %v11753_v2, %v5945_v52 }
 0x359   :  { %v11781_v36 = vpop.permute.xlu0 %6044 }
 0x35a   :  { %v3374_v1 = vpop.f32.mrb[178].mxu1  ;;  %v11783_v39 = vpop.permute.xlu1 %5778  ;;  %5074 = vrot.lane.b32.xlu1 %v4637_v49, %s8019_s3 }
 0x35b   :  { %4531 = vst [vmem:[#allocation4 + $0x9d8] sm:$0xff] %v3374_v1  ;;  %v3376_v48 = vpop.f32.mrb[179].mxu1  ;;  %5076 = vrot.lane.b32.xlu0 %v4638_v60, %s8019_s3  ;;  %v11806_v1 = vld [vmem:[%s13159_s5] ss:$0 sm:$0xff] }
 0x35c   :  { %4532 = vst [vmem:[#allocation4 + $0x9e0] sm:$0xff] %v3376_v48  ;;  %v6553_v48 = vld [vmem:[#allocation4 + $0x4a8] sm:$0xff] }
 0x35d   :  { %v6313_v4 = vpop.permute.xlu0 %6312 }
 0x35e   :  { %v3380_v19 = vpop.f32.mrb[180].mxu1  ;;  %v11792_v9 = vpop.permute.xlu1 %6046  ;;  %v6488_v43 = vadd.f32 %v6313_v4, %v6216_v27  ;;  %4810 = vrot.lane.b32.xlu1 %v4639_v29, %s8018_s26 }
 0x35f   :  { %4534 = vst [vmem:[#allocation4 + $0x9f0] sm:$0xff] %v3380_v19  ;;  %v3382_v17 = vpop.f32.mrb[181].mxu1  ;;  %5344 = vrot.lane.b32.xlu0 %v4638_v60, %s8020_s29 }
 0x360   :  { %4535 = vst [vmem:[#allocation4 + $0x9f8] sm:$0xff] %v3382_v17  ;;  %v6616_v47 = vadd.f32 %v6552_v38, %v6488_v43  ;;  %v4640_v17 = vld [vmem:[#allocation4 + $0x6c0] sm:$0xff]  ;;  %v2276_v43 = vld [vmem:[#allocation3 + $0x3d0] sm:$0xff] }
 0x361   :  { %v11801_v56 = vpop.permute.xlu0 %4796  ;;  %7253 = vmatmul.mubr.msk.f32.gmra.mrb[212].mxu1 %vm94_vm0, %v2276_v43  ;;  %7884 = vmatprep.mubr.msk.f32.mxu0 %vm94_vm0, %v2276_v43 }
 0x362   :  { %v3386_v44 = vpop.f32.mrb[182].mxu1  ;;  %v6315_v55 = vpop.permute.xlu1 %6314  ;;  %v6687_v10 = vmul.f32 %v11806_v1, %v6616_v47  ;;  %5078 = vrot.lane.b32.xlu1 %v4639_v29, %s8019_s3  ;;  %3480 = vmatprep.mubr.f32.mxu1 %v13283_v42 }
 0x363   :  { %4537 = vst [vmem:[#allocation4 + $0xa08] sm:$0xff] %v3386_v44  ;;  %v3388_v49 = vpop.f32.mrb[183].mxu1  ;;  %v6489_v0 = vadd.f32 %v6315_v55, %v6217_v53  ;;  %4812 = vrot.lane.b32.xlu0 %v4640_v17, %s8018_s26 }
 0x364   :  { %4538 = vst [vmem:[#allocation4 + $0xa10] sm:$0xff] %v3388_v49  ;;  %v6758_v34 = vadd.f32 %v11814_v7, %v6687_v10  ;;  %v6887_v49 = vld [vmem:[%s13156_s0 + $0x88] sm:$0xff] }
 0x365   :  { %v6617_v19 = vadd.f32 %v6553_v48, %v6489_v0  ;;  %v11820_v60 = vpop.permute.xlu0 %5064  ;;  %v4641_v10 = vld [vmem:[#allocation4 + $0x6d8] sm:$0xff] }
 0x366   :  { %v3392_v2 = vpop.f32.mrb[184].mxu1  ;;  %v11822_v27 = vpop.permute.xlu1 %4798  ;;  %v6822_v4 = vmax.f32 %v6758_v34, 0.0  ;;  %5346 = vrot.lane.b32.xlu1 %v4639_v29, %s8020_s29  ;;  %v2277_v0 = vld [vmem:[#allocation3 + $0x3d8] sm:$0xff] }
 0x367   :  { %4540 = vst [vmem:[#allocation4 + $0xa20] sm:$0xff] %v3392_v2  ;;  %v3394_v14 = vpop.f32.mrb[185].mxu1  ;;  %v6688_v52 = vmul.f32 %v11806_v1, %v6617_v19  ;;  %5080 = vrot.lane.b32.xlu0 %v4640_v17, %s8019_s3  ;;  %7254 = vmatmul.mubr.msk.f32.gmra.mrb[214].mxu1 %vm94_vm0, %v2277_v0 }
 0x368   :  { %4541 = vst [vmem:[#allocation4 + $0xa28] sm:$0xff] %v3394_v14  ;;  %v6950_v44 = vadd.f32 %v6886_v35, %v6822_v4  ;;  %3486 = vmatprep.mubr.f32.mxu1 %v13283_v42  ;;  %7885 = vmatmul.mubr.msk.f32.gmra.mrb[218].mxu0 %vm94_vm0, %v2277_v0  ;;  %v2278_v35 = vld [vmem:[#allocation3 + $0x3e0] sm:$0xff] }
 0x369   :  { %v6759_v38 = vadd.f32 %v11814_v7, %v6688_v52  ;;  %v11834_v47 = vpop.permute.xlu0 %5332  ;;  %7887 = vmatprep.mubr.msk.f32.mxu0 %vm94_vm0, %v2278_v35 }
 0x36a   :  { %v3398_v51 = vpop.f32.mrb[186].mxu1  ;;  %v11836_v55 = vpop.permute.xlu1 %5066  ;;  %7014 = vst.msk [vmem:[%s13161_s7 + $0x80] sm:$0xff] %vm94_vm0, %v6950_v44  ;;  %4814 = vrot.lane.b32.xlu1 %v4641_v10, %s8018_s26  ;;  %v4642_v44 = vld [vmem:[#allocation4 + $0x6f0] sm:$0xff] }
 0x36b   :  { %4543 = vst [vmem:[#allocation4 + $0xa38] sm:$0xff] %v3398_v51  ;;  %v3400_v53 = vpop.f32.mrb[187].mxu1  ;;  %v6823_v29 = vmax.f32 %v6759_v38, 0.0  ;;  %5348 = vrot.lane.b32.xlu0 %v4640_v17, %s8020_s29  ;;  %7255 = vmatmul.mubr.msk.f32.gmra.mrb[216].mxu1 %vm94_vm0, %v2278_v35  ;;  %v5946_v17 = vadd.f32 %v11739_v3, %v11682_v21  ;;  %v2279_v38 = vld [vmem:[#allocation3 + $0x3e8] sm:$0xff]  ;;  %v5947_v21 = vadd.f32 %v11747_v23, %v11690_v33 }
 0x36c   :  { %4544 = vst [vmem:[#allocation4 + $0xa40] sm:$0xff] %v3400_v53  ;;  %3492 = vmatprep.mubr.f32.mxu1 %v13283_v42  ;;  %7888 = vmatmul.mubr.msk.f32.gmra.mrb[220].mxu0 %vm94_vm0, %v2279_v38 }
 0x36d   :  { %v6951_v48 = vadd.f32 %v6887_v49, %v6823_v29  ;;  %v11847_v14 = vpop.permute.xlu0 %5780  ;;  %v6218_v49 = vadd.f32 %v11781_v36, %v5946_v17  ;;  %v6219_v36 = vadd.f32 %v11792_v9, %v5947_v21 }
 0x36e   :  { %v3404_v2 = vpop.f32.mrb[188].mxu1  ;;  %v11849_v19 = vpop.permute.xlu1 %5334  ;;  %5082 = vrot.lane.b32.xlu1 %v4641_v10, %s8019_s3 }
 0x36f   :  { %4546 = vst [vmem:[#allocation4 + $0xa50] sm:$0xff] %v3404_v2  ;;  %v3406_v34 = vpop.f32.mrb[189].mxu1  ;;  %7015 = vst.msk [vmem:[%s13161_s7 + $0x88] sm:$0xff] %vm94_vm0, %v6951_v48  ;;  %4816 = vrot.lane.b32.xlu0 %v4642_v44, %s8018_s26  ;;  %7256 = vmatmul.mubr.msk.f32.gmra.mrb[218].mxu1 %vm94_vm0, %v2279_v38 }
 0x370   :  { %4547 = vst [vmem:[#allocation4 + $0xa58] sm:$0xff] %v3406_v34  ;;  %3498 = vmatprep.mubr.f32.mxu1 %v13283_v42  ;;  %v6554_v34 = vld [vmem:[#allocation4 + $0x4c0] sm:$0xff] }
 0x371   :  { %v11860_v43 = vpop.permute.xlu0 %6048 }
 0x372   :  { %v3410_v4 = vpop.f32.mrb[190].mxu1  ;;  %v11862_v51 = vpop.permute.xlu1 %5782  ;;  %5350 = vrot.lane.b32.xlu1 %v4641_v10, %s8020_s29  ;;  %v4643_v10 = vld [vmem:[#allocation4 + $0x708] sm:$0xff] }
 0x373   :  { %4549 = vst [vmem:[#allocation4 + $0xa68] sm:$0xff] %v3410_v4  ;;  %v3412_v52 = vpop.f32.mrb[191].mxu1  ;;  %5084 = vrot.lane.b32.xlu0 %v4642_v44, %s8019_s3 }
 0x374   :  { %4550 = vst [vmem:[#allocation4 + $0xa70] sm:$0xff] %v3412_v52 }
 0x375   :  { %v6317_v0 = vpop.permute.xlu0 %6316 }
 0x376   :  { %v3416_v53 = vpop.f32.mrb[192].mxu1  ;;  %v11872_v2 = vpop.permute.xlu1 %6050  ;;  %v6490_v3 = vadd.f32 %v6317_v0, %v6218_v49  ;;  %4818 = vrot.lane.b32.xlu1 %v4643_v10, %s8018_s26  ;;  %v7978_v49 = vld [vmem:[#allocation4 + $0x360] sm:$0xff] }
 0x377   :  { %4552 = vst [vmem:[#allocation4 + $0xa80] sm:$0xff] %v3416_v53  ;;  %v3418_v29 = vpop.f32.mrb[193].mxu1  ;;  %5352 = vrot.lane.b32.xlu0 %v4642_v44, %s8020_s29  ;;  %v6555_v53 = vld [vmem:[#allocation4 + $0x4d8] sm:$0xff] }
 0x378   :  { %4553 = vst [vmem:[#allocation4 + $0xa88] sm:$0xff] %v3418_v29  ;;  %v6618_v4 = vadd.f32 %v6554_v34, %v6490_v3  ;;  %v4948_v29 = vadd.f32 %v7978_v49, %v11630_v54  ;;  %v6888_v3 = vld [vmem:[%s13156_s0 + $0x90] sm:$0xff]  ;;  %v11893_v34 = vld [vmem:[#allocation4 + $0x6f8] sm:$0xff] }
 0x379   :  { %v11879_v52 = vpop.permute.xlu0 %5068 }
 0x37a   :  { %v3422_v48 = vpop.f32.mrb[194].mxu1  ;;  %v6319_v17 = vpop.permute.xlu1 %6318  ;;  %v6689_v38 = vmul.f32 %v11806_v1, %v6618_v4  ;;  %5086 = vrot.lane.b32.xlu1 %v4643_v10, %s8019_s3 }
 0x37b   :  { %4555 = vst [vmem:[#allocation4 + $0xa98] sm:$0xff] %v3422_v48  ;;  %v3424_v35 = vpop.f32.mrb[195].mxu1  ;;  %v6491_v33 = vadd.f32 %v6319_v17, %v6219_v36  ;;  %v5220_v36 = vadd.f32 %v11664_v25, %v4948_v29  ;;  %5800 = vrot.lane.b32.xlu0 %v11893_v34, %s8018_s26  ;;  %v7979_v17 = vld [vmem:[#allocation4 + $0x378] sm:$0xff]  ;;  %v6889_v25 = vld [vmem:[%s13156_s0 + $0x98] sm:$0xff] }
 0x37c   :  { %4556 = vst [vmem:[#allocation4 + $0xaa0] sm:$0xff] %v3424_v35  ;;  %v6760_v9 = vadd.f32 %v11814_v7, %v6689_v38  ;;  %v4949_v38 = vadd.f32 %v7979_v17, %v11643_v13 }
 0x37d   :  { %v6619_v21 = vadd.f32 %v6555_v53, %v6491_v33  ;;  %v11889_v48 = vpop.permute.xlu0 %5336  ;;  %v5492_v33 = vadd.f32 %v11702_v11, %v5220_v36  ;;  %v11916_v11 = vld [vmem:[#allocation4 + $0x710] sm:$0xff]  ;;  %v7980_v36 = vld [vmem:[#allocation4 + $0x428] sm:$0xff] }
 0x37e   :  { %v3428_v23 = vpop.f32.mrb[196].mxu1  ;;  %v11891_v44 = vpop.permute.xlu1 %5070  ;;  %v6824_v35 = vmax.f32 %v6760_v9, 0.0  ;;  %5354 = vrot.lane.b32.xlu1 %v4643_v10, %s8020_s29  ;;  %v4644_v10 = vld [vmem:[#allocation4 + $0x720] sm:$0xff] }
 0x37f   :  { %4558 = vst [vmem:[#allocation4 + $0xab0] sm:$0xff] %v3428_v23  ;;  %v3430_v0 = vpop.f32.mrb[197].mxu1  ;;  %v6690_v54 = vmul.f32 %v11806_v1, %v6619_v21  ;;  %4820 = vrot.lane.b32.xlu0 %v4644_v10, %s8018_s26 }
 0x380   :  { %4559 = vst [vmem:[#allocation4 + $0xab8] sm:$0xff] %v3430_v0  ;;  %v6952_v23 = vadd.f32 %v6888_v3, %v6824_v35  ;;  %v5221_v0 = vadd.f32 %v11674_v37, %v4949_v38  ;;  %v5620_v35 = vadd.f32 %v7980_v36, %v5492_v33  ;;  %v7981_v33 = vld [vmem:[#allocation4 + $0x440] sm:$0xff] }
 0x381   :  { %v6761_v53 = vadd.f32 %v11814_v7, %v6690_v54  ;;  %v11906_v29 = vpop.permute.xlu0 %5784 }
 0x382   :  { %v3434_v4 = vpop.f32.mrb[198].mxu1  ;;  %v11908_v9 = vpop.permute.xlu1 %5338  ;;  %7016 = vst.msk [vmem:[%s13161_s7 + $0x90] sm:$0xff] %vm94_vm0, %v6952_v23  ;;  %5802 = vrot.lane.b32.xlu1 %v11916_v11, %s8018_s26  ;;  %v5493_v3 = vadd.f32 %v11714_v63, %v5221_v0  ;;  %v5948_v38 = vadd.f32 %v11773_v40, %v5620_v35  ;;  %v4645_v63 = vld [vmem:[#allocation4 + $0x738] sm:$0xff]  ;;  %v6556_v35 = vld [vmem:[#allocation4 + $0x4f0] sm:$0xff] }
 0x383   :  { %4561 = vst [vmem:[#allocation4 + $0xac8] sm:$0xff] %v3434_v4  ;;  %v3436_v49 = vpop.f32.mrb[199].mxu1  ;;  %v6825_v13 = vmax.f32 %v6761_v53, 0.0  ;;  %5088 = vrot.lane.b32.xlu0 %v4644_v10, %s8019_s3 }
 0x384   :  { %4562 = vst [vmem:[#allocation4 + $0xad0] sm:$0xff] %v3436_v49  ;;  %v5621_v53 = vadd.f32 %v7981_v33, %v5493_v3  ;;  %v6220_v49 = vadd.f32 %v11860_v43, %v5948_v38 }
 0x385   :  { %v6953_v54 = vadd.f32 %v6889_v25, %v6825_v13  ;;  %v11921_v4 = vpop.permute.xlu0 %6052 }
 0x386   :  { %v3440_v21 = vpop.f32.mrb[200].mxu1  ;;  %v11923_v17 = vpop.permute.xlu1 %5786  ;;  %4822 = vrot.lane.b32.xlu1 %v4645_v63, %s8018_s26  ;;  %v5949_v13 = vadd.f32 %v11783_v39, %v5621_v53 }
 0x387   :  { %4564 = vst [vmem:[#allocation4 + $0xae0] sm:$0xff] %v3440_v21  ;;  %v3442_v37 = vpop.f32.mrb[201].mxu1  ;;  %7017 = vst.msk [vmem:[%s13161_s7 + $0x98] sm:$0xff] %vm94_vm0, %v6953_v54  ;;  %5356 = vrot.lane.b32.xlu0 %v4644_v10, %s8020_s29  ;;  %v7982_v54 = vld [vmem:[#allocation4 + $0x390] sm:$0xff] }
 0x388   :  { %4565 = vst [vmem:[#allocation4 + $0xae8] sm:$0xff] %v3442_v37  ;;  %v4950_v3 = vadd.f32 %v7982_v54, %v11657_v32  ;;  %v6221_v43 = vadd.f32 %v11872_v2, %v5949_v13  ;;  %v6557_v32 = vld [vmem:[#allocation4 + $0x508] sm:$0xff] }
 0x389   :  { %v6321_v0 = vpop.permute.xlu0 %6320  ;;  %v7983_v2 = vld [vmem:[#allocation4 + $0x3a8] sm:$0xff] }
 0x38a   :  { %v3446_v23 = vpop.f32.mrb[202].mxu1  ;;  %v11933_v40 = vpop.permute.xlu1 %6054  ;;  %v6492_v21 = vadd.f32 %v6321_v0, %v6220_v49  ;;  %5090 = vrot.lane.b32.xlu1 %v4645_v63, %s8019_s3  ;;  %v5222_v39 = vadd.f32 %v11692_v50, %v4950_v3  ;;  %v4951_v0 = vadd.f32 %v7983_v2, %v11666_v22  ;;  %v6890_v50 = vld [vmem:[%s13156_s0 + $0xa0] sm:$0xff] }
 0x38b   :  { %4567 = vst [vmem:[#allocation4 + $0xaf8] sm:$0xff] %v3446_v23  ;;  %v3448_v25 = vpop.f32.mrb[203].mxu1 }
 0x38c   :  { %4568 = vst [vmem:[#allocation4 + $0xb00] sm:$0xff] %v3448_v25  ;;  %v6620_v38 = vadd.f32 %v6556_v35, %v6492_v21  ;;  %v11942_v25 = vld [vmem:[#allocation4 + $0x728] sm:$0xff]  ;;  %v5494_v13 = vadd.f32 %v11733_v26, %v5222_v39  ;;  %v11963_v26 = vld [vmem:[#allocation4 + $0x740] sm:$0xff] }
 0x38d   :  { %v11940_v23 = vpop.permute.xlu0 %5340  ;;  %5804 = vrot.lane.b32.xlu0 %v11942_v25, %s8018_s26 }
 0x38e   :  { %v3452_v36 = vpop.f32.mrb[204].mxu1  ;;  %v6323_v33 = vpop.permute.xlu1 %6322  ;;  %v6691_v10 = vmul.f32 %v11806_v1, %v6620_v38  ;;  %5358 = vrot.lane.b32.xlu1 %v4645_v63, %s8020_s29  ;;  %v5223_v63 = vadd.f32 %v11704_v61, %v4951_v0  ;;  %v7984_v38 = vld [vmem:[#allocation4 + $0x458] sm:$0xff]  ;;  %v7985_v0 = vld [vmem:[#allocation4 + $0x3c0] sm:$0xff] }
 0x38f   :  { %v3454_v37 = vpop.f32.mrb[205].mxu1  ;;  %v6493_v53 = vadd.f32 %v6323_v33, %v6221_v43  ;;  %v5622_v33 = vadd.f32 %v7984_v38, %v5494_v13  ;;  %v6891_v61 = vld [vmem:[%s13156_s0 + $0xa8] sm:$0xff]  ;;  %v4952_v13 = vadd.f32 %v7985_v0, %v11684_v18  ;;  %v4647_v18 = vld [vmem:[#allocation4 + $0x768] sm:$0xff] }
 0x390   :  { %4571 = vst [vmem:[#allocation4 + $0xb18] sm:$0xff] %v3454_v37  ;;  %v6762_v21 = vadd.f32 %v11814_v7, %v6691_v10  ;;  %v5495_v37 = vadd.f32 %v11741_v58, %v5223_v63 }
 0x391   :  { %v6621_v35 = vadd.f32 %v6557_v32, %v6493_v53  ;;  %v11955_v54 = vpop.permute.xlu0 %5788  ;;  %6072 = vrot.lane.b32.xlu0 %v11942_v25, %s8019_s3  ;;  %v4646_v32 = vld [vmem:[#allocation4 + $0x750] sm:$0xff]  ;;  %v5950_v2 = vadd.f32 %v11847_v14, %v5622_v33  ;;  %v6558_v33 = vld [vmem:[#allocation4 + $0x520] sm:$0xff] }
 0x392   :  { %v3458_v49 = vpop.f32.mrb[206].mxu1  ;;  %v11957_v3 = vpop.permute.xlu1 %5342  ;;  %v6826_v43 = vmax.f32 %v6762_v21, 0.0  ;;  %5806 = vrot.lane.b32.xlu1 %v11963_v26, %s8018_s26  ;;  %v7986_v21 = vld [vmem:[#allocation4 + $0x470] sm:$0xff] }
 0x393   :  { %v3460_v36 = vpop.f32.mrb[207].mxu1  ;;  %v6692_v22 = vmul.f32 %v11806_v1, %v6621_v35  ;;  %v6222_v35 = vadd.f32 %v11921_v4, %v5950_v2  ;;  %v7987_v4 = vld [vmem:[#allocation4 + $0x3d8] sm:$0xff] }
 0x394   :  { %4574 = vst [vmem:[#allocation4 + $0xb30] sm:$0xff] %v3460_v36  ;;  %v6954_v39 = vadd.f32 %v6890_v50, %v6826_v43  ;;  %v5623_v36 = vadd.f32 %v7986_v21, %v5495_v37  ;;  %v5224_v43 = vadd.f32 %v11727_v20, %v4952_v13  ;;  %v4953_v37 = vadd.f32 %v7987_v4, %v11694_v46  ;;  %v6559_v13 = vld [vmem:[#allocation4 + $0x538] sm:$0xff]  ;;  %v7988_v21 = vld [vmem:[#allocation4 + $0x488] sm:$0xff] }
 0x395   :  { %v6763_v10 = vadd.f32 %v11814_v7, %v6692_v22  ;;  %v6057_v53 = vpop.permute.xlu0 %6056  ;;  %4824 = vrot.lane.b32.xlu0 %v4646_v32, %s8018_s26 }
 0x396   :  { %v11972_v49 = vpop.permute.xlu1 %5790  ;;  %7018 = vst.msk [vmem:[%s13161_s7 + $0xa0] sm:$0xff] %vm94_vm0, %v6954_v39  ;;  %6074 = vrot.lane.b32.xlu1 %v11963_v26, %s8019_s3  ;;  %v5951_v22 = vadd.f32 %v11862_v51, %v5623_v36  ;;  %v5496_v39 = vadd.f32 %v11764_v30, %v5224_v43  ;;  %v5225_v2 = vadd.f32 %v11735_v6, %v4953_v37 }
 0x397   :  { %v6827_v58 = vmax.f32 %v6763_v10, 0.0 }
 0x398   :  { %v6223_v20 = vadd.f32 %v11933_v40, %v5951_v22  ;;  %v5497_v46 = vadd.f32 %v11775_v8, %v5225_v2  ;;  %v5624_v30 = vadd.f32 %v7988_v21, %v5496_v39  ;;  %v7989_v22 = vld [vmem:[#allocation4 + $0x3f0] sm:$0xff] }
 0x399   :  { %v6955_v50 = vadd.f32 %v6891_v61, %v6827_v58  ;;  %v6325_v14 = vpop.permute.xlu0 %6324  ;;  %5092 = vrot.lane.b32.xlu0 %v4646_v32, %s8019_s3 }
 0x39a   :  { %v6059_v63 = vpop.permute.xlu1 %6058  ;;  %v6494_v38 = vadd.f32 %v6325_v14, %v6222_v35  ;;  %4826 = vrot.lane.b32.xlu1 %v4647_v18, %s8018_s26  ;;  %v6892_v35 = vld [vmem:[%s13156_s0 + $0xb0] sm:$0xff]  ;;  %v12010_v14 = vld [vmem:[#allocation4 + $0x758] sm:$0xff] }
 0x39b   :  { %7019 = vst.msk [vmem:[%s13161_s7 + $0xa8] sm:$0xff] %vm94_vm0, %v6955_v50 }
 0x39c   :  { %v6622_v51 = vadd.f32 %v6558_v33, %v6494_v38  ;;  %v4954_v38 = vadd.f32 %v7989_v22, %v11720_v24  ;;  %v7990_v33 = vld [vmem:[#allocation4 + $0x4a0] sm:$0xff] }
 0x39d   :  { %v11995_v10 = vpop.permute.xlu0 %5792  ;;  %5360 = vrot.lane.b32.xlu0 %v4646_v32, %s8020_s29  ;;  %v5952_v32 = vadd.f32 %v11906_v29, %v5624_v30  ;;  %v5625_v4 = vadd.f32 %v7990_v33, %v5497_v46  ;;  %v6893_v29 = vld [vmem:[%s13156_s0 + $0xb8] sm:$0xff] }
 0x39e   :  { %v6327_v61 = vpop.permute.xlu1 %6326  ;;  %v6693_v58 = vmul.f32 %v11806_v1, %v6622_v51  ;;  %5094 = vrot.lane.b32.xlu1 %v4647_v18, %s8019_s3 }
 0x39f   :  { %v6495_v0 = vadd.f32 %v6327_v61, %v6223_v20  ;;  %v6224_v37 = vadd.f32 %v6057_v53, %v5952_v32  ;;  %v6560_v61 = vld [vmem:[#allocation4 + $0x550] sm:$0xff]  ;;  %v5953_v24 = vadd.f32 %v11923_v17, %v5625_v4 }
 0x3a0   :  { %v6764_v40 = vadd.f32 %v11814_v7, %v6693_v58  ;;  %v5226_v58 = vadd.f32 %v11757_v12, %v4954_v38  ;;  %v6894_v4 = vld [vmem:[%s13156_s0 + $0xc0] sm:$0xff] }
 0x3a1   :  { %v6623_v36 = vadd.f32 %v6559_v13, %v6495_v0  ;;  %v12006_v6 = vpop.permute.xlu0 %6060  ;;  %5808 = vrot.lane.b32.xlu0 %v12010_v14, %s8018_s26  ;;  %v12032_v0 = vld [vmem:[#allocation4 + $0x770] sm:$0xff]  ;;  %v7991_v13 = vld [vmem:[#allocation4 + $0x408] sm:$0xff]  ;;  %v6225_v17 = vadd.f32 %v6059_v63, %v5953_v24 }
 0x3a2   :  { %v12008_v50 = vpop.permute.xlu1 %5794  ;;  %v6828_v43 = vmax.f32 %v6764_v40, 0.0  ;;  %5362 = vrot.lane.b32.xlu1 %v4647_v18, %s8020_s29  ;;  %v4955_v46 = vadd.f32 %v7991_v13, %v11729_v41  ;;  %v5498_v12 = vadd.f32 %v11834_v47, %v5226_v58  ;;  %v7992_v47 = vld [vmem:[#allocation4 + $0x420] sm:$0xff] }
 0x3a3   :  { %v6694_v8 = vmul.f32 %v11806_v1, %v6623_v36  ;;  %v4956_v63 = vadd.f32 %v7992_v47, %v11751_v5  ;;  %v4668_v5 = vld [vmem:[#allocation4 + $0x780] sm:$0xff] }
 0x3a4   :  { %v6956_v39 = vadd.f32 %v6892_v35, %v6828_v43  ;;  %v6561_v35 = vld [vmem:[#allocation4 + $0x568] sm:$0xff]  ;;  %v5227_v32 = vadd.f32 %v11766_v31, %v4955_v46  ;;  %v5626_v31 = vadd.f32 %v11634_v57, %v5498_v12  ;;  %v7993_v57 = vld [vmem:[#allocation4 + $0x438] sm:$0xff] }
 0x3a5   :  { %v6765_v20 = vadd.f32 %v11814_v7, %v6694_v8  ;;  %v6329_v51 = vpop.permute.xlu0 %6328  ;;  %6076 = vrot.lane.b32.xlu0 %v12010_v14, %s8019_s3  ;;  %v5228_v33 = vadd.f32 %v11820_v60, %v4956_v63  ;;  %v6563_v63 = vld [vmem:[#allocation4 + $0x598] sm:$0xff] }
 0x3a6   :  { %v12022_v2 = vpop.permute.xlu1 %6062  ;;  %7020 = vst.msk [vmem:[%s13161_s7 + $0xb0] sm:$0xff] %vm94_vm0, %v6956_v39  ;;  %v6496_v18 = vadd.f32 %v6329_v51, %v6224_v37  ;;  %5810 = vrot.lane.b32.xlu1 %v12032_v0, %s8018_s26  ;;  %v5499_v8 = vadd.f32 %v11849_v19, %v5227_v32  ;;  %v4957_v51 = vadd.f32 %v7993_v57, %v11759_v16  ;;  %v6895_v16 = vld [vmem:[%s13156_s0 + $0xc8] sm:$0xff]  ;;  %v7995_v32 = vld [vmem:[#allocation4 + $0x468] sm:$0xff] }
 0x3a7   :  { %v6829_v53 = vmax.f32 %v6765_v20, 0.0  ;;  %v5954_v20 = vadd.f32 %v11955_v54, %v5626_v31  ;;  %v5500_v58 = vadd.f32 %v11889_v48, %v5228_v33 }
 0x3a8   :  { %v6624_v30 = vadd.f32 %v6560_v61, %v6496_v18  ;;  %v7994_v61 = vld [vmem:[#allocation4 + $0x450] sm:$0xff]  ;;  %v5627_v24 = vadd.f32 %v11647_v62, %v5499_v8  ;;  %v5229_v13 = vadd.f32 %v11836_v55, %v4957_v51  ;;  %v4669_v55 = vld [vmem:[#allocation4 + $0x798] sm:$0xff] }
 0x3a9   :  { %v6957_v21 = vadd.f32 %v6893_v29, %v6829_v53  ;;  %v12038_v40 = vpop.permute.xlu0 %5796  ;;  %6344 = vrot.lane.b32.xlu0 %v12010_v14, %s8020_s29  ;;  %v4958_v60 = vadd.f32 %v7994_v61, %v11801_v56  ;;  %v6226_v54 = vadd.f32 %v12006_v6, %v5954_v20  ;;  %v6562_v56 = vld [vmem:[#allocation4 + $0x580] sm:$0xff] }
 0x3aa   :  { %v6331_v36 = vpop.permute.xlu1 %6330  ;;  %v6695_v41 = vmul.f32 %v11806_v1, %v6624_v30  ;;  %6078 = vrot.lane.b32.xlu1 %v12032_v0, %s8019_s3  ;;  %v5628_v30 = vadd.f32 %v11668_v59, %v5500_v58 }
 0x3ab   :  { %7021 = vst.msk [vmem:[%s13161_s7 + $0xb8] sm:$0xff] %vm94_vm0, %v6957_v21  ;;  %v6497_v43 = vadd.f32 %v6331_v36, %v6225_v17  ;;  %v5230_v48 = vadd.f32 %v11879_v52, %v4958_v60  ;;  %v5955_v17 = vadd.f32 %v11972_v49, %v5627_v24  ;;  %v5501_v21 = vadd.f32 %v11908_v9, %v5229_v13  ;;  %v6566_v24 = vld [vmem:[#allocation4 + $0x5e0] sm:$0xff] }
 0x3ac   :  { %v6766_v22 = vadd.f32 %v11814_v7, %v6695_v41  ;;  %v4959_v41 = vadd.f32 %v7995_v32, %v11822_v27  ;;  %v5956_v8 = vadd.f32 %v11995_v10, %v5628_v30 }
 0x3ad   :  { %v6625_v38 = vadd.f32 %v6561_v35, %v6497_v43  ;;  %v6065_v37 = vpop.permute.xlu0 %6064  ;;  %4828 = vrot.lane.b32.xlu0 %v4668_v5, %s8018_s26  ;;  %v5502_v52 = vadd.f32 %v11940_v23, %v5230_v48  ;;  %v6227_v49 = vadd.f32 %v12022_v2, %v5955_v17  ;;  %v5629_v2 = vadd.f32 %v11678_v15, %v5501_v21  ;;  %v12105_v15 = vld [vmem:[#allocation4 + $0x788] sm:$0xff] }
 0x3ae   :  { %v12058_v39 = vpop.permute.xlu1 %5798  ;;  %v6830_v29 = vmax.f32 %v6766_v22, 0.0  ;;  %6346 = vrot.lane.b32.xlu1 %v12032_v0, %s8020_s29  ;;  %v5231_v23 = vadd.f32 %v11891_v44, %v4959_v41  ;;  %v6228_v31 = vadd.f32 %v6065_v37, %v5956_v8  ;;  %v6564_v44 = vld [vmem:[#allocation4 + $0x5b0] sm:$0xff] }
 0x3af   :  { %v6696_v19 = vmul.f32 %v11806_v1, %v6625_v38  ;;  %v5630_v27 = vadd.f32 %v11696_v28, %v5502_v52  ;;  %v5957_v33 = vadd.f32 %v12008_v50, %v5629_v2 }
 0x3b0   :  { %v6958_v53 = vadd.f32 %v6894_v4, %v6830_v29  ;;  %v5503_v38 = vadd.f32 %v11957_v3, %v5231_v23  ;;  %v6896_v4 = vld [vmem:[%s13156_s0 + $0xd0] sm:$0xff]  ;;  %v4996_v23 = vld [vmem:[#allocation4 + $0x7b0] sm:$0xff] }
 0x3b1   :  { %v6767_v18 = vadd.f32 %v11814_v7, %v6696_v19  ;;  %v6333_v46 = vpop.permute.xlu0 %6332  ;;  %5096 = vrot.lane.b32.xlu0 %v4668_v5, %s8019_s3  ;;  %v5958_v29 = vadd.f32 %v12038_v40, %v5630_v27  ;;  %v6897_v40 = vld [vmem:[%s13156_s0 + $0xd8] sm:$0xff] }
 0x3b2   :  { %v6067_v12 = vpop.permute.xlu1 %6066  ;;  %7022 = vst.msk [vmem:[%s13161_s7 + $0xc0] sm:$0xff] %vm94_vm0, %v6958_v53  ;;  %v6498_v6 = vadd.f32 %v6333_v46, %v6226_v54  ;;  %4830 = vrot.lane.b32.xlu1 %v4669_v55, %s8018_s26  ;;  %v5631_v60 = vadd.f32 %v11708_v45, %v5503_v38  ;;  %v6565_v53 = vld [vmem:[#allocation4 + $0x5c8] sm:$0xff]  ;;  %v12124_v45 = vld [vmem:[#allocation4 + $0x7a0] sm:$0xff] }
 0x3b3   :  { %v6831_v62 = vmax.f32 %v6767_v18, 0.0  ;;  %v6229_v3 = vadd.f32 %v6067_v12, %v5957_v33 }
 0x3b4   :  { %v6626_v35 = vadd.f32 %v6562_v56, %v6498_v6  ;;  %v5959_v56 = vadd.f32 %v12058_v39, %v5631_v60  ;;  %v6898_v6 = vld [vmem:[%s13156_s0 + $0xe0] sm:$0xff]  ;;  %v5268_v60 = vld [vmem:[#allocation4 + $0x7e0] sm:$0xff] }
 0x3b5   :  { %v6959_v36 = vadd.f32 %v6895_v16, %v6831_v62  ;;  %v6069_v43 = vpop.permute.xlu0 %6068  ;;  %5364 = vrot.lane.b32.xlu0 %v4668_v5, %s8020_s29 }
 0x3b6   :  { %v6335_v47 = vpop.permute.xlu1 %6334  ;;  %v6697_v59 = vmul.f32 %v11806_v1, %v6626_v35  ;;  %5098 = vrot.lane.b32.xlu1 %v4669_v55, %s8019_s3  ;;  %v6230_v57 = vadd.f32 %v6069_v43, %v5958_v29 }
 0x3b7   :  { %7023 = vst.msk [vmem:[%s13161_s7 + $0xc8] sm:$0xff] %vm94_vm0, %v6959_v36  ;;  %v6499_v9 = vadd.f32 %v6335_v47, %v6227_v49  ;;  %v6567_v36 = vld [vmem:[#allocation4 + $0x5f8] sm:$0xff]  ;;  %v6900_v47 = vld [vmem:[%s13156_s0 + $0xf0] sm:$0xff] }
 0x3b8   :  { %v6768_v10 = vadd.f32 %v11814_v7, %v6697_v59 }
 0x3b9   :  { %v6627_v22 = vadd.f32 %v6563_v63, %v6499_v9  ;;  %v6337_v5 = vpop.permute.xlu0 %6336  ;;  %5812 = vrot.lane.b32.xlu0 %v12105_v15, %s8018_s26  ;;  %v6899_v63 = vld [vmem:[%s13156_s0 + $0xe8] sm:$0xff] }
 0x3ba   :  { %v6071_v20 = vpop.permute.xlu1 %6070  ;;  %v6832_v28 = vmax.f32 %v6768_v10, 0.0  ;;  %v6500_v19 = vadd.f32 %v6337_v5, %v6228_v31  ;;  %5366 = vrot.lane.b32.xlu1 %v4669_v55, %s8020_s29 }
 0x3bb   :  { %v6698_v37 = vmul.f32 %v11806_v1, %v6627_v22  ;;  %v6231_v55 = vadd.f32 %v6071_v20, %v5959_v56 }
 0x3bc   :  { %v6960_v50 = vadd.f32 %v6896_v4, %v6832_v28  ;;  %v6628_v61 = vadd.f32 %v6564_v44, %v6500_v19  ;;  %v12187_v28 = vld [vmem:[#allocation4 + $0x7b8] sm:$0xff] }
 0x3bd   :  { %v6769_v51 = vadd.f32 %v11814_v7, %v6698_v37  ;;  %v6341_v58 = vpop.permute.xlu0 %6340  ;;  %6080 = vrot.lane.b32.xlu0 %v12105_v15, %s8019_s3 }
 0x3be   :  { %v6339_v54 = vpop.permute.xlu1 %6338  ;;  %7024 = vst.msk [vmem:[%s13161_s7 + $0xd0] sm:$0xff] %vm94_vm0, %v6960_v50  ;;  %v6699_v13 = vmul.f32 %v11806_v1, %v6628_v61  ;;  %v6502_v16 = vadd.f32 %v6341_v58, %v6230_v57  ;;  %5814 = vrot.lane.b32.xlu1 %v12124_v45, %s8018_s26 }
 0x3bf   :  { %v6833_v18 = vmax.f32 %v6769_v51, 0.0  ;;  %v6501_v46 = vadd.f32 %v6339_v54, %v6229_v3  ;;  %v12202_v3 = vld [vmem:[#allocation4 + $0x7d0] sm:$0xff]  ;;  %v5269_v54 = vld [vmem:[#allocation4 + $0x7f8] sm:$0xff] }
 0x3c0   :  { %v6770_v48 = vadd.f32 %v11814_v7, %v6699_v13  ;;  %v6630_v17 = vadd.f32 %v6566_v24, %v6502_v16  ;;  %v12225_v24 = vld [vmem:[#allocation4 + $0x7e8] sm:$0xff]  ;;  %v12236_v13 = vld [vmem:[#allocation4 + $0x800] sm:$0xff]  ;;  %v2280_v16 = vld [vmem:[#allocation3 + $0x3f0] sm:$0xff] }
 0x3c1   :  { %v6961_v12 = vadd.f32 %v6897_v40, %v6833_v18  ;;  %v6629_v62 = vadd.f32 %v6565_v53, %v6501_v46  ;;  %v12133_v21 = vpop.permute.xlu0 %4800  ;;  %6348 = vrot.lane.b32.xlu0 %v12105_v15, %s8020_s29  ;;  %13485 = vst [vmem:[#allocation20_spill] sm:$0xff] %v12236_v13  ;;  %7890 = vmatprep.mubr.msk.f32.mxu0 %vm94_vm0, %v2280_v16  ;;  %v2281_v46 = vld [vmem:[#allocation3 + $0x3f8] sm:$0xff] }
 0x3c2   :  { %v6343_v30 = vpop.permute.xlu1 %6342  ;;  %v6834_v39 = vmax.f32 %v6770_v48, 0.0  ;;  %v6701_v52 = vmul.f32 %v11806_v1, %v6630_v17  ;;  %6082 = vrot.lane.b32.xlu1 %v12124_v45, %s8019_s3  ;;  %7891 = vmatmul.mubr.msk.f32.gmra.mrb[222].mxu0 %vm94_vm0, %v2281_v46 }
 0x3c3   :  { %7025 = vst.msk [vmem:[%s13161_s7 + $0xd8] sm:$0xff] %vm94_vm0, %v6961_v12  ;;  %v6700_v49 = vmul.f32 %v11806_v1, %v6629_v62  ;;  %v6503_v35 = vadd.f32 %v6343_v30, %v6231_v55  ;;  %7257 = vmatmul.mubr.msk.f32.gmra.mrb[220].mxu1 %vm94_vm0, %v2280_v16  ;;  %v12257_v62 = vld [vmem:[#allocation4 + $0x818] sm:$0xff]  ;;  %v12269_v55 = vld [vmem:[#allocation4 + $0x830] sm:$0xff] }
 0x3c4   :  { %v6962_v32 = vadd.f32 %v6898_v6, %v6834_v39  ;;  %v6772_v41 = vadd.f32 %v11814_v7, %v6701_v52  ;;  %3504 = vmatprep.mubr.f32.mxu1 %v13283_v42  ;;  %13486 = vst [vmem:[#allocation23_spill] sm:$0xff] %v12257_v62  ;;  %13487 = vst [vmem:[#allocation24_spill] sm:$0xff] %v12269_v55 }
 0x3c5   :  { %v6771_v43 = vadd.f32 %v11814_v7, %v6700_v49  ;;  %v6631_v8 = vadd.f32 %v6567_v36, %v6503_v35  ;;  %v12153_v59 = vpop.permute.xlu0 %4804  ;;  %5100 = vrot.lane.b32.xlu0 %v4996_v23, %s8019_s3  ;;  %v5668_v36 = vld [vmem:[#allocation4 + $0x848] sm:$0xff] }
 0x3c6   :  { %v12155_v9 = vpop.permute.xlu1 %4802  ;;  %7026 = vst.msk [vmem:[%s13161_s7 + $0xe0] sm:$0xff] %vm94_vm0, %v6962_v32  ;;  %v6836_v2 = vmax.f32 %v6772_v41, 0.0  ;;  %6350 = vrot.lane.b32.xlu1 %v12124_v45, %s8020_s29  ;;  %v5669_v41 = vld [vmem:[#allocation4 + $0x860] sm:$0xff] }
 0x3c7   :  { %v6835_v27 = vmax.f32 %v6771_v43, 0.0  ;;  %v6702_v31 = vmul.f32 %v11806_v1, %v6631_v8  ;;  %v6901_v1 = vld [vmem:[%s13156_s0 + $0xf8] sm:$0xff]  ;;  %7258 = vmatmul.mubr.msk.f32.gmra.mrb[222].mxu1 %vm94_vm0, %v2281_v46 }
 0x3c8   :  { %v6964_v10 = vadd.f32 %v6900_v47, %v6836_v2 }
 0x3c9   :  { %v6963_v22 = vadd.f32 %v6899_v63, %v6835_v27  ;;  %v6773_v38 = vadd.f32 %v11814_v7, %v6702_v31  ;;  %v12166_v33 = vpop.permute.xlu0 %5072  ;;  %5368 = vrot.lane.b32.xlu0 %v4996_v23, %s8020_s29  ;;  %v4997_v7 = vld [vmem:[#allocation4 + $0x7c8] sm:$0xff]  ;;  %v5996_v23 = vld [vmem:[#allocation4 + $0x878] sm:$0xff]  ;;  %v5997_v31 = vld [vmem:[#allocation4 + $0x890] sm:$0xff] }
 0x3ca   :  { %v12168_v4 = vpop.permute.xlu1 %4806  ;;  %7028 = vst.msk [vmem:[%s13161_s7 + $0xf0] sm:$0xff] %vm94_vm0, %v6964_v10  ;;  %5102 = vrot.lane.b32.xlu1 %v4997_v7, %s8019_s3 }
 0x3cb   :  { %7027 = vst.msk [vmem:[%s13161_s7 + $0xe8] sm:$0xff] %vm94_vm0, %v6963_v22  ;;  %v6837_v5 = vmax.f32 %v6773_v38, 0.0  ;;  %v6268_v38 = vld [vmem:[#allocation4 + $0x8a8] sm:$0xff] }
 0x3cd   :  { %v6965_v44 = vadd.f32 %v6901_v1, %v6837_v5  ;;  %v12183_v20 = vpop.permute.xlu0 %4808  ;;  %5816 = vrot.lane.b32.xlu0 %v12187_v28, %s8018_s26  ;;  %v12318_v5 = vld [vmem:[#allocation4 + $0x930] sm:$0xff] }
 0x3ce   :  { %v12185_v29 = vpop.permute.xlu1 %5074  ;;  %5370 = vrot.lane.b32.xlu1 %v4997_v7, %s8020_s29  ;;  %13488 = vst [vmem:[#allocation27_spill] sm:$0xff] %v12318_v5 }
 0x3cf   :  { %7029 = vst.msk [vmem:[%s13161_s7 + $0xf8] sm:$0xff] %vm94_vm0, %v6965_v44  ;;  %v6269_v44 = vld [vmem:[#allocation4 + $0x8c0] sm:$0xff] }
 0x3d1   :  { %v12196_v37 = vpop.permute.xlu0 %5076  ;;  %6084 = vrot.lane.b32.xlu0 %v12187_v28, %s8019_s3 }
 0x3d2   :  { %v12198_v19 = vpop.permute.xlu1 %4810  ;;  %5818 = vrot.lane.b32.xlu1 %v12202_v3, %s8018_s26 }
 0x3d5   :  { %v12206_v50 = vpop.permute.xlu0 %5344  ;;  %6352 = vrot.lane.b32.xlu0 %v12187_v28, %s8020_s29 }
 0x3d6   :  { %v12208_v57 = vpop.permute.xlu1 %5078  ;;  %6086 = vrot.lane.b32.xlu1 %v12202_v3, %s8019_s3 }
 0x3d9   :  { %v12214_v51 = vpop.permute.xlu0 %4812  ;;  %5372 = vrot.lane.b32.xlu0 %v5268_v60, %s8020_s29  ;;  %v4632_v60 = vld [vmem:[#allocation4 + $0x600] sm:$0xff] }
 0x3da   :  { %v12216_v61 = vpop.permute.xlu1 %5346  ;;  %6354 = vrot.lane.b32.xlu1 %v12202_v3, %s8020_s29  ;;  %v4960_v16 = vadd.f32 %v12133_v21, %v4632_v60  ;;  %v12339_v21 = vld [vmem:[#allocation4 + $0x978] sm:$0xff] }
 0x3db   :  { %13491 = vst [vmem:[#allocation26_spill] sm:$0xff] %v12339_v21 }
 0x3dd   :  { %v12221_v40 = vpop.permute.xlu0 %5080  ;;  %5820 = vrot.lane.b32.xlu0 %v12225_v24, %s8018_s26 }
 0x3de   :  { %v12223_v58 = vpop.permute.xlu1 %4814  ;;  %5374 = vrot.lane.b32.xlu1 %v5269_v54, %s8020_s29  ;;  %v12323_v54 = vld [vmem:[#allocation4 + $0x960] sm:$0xff] }
 0x3df   :  { %13489 = vst [vmem:[#allocation5_spill] sm:$0xff] %v12323_v54 }
 0x3e1   :  { %v12230_v53 = vpop.permute.xlu0 %5348  ;;  %6088 = vrot.lane.b32.xlu0 %v12225_v24, %s8019_s3 }
 0x3e2   :  { %v12232_v18 = vpop.permute.xlu1 %5082  ;;  %5822 = vrot.lane.b32.xlu1 %v12236_v13, %s8018_s26 }
 0x3e5   :  { %v12243_v56 = vpop.permute.xlu0 %4816  ;;  %6356 = vrot.lane.b32.xlu0 %v12225_v24, %s8020_s29 }
 0x3e6   :  { %v12245_v12 = vpop.permute.xlu1 %5350  ;;  %6090 = vrot.lane.b32.xlu1 %v12236_v13, %s8019_s3 }
 0x3e9   :  { %v12253_v48 = vpop.permute.xlu0 %5084  ;;  %5824 = vrot.lane.b32.xlu0 %v12257_v62, %s8018_s26 }
 0x3ea   :  { %v12255_v17 = vpop.permute.xlu1 %4818  ;;  %6358 = vrot.lane.b32.xlu1 %v12236_v13, %s8020_s29 }
 0x3ed   :  { %v12263_v42 = vpop.permute.xlu0 %5352  ;;  %6092 = vrot.lane.b32.xlu0 %v12257_v62, %s8019_s3 }
 0x3ee   :  { %v12265_v6 = vpop.permute.xlu1 %5086  ;;  %5826 = vrot.lane.b32.xlu1 %v12269_v55, %s8018_s26 }
 0x3f1   :  { %v12273_v30 = vpop.permute.xlu0 %5800  ;;  %6360 = vrot.lane.b32.xlu0 %v12257_v62, %s8020_s29  ;;  %v12362_v62 = vld [vmem:[#allocation4 + $0x9a8] sm:$0xff] }
 0x3f2   :  { %v12275_v39 = vpop.permute.xlu1 %5354  ;;  %6094 = vrot.lane.b32.xlu1 %v12269_v55, %s8019_s3  ;;  %13493 = vst [vmem:[#allocation6_spill] sm:$0xff] %v12362_v62 }
 0x3f5   :  { %v12281_v52 = vpop.permute.xlu0 %4820  ;;  %5828 = vrot.lane.b32.xlu0 %v5668_v36, %s8018_s26 }
 0x3f6   :  { %v12283_v49 = vpop.permute.xlu1 %5802  ;;  %6362 = vrot.lane.b32.xlu1 %v12269_v55, %s8020_s29 }
 0x3f9   :  { %v12288_v35 = vpop.permute.xlu0 %5088  ;;  %6096 = vrot.lane.b32.xlu0 %v5668_v36, %s8019_s3 }
 0x3fa   :  { %v12290_v32 = vpop.permute.xlu1 %4822  ;;  %5830 = vrot.lane.b32.xlu1 %v5669_v41, %s8018_s26 }
 0x3fd   :  { %v12294_v43 = vpop.permute.xlu0 %5356  ;;  %6364 = vrot.lane.b32.xlu0 %v5668_v36, %s8020_s29 }
 0x3fe   :  { %v12296_v47 = vpop.permute.xlu1 %5090  ;;  %6098 = vrot.lane.b32.xlu1 %v5669_v41, %s8019_s3 }
 0x401   :  { %v12300_v63 = vpop.permute.xlu0 %5804  ;;  %6100 = vrot.lane.b32.xlu0 %v5996_v23, %s8019_s3 }
 0x402   :  { %v12302_v8 = vpop.permute.xlu1 %5358  ;;  %6366 = vrot.lane.b32.xlu1 %v5669_v41, %s8020_s29  ;;  %v5232_v41 = vadd.f32 %v12166_v33, %v4960_v16  ;;  %v5568_v16 = vld [vmem:[#allocation4 + $0x6c8] sm:$0xff] }
 0x405   :  { %v6073_v2 = vpop.permute.xlu0 %6072  ;;  %6368 = vrot.lane.b32.xlu0 %v5996_v23, %s8020_s29  ;;  %v12333_v23 = vld [vmem:[#allocation4 + $0x948] sm:$0xff] }
 0x406   :  { %v12306_v27 = vpop.permute.xlu1 %5806  ;;  %6102 = vrot.lane.b32.xlu1 %v5997_v31, %s8019_s3  ;;  %13490 = vst [vmem:[#allocation28_spill] sm:$0xff] %v12333_v23 }
 0x409   :  { %v12310_v10 = vpop.permute.xlu0 %4824  ;;  %6372 = vrot.lane.b32.xlu0 %v6268_v38, %s8020_s29 }
 0x40a   :  { %v6075_v22 = vpop.permute.xlu1 %6074  ;;  %6370 = vrot.lane.b32.xlu1 %v5997_v31, %s8020_s29  ;;  %v4633_v31 = vld [vmem:[#allocation4 + $0x618] sm:$0xff] }
 0x40b   :  { %v4961_v38 = vadd.f32 %v12155_v9, %v4633_v31 }
 0x40d   :  { %v12314_v1 = vpop.permute.xlu0 %5092  ;;  %4832 = vrot.lane.b32.xlu0 %v12318_v5, %s8018_s26  ;;  %v5233_v33 = vadd.f32 %v12185_v29, %v4961_v38  ;;  %v5569_v29 = vld [vmem:[#allocation4 + $0x6e0] sm:$0xff] }
 0x40e   :  { %v12316_v7 = vpop.permute.xlu1 %4826  ;;  %6374 = vrot.lane.b32.xlu1 %v6269_v44, %s8020_s29  ;;  %v5504_v44 = vadd.f32 %v12206_v50, %v5232_v41 }
 0x40f   :  { %v5505_v9 = vadd.f32 %v12216_v61, %v5233_v33 }
 0x410   :  { %v5632_v50 = vadd.f32 %v5568_v16, %v5504_v44 }
 0x411   :  { %v12326_v46 = vpop.permute.xlu0 %5360  ;;  %4836 = vrot.lane.b32.xlu0 %v12323_v54, %s8018_s26  ;;  %v5633_v38 = vadd.f32 %v5569_v29, %v5505_v9 }
 0x412   :  { %v12328_v36 = vpop.permute.xlu1 %5094  ;;  %4834 = vrot.lane.b32.xlu1 %v12333_v23, %s8018_s26  ;;  %v12350_v23 = vld [vmem:[#allocation4 + $0x990] sm:$0xff]  ;;  %v5960_v55 = vadd.f32 %v12273_v30, %v5632_v50 }
 0x413   :  { %13492 = vst [vmem:[#allocation11_spill] sm:$0xff] %v12350_v23  ;;  %v5961_v44 = vadd.f32 %v12283_v49, %v5633_v38  ;;  %v6568_v30 = vld [vmem:[#allocation4 + $0x790] sm:$0xff] }
 0x414   :  { %v6902_v38 = vld [vmem:[%s13156_s0 + $0x100] sm:$0xff] }
 0x415   :  { %v12341_v60 = vpop.permute.xlu0 %5808  ;;  %5104 = vrot.lane.b32.xlu0 %v12323_v54, %s8019_s3  ;;  %v6232_v54 = vadd.f32 %v6073_v2, %v5960_v55  ;;  %v6233_v16 = vadd.f32 %v6075_v22, %v5961_v44  ;;  %v12376_v2 = vld [vmem:[%s13159_s5] ss:$0 sm:$0xff] }
 0x416   :  { %v12343_v5 = vpop.permute.xlu1 %5362  ;;  %4838 = vrot.lane.b32.xlu1 %v12339_v21, %s8018_s26  ;;  %v12386_v22 = vld [vmem:[%s13160_s6] ss:$0 sm:$0xff] }
 0x419   :  { %v12353_v41 = vpop.permute.xlu0 %6076  ;;  %4840 = vrot.lane.b32.xlu0 %v12350_v23, %s8018_s26 }
 0x41a   :  { %v12355_v31 = vpop.permute.xlu1 %5810  ;;  %5106 = vrot.lane.b32.xlu1 %v12339_v21, %s8019_s3 }
 0x41d   :  { %v6345_v13 = vpop.permute.xlu0 %6344  ;;  %5108 = vrot.lane.b32.xlu0 %v12350_v23, %s8019_s3 }
 0x41e   :  { %v12364_v61 = vpop.permute.xlu1 %6078  ;;  %v6504_v33 = vadd.f32 %v6345_v13, %v6232_v54  ;;  %4842 = vrot.lane.b32.xlu1 %v12362_v62, %s8018_s26  ;;  %v6569_v54 = vld [vmem:[#allocation4 + $0x7a8] sm:$0xff] }
 0x420   :  { %v6632_v50 = vadd.f32 %v6568_v30, %v6504_v33  ;;  %v12396_v30 = vld [vmem:[#allocation4 + $0x9c0] sm:$0xff] }
 0x421   :  { %v12371_v21 = vpop.permute.xlu0 %4828  ;;  %5376 = vrot.lane.b32.xlu0 %v12350_v23, %s8020_s29  ;;  %13495 = vst [vmem:[#allocation29_spill] sm:$0xff] %v12396_v30  ;;  %v6903_v23 = vld [vmem:[%s13156_s0 + $0x108] sm:$0xff] }
 0x422   :  { %v6347_v55 = vpop.permute.xlu1 %6346  ;;  %v6703_v49 = vmul.f32 %v12376_v2, %v6632_v50  ;;  %5110 = vrot.lane.b32.xlu1 %v12362_v62, %s8019_s3 }
 0x423   :  { %v6505_v13 = vadd.f32 %v6347_v55, %v6233_v16  ;;  %v7998_v55 = vld [vmem:[#allocation4 + $0x630] sm:$0xff] }
 0x424   :  { %v6774_v9 = vadd.f32 %v12386_v22, %v6703_v49  ;;  %v4962_v49 = vadd.f32 %v7998_v55, %v12153_v59  ;;  %v12419_v59 = vld [vmem:[#allocation4 + $0x9d8] sm:$0xff] }
 0x425   :  { %v6633_v29 = vadd.f32 %v6569_v54, %v6505_v13  ;;  %v12392_v44 = vpop.permute.xlu0 %5096  ;;  %4844 = vrot.lane.b32.xlu0 %v12396_v30, %s8018_s26  ;;  %13496 = vst [vmem:[#allocation12_spill] sm:$0xff] %v12419_v59 }
 0x426   :  { %v12394_v33 = vpop.permute.xlu1 %4830  ;;  %v6838_v16 = vmax.f32 %v6774_v9, 0.0  ;;  %5378 = vrot.lane.b32.xlu1 %v12362_v62, %s8020_s29 }
 0x427   :  { %13494 = vst [vmem:[#allocation10_spill] sm:$0xff] %v12394_v33  ;;  %v6704_v50 = vmul.f32 %v12376_v2, %v6633_v29  ;;  %v5234_v29 = vadd.f32 %v12196_v37, %v4962_v49 }
 0x428   :  { %v6966_v13 = vadd.f32 %v6902_v38, %v6838_v16  ;;  %v7999_v38 = vld [vmem:[#allocation4 + $0x648] sm:$0xff] }
 0x429   :  { %v6775_v54 = vadd.f32 %v12386_v22, %v6704_v50  ;;  %v12408_v33 = vpop.permute.xlu0 %5364  ;;  %5112 = vrot.lane.b32.xlu0 %v12396_v30, %s8019_s3  ;;  %v4963_v16 = vadd.f32 %v7999_v38, %v12168_v4  ;;  %v5506_v50 = vadd.f32 %v12230_v53, %v5234_v29  ;;  %v12446_v29 = vld [vmem:[#allocation4 + $0x9f0] sm:$0xff] }
 0x42a   :  { %v12410_v9 = vpop.permute.xlu1 %5098  ;;  %7030 = vst.msk [vmem:[%s13161_s7 + $0x100] sm:$0xff] %vm94_vm0, %v6966_v13  ;;  %4846 = vrot.lane.b32.xlu1 %v12419_v59, %s8018_s26  ;;  %13497 = vst [vmem:[#allocation14_spill] sm:$0xff] %v12446_v29 }
 0x42b   :  { %v6839_v62 = vmax.f32 %v6775_v54, 0.0  ;;  %v5235_v13 = vadd.f32 %v12208_v57, %v4963_v16  ;;  %v3464_v54 = vpop.f32.mrb[208].mxu1 }
 0x42c   :  { %v12438_v4 = vpop.f32.mrb[209].mxu1 }
 0x42d   :  { %v6967_v37 = vadd.f32 %v6903_v23, %v6839_v62  ;;  %v12425_v55 = vpop.permute.xlu0 %5812  ;;  %5380 = vrot.lane.b32.xlu0 %v12396_v30, %s8020_s29  ;;  %v5507_v53 = vadd.f32 %v12245_v12, %v5235_v13  ;;  %v5634_v62 = vadd.f32 %v11893_v34, %v5506_v50  ;;  %v3470_v16 = vpop.f32.mrb[210].mxu1 }
 0x42e   :  { %v12427_v49 = vpop.permute.xlu1 %5366  ;;  %5114 = vrot.lane.b32.xlu1 %v12419_v59, %s8019_s3 }
 0x42f   :  { %7031 = vst.msk [vmem:[%s13161_s7 + $0x108] sm:$0xff] %vm94_vm0, %v6967_v37  ;;  %v5962_v38 = vadd.f32 %v12300_v63, %v5634_v62  ;;  %v12453_v37 = vpop.f32.mrb[211].mxu1  ;;  %v5635_v12 = vadd.f32 %v11916_v11, %v5507_v53  ;;  %v12462_v63 = vld [vmem:[#allocation4 + $0xa08] sm:$0xff]  ;;  %v6570_v62 = vld [vmem:[#allocation4 + $0x7c0] sm:$0xff] }
 0x430   :  { %13498 = vst [vmem:[#allocation9_spill] sm:$0xff] %v12453_v37 }
 0x431   :  { %v12442_v23 = vpop.permute.xlu0 %6080  ;;  %4848 = vrot.lane.b32.xlu0 %v12446_v29, %s8018_s26  ;;  %v6234_v34 = vadd.f32 %v12353_v41, %v5962_v38  ;;  %v5963_v54 = vadd.f32 %v12306_v27, %v5635_v12  ;;  %v6571_v12 = vld [vmem:[#allocation4 + $0x7d8] sm:$0xff] }
 0x432   :  { %v12444_v57 = vpop.permute.xlu1 %5814  ;;  %5382 = vrot.lane.b32.xlu1 %v12419_v59, %s8020_s29 }
 0x433   :  { %v6235_v16 = vadd.f32 %v12364_v61, %v5963_v54 }
 0x434   :  { %v3476_v27 = vpop.f32.mrb[212].mxu1 }
 0x435   :  { %v6349_v50 = vpop.permute.xlu0 %6348  ;;  %5116 = vrot.lane.b32.xlu0 %v12446_v29, %s8019_s3 }
 0x436   :  { %v12457_v13 = vpop.permute.xlu1 %6082  ;;  %v6506_v30 = vadd.f32 %v6349_v50, %v6234_v34  ;;  %4850 = vrot.lane.b32.xlu1 %v12462_v63, %s8018_s26  ;;  %v12474_v34 = vpop.f32.mrb[213].mxu1  ;;  %v8000_v50 = vld [vmem:[#allocation4 + $0x660] sm:$0xff] }
 0x437   :  { %13499 = vst [vmem:[#allocation13_spill] sm:$0xff] %v12474_v34  ;;  %v4964_v61 = vadd.f32 %v8000_v50, %v12183_v20 }
 0x438   :  { %v6634_v11 = vadd.f32 %v6570_v62, %v6506_v30  ;;  %v6904_v62 = vld [vmem:[%s13156_s0 + $0x110] sm:$0xff] }
 0x439   :  { %v12467_v53 = vpop.permute.xlu0 %5100  ;;  %5384 = vrot.lane.b32.xlu0 %v12446_v29, %s8020_s29  ;;  %v5236_v27 = vadd.f32 %v12221_v40, %v4964_v61  ;;  %v6905_v61 = vld [vmem:[%s13156_s0 + $0x118] sm:$0xff] }
 0x43a   :  { %v6351_v41 = vpop.permute.xlu1 %6350  ;;  %v6705_v38 = vmul.f32 %v12376_v2, %v6634_v11  ;;  %5118 = vrot.lane.b32.xlu1 %v12462_v63, %s8019_s3  ;;  %v3482_v20 = vpop.f32.mrb[214].mxu1 }
 0x43b   :  { %v6507_v59 = vadd.f32 %v6351_v41, %v6235_v16  ;;  %v12485_v41 = vld [vmem:[#allocation4 + $0x9f8] sm:$0xff]  ;;  %v5508_v50 = vadd.f32 %v12263_v42, %v5236_v27  ;;  %v12505_v20 = vld [vmem:[#allocation4 + $0xa20] sm:$0xff]  ;;  %v12514_v42 = vld [vmem:[#allocation4 + $0xa10] sm:$0xff] }
 0x43c   :  { %v6776_v30 = vadd.f32 %v12386_v22, %v6705_v38  ;;  %13500 = vst [vmem:[#allocation21_spill] sm:$0xff] %v12485_v41  ;;  %v8001_v38 = vld [vmem:[#allocation4 + $0x678] sm:$0xff]  ;;  %13501 = vst [vmem:[#allocation7_spill] sm:$0xff] %v12514_v42 }
 0x43d   :  { %v6635_v54 = vadd.f32 %v6571_v12, %v6507_v59  ;;  %v12481_v16 = vpop.permute.xlu0 %5368  ;;  %5832 = vrot.lane.b32.xlu0 %v12485_v41, %s8018_s26  ;;  %v12493_v59 = vpop.f32.mrb[215].mxu1  ;;  %v4965_v12 = vadd.f32 %v8001_v38, %v12198_v19 }
 0x43e   :  { %v12483_v11 = vpop.permute.xlu1 %5102  ;;  %v6840_v29 = vmax.f32 %v6776_v30, 0.0  ;;  %5386 = vrot.lane.b32.xlu1 %v12462_v63, %s8020_s29 }
 0x43f   :  { %v6706_v34 = vmul.f32 %v12376_v2, %v6635_v54  ;;  %v5237_v41 = vadd.f32 %v12232_v18, %v4965_v12  ;;  %v5636_v18 = vadd.f32 %v11942_v25, %v5508_v50 }
 0x440   :  { %v6968_v37 = vadd.f32 %v6904_v62, %v6840_v29  ;;  %v3488_v29 = vpop.f32.mrb[216].mxu1 }
 0x441   :  { %v6777_v40 = vadd.f32 %v12386_v22, %v6706_v34  ;;  %v12501_v30 = vpop.permute.xlu0 %5816  ;;  %4852 = vrot.lane.b32.xlu0 %v12505_v20, %s8018_s26  ;;  %v12518_v34 = vpop.f32.mrb[217].mxu1  ;;  %v5509_v62 = vadd.f32 %v12275_v39, %v5237_v41 }
 0x442   :  { %v12503_v54 = vpop.permute.xlu1 %5370  ;;  %7032 = vst.msk [vmem:[%s13161_s7 + $0x110] sm:$0xff] %vm94_vm0, %v6968_v37  ;;  %5834 = vrot.lane.b32.xlu1 %v12514_v42, %s8018_s26  ;;  %v5964_v37 = vadd.f32 %v12341_v60, %v5636_v18  ;;  %v3494_v29 = vpop.f32.mrb[218].mxu1  ;;  %v6572_v18 = vld [vmem:[#allocation4 + $0x7f0] sm:$0xff]  ;;  %v12550_v42 = vld [vmem:[#allocation4 + $0xa28] sm:$0xff] }
 0x443   :  { %v6841_v19 = vmax.f32 %v6777_v40, 0.0  ;;  %v12531_v40 = vld [vmem:[#allocation4 + $0xa38] sm:$0xff]  ;;  %v12535_v25 = vpop.f32.mrb[219].mxu1  ;;  %v5637_v39 = vadd.f32 %v11963_v26, %v5509_v62 }
 0x444   :  { %v6236_v60 = vadd.f32 %v12442_v23, %v5964_v37 }
 0x445   :  { %v6969_v27 = vadd.f32 %v6905_v61, %v6841_v19  ;;  %v6085_v38 = vpop.permute.xlu0 %6084  ;;  %5120 = vrot.lane.b32.xlu0 %v12505_v20, %s8019_s3  ;;  %v5965_v61 = vadd.f32 %v12355_v31, %v5637_v39 }
 0x446   :  { %v12522_v12 = vpop.permute.xlu1 %5818  ;;  %4854 = vrot.lane.b32.xlu1 %v12531_v40, %s8018_s26 }
 0x447   :  { %7033 = vst.msk [vmem:[%s13161_s7 + $0x118] sm:$0xff] %vm94_vm0, %v6969_v27  ;;  %v8002_v27 = vld [vmem:[#allocation4 + $0x690] sm:$0xff]  ;;  %v6237_v26 = vadd.f32 %v12457_v13, %v5965_v61 }
 0x448   :  { %v4966_v29 = vadd.f32 %v8002_v27, %v12214_v51  ;;  %v8003_v51 = vld [vmem:[#allocation4 + $0x6a8] sm:$0xff] }
 0x449   :  { %v6353_v41 = vpop.permute.xlu0 %6352  ;;  %5388 = vrot.lane.b32.xlu0 %v12505_v20, %s8020_s29  ;;  %v4967_v13 = vadd.f32 %v8003_v51, %v12223_v58  ;;  %v12572_v58 = vld [vmem:[#allocation4 + $0xa40] sm:$0xff] }
 0x44a   :  { %v12539_v50 = vpop.permute.xlu1 %6086  ;;  %v6508_v19 = vadd.f32 %v6353_v41, %v6236_v60  ;;  %5122 = vrot.lane.b32.xlu1 %v12531_v40, %s8019_s3  ;;  %v5238_v31 = vadd.f32 %v12253_v48, %v4966_v29  ;;  %v6573_v41 = vld [vmem:[#allocation4 + $0x808] sm:$0xff]  ;;  %v6906_v48 = vld [vmem:[%s13156_s0 + $0x120] sm:$0xff] }
 0x44c   :  { %v6636_v62 = vadd.f32 %v6572_v18, %v6508_v19  ;;  %v5510_v61 = vadd.f32 %v12294_v43, %v5238_v31 }
 0x44d   :  { %v12548_v23 = vpop.permute.xlu0 %5372  ;;  %5836 = vrot.lane.b32.xlu0 %v12550_v42, %s8018_s26 }
 0x44e   :  { %v6355_v37 = vpop.permute.xlu1 %6354  ;;  %v6707_v39 = vmul.f32 %v12376_v2, %v6636_v62  ;;  %5390 = vrot.lane.b32.xlu1 %v12531_v40, %s8020_s29  ;;  %v5638_v31 = vadd.f32 %v12010_v14, %v5510_v61  ;;  %v8004_v14 = vld [vmem:[#allocation4 + $0x6c0] sm:$0xff] }
 0x44f   :  { %v6509_v60 = vadd.f32 %v6355_v37, %v6237_v26  ;;  %v5239_v26 = vadd.f32 %v12265_v6, %v4967_v13  ;;  %v6907_v6 = vld [vmem:[%s13156_s0 + $0x128] sm:$0xff]  ;;  %v4662_v13 = vld [vmem:[#allocation4 + $0xa50] sm:$0xff]  ;;  %v4968_v61 = vadd.f32 %v8004_v14, %v12243_v56  ;;  %v6574_v56 = vld [vmem:[#allocation4 + $0x820] sm:$0xff] }
 0x450   :  { %v6778_v19 = vadd.f32 %v12386_v22, %v6707_v39 }
 0x451   :  { %v6637_v18 = vadd.f32 %v6573_v41, %v6509_v60  ;;  %v12564_v27 = vpop.permute.xlu0 %5820  ;;  %6104 = vrot.lane.b32.xlu0 %v12550_v42, %s8019_s3  ;;  %v5511_v43 = vadd.f32 %v12302_v8, %v5239_v26 }
 0x452   :  { %v12566_v29 = vpop.permute.xlu1 %5374  ;;  %v6842_v62 = vmax.f32 %v6778_v19, 0.0  ;;  %5838 = vrot.lane.b32.xlu1 %v12572_v58, %s8018_s26  ;;  %v5966_v19 = vadd.f32 %v12425_v55, %v5638_v31 }
 0x453   :  { %v6708_v37 = vmul.f32 %v12376_v2, %v6637_v18  ;;  %v5639_v18 = vadd.f32 %v12032_v0, %v5511_v43  ;;  %v8005_v0 = vld [vmem:[#allocation4 + $0x6d8] sm:$0xff] }
 0x454   :  { %v6970_v39 = vadd.f32 %v6906_v48, %v6842_v62  ;;  %v6238_v48 = vadd.f32 %v6085_v38, %v5966_v19  ;;  %v4969_v38 = vadd.f32 %v8005_v0, %v12255_v17 }
 0x455   :  { %v6779_v60 = vadd.f32 %v12386_v22, %v6708_v37  ;;  %v6089_v41 = vpop.permute.xlu0 %6088  ;;  %4856 = vrot.lane.b32.xlu0 %v4662_v13, %s8018_s26  ;;  %v5240_v37 = vadd.f32 %v12288_v35, %v4968_v61  ;;  %v5967_v31 = vadd.f32 %v12444_v57, %v5639_v18  ;;  %v6575_v18 = vld [vmem:[#allocation4 + $0x838] sm:$0xff] }
 0x456   :  { %v12582_v51 = vpop.permute.xlu1 %5822  ;;  %7034 = vst.msk [vmem:[%s13161_s7 + $0x120] sm:$0xff] %vm94_vm0, %v6970_v39  ;;  %6106 = vrot.lane.b32.xlu1 %v12572_v58, %s8019_s3 }
 0x457   :  { %v6843_v8 = vmax.f32 %v6779_v60, 0.0  ;;  %v4663_v60 = vld [vmem:[#allocation4 + $0xa68] sm:$0xff]  ;;  %v5512_v43 = vadd.f32 %v12326_v46, %v5240_v37  ;;  %v6239_v35 = vadd.f32 %v12539_v50, %v5967_v31  ;;  %v12621_v37 = vld [vmem:[#allocation4 + $0xa58] sm:$0xff] }
 0x459   :  { %v6971_v26 = vadd.f32 %v6907_v6, %v6843_v8  ;;  %v6357_v62 = vpop.permute.xlu0 %6356  ;;  %5124 = vrot.lane.b32.xlu0 %v4662_v13, %s8019_s3  ;;  %v5241_v8 = vadd.f32 %v12296_v47, %v4969_v38  ;;  %v5640_v46 = vadd.f32 %v12105_v15, %v5512_v43  ;;  %v8006_v15 = vld [vmem:[#allocation4 + $0x6f0] sm:$0xff] }
 0x45a   :  { %v6091_v55 = vpop.permute.xlu1 %6090  ;;  %v6510_v39 = vadd.f32 %v6357_v62, %v6238_v48  ;;  %4858 = vrot.lane.b32.xlu1 %v4663_v60, %s8018_s26 }
 0x45b   :  { %7035 = vst.msk [vmem:[%s13161_s7 + $0x128] sm:$0xff] %vm94_vm0, %v6971_v26  ;;  %v5513_v17 = vadd.f32 %v12343_v5, %v5241_v8  ;;  %v6908_v26 = vld [vmem:[%s13156_s0 + $0x130] sm:$0xff] }
 0x45c   :  { %v6638_v57 = vadd.f32 %v6574_v56, %v6510_v39  ;;  %v4970_v39 = vadd.f32 %v8006_v15, %v12281_v52 }
 0x45d   :  { %v12605_v6 = vpop.permute.xlu0 %5824  ;;  %5392 = vrot.lane.b32.xlu0 %v4662_v13, %s8020_s29  ;;  %v5968_v13 = vadd.f32 %v12501_v30, %v5640_v46  ;;  %v5641_v56 = vadd.f32 %v12124_v45, %v5513_v17  ;;  %v6909_v30 = vld [vmem:[%s13156_s0 + $0x138] sm:$0xff] }
 0x45e   :  { %v6359_v19 = vpop.permute.xlu1 %6358  ;;  %v6709_v14 = vmul.f32 %v12376_v2, %v6638_v57  ;;  %5126 = vrot.lane.b32.xlu1 %v4663_v60, %s8019_s3  ;;  %v6576_v57 = vld [vmem:[#allocation4 + $0x850] sm:$0xff]  ;;  %v5242_v8 = vadd.f32 %v12314_v1, %v4970_v39 }
 0x45f   :  { %v6511_v61 = vadd.f32 %v6359_v19, %v6239_v35  ;;  %v6240_v0 = vadd.f32 %v6089_v41, %v5968_v13  ;;  %v5969_v52 = vadd.f32 %v12522_v12, %v5641_v56  ;;  %v6910_v56 = vld [vmem:[%s13156_s0 + $0x140] sm:$0xff] }
 0x460   :  { %v6780_v50 = vadd.f32 %v12386_v22, %v6709_v14  ;;  %v8007_v14 = vld [vmem:[#allocation4 + $0x708] sm:$0xff]  ;;  %v5514_v1 = vadd.f32 %v12408_v33, %v5242_v8  ;;  %v8008_v33 = vld [vmem:[#allocation4 + $0x720] sm:$0xff] }
 0x461   :  { %v6639_v48 = vadd.f32 %v6575_v18, %v6511_v61  ;;  %v12617_v47 = vpop.permute.xlu0 %6092  ;;  %5840 = vrot.lane.b32.xlu0 %v12621_v37, %s8018_s26  ;;  %v4971_v61 = vadd.f32 %v8007_v14, %v12290_v32  ;;  %v6241_v12 = vadd.f32 %v6091_v55, %v5969_v52  ;;  %v4972_v55 = vadd.f32 %v8008_v33, %v12310_v10  ;;  %v4670_v10 = vld [vmem:[#allocation4 + $0xa80] sm:$0xff] }
 0x462   :  { %v12619_v62 = vpop.permute.xlu1 %5826  ;;  %v6844_v31 = vmax.f32 %v6780_v50, 0.0  ;;  %5394 = vrot.lane.b32.xlu1 %v4663_v60, %s8020_s29  ;;  %v12644_v60 = vld [vmem:[#allocation4 + $0xa70] sm:$0xff] }
 0x463   :  { %v6710_v5 = vmul.f32 %v12376_v2, %v6639_v48  ;;  %v6577_v48 = vld [vmem:[#allocation4 + $0x868] sm:$0xff]  ;;  %v5244_v39 = vadd.f32 %v12392_v44, %v4972_v55 }
 0x464   :  { %v6972_v38 = vadd.f32 %v6908_v26, %v6844_v31  ;;  %v5243_v26 = vadd.f32 %v12328_v36, %v4971_v61  ;;  %v5642_v36 = vadd.f32 %v12187_v28, %v5514_v1  ;;  %v8009_v28 = vld [vmem:[#allocation4 + $0x738] sm:$0xff] }
 0x465   :  { %v6781_v43 = vadd.f32 %v12386_v22, %v6710_v5  ;;  %v6361_v35 = vpop.permute.xlu0 %6360  ;;  %6108 = vrot.lane.b32.xlu0 %v12621_v37, %s8019_s3  ;;  %v5516_v8 = vadd.f32 %v12481_v16, %v5244_v39 }
 0x466   :  { %v12634_v19 = vpop.permute.xlu1 %6094  ;;  %7036 = vst.msk [vmem:[%s13161_s7 + $0x130] sm:$0xff] %vm94_vm0, %v6972_v38  ;;  %v6512_v41 = vadd.f32 %v6361_v35, %v6240_v0  ;;  %5842 = vrot.lane.b32.xlu1 %v12644_v60, %s8018_s26  ;;  %v5515_v31 = vadd.f32 %v12427_v49, %v5243_v26  ;;  %v4973_v35 = vadd.f32 %v8009_v28, %v12316_v7  ;;  %v6911_v7 = vld [vmem:[%s13156_s0 + $0x148] sm:$0xff]  ;;  %v8011_v26 = vld [vmem:[#allocation4 + $0x768] sm:$0xff] }
 0x467   :  { %v6845_v45 = vmax.f32 %v6781_v43, 0.0  ;;  %v5970_v43 = vadd.f32 %v12564_v27, %v5642_v36 }
 0x468   :  { %v6640_v17 = vadd.f32 %v6576_v57, %v6512_v41  ;;  %v8010_v57 = vld [vmem:[#allocation4 + $0x750] sm:$0xff]  ;;  %v5643_v52 = vadd.f32 %v12202_v3, %v5515_v31  ;;  %v5245_v14 = vadd.f32 %v12410_v9, %v4973_v35  ;;  %v4671_v9 = vld [vmem:[#allocation4 + $0xa98] sm:$0xff] }
 0x469   :  { %v6973_v18 = vadd.f32 %v6909_v30, %v6845_v45  ;;  %v12650_v46 = vpop.permute.xlu0 %5828  ;;  %6376 = vrot.lane.b32.xlu0 %v12621_v37, %s8020_s29  ;;  %v4974_v44 = vadd.f32 %v8010_v57, %v12371_v21  ;;  %v6242_v27 = vadd.f32 %v12617_v47, %v5970_v43  ;;  %v6578_v21 = vld [vmem:[#allocation4 + $0x880] sm:$0xff]  ;;  %v6579_v31 = vld [vmem:[#allocation4 + $0x898] sm:$0xff]  ;;  %v12717_v57 = vld [vmem:[#allocation4 + $0xa88] sm:$0xff] }
 0x46a   :  { %v6363_v50 = vpop.permute.xlu1 %6362  ;;  %v6711_v32 = vmul.f32 %v12376_v2, %v6640_v17  ;;  %6110 = vrot.lane.b32.xlu1 %v12644_v60, %s8019_s3  ;;  %v5644_v17 = vadd.f32 %v12225_v24, %v5516_v8 }
 0x46b   :  { %7037 = vst.msk [vmem:[%s13161_s7 + $0x138] sm:$0xff] %vm94_vm0, %v6973_v18  ;;  %v6513_v13 = vadd.f32 %v6363_v50, %v6241_v12  ;;  %v5246_v16 = vadd.f32 %v12467_v53, %v4974_v44  ;;  %v5971_v12 = vadd.f32 %v12582_v51, %v5643_v52  ;;  %v5517_v18 = vadd.f32 %v12503_v54, %v5245_v14  ;;  %v13505_v14 = vld [vmem:[#allocation24_spill] sm:$0xff] }
 0x46c   :  { %v6782_v5 = vadd.f32 %v12386_v22, %v6711_v32  ;;  %v13502_v32 = vld [vmem:[#allocation10_spill] sm:$0xff]  ;;  %v5972_v36 = vadd.f32 %v12605_v6, %v5644_v17 }
 0x46d   :  { %v6641_v15 = vadd.f32 %v6577_v48, %v6513_v13  ;;  %v6097_v0 = vpop.permute.xlu0 %6096  ;;  %4860 = vrot.lane.b32.xlu0 %v4670_v10, %s8018_s26  ;;  %v5518_v53 = vadd.f32 %v12548_v23, %v5246_v16  ;;  %v6243_v51 = vadd.f32 %v12634_v19, %v5971_v12  ;;  %v4975_v13 = vadd.f32 %v8011_v26, %v13502_v32  ;;  %v13503_v19 = vld [vmem:[#allocation20_spill] sm:$0xff]  ;;  %v6581_v12 = vld [vmem:[#allocation4 + $0x8c8] sm:$0xff]  ;;  %v6914_v26 = vld [vmem:[%s13156_s0 + $0x160] sm:$0xff] }
 0x46e   :  { %v12670_v38 = vpop.permute.xlu1 %5830  ;;  %v6846_v30 = vmax.f32 %v6782_v5, 0.0  ;;  %6378 = vrot.lane.b32.xlu1 %v12644_v60, %s8020_s29  ;;  %v5645_v5 = vadd.f32 %v13503_v19, %v5517_v18  ;;  %v12736_v18 = vld [vmem:[#allocation4 + $0xaa0] sm:$0xff] }
 0x46f   :  { %v6712_v49 = vmul.f32 %v12376_v2, %v6641_v15  ;;  %v5247_v23 = vadd.f32 %v12483_v11, %v4975_v13  ;;  %v13504_v15 = vld [vmem:[#allocation23_spill] sm:$0xff] }
 0x470   :  { %v6974_v45 = vadd.f32 %v6910_v56, %v6846_v30  ;;  %v5646_v39 = vadd.f32 %v13504_v15, %v5518_v53  ;;  %v6244_v56 = vadd.f32 %v6097_v0, %v5972_v36  ;;  %v6580_v11 = vld [vmem:[#allocation4 + $0x8b0] sm:$0xff]  ;;  %v6583_v36 = vld [vmem:[#allocation4 + $0x8f8] sm:$0xff] }
 0x471   :  { %v6783_v41 = vadd.f32 %v12386_v22, %v6712_v49  ;;  %v6365_v61 = vpop.permute.xlu0 %6364  ;;  %5128 = vrot.lane.b32.xlu0 %v4670_v10, %s8019_s3  ;;  %v5519_v30 = vadd.f32 %v12566_v29, %v5247_v23  ;;  %v5973_v49 = vadd.f32 %v12619_v62, %v5645_v5  ;;  %v6916_v5 = vld [vmem:[%s13156_s0 + $0x170] sm:$0xff]  ;;  %v6915_v15 = vld [vmem:[%s13156_s0 + $0x168] sm:$0xff] }
 0x472   :  { %v6099_v1 = vpop.permute.xlu1 %6098  ;;  %7038 = vst.msk [vmem:[%s13161_s7 + $0x140] sm:$0xff] %vm94_vm0, %v6974_v45  ;;  %v6514_v47 = vadd.f32 %v6365_v61, %v6242_v27  ;;  %4862 = vrot.lane.b32.xlu1 %v4671_v9, %s8018_s26  ;;  %v5974_v44 = vadd.f32 %v12650_v46, %v5646_v39  ;;  %v6913_v46 = vld [vmem:[%s13156_s0 + $0x158] sm:$0xff] }
 0x473   :  { %v6847_v3 = vmax.f32 %v6783_v41, 0.0  ;;  %v6245_v29 = vadd.f32 %v6099_v1, %v5973_v49 }
 0x474   :  { %v6642_v48 = vadd.f32 %v6578_v21, %v6514_v47  ;;  %v6582_v21 = vld [vmem:[#allocation4 + $0x8e0] sm:$0xff] }
 0x475   :  { %v6975_v50 = vadd.f32 %v6911_v7, %v6847_v3  ;;  %v6101_v33 = vpop.permute.xlu0 %6100  ;;  %5396 = vrot.lane.b32.xlu0 %v4670_v10, %s8020_s29  ;;  %v6912_v10 = vld [vmem:[%s13156_s0 + $0x150] sm:$0xff]  ;;  %v5647_v7 = vadd.f32 %v13505_v14, %v5519_v30 }
 0x476   :  { %v6367_v55 = vpop.permute.xlu1 %6366  ;;  %v6713_v24 = vmul.f32 %v12376_v2, %v6642_v48  ;;  %5130 = vrot.lane.b32.xlu1 %v4671_v9, %s8019_s3  ;;  %v6246_v27 = vadd.f32 %v6101_v33, %v5974_v44 }
 0x477   :  { %7039 = vst.msk [vmem:[%s13161_s7 + $0x148] sm:$0xff] %vm94_vm0, %v6975_v50  ;;  %v6515_v54 = vadd.f32 %v6367_v55, %v6243_v51  ;;  %v5975_v17 = vadd.f32 %v12670_v38, %v5647_v7 }
 0x478   :  { %v6784_v6 = vadd.f32 %v12386_v22, %v6713_v24 }
 0x479   :  { %v6643_v43 = vadd.f32 %v6579_v31, %v6515_v54  ;;  %v6369_v28 = vpop.permute.xlu0 %6368  ;;  %5844 = vrot.lane.b32.xlu0 %v12717_v57, %s8018_s26 }
 0x47a   :  { %v6103_v35 = vpop.permute.xlu1 %6102  ;;  %v6848_v8 = vmax.f32 %v6784_v6, 0.0  ;;  %v6516_v52 = vadd.f32 %v6369_v28, %v6244_v56  ;;  %5398 = vrot.lane.b32.xlu1 %v4671_v9, %s8020_s29 }
 0x47b   :  { %v6714_v0 = vmul.f32 %v12376_v2, %v6643_v43  ;;  %v6247_v32 = vadd.f32 %v6103_v35, %v5975_v17  ;;  %v4998_v43 = vld [vmem:[#allocation4 + $0xab0] sm:$0xff] }
 0x47c   :  { %v6976_v62 = vadd.f32 %v6912_v10, %v6848_v8  ;;  %v6644_v41 = vadd.f32 %v6580_v11, %v6516_v52  ;;  %v4648_v10 = vld [vmem:[#allocation4 + $0x900] sm:$0xff] }
 0x47d   :  { %v6785_v45 = vadd.f32 %v12386_v22, %v6714_v0  ;;  %v6373_v61 = vpop.permute.xlu0 %6372  ;;  %6112 = vrot.lane.b32.xlu0 %v12717_v57, %s8019_s3 }
 0x47e   :  { %v6371_v16 = vpop.permute.xlu1 %6370  ;;  %7040 = vst.msk [vmem:[%s13161_s7 + $0x150] sm:$0xff] %vm94_vm0, %v6976_v62  ;;  %v6715_v3 = vmul.f32 %v12376_v2, %v6644_v41  ;;  %v6518_v47 = vadd.f32 %v6373_v61, %v6246_v27  ;;  %5846 = vrot.lane.b32.xlu1 %v12736_v18, %s8018_s26  ;;  %v4649_v27 = vld [vmem:[#allocation4 + $0x918] sm:$0xff] }
 0x47f   :  { %v6849_v1 = vmax.f32 %v6785_v45, 0.0  ;;  %v6517_v9 = vadd.f32 %v6371_v16, %v6245_v29 }
 0x480   :  { %v6786_v51 = vadd.f32 %v12386_v22, %v6715_v3  ;;  %v6646_v50 = vadd.f32 %v6582_v21, %v6518_v47  ;;  %v13506_v21 = vld [vmem:[#allocation27_spill] sm:$0xff] }
 0x481   :  { %v6977_v53 = vadd.f32 %v6913_v46, %v6849_v1  ;;  %v6645_v48 = vadd.f32 %v6581_v12, %v6517_v9  ;;  %v4833_v13 = vpop.permute.xlu0 %4832  ;;  %6380 = vrot.lane.b32.xlu0 %v12717_v57, %s8020_s29  ;;  %v12785_v46 = vld [vmem:[#allocation4 + $0xab8] sm:$0xff]  ;;  %v12797_v47 = vld [vmem:[#allocation4 + $0xad0] sm:$0xff] }
 0x482   :  { %v6375_v33 = vpop.permute.xlu1 %6374  ;;  %v6850_v38 = vmax.f32 %v6786_v51, 0.0  ;;  %v6717_v55 = vmul.f32 %v12376_v2, %v6646_v50  ;;  %6114 = vrot.lane.b32.xlu1 %v12736_v18, %s8019_s3  ;;  %v4976_v44 = vadd.f32 %v4833_v13, %v4648_v10  ;;  %v13507_v9 = vld [vmem:[#allocation28_spill] sm:$0xff]  ;;  %v5270_v13 = vld [vmem:[#allocation4 + $0xae0] sm:$0xff] }
 0x483   :  { %7041 = vst.msk [vmem:[%s13161_s7 + $0x158] sm:$0xff] %vm94_vm0, %v6977_v53  ;;  %v6716_v31 = vmul.f32 %v12376_v2, %v6645_v48  ;;  %v6519_v24 = vadd.f32 %v6375_v33, %v6247_v32 }
 0x484   :  { %v6978_v54 = vadd.f32 %v6914_v26, %v6850_v38  ;;  %v6788_v23 = vadd.f32 %v12386_v22, %v6717_v55  ;;  %v13508_v38 = vld [vmem:[#allocation5_spill] sm:$0xff] }
 0x485   :  { %v6787_v19 = vadd.f32 %v12386_v22, %v6716_v31  ;;  %v6647_v39 = vadd.f32 %v6583_v36, %v6519_v24  ;;  %v4837_v56 = vpop.permute.xlu0 %4836  ;;  %5132 = vrot.lane.b32.xlu0 %v4998_v43, %s8019_s3  ;;  %v12814_v24 = vld [vmem:[#allocation4 + $0xae8] sm:$0xff] }
 0x486   :  { %v4835_v6 = vpop.permute.xlu1 %4834  ;;  %7042 = vst.msk [vmem:[%s13161_s7 + $0x160] sm:$0xff] %vm94_vm0, %v6978_v54  ;;  %v6852_v30 = vmax.f32 %v6788_v23, 0.0  ;;  %6382 = vrot.lane.b32.xlu1 %v12736_v18, %s8020_s29  ;;  %v4978_v16 = vadd.f32 %v4837_v56, %v13506_v21  ;;  %v5271_v23 = vld [vmem:[#allocation4 + $0xaf8] sm:$0xff] }
 0x487   :  { %v6851_v49 = vmax.f32 %v6787_v19, 0.0  ;;  %v6718_v28 = vmul.f32 %v12376_v2, %v6647_v39  ;;  %v6917_v2 = vld [vmem:[%s13156_s0 + $0x178] sm:$0xff]  ;;  %v4977_v45 = vadd.f32 %v4835_v6, %v4649_v27  ;;  %v7883_v19 = vpop.f32.mrb[216].mxu0 }
 0x488   :  { %v6980_v11 = vadd.f32 %v6916_v5, %v6852_v30  ;;  %v13509_v5 = vld [vmem:[#allocation26_spill] sm:$0xff]  ;;  %4581 = vst.msk [vmem:[#allocation4 + $0xb68] sm:$0xff] %vm94_vm0, %v7883_v19  ;;  %v4177_v39 = vpop.f32.mrb[217].mxu0 }
 0x489   :  { %v6979_v35 = vadd.f32 %v6915_v15, %v6851_v49  ;;  %v6789_v8 = vadd.f32 %v12386_v22, %v6718_v28  ;;  %v5105_v0 = vpop.permute.xlu0 %5104  ;;  %5400 = vrot.lane.b32.xlu0 %v4998_v43, %s8020_s29  ;;  %v4999_v22 = vld [vmem:[#allocation4 + $0xac8] sm:$0xff]  ;;  %4578 = vst.msk [vmem:[#allocation4 + $0xb50] sm:$0xff] %vm94_vm0, %v4177_v39  ;;  %v12826_v49 = vld [vmem:[#allocation4 + $0xb00] sm:$0xff] }
 0x48a   :  { %v4839_v52 = vpop.permute.xlu1 %4838  ;;  %7044 = vst.msk [vmem:[%s13161_s7 + $0x170] sm:$0xff] %vm94_vm0, %v6980_v11  ;;  %v5248_v29 = vadd.f32 %v5105_v0, %v4976_v44  ;;  %5134 = vrot.lane.b32.xlu1 %v4999_v22, %s8019_s3 }
 0x48b   :  { %7043 = vst.msk [vmem:[%s13161_s7 + $0x168] sm:$0xff] %vm94_vm0, %v6979_v35  ;;  %v6853_v62 = vmax.f32 %v6789_v8, 0.0  ;;  %v4979_v17 = vadd.f32 %v4839_v52, %v13507_v9  ;;  %v13510_v35 = vld [vmem:[#allocation11_spill] sm:$0xff]  ;;  %v12837_v52 = vld [vmem:[#allocation4 + $0xb18] sm:$0xff] }
 0x48d   :  { %v6981_v41 = vadd.f32 %v6917_v2, %v6853_v62  ;;  %v4841_v14 = vpop.permute.xlu0 %4840  ;;  %5848 = vrot.lane.b32.xlu0 %v12785_v46, %s8018_s26 }
 0x48e   :  { %v5107_v7 = vpop.permute.xlu1 %5106  ;;  %5402 = vrot.lane.b32.xlu1 %v4999_v22, %s8020_s29  ;;  %v4980_v55 = vadd.f32 %v4841_v14, %v13508_v38  ;;  %v13511_v22 = vld [vmem:[#allocation6_spill] sm:$0xff] }
 0x48f   :  { %v5249_v61 = vadd.f32 %v5107_v7, %v4977_v45  ;;  %7045 = vst.msk [vmem:[%s13161_s7 + $0x178] sm:$0xff] %vm94_vm0, %v6981_v41 }
 0x491   :  { %v5109_v12 = vpop.permute.xlu0 %5108  ;;  %6116 = vrot.lane.b32.xlu0 %v12785_v46, %s8019_s3 }
 0x492   :  { %v4843_v1 = vpop.permute.xlu1 %4842  ;;  %v5250_v3 = vadd.f32 %v5109_v12, %v4978_v16  ;;  %5850 = vrot.lane.b32.xlu1 %v12797_v47, %s8018_s26 }
 0x493   :  { %v4981_v15 = vadd.f32 %v4843_v1, %v13509_v5 }
 0x495   :  { %v5377_v53 = vpop.permute.xlu0 %5376  ;;  %6384 = vrot.lane.b32.xlu0 %v12785_v46, %s8020_s29 }
 0x496   :  { %v5111_v51 = vpop.permute.xlu1 %5110  ;;  %v12802_v50 = vadd.f32 %v5377_v53, %v5248_v29  ;;  %6118 = vrot.lane.b32.xlu1 %v12797_v47, %s8019_s3  ;;  %v7886_v29 = vpop.f32.mrb[218].mxu0 }
 0x497   :  { %v5251_v48 = vadd.f32 %v5111_v51, %v4979_v17  ;;  %4587 = vst.msk [vmem:[#allocation4 + $0xb98] sm:$0xff] %vm94_vm0, %v7886_v29  ;;  %v4187_v27 = vpop.f32.mrb[219].mxu0  ;;  %v13512_v51 = vld [vmem:[#allocation29_spill] sm:$0xff] }
 0x498   :  { %4584 = vst.msk [vmem:[#allocation4 + $0xb80] sm:$0xff] %vm94_vm0, %v4187_v27  ;;  %v7889_v1 = vpop.f32.mrb[220].mxu0 }
 0x499   :  { %v4845_v26 = vpop.permute.xlu0 %4844  ;;  %5404 = vrot.lane.b32.xlu0 %v5270_v13, %s8020_s29  ;;  %4593 = vst.msk [vmem:[#allocation4 + $0xbc8] sm:$0xff] %vm94_vm0, %v7889_v1 }
 0x49a   :  { %v5379_v32 = vpop.permute.xlu1 %5378  ;;  %6386 = vrot.lane.b32.xlu1 %v12797_v47, %s8020_s29  ;;  %v4982_v44 = vadd.f32 %v4845_v26, %v13510_v35 }
 0x49b   :  { %v12808_v33 = vadd.f32 %v5379_v32, %v5249_v61  ;;  %v12850_v61 = vld [vmem:[#allocation4 + $0xb30] sm:$0xff] }
 0x49d   :  { %v5113_v31 = vpop.permute.xlu0 %5112  ;;  %5852 = vrot.lane.b32.xlu0 %v12814_v24, %s8018_s26 }
 0x49e   :  { %v4847_v36 = vpop.permute.xlu1 %4846  ;;  %v5252_v54 = vadd.f32 %v5113_v31, %v4980_v55  ;;  %5406 = vrot.lane.b32.xlu1 %v5271_v23, %s8020_s29  ;;  %v13513_v55 = vld [vmem:[#allocation9_spill] sm:$0xff]  ;;  %v13514_v31 = vld [vmem:[#allocation12_spill] sm:$0xff] }
 0x49f   :  { %v4983_v62 = vadd.f32 %v4847_v36, %v13511_v22 }
 0x4a1   :  { %v5381_v56 = vpop.permute.xlu0 %5380  ;;  %6120 = vrot.lane.b32.xlu0 %v12814_v24, %s8019_s3 }
 0x4a2   :  { %v5115_v6 = vpop.permute.xlu1 %5114  ;;  %v12822_v43 = vadd.f32 %v5381_v56, %v5250_v3  ;;  %5854 = vrot.lane.b32.xlu1 %v12826_v49, %s8018_s26  ;;  %v4197_v3 = vpop.f32.mrb[221].mxu0 }
 0x4a3   :  { %v5253_v30 = vadd.f32 %v5115_v6, %v4981_v15  ;;  %4590 = vst.msk [vmem:[#allocation4 + $0xbb0] sm:$0xff] %vm94_vm0, %v4197_v3  ;;  %v7892_v53 = vpop.f32.mrb[222].mxu0  ;;  %v13515_v6 = vld [vmem:[#allocation13_spill] sm:$0xff] }
 0x4a4   :  { %4599 = vst.msk [vmem:[#allocation4 + $0xbf8] sm:$0xff] %vm94_vm0, %v7892_v53  ;;  %v4207_v26 = vpop.f32.mrb[223].mxu0 }
 0x4a5   :  { %v4849_v10 = vpop.permute.xlu0 %4848  ;;  %6388 = vrot.lane.b32.xlu0 %v12814_v24, %s8020_s29  ;;  %4596 = vst.msk [vmem:[#allocation4 + $0xbe0] sm:$0xff] %vm94_vm0, %v4207_v26  ;;  %v5585_v26 = vld [vmem:[#allocation4 + $0x9e0] sm:$0xff] }
 0x4a6   :  { %v5383_v28 = vpop.permute.xlu1 %5382  ;;  %6122 = vrot.lane.b32.xlu1 %v12826_v49, %s8019_s3 }
 0x4a7   :  { %v12830_v11 = vadd.f32 %v5383_v28, %v5251_v48  ;;  %v4984_v48 = vadd.f32 %v4849_v10, %v13512_v51 }
 0x4a9   :  { %v5117_v8 = vpop.permute.xlu0 %5116  ;;  %5856 = vrot.lane.b32.xlu0 %v12837_v52, %s8018_s26 }
 0x4aa   :  { %v4851_v0 = vpop.permute.xlu1 %4850  ;;  %v5254_v2 = vadd.f32 %v5117_v8, %v4982_v44  ;;  %6390 = vrot.lane.b32.xlu1 %v12826_v49, %s8020_s29  ;;  %v13516_v8 = vld [vmem:[#allocation14_spill] sm:$0xff] }
 0x4ab   :  { %v4985_v36 = vadd.f32 %v4851_v0, %v13514_v31 }
 0x4ad   :  { %v5385_v45 = vpop.permute.xlu0 %5384  ;;  %6124 = vrot.lane.b32.xlu0 %v12837_v52, %s8019_s3 }
 0x4ae   :  { %v5119_v41 = vpop.permute.xlu1 %5118  ;;  %v12846_v14 = vadd.f32 %v5385_v45, %v5252_v54  ;;  %5858 = vrot.lane.b32.xlu1 %v12850_v61, %s8018_s26 }
 0x4af   :  { %v5255_v7 = vadd.f32 %v5119_v41, %v4983_v62 }
 0x4b1   :  { %v12854_v21 = vpop.permute.xlu0 %5832  ;;  %6392 = vrot.lane.b32.xlu0 %v12837_v52, %s8020_s29 }
 0x4b2   :  { %v5387_v16 = vpop.permute.xlu1 %5386  ;;  %6126 = vrot.lane.b32.xlu1 %v12850_v61, %s8019_s3 }
 0x4b3   :  { %v12856_v12 = vadd.f32 %v5387_v16, %v5253_v30 }
 0x4b5   :  { %v4853_v9 = vpop.permute.xlu0 %4852  ;;  %5860 = vrot.lane.b32.xlu0 %v12438_v4, %s8018_s26 }
 0x4b6   :  { %v5835_v17 = vpop.permute.xlu1 %5834  ;;  %6394 = vrot.lane.b32.xlu1 %v12850_v61, %s8020_s29  ;;  %v4986_v0 = vadd.f32 %v4853_v9, %v13516_v8  ;;  %v5584_v9 = vld [vmem:[#allocation4 + $0x9c8] sm:$0xff] }
 0x4b7   :  { %v5648_v53 = vadd.f32 %v5584_v9, %v12802_v50  ;;  %v12920_v50 = vld [vmem:[%s13159_s5] ss:$0 sm:$0xff] }
 0x4b9   :  { %v5121_v32 = vpop.permute.xlu0 %5120  ;;  %6128 = vrot.lane.b32.xlu0 %v12438_v4, %s8019_s3 }
 0x4ba   :  { %v4855_v13 = vpop.permute.xlu1 %4854  ;;  %v5256_v38 = vadd.f32 %v5121_v32, %v4984_v48  ;;  %5862 = vrot.lane.b32.xlu1 %v13513_v55, %s8018_s26 }
 0x4bb   :  { %v4987_v45 = vadd.f32 %v4855_v13, %v12462_v63  ;;  %v5649_v63 = vadd.f32 %v5585_v26, %v12808_v33  ;;  %v6585_v33 = vld [vmem:[#allocation4 + $0xaa8] sm:$0xff] }
 0x4bd   :  { %v5389_v54 = vpop.permute.xlu0 %5388  ;;  %6396 = vrot.lane.b32.xlu0 %v12438_v4, %s8020_s29  ;;  %v3500_v4 = vpop.f32.mrb[220].mxu1 }
 0x4be   :  { %v5123_v23 = vpop.permute.xlu1 %5122  ;;  %v12876_v19 = vadd.f32 %v5389_v54, %v5254_v2  ;;  %6130 = vrot.lane.b32.xlu1 %v13513_v55, %s8019_s3  ;;  %v3502_v44 = vpop.f32.mrb[221].mxu1 }
 0x4bf   :  { %v5257_v5 = vadd.f32 %v5123_v23, %v4985_v36  ;;  %v3506_v2 = vpop.f32.mrb[222].mxu1  ;;  %v6584_v36 = vld [vmem:[#allocation4 + $0xa90] sm:$0xff] }
 0x4c0   :  { %v3508_v27 = vpop.f32.mrb[223].mxu1  ;;  %v6918_v44 = vld [vmem:[%s13156_s0 + $0x180] sm:$0xff] }
 0x4c1   :  { %v12882_v15 = vpop.permute.xlu0 %5836  ;;  %6132 = vrot.lane.b32.xlu0 %v13515_v6, %s8019_s3 }
 0x4c2   :  { %v5391_v39 = vpop.permute.xlu1 %5390  ;;  %6398 = vrot.lane.b32.xlu1 %v13513_v55, %s8020_s29  ;;  %v5977_v55 = vadd.f32 %v5835_v17, %v5649_v63  ;;  %v12927_v17 = vld [vmem:[%s13160_s6] ss:$0 sm:$0xff] }
 0x4c3   :  { %v12884_v56 = vadd.f32 %v5391_v39, %v5255_v7 }
 0x4c5   :  { %v6105_v30 = vpop.permute.xlu0 %6104  ;;  %6400 = vrot.lane.b32.xlu0 %v13515_v6, %s8020_s29 }
 0x4c6   :  { %v12890_v10 = vpop.permute.xlu1 %5838  ;;  %6134 = vrot.lane.b32.xlu1 %v12493_v59, %s8019_s3 }
 0x4c9   :  { %v4857_v28 = vpop.permute.xlu0 %4856  ;;  %6404 = vrot.lane.b32.xlu0 %v12518_v34, %s8020_s29 }
 0x4ca   :  { %v6107_v35 = vpop.permute.xlu1 %6106  ;;  %6402 = vrot.lane.b32.xlu1 %v12493_v59, %s8020_s29 }
 0x4cb   :  { %v6249_v54 = vadd.f32 %v6107_v35, %v5977_v55 }
 0x4cd   :  { %v5125_v29 = vpop.permute.xlu0 %5124 }
 0x4ce   :  { %v4859_v22 = vpop.permute.xlu1 %4858  ;;  %v5258_v62 = vadd.f32 %v5125_v29, %v4986_v0  ;;  %6406 = vrot.lane.b32.xlu1 %v12535_v25, %s8020_s29  ;;  %v5976_v25 = vadd.f32 %v12854_v21, %v5648_v53 }
 0x4d0   :  { %v6248_v32 = vadd.f32 %v6105_v30, %v5976_v25  ;;  %v4988_v30 = vadd.f32 %v4857_v28, %v12505_v20  ;;  %v4989_v20 = vadd.f32 %v4859_v22, %v12531_v40 }
 0x4d1   :  { %v5393_v41 = vpop.permute.xlu0 %5392 }
 0x4d2   :  { %v5127_v7 = vpop.permute.xlu1 %5126  ;;  %v12904_v16 = vadd.f32 %v5393_v41, %v5256_v38  ;;  %v6919_v41 = vld [vmem:[%s13156_s0 + $0x188] sm:$0xff] }
 0x4d3   :  { %v5259_v34 = vadd.f32 %v5127_v7, %v4987_v45 }
 0x4d5   :  { %v12906_v1 = vpop.permute.xlu0 %5840 }
 0x4d6   :  { %v5395_v59 = vpop.permute.xlu1 %5394 }
 0x4d7   :  { %v12908_v3 = vadd.f32 %v5395_v59, %v5257_v5 }
 0x4d9   :  { %v6109_v51 = vpop.permute.xlu0 %6108 }
 0x4da   :  { %v12911_v48 = vpop.permute.xlu1 %5842 }
 0x4dd   :  { %v6377_v13 = vpop.permute.xlu0 %6376 }
 0x4de   :  { %v6111_v38 = vpop.permute.xlu1 %6110  ;;  %v6520_v31 = vadd.f32 %v6377_v13, %v6248_v32  ;;  %v13517_v32 = vld [vmem:[#allocation21_spill] sm:$0xff] }
 0x4df   :  { %v5650_v13 = vadd.f32 %v13517_v32, %v12822_v43 }
 0x4e0   :  { %v6648_v23 = vadd.f32 %v6584_v36, %v6520_v31  ;;  %v13518_v36 = vld [vmem:[#allocation7_spill] sm:$0xff] }
 0x4e1   :  { %v12915_v5 = vpop.permute.xlu0 %4860 }
 0x4e2   :  { %v6379_v39 = vpop.permute.xlu1 %6378  ;;  %v6719_v21 = vmul.f32 %v12920_v50, %v6648_v23 }
 0x4e3   :  { %v6521_v6 = vadd.f32 %v6379_v39, %v6249_v54  ;;  %v5651_v54 = vadd.f32 %v13518_v36, %v12830_v11  ;;  %v6920_v11 = vld [vmem:[%s13156_s0 + $0x190] sm:$0xff]  ;;  %v5653_v36 = vadd.f32 %v12572_v58, %v12856_v12  ;;  %v6922_v58 = vld [vmem:[%s13156_s0 + $0x1a0] sm:$0xff] }
 0x4e4   :  { %v6790_v4 = vadd.f32 %v12927_v17, %v6719_v21 }
 0x4e5   :  { %v6649_v35 = vadd.f32 %v6585_v33, %v6521_v6  ;;  %v5129_v8 = vpop.permute.xlu0 %5128  ;;  %v5979_v6 = vadd.f32 %v12890_v10, %v5651_v54 }
 0x4e6   :  { %v12933_v0 = vpop.permute.xlu1 %4862  ;;  %v6854_v2 = vmax.f32 %v6790_v4, 0.0  ;;  %v12936_v27 = vadd.f32 %v5129_v8, %v4988_v30  ;;  %v6586_v30 = vld [vmem:[#allocation4 + $0xac0] sm:$0xff] }
 0x4e7   :  { %v6720_v29 = vmul.f32 %v12920_v50, %v6649_v35 }
 0x4e8   :  { %v6982_v28 = vadd.f32 %v6918_v44, %v6854_v2  ;;  %v6587_v2 = vld [vmem:[#allocation4 + $0xad8] sm:$0xff] }
 0x4e9   :  { %v6791_v45 = vadd.f32 %v12927_v17, %v6720_v29  ;;  %v5397_v7 = vpop.permute.xlu0 %5396 }
 0x4ea   :  { %v5131_v59 = vpop.permute.xlu1 %5130  ;;  %7046 = vst.msk [vmem:[%s13161_s7 + $0x180] sm:$0xff] %vm94_vm0, %v6982_v28  ;;  %v12947_v53 = vadd.f32 %v5397_v7, %v5258_v62  ;;  %v5978_v62 = vadd.f32 %v12882_v15, %v5650_v13 }
 0x4eb   :  { %v6855_v9 = vmax.f32 %v6791_v45, 0.0  ;;  %v12949_v25 = vadd.f32 %v5131_v59, %v4989_v20 }
 0x4ec   :  { %v6250_v23 = vadd.f32 %v6109_v51, %v5978_v62 }
 0x4ed   :  { %v6983_v40 = vadd.f32 %v6919_v41, %v6855_v9  ;;  %v12951_v22 = vpop.permute.xlu0 %5844  ;;  %v6921_v41 = vld [vmem:[%s13156_s0 + $0x198] sm:$0xff] }
 0x4ee   :  { %v5399_v26 = vpop.permute.xlu1 %5398 }
 0x4ef   :  { %7047 = vst.msk [vmem:[%s13161_s7 + $0x188] sm:$0xff] %vm94_vm0, %v6983_v40  ;;  %v12957_v63 = vadd.f32 %v5399_v26, %v5259_v34  ;;  %v6251_v34 = vadd.f32 %v6111_v38, %v5979_v6  ;;  %v5652_v40 = vadd.f32 %v12550_v42, %v12846_v14  ;;  %v5981_v6 = vadd.f32 %v12911_v48, %v5653_v36  ;;  %v6588_v14 = vld [vmem:[#allocation4 + $0xaf0] sm:$0xff]  ;;  %v6590_v36 = vld [vmem:[#allocation4 + $0xb20] sm:$0xff] }
 0x4f1   :  { %v6113_v55 = vpop.permute.xlu0 %6112  ;;  %v5980_v62 = vadd.f32 %v12906_v1, %v5652_v40 }
 0x4f2   :  { %v12961_v31 = vpop.permute.xlu1 %5846 }
 0x4f3   :  { %v6252_v54 = vadd.f32 %v6113_v55, %v5980_v62 }
 0x4f5   :  { %v6381_v39 = vpop.permute.xlu0 %6380 }
 0x4f6   :  { %v6115_v21 = vpop.permute.xlu1 %6114  ;;  %v6522_v33 = vadd.f32 %v6381_v39, %v6250_v23 }
 0x4f8   :  { %v6650_v4 = vadd.f32 %v6586_v30, %v6522_v33  ;;  %v6253_v33 = vadd.f32 %v6115_v21, %v5981_v6 }
 0x4f9   :  { %v12967_v35 = vpop.permute.xlu0 %5132 }
 0x4fa   :  { %v6383_v43 = vpop.permute.xlu1 %6382  ;;  %v6721_v44 = vmul.f32 %v12920_v50, %v6650_v4 }
 0x4fb   :  { %v6523_v8 = vadd.f32 %v6383_v43, %v6251_v34 }
 0x4fc   :  { %v6792_v15 = vadd.f32 %v12927_v17, %v6721_v44  ;;  %v6589_v44 = vld [vmem:[#allocation4 + $0xb08] sm:$0xff] }
 0x4fd   :  { %v6651_v29 = vadd.f32 %v6587_v2, %v6523_v8  ;;  %v12974_v51 = vpop.permute.xlu0 %5400 }
 0x4fe   :  { %v12976_v10 = vpop.permute.xlu1 %5134  ;;  %v6856_v38 = vmax.f32 %v6792_v15, 0.0  ;;  %v5654_v15 = vadd.f32 %v12621_v37, %v12876_v19  ;;  %v5655_v37 = vadd.f32 %v12644_v60, %v12884_v56 }
 0x4ff   :  { %v6722_v20 = vmul.f32 %v12920_v50, %v6651_v29 }
 0x500   :  { %v6984_v28 = vadd.f32 %v6920_v11, %v6856_v38  ;;  %v6923_v38 = vld [vmem:[%s13156_s0 + $0x1a8] sm:$0xff]  ;;  %v5983_v62 = vadd.f32 %v12961_v31, %v5655_v37 }
 0x501   :  { %v6793_v45 = vadd.f32 %v12927_v17, %v6722_v20  ;;  %v5849_v7 = vpop.permute.xlu0 %5848 }
 0x502   :  { %v12983_v59 = vpop.permute.xlu1 %5402  ;;  %7048 = vst.msk [vmem:[%s13161_s7 + $0x190] sm:$0xff] %vm94_vm0, %v6984_v28 }
 0x503   :  { %v6857_v9 = vmax.f32 %v6793_v45, 0.0  ;;  %v5982_v45 = vadd.f32 %v12951_v22, %v5654_v15 }
 0x505   :  { %v6985_v26 = vadd.f32 %v6921_v41, %v6857_v9  ;;  %v6117_v32 = vpop.permute.xlu0 %6116 }
 0x506   :  { %v12991_v13 = vpop.permute.xlu1 %5850  ;;  %v6254_v19 = vadd.f32 %v6117_v32, %v5982_v45  ;;  %v6591_v32 = vld [vmem:[#allocation4 + $0xb38] sm:$0xff] }
 0x507   :  { %7049 = vst.msk [vmem:[%s13161_s7 + $0x198] sm:$0xff] %vm94_vm0, %v6985_v26 }
 0x509   :  { %v6385_v23 = vpop.permute.xlu0 %6384 }
 0x50a   :  { %v6119_v39 = vpop.permute.xlu1 %6118  ;;  %v6524_v42 = vadd.f32 %v6385_v23, %v6252_v54 }
 0x50b   :  { %v6255_v54 = vadd.f32 %v6119_v39, %v5983_v62 }
 0x50c   :  { %v6652_v30 = vadd.f32 %v6588_v14, %v6524_v42  ;;  %v5656_v14 = vadd.f32 %v12717_v57, %v12904_v16  ;;  %v6925_v16 = vld [vmem:[%s13156_s0 + $0x1b8] sm:$0xff] }
 0x50d   :  { %v13001_v34 = vpop.permute.xlu0 %5404 }
 0x50e   :  { %v6387_v1 = vpop.permute.xlu1 %6386  ;;  %v6723_v4 = vmul.f32 %v12920_v50, %v6652_v30  ;;  %v6924_v30 = vld [vmem:[%s13156_s0 + $0x1b0] sm:$0xff] }
 0x50f   :  { %v6525_v43 = vadd.f32 %v6387_v1, %v6253_v33 }
 0x510   :  { %v6794_v8 = vadd.f32 %v12927_v17, %v6723_v4  ;;  %v5984_v4 = vadd.f32 %v5849_v7, %v5656_v14 }
 0x511   :  { %v6653_v2 = vadd.f32 %v6589_v44, %v6525_v43  ;;  %v13008_v12 = vpop.permute.xlu0 %5852 }
 0x512   :  { %v13010_v48 = vpop.permute.xlu1 %5406  ;;  %v6858_v55 = vmax.f32 %v6794_v8, 0.0  ;;  %v5657_v8 = vadd.f32 %v12736_v18, %v12908_v3 }
 0x513   :  { %v6724_v21 = vmul.f32 %v12920_v50, %v6653_v2 }
 0x514   :  { %v6986_v29 = vadd.f32 %v6922_v58, %v6858_v55  ;;  %v6592_v55 = vld [vmem:[#allocation4 + $0xb50] sm:$0xff] }
 0x515   :  { %v6795_v11 = vadd.f32 %v12927_v17, %v6724_v21  ;;  %v6121_v20 = vpop.permute.xlu0 %6120 }
 0x516   :  { %v13019_v28 = vpop.permute.xlu1 %5854  ;;  %7050 = vst.msk [vmem:[%s13161_s7 + $0x1a0] sm:$0xff] %vm94_vm0, %v6986_v29  ;;  %v6256_v2 = vadd.f32 %v6121_v20, %v5984_v4  ;;  %v5985_v29 = vadd.f32 %v12991_v13, %v5657_v8  ;;  %v6593_v20 = vld [vmem:[#allocation4 + $0xb68] sm:$0xff] }
 0x517   :  { %v6859_v41 = vmax.f32 %v6795_v11, 0.0 }
 0x519   :  { %v6987_v9 = vadd.f32 %v6923_v38, %v6859_v41  ;;  %v6389_v40 = vpop.permute.xlu0 %6388 }
 0x51a   :  { %v6123_v26 = vpop.permute.xlu1 %6122  ;;  %v6526_v22 = vadd.f32 %v6389_v40, %v6254_v19  ;;  %v5658_v19 = vadd.f32 %v12785_v46, %v12947_v53  ;;  %v5532_v46 = vadd.f32 %v12974_v51, %v12936_v27  ;;  %v5659_v53 = vadd.f32 %v12797_v47, %v12957_v63  ;;  %v8015_v63 = vld [vmem:[#allocation4 + $0xa68] sm:$0xff] }
 0x51b   :  { %7051 = vst.msk [vmem:[%s13161_s7 + $0x1a8] sm:$0xff] %vm94_vm0, %v6987_v9  ;;  %v6257_v3 = vadd.f32 %v6123_v26, %v5985_v29  ;;  %v6926_v26 = vld [vmem:[%s13156_s0 + $0x1c0] sm:$0xff]  ;;  %v4991_v51 = vadd.f32 %v8015_v63, %v12933_v0  ;;  %v6928_v29 = vld [vmem:[%s13156_s0 + $0x1d0] sm:$0xff]  ;;  %v6931_v63 = vld [vmem:[%s13156_s0 + $0x1e8] sm:$0xff] }
 0x51c   :  { %v6654_v23 = vadd.f32 %v6590_v36, %v6526_v22  ;;  %v5986_v36 = vadd.f32 %v13008_v12, %v5658_v19  ;;  %v6927_v12 = vld [vmem:[%s13156_s0 + $0x1c8] sm:$0xff] }
 0x51d   :  { %v13033_v42 = vpop.permute.xlu0 %5856 }
 0x51e   :  { %v6391_v6 = vpop.permute.xlu1 %6390  ;;  %v6725_v60 = vmul.f32 %v12920_v50, %v6654_v23 }
 0x51f   :  { %v6527_v56 = vadd.f32 %v6391_v6, %v6255_v54  ;;  %v8014_v6 = vld [vmem:[#allocation4 + $0xa50] sm:$0xff] }
 0x520   :  { %v6796_v31 = vadd.f32 %v12927_v17, %v6725_v60  ;;  %v4990_v60 = vadd.f32 %v8014_v6, %v12915_v5  ;;  %v5987_v5 = vadd.f32 %v13019_v28, %v5659_v53 }
 0x521   :  { %v6655_v33 = vadd.f32 %v6591_v32, %v6527_v56  ;;  %v6125_v1 = vpop.permute.xlu0 %6124 }
 0x522   :  { %v13042_v39 = vpop.permute.xlu1 %5858  ;;  %v6860_v43 = vmax.f32 %v6796_v31, 0.0  ;;  %v6258_v56 = vadd.f32 %v6125_v1, %v5986_v36  ;;  %v6594_v31 = vld [vmem:[#allocation4 + $0xb80] sm:$0xff]  ;;  %v5262_v4 = vadd.f32 %v12967_v35, %v4990_v60  ;;  %v5533_v1 = vadd.f32 %v12983_v59, %v12949_v25 }
 0x523   :  { %v6726_v44 = vmul.f32 %v12920_v50, %v6655_v33 }
 0x524   :  { %v6988_v58 = vadd.f32 %v6924_v30, %v6860_v43  ;;  %v5660_v43 = vadd.f32 %v12814_v24, %v5532_v46  ;;  %v5661_v59 = vadd.f32 %v12826_v49, %v5533_v1 }
 0x525   :  { %v6797_v57 = vadd.f32 %v12927_v17, %v6726_v44  ;;  %v6393_v21 = vpop.permute.xlu0 %6392  ;;  %v5534_v44 = vadd.f32 %v13001_v34, %v5262_v4 }
 0x526   :  { %v6127_v15 = vpop.permute.xlu1 %6126  ;;  %7052 = vst.msk [vmem:[%s13161_s7 + $0x1b0] sm:$0xff] %vm94_vm0, %v6988_v58  ;;  %v6528_v18 = vadd.f32 %v6393_v21, %v6256_v2  ;;  %v5263_v2 = vadd.f32 %v12976_v10, %v4991_v51  ;;  %v6595_v58 = vld [vmem:[#allocation4 + $0xb98] sm:$0xff]  ;;  %v6932_v51 = vld [vmem:[%s13156_s0 + $0x1f0] sm:$0xff] }
 0x527   :  { %v6861_v7 = vmax.f32 %v6797_v57, 0.0  ;;  %v6259_v35 = vadd.f32 %v6127_v15, %v5987_v5  ;;  %v5662_v34 = vadd.f32 %v12837_v52, %v5534_v44 }
 0x528   :  { %v6656_v38 = vadd.f32 %v6592_v55, %v6528_v18  ;;  %v5988_v55 = vadd.f32 %v13033_v42, %v5660_v43  ;;  %v5535_v25 = vadd.f32 %v13010_v48, %v5263_v2  ;;  %v5989_v42 = vadd.f32 %v13042_v39, %v5661_v59  ;;  %v6933_v2 = vld [vmem:[%s13156_s0 + $0x1f8] sm:$0xff] }
 0x529   :  { %v6989_v11 = vadd.f32 %v6925_v16, %v6861_v7  ;;  %v5861_v41 = vpop.permute.xlu0 %5860  ;;  %v6596_v7 = vld [vmem:[#allocation4 + $0xbb0] sm:$0xff] }
 0x52a   :  { %v6395_v45 = vpop.permute.xlu1 %6394  ;;  %v6727_v13 = vmul.f32 %v12920_v50, %v6656_v38  ;;  %v5663_v52 = vadd.f32 %v12850_v61, %v5535_v25 }
 0x52b   :  { %7053 = vst.msk [vmem:[%s13161_s7 + $0x1b8] sm:$0xff] %vm94_vm0, %v6989_v11  ;;  %v6529_v37 = vadd.f32 %v6395_v45, %v6257_v3  ;;  %v5990_v11 = vadd.f32 %v5861_v41, %v5662_v34  ;;  %v6598_v41 = vld [vmem:[#allocation4 + $0xbe0] sm:$0xff] }
 0x52c   :  { %v6798_v9 = vadd.f32 %v12927_v17, %v6727_v13 }
 0x52d   :  { %v6657_v40 = vadd.f32 %v6593_v20, %v6529_v37  ;;  %v6129_v62 = vpop.permute.xlu0 %6128 }
 0x52e   :  { %v5863_v22 = vpop.permute.xlu1 %5862  ;;  %v6862_v54 = vmax.f32 %v6798_v9, 0.0  ;;  %v6260_v10 = vadd.f32 %v6129_v62, %v5988_v55  ;;  %v6929_v9 = vld [vmem:[%s13156_s0 + $0x1d8] sm:$0xff] }
 0x52f   :  { %v6728_v23 = vmul.f32 %v12920_v50, %v6657_v40  ;;  %v5991_v19 = vadd.f32 %v5863_v22, %v5663_v52  ;;  %v6597_v40 = vld [vmem:[#allocation4 + $0xbc8] sm:$0xff] }
 0x530   :  { %v6990_v32 = vadd.f32 %v6926_v26, %v6862_v54 }
 0x531   :  { %v6799_v14 = vadd.f32 %v12927_v17, %v6728_v23  ;;  %v6397_v33 = vpop.permute.xlu0 %6396 }
 0x532   :  { %v6131_v30 = vpop.permute.xlu1 %6130  ;;  %7054 = vst.msk [vmem:[%s13161_s7 + $0x1c0] sm:$0xff] %vm94_vm0, %v6990_v32  ;;  %v6530_v27 = vadd.f32 %v6397_v33, %v6258_v56  ;;  %v6930_v56 = vld [vmem:[%s13156_s0 + $0x1e0] sm:$0xff]  ;;  %v6599_v32 = vld [vmem:[#allocation4 + $0xbf8] sm:$0xff] }
 0x533   :  { %v6863_v47 = vmax.f32 %v6799_v14, 0.0  ;;  %v6261_v20 = vadd.f32 %v6131_v30, %v5989_v42 }
 0x534   :  { %v6658_v28 = vadd.f32 %v6594_v31, %v6530_v27 }
 0x535   :  { %v6991_v8 = vadd.f32 %v6927_v12, %v6863_v47  ;;  %v6133_v16 = vpop.permute.xlu0 %6132 }
 0x536   :  { %v6399_v57 = vpop.permute.xlu1 %6398  ;;  %v6729_v0 = vmul.f32 %v12920_v50, %v6658_v28  ;;  %v6262_v37 = vadd.f32 %v6133_v16, %v5990_v11 }
 0x537   :  { %7055 = vst.msk [vmem:[%s13161_s7 + $0x1c8] sm:$0xff] %vm94_vm0, %v6991_v8  ;;  %v6531_v24 = vadd.f32 %v6399_v57, %v6259_v35 }
 0x538   :  { %v6800_v21 = vadd.f32 %v12927_v17, %v6729_v0 }
 0x539   :  { %v6659_v15 = vadd.f32 %v6595_v58, %v6531_v24  ;;  %v6401_v18 = vpop.permute.xlu0 %6400 }
 0x53a   :  { %v6135_v3 = vpop.permute.xlu1 %6134  ;;  %v6864_v38 = vmax.f32 %v6800_v21, 0.0  ;;  %v6532_v49 = vadd.f32 %v6401_v18, %v6260_v10 }
 0x53b   :  { %v6730_v48 = vmul.f32 %v12920_v50, %v6659_v15  ;;  %v6263_v6 = vadd.f32 %v6135_v3, %v5991_v19 }
 0x53c   :  { %v6992_v45 = vadd.f32 %v6928_v29, %v6864_v38  ;;  %v6660_v39 = vadd.f32 %v6596_v7, %v6532_v49 }
 0x53d   :  { %v6801_v13 = vadd.f32 %v12927_v17, %v6730_v48  ;;  %v6405_v62 = vpop.permute.xlu0 %6404 }
 0x53e   :  { %v6403_v26 = vpop.permute.xlu1 %6402  ;;  %7056 = vst.msk [vmem:[%s13161_s7 + $0x1d0] sm:$0xff] %vm94_vm0, %v6992_v45  ;;  %v6731_v36 = vmul.f32 %v12920_v50, %v6660_v39  ;;  %v6534_v23 = vadd.f32 %v6405_v62, %v6262_v37 }
 0x53f   :  { %v6865_v61 = vmax.f32 %v6801_v13, 0.0  ;;  %v6533_v54 = vadd.f32 %v6403_v26, %v6261_v20 }
 0x540   :  { %v6802_v60 = vadd.f32 %v12927_v17, %v6731_v36  ;;  %v6662_v53 = vadd.f32 %v6598_v41, %v6534_v23 }
 0x541   :  { %v6993_v22 = vadd.f32 %v6929_v9, %v6865_v61  ;;  %v6661_v46 = vadd.f32 %v6597_v40, %v6533_v54 }
 0x542   :  { %v6407_v14 = vpop.permute.xlu1 %6406  ;;  %v6866_v12 = vmax.f32 %v6802_v60, 0.0  ;;  %v6733_v33 = vmul.f32 %v12920_v50, %v6662_v53 }
 0x543   :  { %7057 = vst.msk [vmem:[%s13161_s7 + $0x1d8] sm:$0xff] %vm94_vm0, %v6993_v22  ;;  %v6732_v31 = vmul.f32 %v12920_v50, %v6661_v46  ;;  %v6535_v30 = vadd.f32 %v6407_v14, %v6263_v6 }
 0x544   :  { %v6994_v4 = vadd.f32 %v6930_v56, %v6866_v12  ;;  %v6804_v47 = vadd.f32 %v12927_v17, %v6733_v33 }
 0x545   :  { %v6803_v5 = vadd.f32 %v12927_v17, %v6732_v31  ;;  %v6663_v27 = vadd.f32 %v6599_v32, %v6535_v30 }
 0x546   :  { %7058 = vst.msk [vmem:[%s13161_s7 + $0x1e0] sm:$0xff] %vm94_vm0, %v6994_v4  ;;  %v6868_v43 = vmax.f32 %v6804_v47, 0.0 }
 0x547   :  { %v6867_v1 = vmax.f32 %v6803_v5, 0.0  ;;  %v6734_v44 = vmul.f32 %v12920_v50, %v6663_v27 }
 0x548   :  { %v6996_v8 = vadd.f32 %v6932_v51, %v6868_v43 }
 0x549   :  { %v6995_v35 = vadd.f32 %v6931_v63, %v6867_v1  ;;  %v6805_v28 = vadd.f32 %v12927_v17, %v6734_v44 }
 0x54a   :  { %7060 = vst.msk [vmem:[%s13161_s7 + $0x1f0] sm:$0xff] %vm94_vm0, %v6996_v8 }
 0x54b   :  { %7059 = vst.msk [vmem:[%s13161_s7 + $0x1e8] sm:$0xff] %vm94_vm0, %v6995_v35  ;;  %v6869_v58 = vmax.f32 %v6805_v28, 0.0 }
 0x54d   :  { %v6997_v50 = vadd.f32 %v6933_v2, %v6869_v58 }
 0x54f   :  { %7061 = vst.msk [vmem:[%s13161_s7 + $0x1f8] sm:$0xff] %vm94_vm0, %v6997_v50 }

</bundles_post_ra>
